<compile_context>
chip_gen: v7x
topology: tpu7x:2x2x1
jax: 0.10.0
libtpu: 0.0.40
codegen_flags: <defaults>
</compile_context>

<pallas_src>
import math
import functools

import jax
import jax.numpy as jnp
from jax.experimental import pallas as pl
from jax.experimental.pallas import tpu as pltpu


def _round_up(v, m):
    return (v + m - 1) // m * m


# ----------------------------------------------------------------------------
# Fused DASPP kernel
# ----------------------------------------------------------------------------
def _make_daspp_kernel(H, W, dilations, adap_ch, inter_ch, dil_ch, out_pad_ch, pw):
    n_branch = len(dilations)
    dmax = max(dilations)
    HW = H * W
    Hp = H + 2 * dmax
    Wp = pw + W + pw

    def kernel(x_ref, adap_w, w1_all, w2_all, after_w, after_gp_w, bias_all,
               out_ref, cat_s, pad_s, col_s):
        # ---- static slices of the packed per-layer biases (one row each) ----
        adap_b = bias_all[0:1, 0:adap_ch]
        b1 = [bias_all[1 + 2 * k:2 + 2 * k, 0:inter_ch] for k in range(n_branch)]
        b2 = [bias_all[2 + 2 * k:3 + 2 * k, 0:dil_ch] for k in range(n_branch)]
        after_b = bias_all[1 + 2 * n_branch:2 + 2 * n_branch, 0:out_pad_ch]

        # ---- adap_layer: 1x1 conv (BN scale folded) + bias + ReLU ------------
        fea = jnp.dot(x_ref[0], adap_w[...], preferred_element_type=jnp.float32)
        fea = jnp.maximum(fea + adap_b, 0.0)                 # (HW, adap_ch) f32
        fea_c = fea.astype(cat_s.dtype)
        cat_s[:, 0:adap_ch] = fea_c

        # ---- global-average-pool contribution (rank-1), issued early so the
        #      tiny M=1 MXU op overlaps the branch loop ------------------------
        gp = jnp.mean(fea, axis=0, keepdims=True)            # (1, adap_ch)
        gp_c = jnp.dot(gp.astype(after_gp_w.dtype), after_gp_w[...],
                       preferred_element_type=jnp.float32)   # (1, out_pad_ch)

        # ---- zero ONLY the halo border of the padded conv scratch ------------
        # (interior is fully overwritten by every branch; border persists)
        zrow = jnp.zeros((dmax, Wp, inter_ch), pad_s.dtype)
        pad_s[0:dmax, :, :] = zrow
        pad_s[dmax + H:Hp, :, :] = zrow
        zcol = jnp.zeros((H, pw, inter_ch), pad_s.dtype)
        pad_s[dmax:dmax + H, 0:pw, :] = zcol
        pad_s[dmax:dmax + H, pw + W:Wp, :] = zcol

        # ---- dense-ASPP branches ---------------------------------------------
        w1_row = 0
        for k in range(n_branch):
            d = dilations[k]
            K_k = adap_ch + k * dil_ch

            # 1x1 conv over the lane-concatenated [fea | h2_0 | ... | h2_{k-1}]
            # as ONE matmul over a contiguous K slice (rows reordered in wrapper)
            src = fea_c if k == 0 else cat_s[:, 0:K_k]
            h1 = jnp.dot(src, w1_all[w1_row:w1_row + K_k, :],
                         preferred_element_type=jnp.float32)
            w1_row += K_k
            h1 = jnp.maximum(h1 + b1[k], 0.0)                # (HW, inter_ch) f32

            # scatter ReLU'd h1 into the zero-padded interior (aligned offsets)
            pad_s[dmax:dmax + H, pw:pw + W, :] = (
                h1.astype(pad_s.dtype).reshape(H, W, inter_ch))

            # im2col: 9 shifted windows -> (HW, 9*inter_ch), then ONE matmul
            # with K = 9*inter_ch instead of 9 tiny K = inter_ch matmuls.
            for t in range(9):
                ky, kx = t // 3, t % 3
                r0 = dmax + (ky - 1) * d
                c0 = pw + (kx - 1) * d
                col_s[:, t * inter_ch:(t + 1) * inter_ch] = (
                    pad_s[r0:r0 + H, c0:c0 + W, :].reshape(HW, inter_ch))
            h2 = jnp.dot(col_s[...], w2_all[k],
                         preferred_element_type=jnp.float32)  # (HW, dil_ch)
            h2 = jnp.maximum(h2 + b2[k], 0.0)
            cat_s[:, adap_ch + k * dil_ch:adap_ch + (k + 1) * dil_ch] = (
                h2.astype(cat_s.dtype))

        # ---- after_daspp: ONE full-K 1x1 conv over the concat scratch --------
        out_acc = jnp.dot(cat_s[...], after_w[...],
                          preferred_element_type=jnp.float32)  # (HW, out_pad_ch)
        out = jnp.maximum(out_acc + gp_c + after_b, 0.0)
        out_ref[0] = out.astype(out_ref.dtype)                 # dense 128-lane store

    return kernel


# ----------------------------------------------------------------------------
# Forward wrapper (NCHW in / NCHW out, like the PyTorch module)
# ----------------------------------------------------------------------------
def daspp_forward(x_nchw, params, dilations, compute_dtype=jnp.bfloat16):
    N, Cin, H, W = x_nchw.shape
    dilations = tuple(int(d) for d in dilations)
    n_branch = len(dilations)
    adap_ch = params['adap_w'].shape[1]
    inter_ch = params['branches'][0]['w1'].shape[1]
    dil_ch = params['branches'][0]['w2'].shape[-1]
    dmax = max(dilations)
    pw = _round_up(dmax, 8)                     # sublane-aligned halo width
    HW = H * W
    cat_ch = adap_ch + n_branch * dil_ch
    out_pad_ch = _round_up(adap_ch, 128)        # lane-dense output columns
    f32 = jnp.float32

    # channels-last, flattened spatial, bf16 activations
    x = jnp.transpose(x_nchw, (0, 2, 3, 1)).reshape(N, HW, Cin).astype(compute_dtype)

    # ---- fold BN scale into weights; reorder + pack to the kernel layout -----
    adap_w = (params['adap_w'] * params['adap_s'][None, :]).astype(compute_dtype)

    def _row(v, width):
        v = v.reshape(1, -1)
        return jnp.pad(v, ((0, 0), (0, width - v.shape[1])))

    w1_pieces, w2_list = [], []
    bias_rows = [_row(params['adap_b'], out_pad_ch)]
    for k in range(n_branch):
        br = params['branches'][k]
        w1f = br['w1'] * br['s1'][None, :]
        # torch concat order for branch-k input is [h2_{k-1},...,h2_0, fea];
        # kernel scratch layout is [fea | h2_0 | ... | h2_{k-1}] -> reorder rows.
        rows = [w1f[k * dil_ch:]]                              # fea rows
        for m in range(k):
            s = (k - 1 - m) * dil_ch
            rows.append(w1f[s:s + dil_ch])                     # h2_m rows
        w1_pieces.append(jnp.concatenate(rows, axis=0))
        bias_rows.append(_row(br['b1'], out_pad_ch))
        w2f = (br['w2'] * br['s2'][None, None, None, :]).reshape(9 * inter_ch, dil_ch)
        w2_list.append(w2f)                                    # im2col tap-major rows
        bias_rows.append(_row(br['b2'], out_pad_ch))
    w1_all = jnp.concatenate(w1_pieces, axis=0).astype(compute_dtype)
    w2_all = jnp.stack(w2_list, axis=0).astype(compute_dtype)

    awf = params['after_w'] * params['after_s'][None, :]
    # torch concat order is [gp, h2_{n-1},...,h2_0, fea]; reorder main rows to the
    # scratch layout; gp rows handled as a separate rank-1 contribution.
    rows = [awf[adap_ch + n_branch * dil_ch:]]                 # fea rows
    for m in range(n_branch):
        s = adap_ch + (n_branch - 1 - m) * dil_ch
        rows.append(awf[s:s + dil_ch])                         # h2_m rows
    after_w = jnp.concatenate(rows, axis=0)                    # (cat_ch, adap_ch)
    after_gp_w = awf[:adap_ch]                                 # (adap_ch, adap_ch)
    pad_cols = out_pad_ch - adap_ch                            # lane-dense padding
    if pad_cols:
        after_w = jnp.pad(after_w, ((0, 0), (0, pad_cols)))
        after_gp_w = jnp.pad(after_gp_w, ((0, 0), (0, pad_cols)))
    after_w = after_w.astype(compute_dtype)
    after_gp_w = after_gp_w.astype(compute_dtype)
    bias_rows.append(_row(params['after_b'], out_pad_ch))
    bias_all = jnp.concatenate(bias_rows, axis=0).astype(f32)  # (2+2n, out_pad_ch)

    args = [x, adap_w, w1_all, w2_all, after_w, after_gp_w, bias_all]

    def full_spec(a):
        nd = a.ndim
        return pl.BlockSpec(a.shape, lambda n, _nd=nd: (0,) * _nd)

    in_specs = [pl.BlockSpec((1, HW, Cin), lambda n: (n, 0, 0))]
    in_specs += [full_spec(a) for a in args[1:]]

    kernel = _make_daspp_kernel(H, W, dilations, adap_ch, inter_ch, dil_ch,
                                out_pad_ch, pw)

    # explicit VMEM budget (scratch + double-buffered I/O blocks + weights)
    esize = jnp.dtype(compute_dtype).itemsize
    scratch_bytes = (HW * cat_ch + (H + 2 * dmax) * (2 * pw + W) * inter_ch
                     + HW * 9 * inter_ch) * esize
    io_bytes = 2 * (HW * Cin + HW * out_pad_ch) * esize
    w_bytes = sum(int(a.size) * a.dtype.itemsize for a in args[1:]) * 2
    vmem_limit = int(min(128 * 1024 * 1024,
                         max(32 * 1024 * 1024,
                             2 * (scratch_bytes + io_bytes + w_bytes))))

    out_flat = pl.pallas_call(
        kernel,
        out_shape=jax.ShapeDtypeStruct((N, HW, out_pad_ch), compute_dtype),
        grid=(N,),
        in_specs=in_specs,
        out_specs=pl.BlockSpec((1, HW, out_pad_ch), lambda n: (n, 0, 0)),
        scratch_shapes=[
            pltpu.VMEM((HW, cat_ch), compute_dtype),                   # [fea|h2_*]
            pltpu.VMEM((H + 2 * dmax, 2 * pw + W, inter_ch), compute_dtype),  # pad
            pltpu.VMEM((HW, 9 * inter_ch), compute_dtype),             # im2col
        ],
        compiler_params=pltpu.CompilerParams(
            dimension_semantics=("parallel",),
            vmem_limit_bytes=vmem_limit),
    )(*args)

    # slice away the lane padding, back to NCHW f32
    out = out_flat[:, :, :adap_ch].reshape(N, H, W, adap_ch)
    return jnp.transpose(out, (0, 3, 1, 2)).astype(jnp.float32)


# ----------------------------------------------------------------------------
# Parameter construction (mirrors DASPPBlock.__init__/_init_weight, inference BN)
# ----------------------------------------------------------------------------
def _kaiming_uniform(key, shape, fan_in, a=1.0):
    bound = math.sqrt(6.0 / ((1.0 + a * a) * fan_in))
    return jax.random.uniform(key, shape, jnp.float32, -bound, bound)


def _bn_fold(c, eps=1e-5):
    # _init_weight: gamma=1, beta=0; running stats at PyTorch defaults (mean=0, var=1)
    gamma = jnp.ones((c,), jnp.float32)
    beta = jnp.zeros((c,), jnp.float32)
    mean = jnp.zeros((c,), jnp.float32)
    var = jnp.ones((c,), jnp.float32)
    scale = gamma / jnp.sqrt(var + eps)
    bias = beta - mean * scale
    return scale, bias


def init_daspp_params(key, enc_ch, adap_ch, dilations):
    n_branch = len(dilations)
    dil_branch_ch = math.ceil(adap_ch / n_branch / 32) * 32
    inter_ch = adap_ch // 2
    keys = jax.random.split(key, 2 + 2 * n_branch)

    params = {}
    params['adap_w'] = _kaiming_uniform(keys[0], (enc_ch, adap_ch), fan_in=enc_ch)
    params['adap_s'], params['adap_b'] = _bn_fold(adap_ch)

    params['branches'] = []
    for idx in range(n_branch):
        in_ch = adap_ch + idx * dil_branch_ch
        br = {
            'w1': _kaiming_uniform(keys[1 + 2 * idx], (in_ch, inter_ch), fan_in=in_ch),
            'w2': _kaiming_uniform(keys[2 + 2 * idx], (3, 3, inter_ch, dil_branch_ch),
                                   fan_in=inter_ch * 9),
        }
        br['s1'], br['b1'] = _bn_fold(inter_ch)
        br['s2'], br['b2'] = _bn_fold(dil_branch_ch)
        params['branches'].append(br)

    after_in = adap_ch * 2 + dil_branch_ch * n_branch
    params['after_w'] = _kaiming_uniform(keys[-1], (after_in, adap_ch), fan_in=after_in)
    params['after_s'], params['after_b'] = _bn_fold(adap_ch)
    return params


if __name__ == "__main__":
    # cfg.MODEL.ENCODER.CHANNEL[-1]=8, cfg.MODEL.DASPP.ADAP_CHANNEL=64,
    # cfg.MODEL.DASPP.DILATIONS=(1, 2)
    ENC_CH, ADAP_CH, DILATIONS = 8, 64, (1, 2)
    N, H, W = 2, 16, 16

    key = jax.random.PRNGKey(0)
    kx, kp = jax.random.split(key)
    x = jax.random.normal(kx, (N, ENC_CH, H, W), jnp.float32)   # NCHW like PyTorch
    params = init_daspp_params(kp, ENC_CH, ADAP_CH, DILATIONS)

    fwd = jax.jit(functools.partial(daspp_forward, dilations=DILATIONS))
    out = jax.block_until_ready(fwd(x, params))
    assert out.shape == (N, ADAP_CH, H, W), out.shape
    assert bool(jnp.all(jnp.isfinite(out)))
    print("KERNEL_OK")
</pallas_src>

<mosaic_0001>
module attributes {stable_mosaic.version = 11 : i64} {
  func.func @kernel(%arg0: i32, %arg1: memref<1x256x8xbf16, #tpu.memory_space<vmem>>, %arg2: memref<8x64xbf16, #tpu.memory_space<vmem>>, %arg3: memref<160x32xbf16, #tpu.memory_space<vmem>>, %arg4: memref<2x288x32xbf16, #tpu.memory_space<vmem>>, %arg5: memref<128x128xbf16, #tpu.memory_space<vmem>>, %arg6: memref<64x128xbf16, #tpu.memory_space<vmem>>, %arg7: memref<6x128xf32, #tpu.memory_space<vmem>>, %arg8: memref<1x256x128xbf16, #tpu.memory_space<vmem>>, %arg9: memref<256x128xbf16, #tpu.memory_space<vmem>>, %arg10: memref<20x32x32xbf16, #tpu.memory_space<vmem>>, %arg11: memref<256x288xbf16, #tpu.memory_space<vmem>>) attributes {dimension_semantics = [#tpu.dimension_semantics<parallel>], iteration_bounds = array<i64: 2>, scalar_prefetch = 0 : i64, scratch_operands = 3 : i64, tpu.core_type = #tpu.core_type<tc>, window_params = [{transform_indices = @transform_0, window_bounds = array<i64: 1, 256, 8>}, {pipeline_mode = #tpu.pipeline_mode<synchronous>, transform_indices = @transform_1, window_bounds = array<i64: 8, 64>}, {pipeline_mode = #tpu.pipeline_mode<synchronous>, transform_indices = @transform_2, window_bounds = array<i64: 160, 32>}, {pipeline_mode = #tpu.pipeline_mode<synchronous>, transform_indices = @transform_3, window_bounds = array<i64: 2, 288, 32>}, {pipeline_mode = #tpu.pipeline_mode<synchronous>, transform_indices = @transform_4, window_bounds = array<i64: 128, 128>}, {pipeline_mode = #tpu.pipeline_mode<synchronous>, transform_indices = @transform_5, window_bounds = array<i64: 64, 128>}, {pipeline_mode = #tpu.pipeline_mode<synchronous>, transform_indices = @transform_6, window_bounds = array<i64: 6, 128>}, {transform_indices = @transform_7, window_bounds = array<i64: 1, 256, 128>}]} {
    %c0 = arith.constant 0 : index
    %c0_0 = arith.constant 0 : index
    %0 = vector.load %arg7[%c0, %c0_0] : memref<6x128xf32, #tpu.memory_space<vmem>>, vector<1x64xf32>
    %c1 = arith.constant 1 : index
    %c0_1 = arith.constant 0 : index
    %1 = vector.load %arg7[%c1, %c0_1] : memref<6x128xf32, #tpu.memory_space<vmem>>, vector<1x32xf32>
    %c3 = arith.constant 3 : index
    %c0_2 = arith.constant 0 : index
    %2 = vector.load %arg7[%c3, %c0_2] : memref<6x128xf32, #tpu.memory_space<vmem>>, vector<1x32xf32>
    %c2 = arith.constant 2 : index
    %c0_3 = arith.constant 0 : index
    %3 = vector.load %arg7[%c2, %c0_3] : memref<6x128xf32, #tpu.memory_space<vmem>>, vector<1x32xf32>
    %c4 = arith.constant 4 : index
    %c0_4 = arith.constant 0 : index
    %4 = vector.load %arg7[%c4, %c0_4] : memref<6x128xf32, #tpu.memory_space<vmem>>, vector<1x32xf32>
    %c5 = arith.constant 5 : index
    %c0_5 = arith.constant 0 : index
    %5 = vector.load %arg7[%c5, %c0_5] : memref<6x128xf32, #tpu.memory_space<vmem>>, vector<1x128xf32>
    %c0_6 = arith.constant 0 : index
    %c0_7 = arith.constant 0 : index
    %c0_8 = arith.constant 0 : index
    %6 = vector.load %arg1[%c0_6, %c0_7, %c0_8] : memref<1x256x8xbf16, #tpu.memory_space<vmem>>, vector<1x256x8xbf16>
    %7 = vector.shape_cast %6 : vector<1x256x8xbf16> to vector<256x8xbf16>
    %c0_9 = arith.constant 0 : index
    %c0_10 = arith.constant 0 : index
    %8 = vector.load %arg2[%c0_9, %c0_10] : memref<8x64xbf16, #tpu.memory_space<vmem>>, vector<8x64xbf16>
    %cst = arith.constant dense<0.000000e+00> : vector<256x64xf32>
    %9 = tpu.matmul %7, %8, %cst {dimension_numbers = #tpu.dot_dimension_numbers<[1], [0], [0], [1], [0, 0, 1, 1], [], []>} : vector<256x8xbf16>, vector<8x64xbf16>, vector<256x64xf32> -> vector<256x64xf32>
    %10 = vector.broadcast %0 : vector<1x64xf32> to vector<256x64xf32>
    %11 = arith.addf %9, %10 : vector<256x64xf32>
    %cst_11 = arith.constant 0.000000e+00 : f32
    %12 = vector.broadcast %cst_11 : f32 to vector<256x64xf32>
    %13 = arith.maximumf %11, %12 : vector<256x64xf32>
    %14 = arith.truncf %13 : vector<256x64xf32> to vector<256x64xbf16>
    %c0_12 = arith.constant 0 : index
    %c0_13 = arith.constant 0 : index
    %15 = vector.load %arg9[%c0_12, %c0_13] : memref<256x128xbf16, #tpu.memory_space<vmem>>, vector<256x64xbf16>
    tpu.vector_store %arg9[%c0_12, %c0_13], %14 {strides = array<i32>} : memref<256x128xbf16, #tpu.memory_space<vmem>>, vector<256x64xbf16>,
    %cst_14 = arith.constant dense<0.000000e+00> : vector<64xf32>
    %16 = vector.multi_reduction <add>, %13, %cst_14 [0] : vector<256x64xf32> to vector<64xf32>
    %17 = vector.shape_cast %16 : vector<64xf32> to vector<1x64xf32>
    %cst_15 = arith.constant 2.560000e+02 : f32
    %18 = vector.broadcast %cst_15 : f32 to vector<1x64xf32>
    %19 = arith.divf %17, %18 : vector<1x64xf32>
    %20 = arith.truncf %19 : vector<1x64xf32> to vector<1x64xbf16>
    %c0_16 = arith.constant 0 : index
    %c0_17 = arith.constant 0 : index
    %21 = vector.load %arg6[%c0_16, %c0_17] : memref<64x128xbf16, #tpu.memory_space<vmem>>, vector<64x128xbf16>
    %cst_18 = arith.constant dense<0.000000e+00> : vector<1x128xf32>
    %22 = tpu.matmul %20, %21, %cst_18 {dimension_numbers = #tpu.dot_dimension_numbers<[1], [0], [0], [1], [0, 0, 1, 1], [], []>} : vector<1x64xbf16>, vector<64x128xbf16>, vector<1x128xf32> -> vector<1x128xf32>
    %cst_19 = arith.constant 0.000000e+00 : bf16
    %23 = vector.broadcast %cst_19 : bf16 to vector<2x32x32xbf16>
    %c0_20 = arith.constant 0 : index
    %c0_21 = arith.constant 0 : index
    %c0_22 = arith.constant 0 : index
    %24 = vector.load %arg10[%c0_20, %c0_21, %c0_22] : memref<20x32x32xbf16, #tpu.memory_space<vmem>>, vector<2x32x32xbf16>
    tpu.vector_store %arg10[%c0_20, %c0_21, %c0_22], %23 {strides = array<i32>} : memref<20x32x32xbf16, #tpu.memory_space<vmem>>, vector<2x32x32xbf16>,
    %c18 = arith.constant 18 : index
    %c0_23 = arith.constant 0 : index
    %c0_24 = arith.constant 0 : index
    %25 = vector.load %arg10[%c18, %c0_23, %c0_24] : memref<20x32x32xbf16, #tpu.memory_space<vmem>>, vector<2x32x32xbf16>
    tpu.vector_store %arg10[%c18, %c0_23, %c0_24], %23 {strides = array<i32>} : memref<20x32x32xbf16, #tpu.memory_space<vmem>>, vector<2x32x32xbf16>,
    %cst_25 = arith.constant 0.000000e+00 : bf16
    %26 = vector.broadcast %cst_25 : bf16 to vector<16x8x32xbf16>
    %c2_26 = arith.constant 2 : index
    %c0_27 = arith.constant 0 : index
    %c0_28 = arith.constant 0 : index
    %27 = vector.load %arg10[%c2_26, %c0_27, %c0_28] : memref<20x32x32xbf16, #tpu.memory_space<vmem>>, vector<16x8x32xbf16>
    tpu.vector_store %arg10[%c2_26, %c0_27, %c0_28], %26 {strides = array<i32>} : memref<20x32x32xbf16, #tpu.memory_space<vmem>>, vector<16x8x32xbf16>,
    %c2_29 = arith.constant 2 : index
    %c24 = arith.constant 24 : index
    %c0_30 = arith.constant 0 : index
    %28 = vector.load %arg10[%c2_29, %c24, %c0_30] : memref<20x32x32xbf16, #tpu.memory_space<vmem>>, vector<16x8x32xbf16>
    tpu.vector_store %arg10[%c2_29, %c24, %c0_30], %26 {strides = array<i32>} : memref<20x32x32xbf16, #tpu.memory_space<vmem>>, vector<16x8x32xbf16>,
    %c0_31 = arith.constant 0 : index
    %c0_32 = arith.constant 0 : index
    %29 = vector.load %arg3[%c0_31, %c0_32] : memref<160x32xbf16, #tpu.memory_space<vmem>>, vector<64x32xbf16>
    %cst_33 = arith.constant dense<0.000000e+00> : vector<256x32xf32>
    %30 = tpu.matmul %14, %29, %cst_33 {dimension_numbers = #tpu.dot_dimension_numbers<[1], [0], [0], [1], [0, 0, 1, 1], [], []>} : vector<256x64xbf16>, vector<64x32xbf16>, vector<256x32xf32> -> vector<256x32xf32>
    %31 = vector.broadcast %1 : vector<1x32xf32> to vector<256x32xf32>
    %32 = arith.addf %30, %31 : vector<256x32xf32>
    %cst_34 = arith.constant 0.000000e+00 : f32
    %33 = vector.broadcast %cst_34 : f32 to vector<256x32xf32>
    %34 = arith.maximumf %32, %33 : vector<256x32xf32>
    %35 = arith.truncf %34 : vector<256x32xf32> to vector<256x32xbf16>
    %36 = vector.shape_cast %35 : vector<256x32xbf16> to vector<16x16x32xbf16>
    %c2_35 = arith.constant 2 : index
    %c8 = arith.constant 8 : index
    %c0_36 = arith.constant 0 : index
    %37 = vector.load %arg10[%c2_35, %c8, %c0_36] : memref<20x32x32xbf16, #tpu.memory_space<vmem>>, vector<16x16x32xbf16>
    tpu.vector_store %arg10[%c2_35, %c8, %c0_36], %36 {strides = array<i32>} : memref<20x32x32xbf16, #tpu.memory_space<vmem>>, vector<16x16x32xbf16>,
    %c1_37 = arith.constant 1 : index
    %c7 = arith.constant 7 : index
    %c0_38 = arith.constant 0 : index
    %38 = vector.load %arg10[%c1_37, %c7, %c0_38] : memref<20x32x32xbf16, #tpu.memory_space<vmem>>, vector<16x16x32xbf16>
    %39 = vector.shape_cast %38 : vector<16x16x32xbf16> to vector<256x32xbf16>
    %c0_39 = arith.constant 0 : index
    %c0_40 = arith.constant 0 : index
    %40 = vector.load %arg11[%c0_39, %c0_40] : memref<256x288xbf16, #tpu.memory_space<vmem>>, vector<256x32xbf16>
    tpu.vector_store %arg11[%c0_39, %c0_40], %39 {strides = array<i32>} : memref<256x288xbf16, #tpu.memory_space<vmem>>, vector<256x32xbf16>,
    %c1_41 = arith.constant 1 : index
    %c8_42 = arith.constant 8 : index
    %c0_43 = arith.constant 0 : index
    %41 = vector.load %arg10[%c1_41, %c8_42, %c0_43] : memref<20x32x32xbf16, #tpu.memory_space<vmem>>, vector<16x16x32xbf16>
    %42 = vector.shape_cast %41 : vector<16x16x32xbf16> to vector<256x32xbf16>
    %c0_44 = arith.constant 0 : index
    %c32 = arith.constant 32 : index
    %43 = vector.load %arg11[%c0_44, %c32] : memref<256x288xbf16, #tpu.memory_space<vmem>>, vector<256x32xbf16>
    tpu.vector_store %arg11[%c0_44, %c32], %42 {strides = array<i32>} : memref<256x288xbf16, #tpu.memory_space<vmem>>, vector<256x32xbf16>,
    %c1_45 = arith.constant 1 : index
    %c9 = arith.constant 9 : index
    %c0_46 = arith.constant 0 : index
    %44 = vector.load %arg10[%c1_45, %c9, %c0_46] : memref<20x32x32xbf16, #tpu.memory_space<vmem>>, vector<16x16x32xbf16>
    %45 = vector.shape_cast %44 : vector<16x16x32xbf16> to vector<256x32xbf16>
    %c0_47 = arith.constant 0 : index
    %c64 = arith.constant 64 : index
    %46 = vector.load %arg11[%c0_47, %c64] : memref<256x288xbf16, #tpu.memory_space<vmem>>, vector<256x32xbf16>
    tpu.vector_store %arg11[%c0_47, %c64], %45 {strides = array<i32>} : memref<256x288xbf16, #tpu.memory_space<vmem>>, vector<256x32xbf16>,
    %c2_48 = arith.constant 2 : index
    %c7_49 = arith.constant 7 : index
    %c0_50 = arith.constant 0 : index
    %47 = vector.load %arg10[%c2_48, %c7_49, %c0_50] : memref<20x32x32xbf16, #tpu.memory_space<vmem>>, vector<16x16x32xbf16>
    %48 = vector.shape_cast %47 : vector<16x16x32xbf16> to vector<256x32xbf16>
    %c0_51 = arith.constant 0 : index
    %c96 = arith.constant 96 : index
    %49 = vector.load %arg11[%c0_51, %c96] : memref<256x288xbf16, #tpu.memory_space<vmem>>, vector<256x32xbf16>
    tpu.vector_store %arg11[%c0_51, %c96], %48 {strides = array<i32>} : memref<256x288xbf16, #tpu.memory_space<vmem>>, vector<256x32xbf16>,
    %c2_52 = arith.constant 2 : index
    %c8_53 = arith.constant 8 : index
    %c0_54 = arith.constant 0 : index
    %50 = vector.load %arg10[%c2_52, %c8_53, %c0_54] : memref<20x32x32xbf16, #tpu.memory_space<vmem>>, vector<16x16x32xbf16>
    %51 = vector.shape_cast %50 : vector<16x16x32xbf16> to vector<256x32xbf16>
    %c0_55 = arith.constant 0 : index
    %c128 = arith.constant 128 : index
    %52 = vector.load %arg11[%c0_55, %c128] : memref<256x288xbf16, #tpu.memory_space<vmem>>, vector<256x32xbf16>
    tpu.vector_store %arg11[%c0_55, %c128], %51 {strides = array<i32>} : memref<256x288xbf16, #tpu.memory_space<vmem>>, vector<256x32xbf16>,
    %c2_56 = arith.constant 2 : index
    %c9_57 = arith.constant 9 : index
    %c0_58 = arith.constant 0 : index
    %53 = vector.load %arg10[%c2_56, %c9_57, %c0_58] : memref<20x32x32xbf16, #tpu.memory_space<vmem>>, vector<16x16x32xbf16>
    %54 = vector.shape_cast %53 : vector<16x16x32xbf16> to vector<256x32xbf16>
    %c0_59 = arith.constant 0 : index
    %c160 = arith.constant 160 : index
    %55 = vector.load %arg11[%c0_59, %c160] : memref<256x288xbf16, #tpu.memory_space<vmem>>, vector<256x32xbf16>
    tpu.vector_store %arg11[%c0_59, %c160], %54 {strides = array<i32>} : memref<256x288xbf16, #tpu.memory_space<vmem>>, vector<256x32xbf16>,
    %c3_60 = arith.constant 3 : index
    %c7_61 = arith.constant 7 : index
    %c0_62 = arith.constant 0 : index
    %56 = vector.load %arg10[%c3_60, %c7_61, %c0_62] : memref<20x32x32xbf16, #tpu.memory_space<vmem>>, vector<16x16x32xbf16>
    %57 = vector.shape_cast %56 : vector<16x16x32xbf16> to vector<256x32xbf16>
    %c0_63 = arith.constant 0 : index
    %c192 = arith.constant 192 : index
    %58 = vector.load %arg11[%c0_63, %c192] : memref<256x288xbf16, #tpu.memory_space<vmem>>, vector<256x32xbf16>
    tpu.vector_store %arg11[%c0_63, %c192], %57 {strides = array<i32>} : memref<256x288xbf16, #tpu.memory_space<vmem>>, vector<256x32xbf16>,
    %c3_64 = arith.constant 3 : index
    %c8_65 = arith.constant 8 : index
    %c0_66 = arith.constant 0 : index
    %59 = vector.load %arg10[%c3_64, %c8_65, %c0_66] : memref<20x32x32xbf16, #tpu.memory_space<vmem>>, vector<16x16x32xbf16>
    %60 = vector.shape_cast %59 : vector<16x16x32xbf16> to vector<256x32xbf16>
    %c0_67 = arith.constant 0 : index
    %c224 = arith.constant 224 : index
    %61 = vector.load %arg11[%c0_67, %c224] : memref<256x288xbf16, #tpu.memory_space<vmem>>, vector<256x32xbf16>
    tpu.vector_store %arg11[%c0_67, %c224], %60 {strides = array<i32>} : memref<256x288xbf16, #tpu.memory_space<vmem>>, vector<256x32xbf16>,
    %c3_68 = arith.constant 3 : index
    %c9_69 = arith.constant 9 : index
    %c0_70 = arith.constant 0 : index
    %62 = vector.load %arg10[%c3_68, %c9_69, %c0_70] : memref<20x32x32xbf16, #tpu.memory_space<vmem>>, vector<16x16x32xbf16>
    %63 = vector.shape_cast %62 : vector<16x16x32xbf16> to vector<256x32xbf16>
    %c0_71 = arith.constant 0 : index
    %c256 = arith.constant 256 : index
    %64 = vector.load %arg11[%c0_71, %c256] : memref<256x288xbf16, #tpu.memory_space<vmem>>, vector<256x32xbf16>
    tpu.vector_store %arg11[%c0_71, %c256], %63 {strides = array<i32>} : memref<256x288xbf16, #tpu.memory_space<vmem>>, vector<256x32xbf16>,
    %c0_72 = arith.constant 0 : index
    %c0_73 = arith.constant 0 : index
    %65 = vector.load %arg11[%c0_72, %c0_73] : memref<256x288xbf16, #tpu.memory_space<vmem>>, vector<256x288xbf16>
    %c0_74 = arith.constant 0 : index
    %c0_75 = arith.constant 0 : index
    %c0_76 = arith.constant 0 : index
    %66 = vector.load %arg4[%c0_74, %c0_75, %c0_76] : memref<2x288x32xbf16, #tpu.memory_space<vmem>>, vector<1x288x32xbf16>
    %67 = vector.shape_cast %66 : vector<1x288x32xbf16> to vector<288x32xbf16>
    %cst_77 = arith.constant dense<0.000000e+00> : vector<256x32xf32>
    %68 = tpu.matmul %65, %67, %cst_77 {dimension_numbers = #tpu.dot_dimension_numbers<[1], [0], [0], [1], [0, 0, 1, 1], [], []>} : vector<256x288xbf16>, vector<288x32xbf16>, vector<256x32xf32> -> vector<256x32xf32>
    %69 = vector.broadcast %3 : vector<1x32xf32> to vector<256x32xf32>
    %70 = arith.addf %68, %69 : vector<256x32xf32>
    %cst_78 = arith.constant 0.000000e+00 : f32
    %71 = vector.broadcast %cst_78 : f32 to vector<256x32xf32>
    %72 = arith.maximumf %70, %71 : vector<256x32xf32>
    %73 = arith.truncf %72 : vector<256x32xf32> to vector<256x32xbf16>
    %c0_79 = arith.constant 0 : index
    %c64_80 = arith.constant 64 : index
    %74 = vector.load %arg9[%c0_79, %c64_80] : memref<256x128xbf16, #tpu.memory_space<vmem>>, vector<256x32xbf16>
    tpu.vector_store %arg9[%c0_79, %c64_80], %73 {strides = array<i32>} : memref<256x128xbf16, #tpu.memory_space<vmem>>, vector<256x32xbf16>,
    %c0_81 = arith.constant 0 : index
    %c0_82 = arith.constant 0 : index
    %75 = vector.load %arg9[%c0_81, %c0_82] : memref<256x128xbf16, #tpu.memory_space<vmem>>, vector<256x96xbf16>
    %c64_83 = arith.constant 64 : index
    %c0_84 = arith.constant 0 : index
    %76 = vector.load %arg3[%c64_83, %c0_84] : memref<160x32xbf16, #tpu.memory_space<vmem>>, vector<96x32xbf16>
    %cst_85 = arith.constant dense<0.000000e+00> : vector<256x32xf32>
    %77 = tpu.matmul %75, %76, %cst_85 {dimension_numbers = #tpu.dot_dimension_numbers<[1], [0], [0], [1], [0, 0, 1, 1], [], []>} : vector<256x96xbf16>, vector<96x32xbf16>, vector<256x32xf32> -> vector<256x32xf32>
    %78 = vector.broadcast %2 : vector<1x32xf32> to vector<256x32xf32>
    %79 = arith.addf %77, %78 : vector<256x32xf32>
    %cst_86 = arith.constant 0.000000e+00 : f32
    %80 = vector.broadcast %cst_86 : f32 to vector<256x32xf32>
    %81 = arith.maximumf %79, %80 : vector<256x32xf32>
    %82 = arith.truncf %81 : vector<256x32xf32> to vector<256x32xbf16>
    %83 = vector.shape_cast %82 : vector<256x32xbf16> to vector<16x16x32xbf16>
    %c2_87 = arith.constant 2 : index
    %c8_88 = arith.constant 8 : index
    %c0_89 = arith.constant 0 : index
    %84 = vector.load %arg10[%c2_87, %c8_88, %c0_89] : memref<20x32x32xbf16, #tpu.memory_space<vmem>>, vector<16x16x32xbf16>
    tpu.vector_store %arg10[%c2_87, %c8_88, %c0_89], %83 {strides = array<i32>} : memref<20x32x32xbf16, #tpu.memory_space<vmem>>, vector<16x16x32xbf16>,
    %c0_90 = arith.constant 0 : index
    %c6 = arith.constant 6 : index
    %c0_91 = arith.constant 0 : index
    %85 = vector.load %arg10[%c0_90, %c6, %c0_91] : memref<20x32x32xbf16, #tpu.memory_space<vmem>>, vector<16x16x32xbf16>
    %86 = vector.shape_cast %85 : vector<16x16x32xbf16> to vector<256x32xbf16>
    %c0_92 = arith.constant 0 : index
    %c0_93 = arith.constant 0 : index
    %87 = vector.load %arg11[%c0_92, %c0_93] : memref<256x288xbf16, #tpu.memory_space<vmem>>, vector<256x32xbf16>
    tpu.vector_store %arg11[%c0_92, %c0_93], %86 {strides = array<i32>} : memref<256x288xbf16, #tpu.memory_space<vmem>>, vector<256x32xbf16>,
    %c0_94 = arith.constant 0 : index
    %c8_95 = arith.constant 8 : index
    %c0_96 = arith.constant 0 : index
    %88 = vector.load %arg10[%c0_94, %c8_95, %c0_96] : memref<20x32x32xbf16, #tpu.memory_space<vmem>>, vector<16x16x32xbf16>
    %89 = vector.shape_cast %88 : vector<16x16x32xbf16> to vector<256x32xbf16>
    %c0_97 = arith.constant 0 : index
    %c32_98 = arith.constant 32 : index
    %90 = vector.load %arg11[%c0_97, %c32_98] : memref<256x288xbf16, #tpu.memory_space<vmem>>, vector<256x32xbf16>
    tpu.vector_store %arg11[%c0_97, %c32_98], %89 {strides = array<i32>} : memref<256x288xbf16, #tpu.memory_space<vmem>>, vector<256x32xbf16>,
    %c0_99 = arith.constant 0 : index
    %c10 = arith.constant 10 : index
    %c0_100 = arith.constant 0 : index
    %91 = vector.load %arg10[%c0_99, %c10, %c0_100] : memref<20x32x32xbf16, #tpu.memory_space<vmem>>, vector<16x16x32xbf16>
    %92 = vector.shape_cast %91 : vector<16x16x32xbf16> to vector<256x32xbf16>
    %c0_101 = arith.constant 0 : index
    %c64_102 = arith.constant 64 : index
    %93 = vector.load %arg11[%c0_101, %c64_102] : memref<256x288xbf16, #tpu.memory_space<vmem>>, vector<256x32xbf16>
    tpu.vector_store %arg11[%c0_101, %c64_102], %92 {strides = array<i32>} : memref<256x288xbf16, #tpu.memory_space<vmem>>, vector<256x32xbf16>,
    %c2_103 = arith.constant 2 : index
    %c6_104 = arith.constant 6 : index
    %c0_105 = arith.constant 0 : index
    %94 = vector.load %arg10[%c2_103, %c6_104, %c0_105] : memref<20x32x32xbf16, #tpu.memory_space<vmem>>, vector<16x16x32xbf16>
    %95 = vector.shape_cast %94 : vector<16x16x32xbf16> to vector<256x32xbf16>
    %c0_106 = arith.constant 0 : index
    %c96_107 = arith.constant 96 : index
    %96 = vector.load %arg11[%c0_106, %c96_107] : memref<256x288xbf16, #tpu.memory_space<vmem>>, vector<256x32xbf16>
    tpu.vector_store %arg11[%c0_106, %c96_107], %95 {strides = array<i32>} : memref<256x288xbf16, #tpu.memory_space<vmem>>, vector<256x32xbf16>,
    %c2_108 = arith.constant 2 : index
    %c8_109 = arith.constant 8 : index
    %c0_110 = arith.constant 0 : index
    %97 = vector.load %arg10[%c2_108, %c8_109, %c0_110] : memref<20x32x32xbf16, #tpu.memory_space<vmem>>, vector<16x16x32xbf16>
    %98 = vector.shape_cast %97 : vector<16x16x32xbf16> to vector<256x32xbf16>
    %c0_111 = arith.constant 0 : index
    %c128_112 = arith.constant 128 : index
    %99 = vector.load %arg11[%c0_111, %c128_112] : memref<256x288xbf16, #tpu.memory_space<vmem>>, vector<256x32xbf16>
    tpu.vector_store %arg11[%c0_111, %c128_112], %98 {strides = array<i32>} : memref<256x288xbf16, #tpu.memory_space<vmem>>, vector<256x32xbf16>,
    %c2_113 = arith.constant 2 : index
    %c10_114 = arith.constant 10 : index
    %c0_115 = arith.constant 0 : index
    %100 = vector.load %arg10[%c2_113, %c10_114, %c0_115] : memref<20x32x32xbf16, #tpu.memory_space<vmem>>, vector<16x16x32xbf16>
    %101 = vector.shape_cast %100 : vector<16x16x32xbf16> to vector<256x32xbf16>
    %c0_116 = arith.constant 0 : index
    %c160_117 = arith.constant 160 : index
    %102 = vector.load %arg11[%c0_116, %c160_117] : memref<256x288xbf16, #tpu.memory_space<vmem>>, vector<256x32xbf16>
    tpu.vector_store %arg11[%c0_116, %c160_117], %101 {strides = array<i32>} : memref<256x288xbf16, #tpu.memory_space<vmem>>, vector<256x32xbf16>,
    %c4_118 = arith.constant 4 : index
    %c6_119 = arith.constant 6 : index
    %c0_120 = arith.constant 0 : index
    %103 = vector.load %arg10[%c4_118, %c6_119, %c0_120] : memref<20x32x32xbf16, #tpu.memory_space<vmem>>, vector<16x16x32xbf16>
    %104 = vector.shape_cast %103 : vector<16x16x32xbf16> to vector<256x32xbf16>
    %c0_121 = arith.constant 0 : index
    %c192_122 = arith.constant 192 : index
    %105 = vector.load %arg11[%c0_121, %c192_122] : memref<256x288xbf16, #tpu.memory_space<vmem>>, vector<256x32xbf16>
    tpu.vector_store %arg11[%c0_121, %c192_122], %104 {strides = array<i32>} : memref<256x288xbf16, #tpu.memory_space<vmem>>, vector<256x32xbf16>,
    %c4_123 = arith.constant 4 : index
    %c8_124 = arith.constant 8 : index
    %c0_125 = arith.constant 0 : index
    %106 = vector.load %arg10[%c4_123, %c8_124, %c0_125] : memref<20x32x32xbf16, #tpu.memory_space<vmem>>, vector<16x16x32xbf16>
    %107 = vector.shape_cast %106 : vector<16x16x32xbf16> to vector<256x32xbf16>
    %c0_126 = arith.constant 0 : index
    %c224_127 = arith.constant 224 : index
    %108 = vector.load %arg11[%c0_126, %c224_127] : memref<256x288xbf16, #tpu.memory_space<vmem>>, vector<256x32xbf16>
    tpu.vector_store %arg11[%c0_126, %c224_127], %107 {strides = array<i32>} : memref<256x288xbf16, #tpu.memory_space<vmem>>, vector<256x32xbf16>,
    %c4_128 = arith.constant 4 : index
    %c10_129 = arith.constant 10 : index
    %c0_130 = arith.constant 0 : index
    %109 = vector.load %arg10[%c4_128, %c10_129, %c0_130] : memref<20x32x32xbf16, #tpu.memory_space<vmem>>, vector<16x16x32xbf16>
    %110 = vector.shape_cast %109 : vector<16x16x32xbf16> to vector<256x32xbf16>
    %c0_131 = arith.constant 0 : index
    %c256_132 = arith.constant 256 : index
    %111 = vector.load %arg11[%c0_131, %c256_132] : memref<256x288xbf16, #tpu.memory_space<vmem>>, vector<256x32xbf16>
    tpu.vector_store %arg11[%c0_131, %c256_132], %110 {strides = array<i32>} : memref<256x288xbf16, #tpu.memory_space<vmem>>, vector<256x32xbf16>,
    %c0_133 = arith.constant 0 : index
    %c0_134 = arith.constant 0 : index
    %112 = vector.load %arg11[%c0_133, %c0_134] : memref<256x288xbf16, #tpu.memory_space<vmem>>, vector<256x288xbf16>
    %c1_135 = arith.constant 1 : index
    %c0_136 = arith.constant 0 : index
    %c0_137 = arith.constant 0 : index
    %113 = vector.load %arg4[%c1_135, %c0_136, %c0_137] : memref<2x288x32xbf16, #tpu.memory_space<vmem>>, vector<1x288x32xbf16>
    %114 = vector.shape_cast %113 : vector<1x288x32xbf16> to vector<288x32xbf16>
    %cst_138 = arith.constant dense<0.000000e+00> : vector<256x32xf32>
    %115 = tpu.matmul %112, %114, %cst_138 {dimension_numbers = #tpu.dot_dimension_numbers<[1], [0], [0], [1], [0, 0, 1, 1], [], []>} : vector<256x288xbf16>, vector<288x32xbf16>, vector<256x32xf32> -> vector<256x32xf32>
    %116 = vector.broadcast %4 : vector<1x32xf32> to vector<256x32xf32>
    %117 = arith.addf %115, %116 : vector<256x32xf32>
    %cst_139 = arith.constant 0.000000e+00 : f32
    %118 = vector.broadcast %cst_139 : f32 to vector<256x32xf32>
    %119 = arith.maximumf %117, %118 : vector<256x32xf32>
    %120 = arith.truncf %119 : vector<256x32xf32> to vector<256x32xbf16>
    %c0_140 = arith.constant 0 : index
    %c96_141 = arith.constant 96 : index
    %121 = vector.load %arg9[%c0_140, %c96_141] : memref<256x128xbf16, #tpu.memory_space<vmem>>, vector<256x32xbf16>
    tpu.vector_store %arg9[%c0_140, %c96_141], %120 {strides = array<i32>} : memref<256x128xbf16, #tpu.memory_space<vmem>>, vector<256x32xbf16>,
    %c0_142 = arith.constant 0 : index
    %c0_143 = arith.constant 0 : index
    %122 = vector.load %arg9[%c0_142, %c0_143] : memref<256x128xbf16, #tpu.memory_space<vmem>>, vector<256x128xbf16>
    %c0_144 = arith.constant 0 : index
    %c0_145 = arith.constant 0 : index
    %123 = vector.load %arg5[%c0_144, %c0_145] : memref<128x128xbf16, #tpu.memory_space<vmem>>, vector<128x128xbf16>
    %cst_146 = arith.constant dense<0.000000e+00> : vector<256x128xf32>
    %124 = tpu.matmul %122, %123, %cst_146 {dimension_numbers = #tpu.dot_dimension_numbers<[1], [0], [0], [1], [0, 0, 1, 1], [], []>} : vector<256x128xbf16>, vector<128x128xbf16>, vector<256x128xf32> -> vector<256x128xf32>
    %125 = vector.broadcast %22 : vector<1x128xf32> to vector<256x128xf32>
    %126 = arith.addf %124, %125 : vector<256x128xf32>
    %127 = vector.broadcast %5 : vector<1x128xf32> to vector<256x128xf32>
    %128 = arith.addf %126, %127 : vector<256x128xf32>
    %cst_147 = arith.constant 0.000000e+00 : f32
    %129 = vector.broadcast %cst_147 : f32 to vector<256x128xf32>
    %130 = arith.maximumf %128, %129 : vector<256x128xf32>
    %131 = arith.truncf %130 : vector<256x128xf32> to vector<256x128xbf16>
    %c0_148 = arith.constant 0 : index
    %c0_149 = arith.constant 0 : index
    %c0_150 = arith.constant 0 : index
    %132 = vector.load %arg8[%c0_148, %c0_149, %c0_150] : memref<1x256x128xbf16, #tpu.memory_space<vmem>>, vector<1x256x128xbf16>
    %133 = vector.shape_cast %132 : vector<1x256x128xbf16> to vector<256x128xbf16>
    %134 = vector.shape_cast %131 : vector<256x128xbf16> to vector<1x256x128xbf16>
    tpu.vector_store %arg8[%c0_148, %c0_149, %c0_150], %134 {strides = array<i32>} : memref<1x256x128xbf16, #tpu.memory_space<vmem>>, vector<1x256x128xbf16>,
    return
  }
  func.func @transform_0(%arg0: i32) -> (i32, i32, i32) {
    %c0_i32 = arith.constant 0 : i32
    %c0_i32_0 = arith.constant 0 : i32
    %c0_i32_1 = arith.constant 0 : i32
    return %arg0, %c0_i32, %c0_i32_0 : i32, i32, i32
  }
  func.func @transform_1(%arg0: i32) -> (i32, i32) {
    %c0_i32 = arith.constant 0 : i32
    %c0_i32_0 = arith.constant 0 : i32
    %c0_i32_1 = arith.constant 0 : i32
    return %c0_i32, %c0_i32_0 : i32, i32
  }
  func.func @transform_2(%arg0: i32) -> (i32, i32) {
    %c0_i32 = arith.constant 0 : i32
    %c0_i32_0 = arith.constant 0 : i32
    %c0_i32_1 = arith.constant 0 : i32
    return %c0_i32, %c0_i32_0 : i32, i32
  }
  func.func @transform_3(%arg0: i32) -> (i32, i32, i32) {
    %c0_i32 = arith.constant 0 : i32
    %c0_i32_0 = arith.constant 0 : i32
    %c0_i32_1 = arith.constant 0 : i32
    %c0_i32_2 = arith.constant 0 : i32
    return %c0_i32, %c0_i32_0, %c0_i32_1 : i32, i32, i32
  }
  func.func @transform_4(%arg0: i32) -> (i32, i32) {
    %c0_i32 = arith.constant 0 : i32
    %c0_i32_0 = arith.constant 0 : i32
    %c0_i32_1 = arith.constant 0 : i32
    return %c0_i32, %c0_i32_0 : i32, i32
  }
  func.func @transform_5(%arg0: i32) -> (i32, i32) {
    %c0_i32 = arith.constant 0 : i32
    %c0_i32_0 = arith.constant 0 : i32
    %c0_i32_1 = arith.constant 0 : i32
    return %c0_i32, %c0_i32_0 : i32, i32
  }
  func.func @transform_6(%arg0: i32) -> (i32, i32) {
    %c0_i32 = arith.constant 0 : i32
    %c0_i32_0 = arith.constant 0 : i32
    %c0_i32_1 = arith.constant 0 : i32
    return %c0_i32, %c0_i32_0 : i32, i32
  }
  func.func @transform_7(%arg0: i32) -> (i32, i32, i32) {
    %c0_i32 = arith.constant 0 : i32
    %c0_i32_0 = arith.constant 0 : i32
    %c0_i32_1 = arith.constant 0 : i32
    return %arg0, %c0_i32, %c0_i32_0 : i32, i32, i32
  }
}

</mosaic_0001>

<bundles_post_ra>
// kernel: daspp_forward.1
= control target key start
LH: loop header
LB: loop body
LE: loop exit
PB: predicated region body
PF: predicated region fallthrough
CT: control target
= control target key end

     0   :  { %s8827_s24 = smov 0   ;;  %s11125_s0 = inlined_call_operand.vmem [shape: bf16[2,256,8], index: 0, kind: input, shape index: {}]   ;;  %s11126_s1 = inlined_call_operand.vmem [shape: bf16[8,64], index: 1, kind: input, shape index: {}]   ;;  %s11127_s2 = inlined_call_operand.vmem [shape: bf16[160,32], index: 2, kind: input, shape index: {}]   ;;  %s11128_s3 = inlined_call_operand.vmem [shape: bf16[2,288,32], index: 3, kind: input, shape index: {}]   ;;  %s11129_s4 = inlined_call_operand.vmem [shape: bf16[128,128], index: 4, kind: input, shape index: {}]   ;;  %s11130_s5 = inlined_call_operand.vmem [shape: bf16[64,128], index: 5, kind: input, shape index: {}]   ;;  %s11131_s6 = inlined_call_operand.vmem [shape: f32[6,128], index: 6, kind: input, shape index: {}]   ;;  %s11132_s7 = inlined_call_operand.vmem [shape: bf16[2,256,128], index: 7, kind: output, shape index: {}]  }
   0x1 LB: > { %s7709_s25 = sadd.s32 4294967295, %s8779_s24   ;;  %p7713_p0 = scmp.ge.s32.totalorder %s8779_s24, 1  ;;  %s8779_s24 = sphi %s8827_s24, %s17_s24  }
   0x2   : > { %p237_p1 = scmp.lt.s32.totalorder %s8779_s24, 3 }
   0x4   : > { %p238_p2 = pnand %p7713_p0, %p237_p1 }
   0x5   : > { %v318_v0 = vld [vmem:[%s11126_s1] sm:$0xf] (!%p238_p2)  ;;  %vm452_vm0 = vcmask (!%p238_p2), 1043456   ;;  %p269_p3 = scmp.lt.s32.totalorder (!%p238_p2), %s7709_s25, 1  ;;  %vm403_vm1 = vcmask (!%p238_p2), 64512   ;;  %v8781_v19 = vmov (!%p238_p2), 0.0  }
   0x6   : > { %241 = sbr.rel (%p238_p2) target bundleno = 2356 (0x934), region = 48  ;;  %8680 = vmatprep.subr.msk.bf16.mxu0 (!%p238_p2), %vm452_vm0, %v318_v0  ;;  %v454_v1 = vsel (!%p238_p2), %vm452_vm0, %v318_v0, 0  ;;  %v8711_v18 = vld [vmem:[%s11130_s5] sm:$0xff] (!%p238_p2)   ;;  %8460 = vmatprep.subr.bf16.mxu1 (!%p238_p2), %v8781_v19  ;;  %v8712_v20 = vld [vmem:[%s11130_s5 + $0x8] sm:$0xff] (!%p238_p2)   ;;  %v8713_v21 = vld [vmem:[%s11130_s5 + $0x10] sm:$0xff] (!%p238_p2)   ;;  %vm8782_vm2 = vmmov (!%p238_p2), 0  }
   0x7   : > { %8427 = vmatpush3.bf16.msra.mxu0 (!%p238_p2), %v454_v1  ;;  %8461 = vmatpush3.bf16.msra.mxu1 (!%p238_p2), %v8711_v18  ;;  %v8714_v22 = vld [vmem:[%s11130_s5 + $0x18] sm:$0xff] (!%p238_p2)   ;;  %v8897_v23 = vld [vmem:[%s11127_s2] sm:$0xff] (!%p238_p2)   ;;  %vm665_vm3 = vcmask (!%p238_p2), 523264   ;;  %vm840_vm4 = vcmask (!%p238_p2), 257024   ;;  %vm857_vm5 = vcmask (!%p238_p2), 261124   ;;  %vm829_vm6 = vcmask (!%p238_p2), 261120  }
   0x8   : > { %8462 = vmatprep.subr.bf16.mxu1 (!%p238_p2), %v8781_v19  ;;  %8468 = vmatprep.mubr.msk.bf16.mxu1 (!%p238_p2), %vm8782_vm2, %v8781_v19  ;;  %v8903_v24 = vld [vmem:[%s11131_s6] ss:$0 sm:$0xff] (!%p238_p2)  ;;  %vm1795_vm7 = vsmask.f32 (!%p238_p2), 3328  ;;  %s8784_s30 = smov (!%p238_p2), 64   ;;  %s8786_s15 = smov (!%p238_p2), 96  }
   0x9   : > { %vm1280_vm8 = vsmask.f32 (!%p238_p2), 4352  ;;  %vm5380_vm9 = vcmask (!%p238_p2), 1042432   ;;  %vm1746_vm10 = vcmask (!%p238_p2), 523520   ;;  %vm2116_vm11 = vcmask (!%p238_p2), 785920  }
   0xa   : > { %vm2485_vm12 = vcmask (!%p238_p2), 1048320   ;;  %vm4657_vm13 = vcmask (!%p238_p2), 785408   ;;  %vm5059_vm14 = vcmask (!%p238_p2), 1044480  }
   0xb   : > { %8463 = vmatpush3.bf16.msra.mxu1 (!%p238_p2), %v8712_v20 }
   0xc   : > { %8464 = vmatprep.subr.bf16.mxu1 (!%p238_p2), %v8781_v19 }
   0xd   : > { %s11136_s25 = smov (!%p269_p3, %s7709_s25), 1 }
   0xe   : > { %s7949_s28 = sshll.u32 %s11136_s25, 7 }
   0xf   : > { %s8848_s8 = scalar_lea.vmem %s11125_s0, %s7949_s28  ;;  %8465 = vmatpush3.bf16.msra.mxu1 %v8713_v21  ;;  %s11048_s23 = scalar_lea.vmem %s11132_s7, %s7949_s28 }
  0x10   : > { %v8695_v2 = vld [vmem:[%s8848_s8] sm:$0xff]   ;;  %v8696_v3 = vld [vmem:[%s8848_s8 + $0x8] sm:$0xff]   ;;  %v8697_v4 = vld [vmem:[%s8848_s8 + $0x10] sm:$0xff]   ;;  %8466 = vmatprep.subr.bf16.mxu1 %v8781_v19 }
  0x11   : > { %8428 = vmatprep.mubr.msk.bf16.mxu0 %vm403_vm1, %v8695_v2  ;;  %v8698_v5 = vld [vmem:[%s8848_s8 + $0x18] sm:$0xff]   ;;  %v8699_v6 = vld [vmem:[%s8848_s8 + $0x20] sm:$0xff]   ;;  %v8700_v7 = vld [vmem:[%s8848_s8 + $0x28] sm:$0xff]  }
  0x12   : > { %8429 = vmatmul.mubr.msk.bf16.vlgmr.msra.gmra.mrb[0].mxu0 %vm403_vm1, %v8696_v3  ;;  %v8701_v8 = vld [vmem:[%s8848_s8 + $0x30] sm:$0xff]   ;;  %v8702_v9 = vld [vmem:[%s8848_s8 + $0x38] sm:$0xff]   ;;  %v8703_v10 = vld [vmem:[%s8848_s8 + $0x40] sm:$0xff]  }
  0x13   : > { %8432 = vmatprep.mubr.msk.bf16.mxu0 %vm403_vm1, %v8697_v4  ;;  %v8704_v11 = vld [vmem:[%s8848_s8 + $0x48] sm:$0xff]   ;;  %v8705_v12 = vld [vmem:[%s8848_s8 + $0x50] sm:$0xff]   ;;  %v8706_v13 = vld [vmem:[%s8848_s8 + $0x58] sm:$0xff]   ;;  %8467 = vmatpush3.bf16.msra.mxu1 %v8714_v22 }
  0x14   : > { %v8707_v14 = vld [vmem:[%s8848_s8 + $0x60] sm:$0xff]   ;;  %v8708_v15 = vld [vmem:[%s8848_s8 + $0x68] sm:$0xff]   ;;  %v8709_v16 = vld [vmem:[%s8848_s8 + $0x70] sm:$0xff]   ;;  %8472 = vmatprep.subr.bf16.mxu1 %v8897_v23 }
  0x15   : > { %v8710_v17 = vld [vmem:[%s8848_s8 + $0x78] sm:$0xff]   ;;  %s8785_s8 = smov 32  }
  0x1a   : > { %8433 = vmatmul.mubr.msk.bf16.gmra.mrb[4].mxu0 %vm403_vm1, %v8698_v5 }
  0x1b   : > { %8436 = vmatprep.mubr.msk.bf16.mxu0 %vm403_vm1, %v8699_v6 }
  0x22   : > { %8437 = vmatmul.mubr.msk.bf16.gmra.mrb[8].mxu0 %vm403_vm1, %v8700_v7 }
  0x23   : > { %8440 = vmatprep.mubr.msk.bf16.mxu0 %vm403_vm1, %v8701_v8 }
  0x2a   : > { %8441 = vmatmul.mubr.msk.bf16.gmra.mrb[12].mxu0 %vm403_vm1, %v8702_v9 }
  0x2b   : > { %8444 = vmatprep.mubr.msk.bf16.mxu0 %vm403_vm1, %v8703_v10 }
  0x32   : > { %8445 = vmatmul.mubr.msk.bf16.gmra.mrb[16].mxu0 %vm403_vm1, %v8704_v11 }
  0x33   : > { %8448 = vmatprep.mubr.msk.bf16.mxu0 %vm403_vm1, %v8705_v12 }
  0x3a   : > { %8449 = vmatmul.mubr.msk.bf16.gmra.mrb[20].mxu0 %vm403_vm1, %v8706_v13 }
  0x3b   : > { %8452 = vmatprep.mubr.msk.bf16.mxu0 %vm403_vm1, %v8707_v14 }
  0x42   : > { %8453 = vmatmul.mubr.msk.bf16.gmra.mrb[24].mxu0 %vm403_vm1, %v8708_v15 }
  0x43   : > { %8456 = vmatprep.mubr.msk.bf16.mxu0 %vm403_vm1, %v8709_v16 }
  0x4a   : > { %8457 = vmatmul.mubr.msk.bf16.gmra.mrb[28].mxu0 %vm403_vm1, %v8710_v17 }
  0xe5   : > { %v8430_v25 = vpop.f32.mrb[0].mxu0 }
  0xe6   : > { %v499_v26 = vadd.f32 %v8430_v25, %v8903_v24  ;;  %v490_v27 = vpop.f32.mrb[1].mxu0 }
  0xe7   : > { %v491_v28 = vadd.f32 %v8903_v24, %v490_v27  ;;  %v8431_v29 = vpop.f32.mrb[2].mxu0 }
  0xe8   : > { %v502_v30 = vadd.f32 %v8431_v29, %v8903_v24  ;;  %v493_v31 = vpop.f32.mrb[3].mxu0  ;;  %v619_v34 = vmax.f32 %v499_v26, 0.0 }
  0xe9   : > { %v617_v32 = vmax.f32 %v491_v28, 0.0  ;;  %v494_v33 = vadd.f32 %v8903_v24, %v493_v31 }
  0xea   : > { %v620_v35 = vmax.f32 %v502_v30, 0.0  ;;  %v685_v45 = vsel %vm665_vm3, %v619_v34, 0.0 }
  0xeb   : > { %v618_v36 = vmax.f32 %v494_v33, 0.0  ;;  %v682_v38 = vsel %vm665_vm3, %v617_v32, 0.0 }
  0xec   : > { %v8909_v37 = vpack.c.bf16 %v620_v35, %v619_v34  ;;  %v687_v51 = vsel %vm665_vm3, %v620_v35, 0.0 }
  0xed   : > { %v8912_v39 = vpack.c.bf16 %v618_v36, %v617_v32  ;;  %v683_v40 = vsel %vm665_vm3, %v618_v36, 0.0  ;;  %v8434_v41 = vpop.f32.mrb[4].mxu0 }
  0xee   : > { %667 = vst.msk [vmem:[#allocation2 + $0x8] sm:$0xff] %vm665_vm3, %v8909_v37  ;;  %v684_v42 = vadd.f32 %v683_v40, %v682_v38  ;;  %v515_v43 = vadd.f32 %v8434_v41, %v8903_v24  ;;  %v506_v44 = vpop.f32.mrb[5].mxu0 }
  0xef   : > { %666 = vst.msk [vmem:[#allocation2] sm:$0xff] %vm665_vm3, %v8912_v39  ;;  %v507_v46 = vadd.f32 %v8903_v24, %v506_v44  ;;  %v8435_v47 = vpop.f32.mrb[6].mxu0 }
  0xf0   : > { %v686_v48 = vadd.f32 %v685_v45, %v684_v42  ;;  %v518_v49 = vadd.f32 %v8435_v47, %v8903_v24  ;;  %v509_v50 = vpop.f32.mrb[7].mxu0  ;;  %v623_v54 = vmax.f32 %v515_v43, 0.0 }
  0xf1   : > { %v621_v52 = vmax.f32 %v507_v46, 0.0  ;;  %v510_v53 = vadd.f32 %v8903_v24, %v509_v50 }
  0xf2   : > { %v688_v55 = vadd.f32 %v687_v51, %v686_v48  ;;  %v624_v56 = vmax.f32 %v518_v49, 0.0  ;;  %v693_v3 = vsel %vm665_vm3, %v623_v54, 0.0 }
  0xf3   : > { %v689_v57 = vsel %vm665_vm3, %v621_v52, 0.0  ;;  %v622_v58 = vmax.f32 %v510_v53, 0.0 }
  0xf4   : > { %v690_v59 = vadd.f32 %v689_v57, %v688_v55  ;;  %v8926_v60 = vpack.c.bf16 %v624_v56, %v623_v54  ;;  %v695_v9 = vsel %vm665_vm3, %v624_v56, 0.0 }
  0xf5   : > { %v8928_v61 = vpack.c.bf16 %v622_v58, %v621_v52  ;;  %v691_v62 = vsel %vm665_vm3, %v622_v58, 0.0  ;;  %v8438_v63 = vpop.f32.mrb[8].mxu0 }
  0xf6   : > { %669 = vst.msk [vmem:[#allocation2 + $0x18] sm:$0xff] %vm665_vm3, %v8926_v60  ;;  %v692_v0 = vadd.f32 %v691_v62, %v690_v59  ;;  %v531_v1 = vadd.f32 %v8438_v63, %v8903_v24  ;;  %v522_v2 = vpop.f32.mrb[9].mxu0 }
  0xf7   : > { %668 = vst.msk [vmem:[#allocation2 + $0x10] sm:$0xff] %vm665_vm3, %v8928_v61  ;;  %v523_v4 = vadd.f32 %v8903_v24, %v522_v2  ;;  %v8439_v5 = vpop.f32.mrb[10].mxu0 }
  0xf8   : > { %v694_v6 = vadd.f32 %v693_v3, %v692_v0  ;;  %v534_v7 = vadd.f32 %v8439_v5, %v8903_v24  ;;  %v525_v8 = vpop.f32.mrb[11].mxu0  ;;  %v627_v12 = vmax.f32 %v531_v1, 0.0 }
  0xf9   : > { %v625_v10 = vmax.f32 %v523_v4, 0.0  ;;  %v526_v11 = vadd.f32 %v8903_v24, %v525_v8 }
  0xfa   : > { %v696_v13 = vadd.f32 %v695_v9, %v694_v6  ;;  %v628_v14 = vmax.f32 %v534_v7, 0.0  ;;  %v701_v27 = vsel %vm665_vm3, %v627_v12, 0.0 }
  0xfb   : > { %v697_v15 = vsel %vm665_vm3, %v625_v10, 0.0  ;;  %v626_v16 = vmax.f32 %v526_v11, 0.0 }
  0xfc   : > { %v698_v17 = vadd.f32 %v697_v15, %v696_v13  ;;  %v8942_v18 = vpack.c.bf16 %v628_v14, %v627_v12  ;;  %v703_v33 = vsel %vm665_vm3, %v628_v14, 0.0 }
  0xfd   : > { %v8944_v19 = vpack.c.bf16 %v626_v16, %v625_v10  ;;  %v699_v20 = vsel %vm665_vm3, %v626_v16, 0.0  ;;  %v8442_v21 = vpop.f32.mrb[12].mxu0 }
  0xfe   : > { %671 = vst.msk [vmem:[#allocation2 + $0x28] sm:$0xff] %vm665_vm3, %v8942_v18  ;;  %v700_v22 = vadd.f32 %v699_v20, %v698_v17  ;;  %v547_v25 = vadd.f32 %v8442_v21, %v8903_v24  ;;  %v538_v26 = vpop.f32.mrb[13].mxu0 }
  0xff   : > { %670 = vst.msk [vmem:[#allocation2 + $0x20] sm:$0xff] %vm665_vm3, %v8944_v19  ;;  %v539_v28 = vadd.f32 %v8903_v24, %v538_v26  ;;  %v8443_v29 = vpop.f32.mrb[14].mxu0 }
 0x100   : > { %v702_v30 = vadd.f32 %v701_v27, %v700_v22  ;;  %v550_v31 = vadd.f32 %v8443_v29, %v8903_v24  ;;  %v541_v32 = vpop.f32.mrb[15].mxu0  ;;  %v631_v36 = vmax.f32 %v547_v25, 0.0 }
 0x101   : > { %v629_v34 = vmax.f32 %v539_v28, 0.0  ;;  %v542_v35 = vadd.f32 %v8903_v24, %v541_v32 }
 0x102   : > { %v704_v38 = vadd.f32 %v703_v33, %v702_v30  ;;  %v632_v40 = vmax.f32 %v550_v31, 0.0  ;;  %v709_v51 = vsel %vm665_vm3, %v631_v36, 0.0 }
 0x103   : > { %v705_v41 = vsel %vm665_vm3, %v629_v34, 0.0  ;;  %v630_v42 = vmax.f32 %v542_v35, 0.0 }
 0x104   : > { %v706_v43 = vadd.f32 %v705_v41, %v704_v38  ;;  %v8958_v44 = vpack.c.bf16 %v632_v40, %v631_v36  ;;  %v711_v57 = vsel %vm665_vm3, %v632_v40, 0.0 }
 0x105   : > { %v8960_v45 = vpack.c.bf16 %v630_v42, %v629_v34  ;;  %v707_v46 = vsel %vm665_vm3, %v630_v42, 0.0  ;;  %v8446_v47 = vpop.f32.mrb[16].mxu0 }
 0x106   : > { %673 = vst.msk [vmem:[#allocation2 + $0x38] sm:$0xff] %vm665_vm3, %v8958_v44  ;;  %v708_v48 = vadd.f32 %v707_v46, %v706_v43  ;;  %v563_v49 = vadd.f32 %v8446_v47, %v8903_v24  ;;  %v554_v50 = vpop.f32.mrb[17].mxu0 }
 0x107   : > { %672 = vst.msk [vmem:[#allocation2 + $0x30] sm:$0xff] %vm665_vm3, %v8960_v45  ;;  %v555_v52 = vadd.f32 %v8903_v24, %v554_v50  ;;  %v8447_v53 = vpop.f32.mrb[18].mxu0 }
 0x108   : > { %v710_v54 = vadd.f32 %v709_v51, %v708_v48  ;;  %v566_v55 = vadd.f32 %v8447_v53, %v8903_v24  ;;  %v557_v56 = vpop.f32.mrb[19].mxu0  ;;  %v635_v62 = vmax.f32 %v563_v49, 0.0 }
 0x109   : > { %v633_v58 = vmax.f32 %v555_v52, 0.0  ;;  %v558_v59 = vadd.f32 %v8903_v24, %v557_v56 }
 0x10a   : > { %v712_v63 = vadd.f32 %v711_v57, %v710_v54  ;;  %v636_v0 = vmax.f32 %v566_v55, 0.0  ;;  %v717_v11 = vsel %vm665_vm3, %v635_v62, 0.0 }
 0x10b   : > { %v713_v1 = vsel %vm665_vm3, %v633_v58, 0.0  ;;  %v634_v2 = vmax.f32 %v558_v59, 0.0 }
 0x10c   : > { %v714_v3 = vadd.f32 %v713_v1, %v712_v63  ;;  %v8974_v4 = vpack.c.bf16 %v636_v0, %v635_v62  ;;  %v719_v17 = vsel %vm665_vm3, %v636_v0, 0.0 }
 0x10d   : > { %v8976_v5 = vpack.c.bf16 %v634_v2, %v633_v58  ;;  %v715_v6 = vsel %vm665_vm3, %v634_v2, 0.0  ;;  %v8450_v7 = vpop.f32.mrb[20].mxu0 }
 0x10e   : > { %675 = vst.msk [vmem:[#allocation2 + $0x48] sm:$0xff] %vm665_vm3, %v8974_v4  ;;  %v716_v8 = vadd.f32 %v715_v6, %v714_v3  ;;  %v579_v9 = vadd.f32 %v8450_v7, %v8903_v24  ;;  %v570_v10 = vpop.f32.mrb[21].mxu0 }
 0x10f   : > { %674 = vst.msk [vmem:[#allocation2 + $0x40] sm:$0xff] %vm665_vm3, %v8976_v5  ;;  %v571_v12 = vadd.f32 %v8903_v24, %v570_v10  ;;  %v8451_v13 = vpop.f32.mrb[22].mxu0 }
 0x110   : > { %v718_v14 = vadd.f32 %v717_v11, %v716_v8  ;;  %v582_v15 = vadd.f32 %v8451_v13, %v8903_v24  ;;  %v573_v16 = vpop.f32.mrb[23].mxu0  ;;  %v639_v22 = vmax.f32 %v579_v9, 0.0 }
 0x111   : > { %v637_v20 = vmax.f32 %v571_v12, 0.0  ;;  %v574_v21 = vadd.f32 %v8903_v24, %v573_v16 }
 0x112   : > { %v720_v25 = vadd.f32 %v719_v17, %v718_v14  ;;  %v640_v26 = vmax.f32 %v582_v15, 0.0  ;;  %v725_v38 = vsel %vm665_vm3, %v639_v22, 0.0 }
 0x113   : > { %v721_v27 = vsel %vm665_vm3, %v637_v20, 0.0  ;;  %v638_v28 = vmax.f32 %v574_v21, 0.0 }
 0x114   : > { %v722_v29 = vadd.f32 %v721_v27, %v720_v25  ;;  %v8990_v30 = vpack.c.bf16 %v640_v26, %v639_v22  ;;  %v727_v47 = vsel %vm665_vm3, %v640_v26, 0.0 }
 0x115   : > { %v8992_v31 = vpack.c.bf16 %v638_v28, %v637_v20  ;;  %v723_v32 = vsel %vm665_vm3, %v638_v28, 0.0  ;;  %v8454_v33 = vpop.f32.mrb[24].mxu0 }
 0x116   : > { %677 = vst.msk [vmem:[#allocation2 + $0x58] sm:$0xff] %vm665_vm3, %v8990_v30  ;;  %v724_v34 = vadd.f32 %v723_v32, %v722_v29  ;;  %v595_v35 = vadd.f32 %v8454_v33, %v8903_v24  ;;  %v586_v36 = vpop.f32.mrb[25].mxu0 }
 0x117   : > { %676 = vst.msk [vmem:[#allocation2 + $0x50] sm:$0xff] %vm665_vm3, %v8992_v31  ;;  %v587_v40 = vadd.f32 %v8903_v24, %v586_v36  ;;  %v8455_v41 = vpop.f32.mrb[26].mxu0 }
 0x118   : > { %v726_v42 = vadd.f32 %v725_v38, %v724_v34  ;;  %v598_v43 = vadd.f32 %v8455_v41, %v8903_v24  ;;  %v589_v46 = vpop.f32.mrb[27].mxu0  ;;  %v643_v50 = vmax.f32 %v595_v35, 0.0  ;;  %v8716_v41 = vld [vmem:[%s11127_s2 + $0x8] sm:$0xff]  }
 0x119   : > { %v641_v48 = vmax.f32 %v587_v40, 0.0  ;;  %v590_v49 = vadd.f32 %v8903_v24, %v589_v46 }
 0x11a   : > { %v728_v51 = vadd.f32 %v727_v47, %v726_v42  ;;  %v644_v52 = vmax.f32 %v598_v43, 0.0  ;;  %v733_v1 = vsel %vm665_vm3, %v643_v50, 0.0  ;;  %v8717_v42 = vld [vmem:[%s11127_s2 + $0x10] sm:$0xff]   ;;  %v8718_v43 = vld [vmem:[%s11127_s2 + $0x18] sm:$0xff]  }
 0x11b   : > { %v729_v53 = vsel %vm665_vm3, %v641_v48, 0.0  ;;  %v642_v54 = vmax.f32 %v590_v49, 0.0 }
 0x11c   : > { %v730_v55 = vadd.f32 %v729_v53, %v728_v51  ;;  %v9006_v56 = vpack.c.bf16 %v644_v52, %v643_v50  ;;  %v735_v9 = vsel %vm665_vm3, %v644_v52, 0.0  ;;  %v8719_v52 = vld [vmem:[%s11128_s3 + $0x80] sm:$0xff]   ;;  %v8720_v53 = vld [vmem:[%s11128_s3 + $0x88] sm:$0xff]  }
 0x11d   : > { %v9008_v57 = vpack.c.bf16 %v642_v54, %v641_v48  ;;  %v731_v58 = vsel %vm665_vm3, %v642_v54, 0.0  ;;  %v8458_v59 = vpop.f32.mrb[28].mxu0 }
 0x11e   : > { %679 = vst.msk [vmem:[#allocation2 + $0x68] sm:$0xff] %vm665_vm3, %v9006_v56  ;;  %v732_v62 = vadd.f32 %v731_v58, %v730_v55  ;;  %v611_v63 = vadd.f32 %v8458_v59, %v8903_v24  ;;  %v602_v0 = vpop.f32.mrb[29].mxu0  ;;  %v9123_v58 = vld [vmem:[%s11131_s6 + $0x1] ss:$0 sm:$0xff] }
 0x11f   : > { %678 = vst.msk [vmem:[#allocation2 + $0x60] sm:$0xff] %vm665_vm3, %v9008_v57  ;;  %v603_v2 = vadd.f32 %v8903_v24, %v602_v0  ;;  %v8459_v3 = vpop.f32.mrb[30].mxu0 }
 0x120   : > { %v734_v6 = vadd.f32 %v733_v1, %v732_v62  ;;  %v614_v7 = vadd.f32 %v8459_v3, %v8903_v24  ;;  %v605_v8 = vpop.f32.mrb[31].mxu0  ;;  %v647_v12 = vmax.f32 %v611_v63, 0.0 }
 0x121   : > { %v645_v10 = vmax.f32 %v603_v2, 0.0  ;;  %v606_v11 = vadd.f32 %v8903_v24, %v605_v8 }
 0x122   : > { %v736_v13 = vadd.f32 %v735_v9, %v734_v6  ;;  %v648_v14 = vmax.f32 %v614_v7, 0.0  ;;  %v741_v26 = vsel %vm665_vm3, %v647_v12, 0.0 }
 0x123   : > { %v737_v15 = vsel %vm665_vm3, %v645_v10, 0.0  ;;  %v646_v16 = vmax.f32 %v606_v11, 0.0 }
 0x124   : > { %v738_v17 = vadd.f32 %v737_v15, %v736_v13  ;;  %v664_v20 = vpack.c.bf16 %v648_v14, %v647_v12  ;;  %v743_v24 = vsel %vm665_vm3, %v648_v14, 0.0 }
 0x125   : > { %v663_v21 = vpack.c.bf16 %v646_v16, %v645_v10  ;;  %v739_v22 = vsel %vm665_vm3, %v646_v16, 0.0 }
 0x126   : > { %681 = vst.msk [vmem:[#allocation2 + $0x78] sm:$0xff] %vm665_vm3, %v664_v20  ;;  %v740_v25 = vadd.f32 %v739_v22, %v738_v17 }
 0x127   : > { %680 = vst.msk [vmem:[#allocation2 + $0x70] sm:$0xff] %vm665_vm3, %v663_v21 }
 0x128   : > { %v742_v27 = vadd.f32 %v741_v26, %v740_v25 }
 0x12a   : > { %v744_v28 = vadd.f32 %v743_v24, %v742_v27 }
 0x12c   : > { %v745_v29 = vrot.slane %v744_v28, 4 }
 0x12e   : > { %v746_v32 = vadd.f32 %v745_v29, %v744_v28 }
 0x130   : > { %v747_v33 = vrot.slane %v746_v32, 2 }
 0x132   : > { %v748_v34 = vadd.f32 %v747_v33, %v746_v32 }
 0x134   : > { %v749_v35 = vrot.slane %v748_v34, 1 }
 0x136   : > { %v750_v36 = vadd.f32 %v749_v35, %v748_v34 }
 0x138   : > { %v752_v38 = vmul.f32 0.00390625, %v750_v36 }
 0x13a   : > { %v753_v40 = vpack.c.bf16 %v752_v38, %v752_v38 }
 0x13c   : > { %8469 = vmatmul.mubr.msk.bf16.vlgmr.msra.gmra.mrb[0].mxu1 %vm665_vm3, %v753_v40 }
 0x13d   : > { %8473 = vmatpush3.bf16.msra.mxu1 %v8897_v23  ;;  %8480 = vmatprep.mubr.msk.bf16.mxu1 %vm665_vm3, %v8912_v39  ;;  %v8783_v23 = vmov 0  }
 0x13e   : > { %8474 = vmatprep.subr.bf16.mxu1 %v8716_v41  ;;  %859 = vst.msk [vmem:[#allocation3 + $0x38] sm:$0xf0] %vm857_vm5, %v8783_v23  ;;  %858 = vst.msk [vmem:[#allocation3 + $0x28] sm:$0xf0] %vm857_vm5, %v8783_v23 }
 0x13f   : > { %841 = vst.msk [vmem:[#allocation3 + $0x20] sm:$0xf] %vm840_vm4, %v8783_v23  ;;  %842 = vst.msk [vmem:[#allocation3 + $0x30] sm:$0xf] %vm840_vm4, %v8783_v23 }
 0x140   : > { %843 = vst.msk [vmem:[#allocation3 + $0x40] sm:$0xf] %vm840_vm4, %v8783_v23  ;;  %844 = vst.msk [vmem:[#allocation3 + $0x50] sm:$0xf] %vm840_vm4, %v8783_v23 }
 0x141   : > { %8475 = vmatpush3.bf16.msra.mxu1 %v8716_v41  ;;  %845 = vst.msk [vmem:[#allocation3 + $0x60] sm:$0xf] %vm840_vm4, %v8783_v23  ;;  %846 = vst.msk [vmem:[#allocation3 + $0x70] sm:$0xf] %vm840_vm4, %v8783_v23 }
 0x142   : > { %8476 = vmatprep.subr.bf16.mxu1 %v8717_v42  ;;  %847 = vst.msk [vmem:[#allocation3 + $0x80] sm:$0xf] %vm840_vm4, %v8783_v23  ;;  %848 = vst.msk [vmem:[#allocation3 + $0x90] sm:$0xf] %vm840_vm4, %v8783_v23 }
 0x143   : > { %849 = vst.msk [vmem:[#allocation3 + $0xa0] sm:$0xf] %vm840_vm4, %v8783_v23  ;;  %850 = vst.msk [vmem:[#allocation3 + $0xb0] sm:$0xf] %vm840_vm4, %v8783_v23 }
 0x144   : > { %851 = vst.msk [vmem:[#allocation3 + $0xc0] sm:$0xf] %vm840_vm4, %v8783_v23  ;;  %852 = vst.msk [vmem:[#allocation3 + $0xd0] sm:$0xf] %vm840_vm4, %v8783_v23 }
 0x145   : > { %8477 = vmatpush3.bf16.msra.mxu1 %v8717_v42  ;;  %853 = vst.msk [vmem:[#allocation3 + $0xe0] sm:$0xf] %vm840_vm4, %v8783_v23  ;;  %854 = vst.msk [vmem:[#allocation3 + $0xf0] sm:$0xf] %vm840_vm4, %v8783_v23 }
 0x146   : > { %8478 = vmatprep.subr.bf16.mxu1 %v8718_v43  ;;  %855 = vst.msk [vmem:[#allocation3 + $0x100] sm:$0xf] %vm840_vm4, %v8783_v23  ;;  %856 = vst.msk [vmem:[#allocation3 + $0x110] sm:$0xf] %vm840_vm4, %v8783_v23 }
 0x147   : > { %860 = vst.msk [vmem:[#allocation3 + $0x48] sm:$0xf0] %vm857_vm5, %v8783_v23  ;;  %861 = vst.msk [vmem:[#allocation3 + $0x58] sm:$0xf0] %vm857_vm5, %v8783_v23 }
 0x148   : > { %862 = vst.msk [vmem:[#allocation3 + $0x68] sm:$0xf0] %vm857_vm5, %v8783_v23  ;;  %863 = vst.msk [vmem:[#allocation3 + $0x78] sm:$0xf0] %vm857_vm5, %v8783_v23 }
 0x149   : > { %8479 = vmatpush3.bf16.msra.mxu1 %v8718_v43  ;;  %864 = vst.msk [vmem:[#allocation3 + $0x88] sm:$0xf0] %vm857_vm5, %v8783_v23  ;;  %865 = vst.msk [vmem:[#allocation3 + $0x98] sm:$0xf0] %vm857_vm5, %v8783_v23 }
 0x14a   : > { %866 = vst.msk [vmem:[#allocation3 + $0xa8] sm:$0xf0] %vm857_vm5, %v8783_v23  ;;  %867 = vst.msk [vmem:[#allocation3 + $0xb8] sm:$0xf0] %vm857_vm5, %v8783_v23  ;;  %8512 = vmatprep.subr.bf16.mxu1 %v8719_v52 }
 0x14b   : > { %868 = vst.msk [vmem:[#allocation3 + $0xc8] sm:$0xf0] %vm857_vm5, %v8783_v23  ;;  %869 = vst.msk [vmem:[#allocation3 + $0xd8] sm:$0xf0] %vm857_vm5, %v8783_v23 }
 0x14c   : > { %8481 = vmatmul.mubr.msk.bf16.vlgmr.msra.gmra.mrb[4].mxu1 %vm665_vm3, %v8909_v37  ;;  %870 = vst.msk [vmem:[#allocation3 + $0xe8] sm:$0xf0] %vm857_vm5, %v8783_v23  ;;  %871 = vst.msk [vmem:[#allocation3 + $0xf8] sm:$0xf0] %vm857_vm5, %v8783_v23 }
 0x14d   : > { %8484 = vmatprep.mubr.msk.bf16.mxu1 %vm665_vm3, %v8928_v61  ;;  %872 = vst.msk [vmem:[#allocation3 + $0x108] sm:$0xf0] %vm857_vm5, %v8783_v23  ;;  %873 = vst.msk [vmem:[#allocation3 + $0x118] sm:$0xf0] %vm857_vm5, %v8783_v23  ;;  %8513 = vmatpush3.bf16.msra.mxu1 %v8719_v52 }
 0x14e   : > { %832 = vst.msk [vmem:[#allocation3 + $0x10] sm:$0xff] %vm829_vm6, %v8783_v23  ;;  %833 = vst.msk [vmem:[#allocation3 + $0x18] sm:$0xff] %vm829_vm6, %v8783_v23  ;;  %8514 = vmatprep.subr.bf16.mxu1 %v8720_v53 }
 0x14f   : > { %830 = vst.msk [vmem:[#allocation3] sm:$0xff] %vm829_vm6, %v8783_v23  ;;  %831 = vst.msk [vmem:[#allocation3 + $0x8] sm:$0xff] %vm829_vm6, %v8783_v23 }
 0x150   : > { %835 = vst.msk [vmem:[#allocation3 + $0x120] sm:$0xff] %vm829_vm6, %v8783_v23  ;;  %836 = vst.msk [vmem:[#allocation3 + $0x128] sm:$0xff] %vm829_vm6, %v8783_v23 }
 0x151   : > { %837 = vst.msk [vmem:[#allocation3 + $0x130] sm:$0xff] %vm829_vm6, %v8783_v23  ;;  %838 = vst.msk [vmem:[#allocation3 + $0x138] sm:$0xff] %vm829_vm6, %v8783_v23  ;;  %8515 = vmatpush3.bf16.msra.mxu1 %v8720_v53 }
 0x154   : > { %8485 = vmatmul.mubr.msk.bf16.gmra.mrb[8].mxu1 %vm665_vm3, %v8926_v60 }
 0x155   : > { %8488 = vmatprep.mubr.msk.bf16.mxu1 %vm665_vm3, %v8944_v19  ;;  %v1763_v37 = vld [vmem:[#allocation3 + $0x10] sm:$0xf0]  ;;  %v1764_v39 = vld [vmem:[#allocation3 + $0x18] sm:$0x1f] }
 0x156   : > { %v1797_v60 = vshrl.u32 %v1763_v37, 16  ;;  %v1800_v61 = vshll.u32 %v1763_v37, 16  ;;  %v1808_v19 = vshll.u32 %v1764_v39, 16 }
 0x15c   : > { %8489 = vmatmul.mubr.msk.bf16.gmra.mrb[12].mxu1 %vm665_vm3, %v8942_v18  ;;  %v1805_v18 = vshrl.u32 %v1764_v39, 16 }
 0x15d   : > { %8492 = vmatprep.mubr.msk.bf16.mxu1 %vm665_vm3, %v8960_v45  ;;  %v1802_v45 = vrot.slane %v1800_v61, 5 }
 0x164   : > { %8493 = vmatmul.mubr.msk.bf16.gmra.mrb[16].mxu1 %vm665_vm3, %v8958_v44  ;;  %v1799_v44 = vrot.slane %v1797_v60, 4 }
 0x165   : > { %8496 = vmatprep.mubr.msk.bf16.mxu1 %vm665_vm3, %v8976_v5  ;;  %v1810_v5 = vrot.slane %v1808_v19, 5 }
 0x166   : > { %v1803_v46 = vor.u32 %v1802_v45, %v1799_v44 }
 0x16c   : > { %8497 = vmatmul.mubr.msk.bf16.gmra.mrb[20].mxu1 %vm665_vm3, %v8974_v4  ;;  %v1807_v4 = vrot.slane %v1805_v18, 4 }
 0x16d   : > { %8500 = vmatprep.mubr.msk.bf16.mxu1 %vm665_vm3, %v8992_v31  ;;  %v1586_v31 = vld [vmem:[#allocation3 + $0x18] sm:$0xf] }
 0x16e   : > { %v1811_v47 = vor.u32 %v1810_v5, %v1807_v4  ;;  %v1651_v49 = vrot.slane %v1586_v31, 4 }
 0x170   : > { %v1812_v50 = vsel %vm1795_vm7, %v1803_v46, %v1811_v47 }
 0x171   : > { %2068 = vrot.lane.b32.xlu1 %v1812_v50, %s8784_s30 }
 0x174   : > { %8501 = vmatmul.mubr.msk.bf16.gmra.mrb[24].mxu1 %vm665_vm3, %v8990_v30  ;;  %v1585_v30 = vld [vmem:[#allocation3 + $0x10] sm:$0xf0] }
 0x175   : > { %8504 = vmatprep.mubr.msk.bf16.mxu1 %vm665_vm3, %v9008_v57  ;;  %v1650_v48 = vrot.slane %v1585_v30, 4 }
 0x177   : > { %v1652_v51 = vsel %vm452_vm0, %v1650_v48, %v1651_v49 }
 0x178   : > { %1698 = vrot.lane.b32.xlu0 %v1652_v51, %s8785_s8 }
 0x17c   : > { %8505 = vmatmul.mubr.msk.bf16.gmra.mrb[28].mxu1 %vm665_vm3, %v9006_v56 }
 0x17d   : > { %8508 = vmatprep.mubr.msk.bf16.mxu1 %vm665_vm3, %v663_v21 }
 0x184   : > { %8509 = vmatmul.mubr.msk.bf16.gmra.mrb[32].mxu1 %vm665_vm3, %v664_v20 }
 0x20f   : > { %v9118_v54 = vpop.f32.mrb[0].mxu1 }
 0x210   : > { %v8470_v55 = vpop.f32.mrb[1].mxu1 }
 0x211   : > { %v826_v56 = vpop.f32.mrb[2].mxu1 }
 0x212   : > { %v8471_v57 = vpop.f32.mrb[3].mxu1 }
 0x21f   : > { %v8482_v59 = vpop.f32.mrb[4].mxu1 }
 0x220   : > { %v1001_v62 = vadd.f32 %v8482_v59, %v9123_v58  ;;  %v992_v63 = vpop.f32.mrb[5].mxu1 }
 0x221   : > { %v993_v0 = vadd.f32 %v9123_v58, %v992_v63  ;;  %v8483_v1 = vpop.f32.mrb[6].mxu1 }
 0x222   : > { %v1004_v2 = vadd.f32 %v8483_v1, %v9123_v58  ;;  %v995_v3 = vpop.f32.mrb[7].mxu1  ;;  %v1121_v7 = vmax.f32 %v1001_v62, 0.0 }
 0x223   : > { %v996_v6 = vadd.f32 %v9123_v58, %v995_v3  ;;  %v1119_v9 = vmax.f32 %v993_v0, 0.0 }
 0x224   : > { %v1122_v8 = vmax.f32 %v1004_v2, 0.0 }
 0x225   : > { %v1120_v10 = vmax.f32 %v996_v6, 0.0 }
 0x226   : > { %v1152_v11 = vpack.c.bf16 %v1122_v8, %v1121_v7 }
 0x227   : > { %v1151_v12 = vpack.c.bf16 %v1120_v10, %v1119_v9  ;;  %v8486_v13 = vpop.f32.mrb[8].mxu1 }
 0x228   : > { %v1184_v14 = vrot.slane %v1152_v11, 4  ;;  %v1017_v15 = vadd.f32 %v8486_v13, %v9123_v58  ;;  %v1008_v16 = vpop.f32.mrb[9].mxu1 }
 0x229   : > { %v1183_v17 = vrot.slane %v1151_v12, 4  ;;  %v1009_v20 = vadd.f32 %v9123_v58, %v1008_v16  ;;  %v8487_v21 = vpop.f32.mrb[10].mxu1 }
 0x22a   : > { %1217 = vst.msk [vmem:[#allocation3 + $0x30] sm:$0xf0] %vm857_vm5, %v1184_v14  ;;  %v1020_v22 = vadd.f32 %v8487_v21, %v9123_v58  ;;  %v1011_v25 = vpop.f32.mrb[11].mxu1  ;;  %v1125_v27 = vmax.f32 %v1017_v15, 0.0 }
 0x22b   : > { %1218 = vst.msk [vmem:[#allocation3 + $0x38] sm:$0xf] %vm840_vm4, %v1184_v14  ;;  %1216 = vst.msk [vmem:[#allocation3 + $0x28] sm:$0xf] %vm840_vm4, %v1183_v17  ;;  %v1012_v26 = vadd.f32 %v9123_v58, %v1011_v25  ;;  %v1123_v28 = vmax.f32 %v1009_v20, 0.0 }
 0x22c   : > { %1215 = vst.msk [vmem:[#allocation3 + $0x20] sm:$0xf0] %vm857_vm5, %v1183_v17  ;;  %v1126_v24 = vmax.f32 %v1020_v22, 0.0 }
 0x22d   : > { %v1124_v29 = vmax.f32 %v1012_v26, 0.0 }
 0x22e   : > { %v1154_v32 = vpack.c.bf16 %v1126_v24, %v1125_v27 }
 0x22f   : > { %v1153_v33 = vpack.c.bf16 %v1124_v29, %v1123_v28  ;;  %v8490_v34 = vpop.f32.mrb[12].mxu1 }
 0x230   : > { %v1186_v35 = vrot.slane %v1154_v32, 4  ;;  %v1033_v36 = vadd.f32 %v8490_v34, %v9123_v58  ;;  %v1024_v38 = vpop.f32.mrb[13].mxu1 }
 0x231   : > { %v3559_v40 = vld [vmem:[#allocation3 + $0x30] sm:$0xf0]  ;;  %v1185_v42 = vrot.slane %v1153_v33, 4  ;;  %v1025_v43 = vadd.f32 %v9123_v58, %v1024_v38  ;;  %v8491_v23 = vpop.f32.mrb[14].mxu1 }
 0x232   : > { %v3560_v41 = vld [vmem:[#allocation3 + $0x38] sm:$0x1f]  ;;  %v3592_v37 = vshrl.u32 %v3559_v40, 16  ;;  %v3595_v39 = vshll.u32 %v3559_v40, 16  ;;  %1221 = vst.msk [vmem:[#allocation3 + $0x50] sm:$0xf0] %vm857_vm5, %v1186_v35  ;;  %v1036_v45 = vadd.f32 %v8491_v23, %v9123_v58 }
 0x233   : > { %v3600_v60 = vshrl.u32 %v3560_v41, 16  ;;  %v3603_v61 = vshll.u32 %v3560_v41, 16  ;;  %1222 = vst.msk [vmem:[#allocation3 + $0x58] sm:$0xf] %vm840_vm4, %v1186_v35  ;;  %v1027_v18 = vpop.f32.mrb[15].mxu1  ;;  %v1129_v19 = vmax.f32 %v1033_v36, 0.0 }
 0x234   : > { %1219 = vst.msk [vmem:[#allocation3 + $0x40] sm:$0xf0] %vm857_vm5, %v1185_v42  ;;  %v1127_v44 = vmax.f32 %v1025_v43, 0.0  ;;  %v1028_v4 = vadd.f32 %v9123_v58, %v1027_v18  ;;  %v3383_v5 = vld [vmem:[#allocation3 + $0x30] sm:$0xf0]  ;;  %v3594_v31 = vrot.slane %v3592_v37, 4 }
 0x235   : > { %1220 = vst.msk [vmem:[#allocation3 + $0x48] sm:$0xf] %vm840_vm4, %v1185_v42  ;;  %v3384_v30 = vld [vmem:[#allocation3 + $0x38] sm:$0xf]  ;;  %v3597_v46 = vrot.slane %v3595_v39, 5  ;;  %v3602_v47 = vrot.slane %v3600_v60, 4 }
 0x236   : > { %v3605_v48 = vrot.slane %v3603_v61, 5  ;;  %v1589_v49 = vld [vmem:[#allocation3 + $0x30] sm:$0xf0]  ;;  %v1130_v50 = vmax.f32 %v1036_v45, 0.0  ;;  %v1128_v51 = vmax.f32 %v1028_v4, 0.0  ;;  %v3447_v52 = vrot.slane %v3383_v5, 4 }
 0x237   : > { %v3448_v53 = vrot.slane %v3384_v30, 4  ;;  %v1590_v55 = vld [vmem:[#allocation3 + $0x38] sm:$0xf]  ;;  %v1656_v56 = vrot.slane %v1589_v49, 4  ;;  %v2648_v59 = vld [vmem:[#allocation3 + $0x30] sm:$0xf0]  ;;  %v3598_v63 = vor.u32 %v3597_v46, %v3594_v31 }
 0x238   : > { %v1657_v57 = vrot.slane %v1590_v55, 4  ;;  %v2649_v62 = vld [vmem:[#allocation3 + $0x38] sm:$0x1f]  ;;  %v3606_v0 = vor.u32 %v3605_v48, %v3602_v47  ;;  %v1156_v1 = vpack.c.bf16 %v1130_v50, %v1129_v19  ;;  %v1155_v2 = vpack.c.bf16 %v1128_v51, %v1127_v44  ;;  %v8494_v6 = vpop.f32.mrb[16].mxu1  ;;  %v1587_v34 = vld [vmem:[#allocation3 + $0x20] sm:$0xf0] }
 0x239   : > { %v3449_v3 = vsel %vm452_vm0, %v3447_v52, %v3448_v53  ;;  %v2696_v7 = vshrl.u32 %v2648_v59, 16  ;;  %v9149_v9 = vadd.f32 %v8494_v6, %v9123_v58  ;;  %v1040_v10 = vpop.f32.mrb[17].mxu1  ;;  %v2699_v11 = vshll.u32 %v2648_v59, 16  ;;  %v3563_v13 = vld [vmem:[#allocation3 + $0x50] sm:$0xf0] }
 0x23a   : > { %3495 = vrot.lane.b32.xlu0 %v3449_v3, %s8786_s15  ;;  %v1658_v8 = vsel %vm452_vm0, %v1656_v56, %v1657_v57  ;;  %v2704_v12 = vshrl.u32 %v2649_v62, 16  ;;  %v3564_v14 = vld [vmem:[#allocation3 + $0x58] sm:$0x1f]  ;;  %v1188_v15 = vrot.slane %v1156_v1, 4  ;;  %v1187_v16 = vrot.slane %v1155_v2, 4  ;;  %v8495_v42 = vpop.f32.mrb[18].mxu1 }
 0x23b   : > { %1702 = vrot.lane.b32.xlu1 %v1658_v8, %s8785_s8  ;;  %v9153_v17 = vadd.f32 %v9123_v58, %v1040_v10  ;;  %v3607_v20 = vsel %vm1795_vm7, %v3598_v63, %v3606_v0  ;;  %v3626_v21 = vshrl.u32 %v3563_v13, 16  ;;  %v3629_v22 = vshll.u32 %v3563_v13, 16  ;;  %v3561_v27 = vld [vmem:[#allocation3 + $0x40] sm:$0xf0]  ;;  %v1588_v35 = vld [vmem:[#allocation3 + $0x28] sm:$0xf] }
 0x23c   : > { %v3634_v25 = vshrl.u32 %v3564_v14, 16  ;;  %v3637_v26 = vshll.u32 %v3564_v14, 16  ;;  %3879 = vst.msk [vmem:[#allocation4 + $0x10] sm:$0xff] %vm829_vm6, %v3607_v20  ;;  %v3562_v24 = vld [vmem:[#allocation3 + $0x48] sm:$0x1f]  ;;  %v3609_v28 = vshrl.u32 %v3561_v27, 16  ;;  %v1052_v31 = vadd.f32 %v8495_v42, %v9123_v58 }
 0x23d   : > { %v3612_v29 = vshll.u32 %v3561_v27, 16  ;;  %1225 = vst.msk [vmem:[#allocation3 + $0x70] sm:$0xf0] %vm857_vm5, %v1188_v15  ;;  %1223 = vst.msk [vmem:[#allocation3 + $0x60] sm:$0xf0] %vm857_vm5, %v1187_v16  ;;  %v1133_v32 = vmax.f32 %v9149_v9, 0.0 }
 0x23e   : > { %1226 = vst.msk [vmem:[#allocation3 + $0x78] sm:$0xf] %vm840_vm4, %v1188_v15  ;;  %1224 = vst.msk [vmem:[#allocation3 + $0x68] sm:$0xf] %vm840_vm4, %v1187_v16  ;;  %v1131_v33 = vmax.f32 %v9153_v17, 0.0  ;;  %v9163_v36 = vrot.slane %v3626_v21, 4 }
 0x23f   : > { %v9165_v38 = vrot.slane %v3629_v22, 5  ;;  %v9167_v40 = vrot.slane %v3634_v25, 4  ;;  %v9169_v41 = vrot.slane %v3637_v26, 5  ;;  %v9171_v43 = vrot.slane %v3609_v28, 4  ;;  %v1043_v60 = vpop.f32.mrb[19].mxu1 }
 0x240   : > { %v9173_v23 = vrot.slane %v3612_v29, 5  ;;  %v3617_v37 = vshrl.u32 %v3562_v24, 16  ;;  %v3620_v39 = vshll.u32 %v3562_v24, 16  ;;  %v2698_v61 = vrot.slane %v2696_v7, 4  ;;  %v9175_v45 = vld [vmem:[#allocation3 + $0x20] sm:$0xf0] }
 0x241   : > { %v2701_v18 = vrot.slane %v2699_v11, 5  ;;  %v2706_v19 = vrot.slane %v2704_v12, 4  ;;  %v2707_v44 = vshll.u32 %v2649_v62, 16  ;;  %v1653_v48 = vrot.slane %v1587_v34, 4  ;;  %v8498_v50 = vpop.f32.mrb[20].mxu1 }
 0x242   : > { %v9179_v5 = vrot.slane %v3617_v37, 4  ;;  %v9181_v30 = vrot.slane %v3620_v39, 5  ;;  %v1654_v49 = vrot.slane %v1588_v35, 4  ;;  %v1134_v52 = vmax.f32 %v1052_v31, 0.0  ;;  %v1056_v56 = vpop.f32.mrb[21].mxu1 }
 0x243   : > { %v2702_v46 = vor.u32 %v2701_v18, %v2698_v61  ;;  %v2709_v47 = vrot.slane %v2707_v44, 5  ;;  %v1044_v53 = vadd.f32 %v9123_v58, %v1043_v60  ;;  %v2679_v55 = vshrl.u32 %v9175_v45, 16  ;;  %v3897_v57 = vld [vmem:[#allocation4 + $0x10] sm:$0xff]  ;;  %v2647_v12 = vld [vmem:[#allocation3 + $0x28] sm:$0x1f]  ;;  %v8499_v20 = vpop.f32.mrb[22].mxu1 }
 0x244   : > { %v3623_v51 = vor.u32 %v9181_v30, %v9179_v5  ;;  %v3567_v59 = vld [vmem:[#allocation3 + $0x70] sm:$0xf0]  ;;  %v3565_v63 = vld [vmem:[#allocation3 + $0x60] sm:$0xf0]  ;;  %v1655_v1 = vsel %vm452_vm0, %v1653_v48, %v1654_v49  ;;  %v9190_v2 = vadd.f32 %v8498_v50, %v9123_v58  ;;  %v9193_v3 = vadd.f32 %v9123_v58, %v1056_v56  ;;  %8516 = vmatprep.mubr.msk.bf16.mxu1 %vm829_vm6, %v3897_v57  ;;  %v3016_v35 = vld [vmem:[#allocation3 + $0x38] sm:$0xf] }
 0x245   : > { %v3568_v62 = vld [vmem:[#allocation3 + $0x78] sm:$0x1f]  ;;  %v2710_v0 = vor.u32 %v2709_v47, %v2706_v19  ;;  %v3660_v6 = vshrl.u32 %v3567_v59, 16  ;;  %v3663_v7 = vshll.u32 %v3567_v59, 16  ;;  %v3566_v11 = vld [vmem:[#allocation3 + $0x68] sm:$0x1f]  ;;  %1700 = vrot.lane.b32.xlu1 %v1655_v1, %s8785_s8  ;;  %v1158_v37 = vpack.c.bf16 %v1134_v52, %v1133_v32 }
 0x246   : > { %v3668_v8 = vshrl.u32 %v3568_v62, 16  ;;  %v3671_v10 = vshll.u32 %v3568_v62, 16  ;;  %v3643_v13 = vshrl.u32 %v3565_v63, 16  ;;  %v3646_v14 = vshll.u32 %v3565_v63, 16  ;;  %v3015_v27 = vld [vmem:[#allocation3 + $0x30] sm:$0xf8] }
 0x247   : > { %v3651_v15 = vshrl.u32 %v3566_v11, 16  ;;  %v3654_v16 = vshll.u32 %v3566_v11, 16  ;;  %v9197_v21 = vrot.slane %v3660_v6, 4  ;;  %v9199_v22 = vrot.slane %v3663_v7, 5  ;;  %v1059_v61 = vpop.f32.mrb[23].mxu1 }
 0x248   : > { %v9201_v25 = vrot.slane %v3668_v8, 4  ;;  %v9203_v26 = vrot.slane %v3671_v10, 5  ;;  %v9205_v24 = vrot.slane %v3643_v13, 4  ;;  %v9207_v28 = vrot.slane %v3646_v14, 5  ;;  %v3387_v47 = vld [vmem:[#allocation3 + $0x50] sm:$0xf0] }
 0x249   : > { %v9209_v29 = vrot.slane %v3651_v15, 4  ;;  %v9211_v34 = vrot.slane %v3654_v16, 5  ;;  %v2711_v42 = vsel %vm1795_vm7, %v2702_v46, %v2710_v0  ;;  %v1132_v39 = vmax.f32 %v1044_v53, 0.0  ;;  %v3388_v56 = vld [vmem:[#allocation3 + $0x58] sm:$0xf]  ;;  %v8502_v9 = vpop.f32.mrb[24].mxu1 }
 0x24a   : > { %v2681_v60 = vrot.slane %v2679_v55, 4  ;;  %2952 = vrot.lane.b32.xlu0 %v2711_v42, %s8785_s8  ;;  %v2682_v18 = vshll.u32 %v9175_v45, 16  ;;  %v2687_v19 = vshrl.u32 %v2647_v12, 16  ;;  %v2690_v44 = vshll.u32 %v2647_v12, 16  ;;  %v2135_v57 = vld [vmem:[#allocation3 + $0x30] sm:$0xf8] }
 0x24b   : > { %v3048_v31 = vshrl.u32 %v3015_v27, 16  ;;  %v1190_v48 = vrot.slane %v1158_v37, 4  ;;  %v1157_v49 = vpack.c.bf16 %v1132_v39, %v1131_v33  ;;  %v3051_v50 = vshll.u32 %v3015_v27, 16  ;;  %v9222_v0 = vpop.f32.mrb[25].mxu1  ;;  %v2136_v7 = vld [vmem:[#allocation3 + $0x38] sm:$0xf] }
 0x24c   : > { %v3056_v46 = vshrl.u32 %v3016_v35, 16  ;;  %v2684_v32 = vrot.slane %v2682_v18, 5  ;;  %v2689_v52 = vrot.slane %v2687_v19, 4  ;;  %v2692_v53 = vrot.slane %v2690_v44, 5  ;;  %v9226_v8 = vpop.f32.mrb[26].mxu1  ;;  %v8721_v10 = vld [vmem:[%s11128_s3 + $0x40] sm:$0xff]  }
 0x24d   : > { %v3050_v55 = vrot.slane %v3048_v31, 3  ;;  %1229 = vst.msk [vmem:[#allocation3 + $0x90] sm:$0xf0] %vm857_vm5, %v1190_v48  ;;  %v1189_v45 = vrot.slane %v1157_v49, 4  ;;  %v3053_v59 = vrot.slane %v3051_v50, 4  ;;  %v3059_v63 = vshll.u32 %v3016_v35, 16  ;;  %8120 = vmatprep.subr.bf16.mxu0 %v8721_v10 }
 0x24e   : > { %1230 = vst.msk [vmem:[#allocation3 + $0x98] sm:$0xf] %vm840_vm4, %v1190_v48  ;;  %v3058_v62 = vrot.slane %v3056_v46, 3  ;;  %v2685_v17 = vor.u32 %v2684_v32, %v2681_v60  ;;  %v2693_v33 = vor.u32 %v2692_v53, %v2689_v52  ;;  %v1137_v1 = vmax.f32 %v9190_v2, 0.0  ;;  %v9235_v27 = vpop.f32.mrb[27].mxu1  ;;  %v8722_v32 = vld [vmem:[%s11128_s3] sm:$0xff]  }
 0x24f   : > { %v1135_v6 = vmax.f32 %v9193_v3, 0.0  ;;  %1227 = vst.msk [vmem:[#allocation3 + $0x80] sm:$0xf0] %vm857_vm5, %v1189_v45  ;;  %v3054_v11 = vor.u32 %v3053_v59, %v3050_v55  ;;  %v3061_v12 = vrot.slane %v3059_v63, 4  ;;  %v1068_v13 = vadd.f32 %v8499_v20, %v9123_v58  ;;  %v3385_v60 = vld [vmem:[#allocation3 + $0x40] sm:$0xf0]  ;;  %8121 = vmatpush3.bf16.msra.mxu0 %v8722_v32 }
 0x250   : > { %1228 = vst.msk [vmem:[#allocation3 + $0x88] sm:$0xf] %vm840_vm4, %v1189_v45  ;;  %v3453_v14 = vrot.slane %v3387_v47, 4  ;;  %v2694_v2 = vsel %vm1795_vm7, %v2685_v17, %v2693_v33  ;;  %v3454_v15 = vrot.slane %v3388_v56, 4  ;;  %v2183_v3 = vshrl.u32 %v2135_v57, 16  ;;  %v9238_v18 = vpop.f32.mrb[28].mxu1 }
 0x251   : > { %v2186_v16 = vshll.u32 %v2135_v57, 16  ;;  %2950 = vrot.lane.b32.xlu0 %v2694_v2, %s8785_s8  ;;  %v3062_v35 = vor.u32 %v3061_v12, %v3058_v62  ;;  %v1138_v42 = vmax.f32 %v1068_v13, 0.0  ;;  %v2191_v37 = vshrl.u32 %v2136_v7, 16  ;;  %v3386_v46 = vld [vmem:[#allocation3 + $0x48] sm:$0xf]  ;;  %v9243_v56 = vpop.f32.mrb[29].mxu1 }
 0x252   : > { %v2194_v39 = vshll.u32 %v2136_v7, 16  ;;  %v3455_v20 = vsel %vm452_vm0, %v3453_v14, %v3454_v15  ;;  %v2185_v19 = vrot.slane %v2183_v3, 3  ;;  %v1060_v31 = vadd.f32 %v9123_v58, %v1059_v61  ;;  %v1767_v61 = vld [vmem:[#allocation3 + $0x30] sm:$0xf0]  ;;  %v2653_v4 = vld [vmem:[#allocation3 + $0x58] sm:$0x1f] }
 0x253   : > { %v2188_v44 = vrot.slane %v2186_v16, 4  ;;  %v3063_v47 = vsel %vm1280_vm8, %v3054_v11, %v3062_v35  ;;  %v1160_v48 = vpack.c.bf16 %v1138_v42, %v1137_v1  ;;  %v2193_v49 = vrot.slane %v2191_v37, 3  ;;  %v9253_v1 = vpop.f32.mrb[30].mxu1 }
 0x254   : > { %v2196_v50 = vrot.slane %v2194_v39, 4  ;;  %v3571_v52 = vld [vmem:[#allocation3 + $0x90] sm:$0xf0]  ;;  %3319 = vrot.lane.b32.xlu1 %v3063_v47, %s8784_s30  ;;  %v1136_v57 = vmax.f32 %v1060_v31, 0.0  ;;  %v3450_v45 = vrot.slane %v3385_v60, 4  ;;  %v9250_v59 = vadd.f32 %v8502_v9, %v9123_v58 }
 0x255   : > { %v3572_v53 = vld [vmem:[#allocation3 + $0x98] sm:$0x1f]  ;;  %v2189_v55 = vor.u32 %v2188_v44, %v2185_v19  ;;  %v3694_v62 = vshrl.u32 %v3571_v52, 16  ;;  %v3697_v63 = vshll.u32 %v3571_v52, 16  ;;  %3499 = vrot.lane.b32.xlu0 %v3455_v20, %s8786_s15  ;;  %v1192_v11 = vrot.slane %v1160_v48, 4 }
 0x256   : > { %v3702_v17 = vshrl.u32 %v3572_v53, 16  ;;  %v3705_v33 = vshll.u32 %v3572_v53, 16  ;;  %v3569_v7 = vld [vmem:[#allocation3 + $0x80] sm:$0xf0]  ;;  %v2197_v12 = vor.u32 %v2196_v50, %v2193_v49  ;;  %v1159_v13 = vpack.c.bf16 %v1136_v57, %v1135_v6  ;;  %v1768_v39 = vld [vmem:[#allocation3 + $0x38] sm:$0x1f] }
 0x257   : > { %v3570_v10 = vld [vmem:[#allocation3 + $0x88] sm:$0x1f]  ;;  %v3451_v14 = vrot.slane %v3386_v46, 4  ;;  %v9255_v2 = vrot.slane %v3694_v62, 4  ;;  %v9257_v15 = vrot.slane %v3697_v63, 5  ;;  %v3677_v16 = vshrl.u32 %v3569_v7, 16 }
 0x258   : > { %v9259_v9 = vrot.slane %v3702_v17, 4  ;;  %v9261_v3 = vrot.slane %v3705_v33, 5  ;;  %v3680_v35 = vshll.u32 %v3569_v7, 16  ;;  %v3685_v42 = vshrl.u32 %v3570_v10, 16  ;;  %1233 = vst.msk [vmem:[#allocation3 + $0xb0] sm:$0xf0] %vm857_vm5, %v1192_v11 }
 0x259   : > { %v3688_v37 = vshll.u32 %v3570_v10, 16  ;;  %1234 = vst.msk [vmem:[#allocation3 + $0xb8] sm:$0xf] %vm840_vm4, %v1192_v11  ;;  %v2198_v6 = vsel %vm1280_vm8, %v2189_v55, %v2197_v12  ;;  %v1191_v60 = vrot.slane %v1159_v13, 4  ;;  %v3452_v20 = vsel %vm452_vm0, %v3450_v45, %v3451_v14  ;;  %v3019_v44 = vld [vmem:[#allocation3 + $0x50] sm:$0xf8] }
 0x25a   : > { %v1831_v19 = vshrl.u32 %v1767_v61, 16  ;;  %v9267_v31 = vrot.slane %v3677_v16, 4  ;;  %v9269_v47 = vrot.slane %v3680_v35, 5  ;;  %v9271_v48 = vrot.slane %v3685_v42, 4  ;;  %2439 = vrot.lane.b32.xlu1 %v2198_v6, %s8786_s15  ;;  %3497 = vrot.lane.b32.xlu0 %v3452_v20, %s8786_s15  ;;  %v9277_v50 = vpop.f32.mrb[31].mxu1  ;;  %v8723_v46 = vld [vmem:[%s11128_s3 + $0x48] sm:$0xff]  }
 0x25b   : > { %v9273_v49 = vrot.slane %v3688_v37, 5  ;;  %1231 = vst.msk [vmem:[#allocation3 + $0xa0] sm:$0xf0] %vm857_vm5, %v1191_v60  ;;  %v1834_v52 = vshll.u32 %v1767_v61, 16  ;;  %v1839_v53 = vshrl.u32 %v1768_v39, 16  ;;  %v1842_v55 = vshll.u32 %v1768_v39, 16  ;;  %8122 = vmatprep.subr.bf16.mxu0 %v8723_v46 }
 0x25c   : > { %1232 = vst.msk [vmem:[#allocation3 + $0xa8] sm:$0xf] %vm840_vm4, %v1191_v60  ;;  %v1833_v32 = vrot.slane %v1831_v19, 4  ;;  %v3020_v57 = vld [vmem:[#allocation3 + $0x58] sm:$0xf]  ;;  %v1141_v45 = vmax.f32 %v9250_v59, 0.0  ;;  %v9287_v62 = vadd.f32 %v9123_v58, %v9222_v0  ;;  %v1084_v63 = vadd.f32 %v9226_v8, %v9123_v58 }
 0x25d   : > { %v3082_v17 = vshrl.u32 %v3019_v44, 16  ;;  %v1836_v33 = vrot.slane %v1834_v52, 5  ;;  %v1841_v7 = vrot.slane %v1839_v53, 4  ;;  %v1844_v10 = vrot.slane %v1842_v55, 5  ;;  %v9292_v16 = vpop.f32.mrb[32].mxu1  ;;  %v8724_v0 = vld [vmem:[%s11128_s3 + $0x8] sm:$0xff]  }
 0x25e   : > { %v3085_v11 = vshll.u32 %v3019_v44, 16  ;;  %v1142_v12 = vmax.f32 %v1084_v63, 0.0  ;;  %v3090_v14 = vshrl.u32 %v3020_v57, 16  ;;  %v3093_v39 = vshll.u32 %v3020_v57, 16  ;;  %v9297_v44 = vpop.f32.mrb[33].mxu1  ;;  %8123 = vmatpush3.bf16.msra.mxu0 %v8724_v0  ;;  %v8725_v46 = vld [vmem:[%s11128_s3 + $0x50] sm:$0xff]  }
 0x25f   : > { %v3084_v13 = vrot.slane %v3082_v17, 3  ;;  %v3575_v59 = vld [vmem:[#allocation3 + $0xb0] sm:$0xf0]  ;;  %v1837_v8 = vor.u32 %v1836_v33, %v1833_v32  ;;  %v1845_v42 = vor.u32 %v1844_v10, %v1841_v7  ;;  %v2133_v32 = vld [vmem:[#allocation3 + $0x20] sm:$0xf8]  ;;  %v9303_v33 = vpop.f32.mrb[34].mxu1  ;;  %8124 = vmatprep.subr.bf16.mxu0 %v8725_v46  ;;  %v1076_v61 = vadd.f32 %v9123_v58, %v9235_v27 }
 0x260   : > { %v3576_v35 = vld [vmem:[#allocation3 + $0xb8] sm:$0x1f]  ;;  %v3087_v37 = vrot.slane %v3085_v11, 4  ;;  %v3728_v6 = vshrl.u32 %v3575_v59, 16  ;;  %v3731_v60 = vshll.u32 %v3575_v59, 16  ;;  %v1162_v53 = vpack.c.bf16 %v1142_v12, %v1141_v45  ;;  %v9320_v46 = vpop.f32.mrb[35].mxu1 }
 0x261   : > { %v3736_v20 = vshrl.u32 %v3576_v35, 16  ;;  %v3739_v19 = vshll.u32 %v3576_v35, 16  ;;  %v1846_v52 = vsel %vm1795_vm7, %v1837_v8, %v1845_v42  ;;  %v3092_v63 = vrot.slane %v3090_v14, 3  ;;  %v2134_v17 = vld [vmem:[#allocation3 + $0x28] sm:$0xf] }
 0x262   : > { %v3088_v55 = vor.u32 %v3087_v37, %v3084_v13  ;;  %v9305_v57 = vrot.slane %v3728_v6, 4  ;;  %v9307_v7 = vrot.slane %v3731_v60, 5  ;;  %v3573_v0 = vld [vmem:[#allocation3 + $0xa0] sm:$0xf0]  ;;  %2072 = vrot.lane.b32.xlu1 %v1846_v52, %s8784_s30  ;;  %v1194_v13 = vrot.slane %v1162_v53, 4 }
 0x263   : > { %v9309_v10 = vrot.slane %v3736_v20, 4  ;;  %v9311_v11 = vrot.slane %v3739_v19, 5  ;;  %v3574_v59 = vld [vmem:[#allocation3 + $0xa8] sm:$0x1f]  ;;  %v3711_v45 = vshrl.u32 %v3573_v0, 16  ;;  %v3714_v12 = vshll.u32 %v3573_v0, 16 }
 0x264   : > { %v3095_v14 = vrot.slane %v3093_v39, 4  ;;  %v3719_v35 = vshrl.u32 %v3574_v59, 16  ;;  %v3722_v8 = vshll.u32 %v3574_v59, 16  ;;  %v2166_v42 = vshrl.u32 %v2133_v32, 16  ;;  %1237 = vst.msk [vmem:[#allocation3 + $0xd0] sm:$0xf0] %vm857_vm5, %v1194_v13 }
 0x265   : > { %v2169_v37 = vshll.u32 %v2133_v32, 16  ;;  %v9314_v6 = vrot.slane %v3711_v45, 4  ;;  %v9316_v60 = vrot.slane %v3714_v12, 5  ;;  %1238 = vst.msk [vmem:[#allocation3 + $0xd8] sm:$0xf] %vm840_vm4, %v1194_v13  ;;  %v2174_v19 = vshrl.u32 %v2134_v17, 16 }
 0x266   : > { %v3096_v20 = vor.u32 %v3095_v14, %v3092_v63  ;;  %v9322_v52 = vrot.slane %v3719_v35, 4  ;;  %v9324_v53 = vrot.slane %v3722_v8, 5  ;;  %v2168_v39 = vrot.slane %v2166_v42, 3  ;;  %v2652_v59 = vld [vmem:[#allocation3 + $0x50] sm:$0xf0] }
 0x267   : > { %v2171_v0 = vrot.slane %v2169_v37, 4  ;;  %v2176_v45 = vrot.slane %v2174_v19, 3  ;;  %v2177_v12 = vshll.u32 %v2134_v17, 16  ;;  %v1765_v13 = vld [vmem:[#allocation3 + $0x20] sm:$0xf0]  ;;  %v11133_v14 = vor.u32 %v9173_v23, %v9171_v43  ;;  %v8726_v43 = vld [vmem:[%s11128_s3 + $0x10] sm:$0xff]  }
 0x268   : > { %v3097_v32 = vsel %vm1280_vm8, %v3088_v55, %v3096_v20  ;;  %v3632_v55 = vor.u32 %v9165_v38, %v9163_v36  ;;  %v3640_v17 = vor.u32 %v9169_v41, %v9167_v40  ;;  %v1140_v8 = vmax.f32 %v1076_v61, 0.0  ;;  %8125 = vmatpush3.bf16.msra.mxu0 %v8726_v43 }
 0x269   : > { %3323 = vrot.lane.b32.xlu0 %v3097_v32, %s8784_s30  ;;  %v2172_v63 = vor.u32 %v2171_v0, %v2168_v39  ;;  %v3624_v35 = vsel %vm1795_vm7, %v11133_v14, %v3623_v51  ;;  %v2179_v27 = vrot.slane %v2177_v12, 4  ;;  %v2730_v42 = vshrl.u32 %v2652_v59, 16  ;;  %v1766_v14 = vld [vmem:[#allocation3 + $0x28] sm:$0x1f] }
 0x26a   : > { %3880 = vst.msk [vmem:[#allocation4 + $0x28] sm:$0xff] %vm829_vm6, %v3624_v35  ;;  %v2733_v37 = vshll.u32 %v2652_v59, 16  ;;  %v3641_v20 = vsel %vm1795_vm7, %v3632_v55, %v3640_v17  ;;  %v2738_v5 = vshrl.u32 %v2653_v4, 16  ;;  %v2741_v30 = vshll.u32 %v2653_v4, 16 }
 0x26b   : > { %v1814_v19 = vshrl.u32 %v1765_v13, 16  ;;  %v2180_v23 = vor.u32 %v2179_v27, %v2176_v45  ;;  %v11134_v36 = vmax.f32 %v9287_v62, 0.0  ;;  %3881 = vst.msk [vmem:[#allocation4 + $0x40] sm:$0xff] %vm829_vm6, %v3641_v20  ;;  %v2732_v40 = vrot.slane %v2730_v42, 4  ;;  %v3579_v51 = vld [vmem:[#allocation3 + $0xd0] sm:$0xf0] }
 0x26c   : > { %v2735_v41 = vrot.slane %v2733_v37, 5  ;;  %v3580_v61 = vld [vmem:[#allocation3 + $0xd8] sm:$0x1f]  ;;  %v2740_v39 = vrot.slane %v2738_v5, 4  ;;  %v2743_v0 = vrot.slane %v2741_v30, 5  ;;  %v1097_v4 = vadd.f32 %v9238_v18, %v9123_v58 }
 0x26d   : > { %v1161_v38 = vpack.c.bf16 %v1140_v8, %v11134_v36  ;;  %v9353_v59 = vadd.f32 %v9123_v58, %v9243_v56  ;;  %v3762_v32 = vshrl.u32 %v3579_v51, 16  ;;  %v3765_v45 = vshll.u32 %v3579_v51, 16  ;;  %v8727_v8 = vld [vmem:[%s11128_s3 + $0x58] sm:$0xff]   ;;  %v3017_v20 = vld [vmem:[#allocation3 + $0x40] sm:$0xf8] }
 0x26e   : > { %v3770_v62 = vshrl.u32 %v3580_v61, 16  ;;  %v3773_v12 = vshll.u32 %v3580_v61, 16  ;;  %v2181_v35 = vsel %vm1280_vm8, %v2172_v63, %v2180_v23  ;;  %v2736_v17 = vor.u32 %v2735_v41, %v2732_v40  ;;  %v3018_v36 = vld [vmem:[#allocation3 + $0x48] sm:$0xf]  ;;  %8126 = vmatprep.subr.bf16.mxu0 %v8727_v8  ;;  %v1593_v61 = vld [vmem:[#allocation3 + $0x50] sm:$0xf0] }
 0x26f   : > { %v1193_v55 = vrot.slane %v1161_v38, 4  ;;  %v2744_v27 = vor.u32 %v2743_v0, %v2740_v39  ;;  %v9359_v18 = vrot.slane %v3762_v32, 4  ;;  %v9361_v42 = vrot.slane %v3765_v45, 5  ;;  %2437 = vrot.lane.b32.xlu1 %v2181_v35, %s8786_s15 }
 0x270   : > { %v9363_v56 = vrot.slane %v3770_v62, 4  ;;  %v9365_v37 = vrot.slane %v3773_v12, 5  ;;  %v1816_v30 = vrot.slane %v1814_v19, 4  ;;  %v1817_v43 = vshll.u32 %v1765_v13, 16  ;;  %v8728_v19 = vld [vmem:[%s11128_s3 + $0x18] sm:$0xff]  }
 0x271   : > { %1235 = vst.msk [vmem:[#allocation3 + $0xc0] sm:$0xf0] %vm857_vm5, %v1193_v55  ;;  %v3900_v63 = vld [vmem:[#allocation4 + $0x28] sm:$0xff]  ;;  %v2745_v5 = vsel %vm1795_vm7, %v2736_v17, %v2744_v27  ;;  %v1822_v23 = vshrl.u32 %v1766_v14, 16  ;;  %v1825_v38 = vshll.u32 %v1766_v14, 16  ;;  %v1145_v40 = vmax.f32 %v1097_v4, 0.0  ;;  %8127 = vmatpush3.bf16.msra.mxu0 %v8728_v19 }
 0x272   : > { %1236 = vst.msk [vmem:[#allocation3 + $0xc8] sm:$0xf] %vm840_vm4, %v1193_v55  ;;  %8517 = vmatmul.mubr.msk.bf16.vlgmr.msra.gmra.mrb[36].mxu1 %vm829_vm6, %v3900_v63  ;;  %2956 = vrot.lane.b32.xlu0 %v2745_v5, %s8785_s8  ;;  %v1143_v41 = vmax.f32 %v9353_v59, 0.0  ;;  %v1100_v51 = vadd.f32 %v9253_v1, %v9123_v58  ;;  %v3903_v13 = vld [vmem:[#allocation4 + $0x40] sm:$0xff]  ;;  %v1819_v39 = vrot.slane %v1817_v43, 5  ;;  %v3065_v32 = vshrl.u32 %v3017_v20, 16 }
 0x273   : > { %v1824_v0 = vrot.slane %v1822_v23, 4  ;;  %v3068_v45 = vshll.u32 %v3017_v20, 16  ;;  %8520 = vmatprep.mubr.msk.bf16.mxu1 %vm829_vm6, %v3903_v13  ;;  %v1827_v62 = vrot.slane %v1825_v38, 5  ;;  %v3073_v4 = vshrl.u32 %v3018_v36, 16  ;;  %v1594_v59 = vld [vmem:[#allocation3 + $0x58] sm:$0xf] }
 0x274   : > { %v1146_v12 = vmax.f32 %v1100_v51, 0.0  ;;  %v3076_v14 = vshll.u32 %v3018_v36, 16  ;;  %v1820_v35 = vor.u32 %v1819_v39, %v1816_v30  ;;  %v3067_v1 = vrot.slane %v3065_v32, 3 }
 0x275   : > { %v3070_v55 = vrot.slane %v3068_v45, 4  ;;  %v1662_v17 = vrot.slane %v1593_v61, 4  ;;  %v1828_v27 = vor.u32 %v1827_v62, %v1824_v0  ;;  %v3075_v63 = vrot.slane %v3073_v4, 3  ;;  %v2650_v45 = vld [vmem:[#allocation3 + $0x40] sm:$0xf0] }
 0x276   : > { %v1164_v8 = vpack.c.bf16 %v1146_v12, %v1145_v40  ;;  %v3078_v5 = vrot.slane %v3076_v14, 4  ;;  %v1663_v23 = vrot.slane %v1594_v59, 4  ;;  %v1092_v20 = vadd.f32 %v9123_v58, %v9277_v50  ;;  %v2651_v12 = vld [vmem:[#allocation3 + $0x48] sm:$0x1f] }
 0x277   : > { %v3071_v43 = vor.u32 %v3070_v55, %v3067_v1  ;;  %v3649_v38 = vor.u32 %v9207_v28, %v9205_v24  ;;  %v1829_v19 = vsel %vm1795_vm7, %v1820_v35, %v1828_v27  ;;  %v3657_v61 = vor.u32 %v9211_v34, %v9209_v29  ;;  %v1591_v29 = vld [vmem:[#allocation3 + $0x40] sm:$0xf0]  ;;  %v1592_v1 = vld [vmem:[#allocation3 + $0x48] sm:$0xf] }
 0x278   : > { %v3577_v51 = vld [vmem:[#allocation3 + $0xc0] sm:$0xf0]  ;;  %v1196_v30 = vrot.slane %v1164_v8, 4  ;;  %v3079_v13 = vor.u32 %v3078_v5, %v3075_v63  ;;  %2070 = vrot.lane.b32.xlu1 %v1829_v19, %s8784_s30  ;;  %v1664_v28 = vsel %vm452_vm0, %v1662_v17, %v1663_v23  ;;  %v1144_v50 = vmax.f32 %v1092_v20, 0.0  ;;  %v3391_v20 = vld [vmem:[#allocation3 + $0x70] sm:$0xf0] }
 0x279   : > { %v3578_v36 = vld [vmem:[#allocation3 + $0xc8] sm:$0x1f]  ;;  %v3745_v40 = vshrl.u32 %v3577_v51, 16  ;;  %v3748_v39 = vshll.u32 %v3577_v51, 16  ;;  %v3658_v62 = vsel %vm1795_vm7, %v3649_v38, %v3657_v61  ;;  %v8729_v34 = vld [vmem:[%s11128_s3 + $0x60] sm:$0xff]   ;;  %v3666_v17 = vor.u32 %v9199_v22, %v9197_v21 }
 0x27a   : > { %v3753_v0 = vshrl.u32 %v3578_v36, 16  ;;  %v3756_v32 = vshll.u32 %v3578_v36, 16  ;;  %1241 = vst.msk [vmem:[#allocation3 + $0xf0] sm:$0xf0] %vm857_vm5, %v1196_v30  ;;  %v3080_v24 = vsel %vm1280_vm8, %v3071_v43, %v3079_v13  ;;  %v1163_v55 = vpack.c.bf16 %v1144_v50, %v1143_v41  ;;  %8128 = vmatprep.subr.bf16.mxu0 %v8729_v34  ;;  %v3392_v19 = vld [vmem:[#allocation3 + $0x78] sm:$0xf] }
 0x27b   : > { %1242 = vst.msk [vmem:[#allocation3 + $0xf8] sm:$0xf] %vm840_vm4, %v1196_v30  ;;  %v9396_v4 = vrot.slane %v3745_v40, 4  ;;  %v9398_v14 = vrot.slane %v3748_v39, 5  ;;  %3321 = vrot.lane.b32.xlu0 %v3080_v24, %s8784_s30  ;;  %v3674_v27 = vor.u32 %v9203_v26, %v9201_v25  ;;  %v2713_v8 = vshrl.u32 %v2650_v45, 16  ;;  %v8730_v21 = vld [vmem:[%s11128_s3 + $0x20] sm:$0xff]  }
 0x27c   : > { %v9400_v59 = vrot.slane %v3753_v0, 4  ;;  %v9402_v35 = vrot.slane %v3756_v32, 5  ;;  %3882 = vst.msk [vmem:[#allocation4 + $0x58] sm:$0xff] %vm829_vm6, %v3658_v62  ;;  %1706 = vrot.lane.b32.xlu1 %v1664_v28, %s8785_s8  ;;  %v2716_v63 = vshll.u32 %v2650_v45, 16  ;;  %v2721_v5 = vshrl.u32 %v2651_v12, 16  ;;  %8129 = vmatpush3.bf16.msra.mxu0 %v8730_v21 }
 0x27d   : > { %v2724_v43 = vshll.u32 %v2651_v12, 16  ;;  %v1659_v23 = vrot.slane %v1591_v29, 4  ;;  %v1195_v38 = vrot.slane %v1163_v55, 4  ;;  %v3675_v51 = vsel %vm1795_vm7, %v3666_v17, %v3674_v27  ;;  %v2139_v0 = vld [vmem:[#allocation3 + $0x50] sm:$0xf8] }
 0x27e   : > { %v2715_v36 = vrot.slane %v2713_v8, 4  ;;  %v1660_v41 = vrot.slane %v1592_v1, 4  ;;  %3883 = vst.msk [vmem:[#allocation4 + $0x70] sm:$0xff] %vm829_vm6, %v3675_v51  ;;  %v2718_v22 = vrot.slane %v2716_v63, 5  ;;  %v2723_v25 = vrot.slane %v2721_v5, 4  ;;  %v8731_v51 = vld [vmem:[%s11128_s3 + $0x68] sm:$0xff]  }
 0x27f   : > { %v2726_v26 = vrot.slane %v2724_v43, 5  ;;  %v1113_v30 = vadd.f32 %v9292_v16, %v9123_v58  ;;  %1239 = vst.msk [vmem:[#allocation3 + $0xe0] sm:$0xf0] %vm857_vm5, %v1195_v38  ;;  %v9423_v61 = vadd.f32 %v9123_v58, %v9297_v44  ;;  %v1116_v40 = vadd.f32 %v9303_v33, %v9123_v58  ;;  %v2140_v32 = vld [vmem:[#allocation3 + $0x58] sm:$0xf]  ;;  %8130 = vmatprep.subr.bf16.mxu0 %v8731_v51 }
 0x280   : > { %1240 = vst.msk [vmem:[#allocation3 + $0xe8] sm:$0xf] %vm840_vm4, %v1195_v38  ;;  %v1661_v13 = vsel %vm452_vm0, %v1659_v23, %v1660_v41  ;;  %v3459_v39 = vrot.slane %v3391_v20, 4  ;;  %v2719_v16 = vor.u32 %v2718_v22, %v2715_v36  ;;  %v3460_v62 = vrot.slane %v3392_v19, 4  ;;  %v8769_v19 = vld [vmem:[%s11131_s6 + $0x1] ss:$0 sm:$0xff] }
 0x281   : > { %v3583_v45 = vld [vmem:[#allocation3 + $0xf0] sm:$0xf0]  ;;  %v2727_v28 = vor.u32 %v2726_v26, %v2723_v25  ;;  %1704 = vrot.lane.b32.xlu1 %v1661_v13, %s8785_s8  ;;  %v1149_v50 = vmax.f32 %v1113_v30, 0.0  ;;  %v1147_v33 = vmax.f32 %v9423_v61, 0.0  ;;  %v1150_v55 = vmax.f32 %v1116_v40, 0.0 }
 0x282   : > { %v3584_v24 = vld [vmem:[#allocation3 + $0xf8] sm:$0x1f]  ;;  %v3796_v12 = vshrl.u32 %v3583_v45, 16  ;;  %v3799_v29 = vshll.u32 %v3583_v45, 16  ;;  %v3461_v17 = vsel %vm452_vm0, %v3459_v39, %v3460_v62  ;;  %v2217_v23 = vshrl.u32 %v2139_v0, 16 }
 0x283   : > { %v3804_v34 = vshrl.u32 %v3584_v24, 16  ;;  %v3807_v44 = vshll.u32 %v3584_v24, 16  ;;  %v3906_v1 = vld [vmem:[#allocation4 + $0x58] sm:$0xff]  ;;  %v2728_v58 = vsel %vm1795_vm7, %v2719_v16, %v2727_v28  ;;  %v1166_v43 = vpack.c.bf16 %v1150_v55, %v1149_v50 }
 0x284   : > { %8521 = vmatmul.mubr.msk.bf16.gmra.mrb[40].mxu1 %vm829_vm6, %v3906_v1  ;;  %v9432_v27 = vrot.slane %v3796_v12, 4  ;;  %v9434_v8 = vrot.slane %v3799_v29, 5  ;;  %2954 = vrot.lane.b32.xlu0 %v2728_v58, %s8785_s8  ;;  %v2220_v20 = vshll.u32 %v2139_v0, 16  ;;  %v2225_v38 = vshrl.u32 %v2140_v32, 16  ;;  %v3389_v0 = vld [vmem:[#allocation3 + $0x60] sm:$0xf0] }
 0x285   : > { %v9436_v63 = vrot.slane %v3804_v34, 4  ;;  %v9438_v5 = vrot.slane %v3807_v44, 5  ;;  %v3909_v36 = vld [vmem:[#allocation4 + $0x70] sm:$0xff]  ;;  %v2228_v41 = vshll.u32 %v2140_v32, 16  ;;  %v1108_v21 = vadd.f32 %v8769_v19, %v9320_v46  ;;  %v1772_v50 = vld [vmem:[#allocation3 + $0x58] sm:$0x1f] }
 0x286   : > { %v3683_v22 = vor.u32 %v9269_v47, %v9267_v31  ;;  %v3691_v25 = vor.u32 %v9273_v49, %v9271_v48  ;;  %v3581_v26 = vld [vmem:[#allocation3 + $0xe0] sm:$0xf0]  ;;  %8524 = vmatprep.mubr.msk.bf16.mxu1 %vm829_vm6, %v3909_v36  ;;  %v1198_v13 = vrot.slane %v1166_v43, 4  ;;  %v2219_v61 = vrot.slane %v2217_v23, 3  ;;  %v3390_v48 = vld [vmem:[#allocation3 + $0x68] sm:$0xf] }
 0x287   : > { %v3582_v30 = vld [vmem:[#allocation3 + $0xe8] sm:$0x1f]  ;;  %v3700_v40 = vor.u32 %v9257_v15, %v9255_v2  ;;  %v3708_v39 = vor.u32 %v9261_v3, %v9259_v9  ;;  %v3779_v46 = vshrl.u32 %v3581_v26, 16  ;;  %v3782_v32 = vshll.u32 %v3581_v26, 16  ;;  %v1771_v15 = vld [vmem:[#allocation3 + $0x50] sm:$0xf0] }
 0x288   : > { %v3787_v31 = vshrl.u32 %v3582_v30, 16  ;;  %v3790_v47 = vshll.u32 %v3582_v30, 16  ;;  %3503 = vrot.lane.b32.xlu0 %v3461_v17, %s8786_s15  ;;  %1245 = vst.msk [vmem:[#allocation3 + $0x110] sm:$0xf0] %vm857_vm5, %v1198_v13  ;;  %v2222_v49 = vrot.slane %v2220_v20, 4  ;;  %v2227_v45 = vrot.slane %v2225_v38, 3 }
 0x289   : > { %1246 = vst.msk [vmem:[#allocation3 + $0x118] sm:$0xf] %vm840_vm4, %v1198_v13  ;;  %v2230_v24 = vrot.slane %v2228_v41, 4  ;;  %v1148_v2 = vmax.f32 %v1108_v21, 0.0  ;;  %v9460_v16 = vrot.slane %v3779_v46, 4  ;;  %v9462_v9 = vrot.slane %v3782_v32, 5 }
 0x28a   : > { %v9464_v3 = vrot.slane %v3787_v31, 4  ;;  %v9466_v28 = vrot.slane %v3790_v47, 5  ;;  %v2223_v62 = vor.u32 %v2222_v49, %v2219_v61  ;;  %v3692_v34 = vsel %vm1795_vm7, %v3683_v22, %v3691_v25  ;;  %v3023_v44 = vld [vmem:[#allocation3 + $0x70] sm:$0xf8]  ;;  %v3024_v43 = vld [vmem:[#allocation3 + $0x78] sm:$0xf] }
 0x28b   : > { %v2231_v12 = vor.u32 %v2230_v24, %v2227_v45  ;;  %v1165_v29 = vpack.c.bf16 %v1148_v2, %v1147_v33  ;;  %3884 = vst.msk [vmem:[#allocation4 + $0x88] sm:$0xff] %vm829_vm6, %v3692_v34  ;;  %v3709_v1 = vsel %vm1795_vm7, %v3700_v40, %v3708_v39  ;;  %v3456_v58 = vrot.slane %v3389_v0, 4  ;;  %v8732_v23 = vld [vmem:[%s11128_s3 + $0x28] sm:$0xff]   ;;  %v2137_v36 = vld [vmem:[#allocation3 + $0x40] sm:$0xf8]  ;;  %v8733_v41 = vld [vmem:[%s11128_s3 + $0x70] sm:$0xff]  }
 0x28c   : > { %v3457_v55 = vrot.slane %v3390_v48, 4  ;;  %v1865_v17 = vshrl.u32 %v1771_v15, 16  ;;  %3885 = vst.msk [vmem:[#allocation4 + $0xa0] sm:$0xff] %vm829_vm6, %v3709_v1  ;;  %v1868_v33 = vshll.u32 %v1771_v15, 16  ;;  %v1873_v51 = vshrl.u32 %v1772_v50, 16  ;;  %8131 = vmatpush3.bf16.msra.mxu0 %v8732_v23  ;;  %v8734_v26 = vld [vmem:[%s11128_s3 + $0x30] sm:$0xff]  }
 0x28d   : > { %v2232_v20 = vsel %vm1280_vm8, %v2223_v62, %v2231_v12  ;;  %v1197_v38 = vrot.slane %v1165_v29, 4  ;;  %v1876_v22 = vshll.u32 %v1772_v50, 16  ;;  %v3116_v25 = vshrl.u32 %v3023_v44, 16  ;;  %v2138_v39 = vld [vmem:[#allocation3 + $0x48] sm:$0xf]  ;;  %8132 = vmatprep.subr.bf16.mxu0 %v8733_v41  ;;  %v8735_v24 = vld [vmem:[%s11128_s3 + $0x78] sm:$0xff]  }
 0x28e   : > { %2443 = vrot.lane.b32.xlu1 %v2232_v20, %s8786_s15  ;;  %v3458_v19 = vsel %vm452_vm0, %v3456_v58, %v3457_v55  ;;  %v1867_v21 = vrot.slane %v1865_v17, 4  ;;  %v1870_v30 = vrot.slane %v1868_v33, 5  ;;  %v1875_v13 = vrot.slane %v1873_v51, 4  ;;  %v8736_v12 = vld [vmem:[%s11128_s3 + $0x38] sm:$0xff]   ;;  %v2656_v55 = vld [vmem:[#allocation3 + $0x70] sm:$0xf0] }
 0x28f   : > { %1243 = vst.msk [vmem:[#allocation3 + $0x100] sm:$0xf0] %vm857_vm5, %v1197_v38  ;;  %3501 = vrot.lane.b32.xlu0 %v3458_v19, %s8786_s15  ;;  %v3119_v61 = vshll.u32 %v3023_v44, 16  ;;  %v3124_v40 = vshrl.u32 %v3024_v43, 16  ;;  %v1878_v0 = vrot.slane %v1876_v22, 5  ;;  %v3118_v46 = vrot.slane %v3116_v25, 3 }
 0x290   : > { %1244 = vst.msk [vmem:[#allocation3 + $0x108] sm:$0xf] %vm840_vm4, %v1197_v38  ;;  %v3127_v32 = vshll.u32 %v3024_v43, 16  ;;  %v2200_v31 = vshrl.u32 %v2137_v36, 16  ;;  %v1871_v47 = vor.u32 %v1870_v30, %v1867_v21  ;;  %v2203_v45 = vshll.u32 %v2137_v36, 16  ;;  %8133 = vmatpush3.bf16.msra.mxu0 %v8734_v26 }
 0x291   : > { %v3121_v48 = vrot.slane %v3119_v61, 4  ;;  %v3126_v49 = vrot.slane %v3124_v40, 3  ;;  %v1879_v2 = vor.u32 %v1878_v0, %v1875_v13  ;;  %v2208_v62 = vshrl.u32 %v2138_v39, 16  ;;  %8134 = vmatprep.subr.bf16.mxu0 %v8735_v24  ;;  %v1769_v61 = vld [vmem:[#allocation3 + $0x40] sm:$0xf0] }
 0x292   : > { %v3129_v15 = vrot.slane %v3127_v32, 4  ;;  %v2202_v50 = vrot.slane %v2200_v31, 3  ;;  %v3912_v29 = vld [vmem:[#allocation4 + $0x88] sm:$0xff]  ;;  %v2205_v44 = vrot.slane %v2203_v45, 4  ;;  %v2211_v1 = vshll.u32 %v2138_v39, 16 }
 0x293   : > { %v3122_v34 = vor.u32 %v3121_v48, %v3118_v46  ;;  %v3717_v58 = vor.u32 %v9316_v60, %v9314_v6  ;;  %8525 = vmatmul.mubr.msk.bf16.gmra.mrb[44].mxu1 %vm829_vm6, %v3912_v29  ;;  %v3915_v17 = vld [vmem:[#allocation4 + $0xa0] sm:$0xff]  ;;  %v1880_v43 = vsel %vm1795_vm7, %v1871_v47, %v1879_v2  ;;  %v2210_v20 = vrot.slane %v2208_v62, 3  ;;  %v1770_v40 = vld [vmem:[#allocation3 + $0x48] sm:$0x1f] }
 0x294   : > { %v3130_v23 = vor.u32 %v3129_v15, %v3126_v49  ;;  %v3725_v38 = vor.u32 %v9324_v53, %v9322_v52  ;;  %8528 = vmatprep.mubr.msk.bf16.mxu1 %vm829_vm6, %v3915_v17  ;;  %2076 = vrot.lane.b32.xlu1 %v1880_v43, %s8784_s30  ;;  %v2206_v33 = vor.u32 %v2205_v44, %v2202_v50  ;;  %v2213_v51 = vrot.slane %v2211_v1, 4  ;;  %v3021_v31 = vld [vmem:[#allocation3 + $0x60] sm:$0xf8]  ;;  %v3022_v62 = vld [vmem:[#allocation3 + $0x68] sm:$0xf] }
 0x295   : > { %v3734_v6 = vor.u32 %v9307_v7, %v9305_v57  ;;  %v3742_v60 = vor.u32 %v9311_v11, %v9309_v10  ;;  %v2764_v22 = vshrl.u32 %v2656_v55, 16  ;;  %v2767_v52 = vshll.u32 %v2656_v55, 16  ;;  %8135 = vmatpush3.bf16.msra.mxu0 %v8736_v12  ;;  %v2657_v57 = vld [vmem:[#allocation3 + $0x78] sm:$0x1f]  ;;  %v1597_v1 = vld [vmem:[#allocation3 + $0x70] sm:$0xf0] }
 0x296   : > { %v3585_v36 = vld [vmem:[#allocation3 + $0x100] sm:$0xf0]  ;;  %v3131_v19 = vsel %vm1280_vm8, %v3122_v34, %v3130_v23  ;;  %v3726_v21 = vsel %vm1795_vm7, %v3717_v58, %v3725_v38  ;;  %v2214_v7 = vor.u32 %v2213_v51, %v2210_v20  ;;  %v2772_v49 = vshrl.u32 %v2657_v57, 16  ;;  %v1598_v23 = vld [vmem:[#allocation3 + $0x78] sm:$0xf] }
 0x297   : > { %v3586_v41 = vld [vmem:[#allocation3 + $0x108] sm:$0x1f]  ;;  %v3813_v53 = vshrl.u32 %v3585_v36, 16  ;;  %v3816_v25 = vshll.u32 %v3585_v36, 16  ;;  %3327 = vrot.lane.b32.xlu0 %v3131_v19, %s8784_s30  ;;  %3886 = vst.msk [vmem:[#allocation4 + $0xb8] sm:$0xff] %vm829_vm6, %v3726_v21  ;;  %v3743_v10 = vsel %vm1795_vm7, %v3734_v6, %v3742_v60  ;;  %v2766_v11 = vrot.slane %v2764_v22, 4 }
 0x298   : > { %v3821_v26 = vshrl.u32 %v3586_v41, 16  ;;  %v3824_v30 = vshll.u32 %v3586_v41, 16  ;;  %v2769_v13 = vrot.slane %v2767_v52, 5  ;;  %3887 = vst.msk [vmem:[#allocation4 + $0xd0] sm:$0xff] %vm829_vm6, %v3743_v10  ;;  %v2215_v47 = vsel %vm1280_vm8, %v2206_v33, %v2214_v7  ;;  %v2654_v21 = vld [vmem:[#allocation3 + $0x60] sm:$0xf0] }
 0x299   : > { %v9510_v39 = vrot.slane %v3813_v53, 4  ;;  %v9512_v0 = vrot.slane %v3816_v25, 5  ;;  %v2775_v45 = vshll.u32 %v2657_v57, 16  ;;  %2441 = vrot.lane.b32.xlu1 %v2215_v47, %s8786_s15  ;;  %v1848_v24 = vshrl.u32 %v1769_v61, 16 }
 0x29a   : > { %v9514_v46 = vrot.slane %v3821_v26, 4  ;;  %v9516_v32 = vrot.slane %v3824_v30, 5  ;;  %v2770_v48 = vor.u32 %v2769_v13, %v2766_v11  ;;  %v1851_v2 = vshll.u32 %v1769_v61, 16  ;;  %v2655_v30 = vld [vmem:[#allocation3 + $0x68] sm:$0x1f] }
 0x29b   : > { %v1856_v15 = vshrl.u32 %v1770_v40, 16  ;;  %v1859_v50 = vshll.u32 %v1770_v40, 16  ;;  %v2774_v12 = vrot.slane %v2772_v49, 4  ;;  %v2777_v29 = vrot.slane %v2775_v45, 5  ;;  %v1595_v13 = vld [vmem:[#allocation3 + $0x60] sm:$0xf0] }
 0x29c   : > { %v3099_v34 = vshrl.u32 %v3021_v31, 16  ;;  %v3102_v44 = vshll.u32 %v3021_v31, 16  ;;  %v1850_v58 = vrot.slane %v1848_v24, 4  ;;  %v1853_v55 = vrot.slane %v1851_v2, 5  ;;  %v3395_v49 = vld [vmem:[#allocation3 + $0x90] sm:$0xf0] }
 0x29d   : > { %v1858_v17 = vrot.slane %v1856_v15, 4  ;;  %v1861_v43 = vrot.slane %v1859_v50, 5  ;;  %v2778_v38 = vor.u32 %v2777_v29, %v2774_v12  ;;  %v3107_v6 = vshrl.u32 %v3022_v62, 16 }
 0x29e   : > { %v3918_v20 = vld [vmem:[#allocation4 + $0xb8] sm:$0xff]  ;;  %v3101_v33 = vrot.slane %v3099_v34, 3  ;;  %v3104_v51 = vrot.slane %v3102_v44, 4  ;;  %v1854_v60 = vor.u32 %v1853_v55, %v1850_v58  ;;  %v3110_v41 = vshll.u32 %v3022_v62, 16 }
 0x29f   : > { %8529 = vmatmul.mubr.msk.bf16.gmra.mrb[48].mxu1 %vm829_vm6, %v3918_v20  ;;  %v1862_v36 = vor.u32 %v1861_v43, %v1858_v17  ;;  %v1668_v19 = vrot.slane %v1597_v1, 4  ;;  %v3921_v22 = vld [vmem:[#allocation4 + $0xd0] sm:$0xff]  ;;  %v2779_v52 = vsel %vm1795_vm7, %v2770_v48, %v2778_v38  ;;  %v3109_v25 = vrot.slane %v3107_v6, 3  ;;  %v1596_v48 = vld [vmem:[#allocation3 + $0x68] sm:$0xf] }
 0x2a0   : > { %v3105_v53 = vor.u32 %v3104_v51, %v3101_v33  ;;  %v1669_v26 = vrot.slane %v1598_v23, 4  ;;  %8532 = vmatprep.mubr.msk.bf16.mxu1 %vm829_vm6, %v3921_v22  ;;  %2960 = vrot.lane.b32.xlu0 %v2779_v52, %s8785_s8  ;;  %v3112_v7 = vrot.slane %v3110_v41, 4  ;;  %v3751_v10 = vor.u32 %v9398_v14, %v9396_v4  ;;  %v3393_v51 = vld [vmem:[#allocation3 + $0x80] sm:$0xf0]  ;;  %v3394_v6 = vld [vmem:[#allocation3 + $0x88] sm:$0xf] }
 0x2a1   : > { %v1863_v57 = vsel %vm1795_vm7, %v1854_v60, %v1862_v36  ;;  %v3759_v11 = vor.u32 %v9402_v35, %v9400_v59  ;;  %v3768_v40 = vor.u32 %v9361_v42, %v9359_v18  ;;  %v3776_v31 = vor.u32 %v9365_v37, %v9363_v56  ;;  %v3396_v59 = vld [vmem:[#allocation3 + $0x98] sm:$0xf]  ;;  %v2143_v35 = vld [vmem:[#allocation3 + $0x70] sm:$0xf8] }
 0x2a2   : > { %2074 = vrot.lane.b32.xlu1 %v1863_v57, %s8784_s30  ;;  %v1670_v61 = vsel %vm452_vm0, %v1668_v19, %v1669_v26  ;;  %v2747_v47 = vshrl.u32 %v2654_v21, 16  ;;  %v3113_v45 = vor.u32 %v3112_v7, %v3109_v25  ;;  %v2750_v14 = vshll.u32 %v2654_v21, 16  ;;  %v2144_v42 = vld [vmem:[#allocation3 + $0x78] sm:$0xf]  ;;  %v1775_v21 = vld [vmem:[#allocation3 + $0x70] sm:$0xf0] }
 0x2a3   : > { %v3760_v4 = vsel %vm1795_vm7, %v3751_v10, %v3759_v11  ;;  %v2755_v24 = vshrl.u32 %v2655_v30, 16  ;;  %v3777_v2 = vsel %vm1795_vm7, %v3768_v40, %v3776_v31  ;;  %v2758_v50 = vshll.u32 %v2655_v30, 16  ;;  %v1776_v26 = vld [vmem:[#allocation3 + $0x78] sm:$0x1f]  ;;  %v3027_v30 = vld [vmem:[#allocation3 + $0x90] sm:$0xf8] }
 0x2a4   : > { %3888 = vst.msk [vmem:[#allocation4 + $0xe8] sm:$0xff] %vm829_vm6, %v3760_v4  ;;  %v2749_v15 = vrot.slane %v2747_v47, 4  ;;  %v1665_v18 = vrot.slane %v1595_v13, 4  ;;  %v3114_v56 = vsel %vm1280_vm8, %v3105_v53, %v3113_v45  ;;  %3889 = vst.msk [vmem:[#allocation4 + $0x100] sm:$0xff] %vm829_vm6, %v3777_v2  ;;  %v2752_v37 = vrot.slane %v2750_v14, 5 }
 0x2a5   : > { %v2757_v62 = vrot.slane %v2755_v24, 4  ;;  %v1666_v12 = vrot.slane %v1596_v48, 4  ;;  %3325 = vrot.lane.b32.xlu0 %v3114_v56, %s8784_s30  ;;  %v2760_v29 = vrot.slane %v2758_v50, 5  ;;  %v3465_v34 = vrot.slane %v3395_v49, 4  ;;  %v2141_v31 = vld [vmem:[#allocation3 + $0x60] sm:$0xf8] }
 0x2a6   : > { %1710 = vrot.lane.b32.xlu1 %v1670_v61, %s8785_s8  ;;  %v3466_v44 = vrot.slane %v3396_v59, 4  ;;  %v2251_v1 = vshrl.u32 %v2143_v35, 16  ;;  %v2753_v58 = vor.u32 %v2752_v37, %v2749_v15  ;;  %v2254_v17 = vshll.u32 %v2143_v35, 16  ;;  %v2142_v4 = vld [vmem:[#allocation3 + $0x68] sm:$0xf] }
 0x2a7   : > { %v1667_v55 = vsel %vm452_vm0, %v1665_v18, %v1666_v12  ;;  %v2259_v43 = vshrl.u32 %v2144_v42, 16  ;;  %v2761_v23 = vor.u32 %v2760_v29, %v2757_v62  ;;  %v2262_v33 = vshll.u32 %v2144_v42, 16  ;;  %v3587_v12 = vld [vmem:[#allocation3 + $0x110] sm:$0xf0] }
 0x2a8   : > { %v3467_v20 = vsel %vm452_vm0, %v3465_v34, %v3466_v44  ;;  %v2253_v38 = vrot.slane %v2251_v1, 3  ;;  %v2256_v60 = vrot.slane %v2254_v17, 4  ;;  %v3785_v41 = vor.u32 %v9462_v9, %v9460_v16 }
 0x2a9   : > { %v2261_v36 = vrot.slane %v2259_v43, 3  ;;  %v3793_v19 = vor.u32 %v9466_v28, %v9464_v3  ;;  %v2762_v22 = vsel %vm1795_vm7, %v2753_v58, %v2761_v23  ;;  %v2264_v52 = vrot.slane %v2262_v33, 4  ;;  %v3588_v58 = vld [vmem:[#allocation3 + $0x118] sm:$0x1f] }
 0x2aa   : > { %1708 = vrot.lane.b32.xlu1 %v1667_v55, %s8785_s8  ;;  %v3802_v53 = vor.u32 %v9434_v8, %v9432_v27  ;;  %v3810_v25 = vor.u32 %v9438_v5, %v9436_v63  ;;  %2958 = vrot.lane.b32.xlu0 %v2762_v22, %s8785_s8  ;;  %v2257_v16 = vor.u32 %v2256_v60, %v2253_v38  ;;  %v3462_v3 = vrot.slane %v3393_v51, 4  ;;  %v3028_v5 = vld [vmem:[#allocation3 + $0x98] sm:$0xf]  ;;  %v6370_v38 = vld [vmem:[#allocation3 + $0x120] sm:$0xe0] }
 0x2ab   : > { %v3924_v57 = vld [vmem:[#allocation4 + $0xe8] sm:$0xff]  ;;  %v3794_v9 = vsel %vm1795_vm7, %v3785_v41, %v3793_v19  ;;  %v3463_v28 = vrot.slane %v3394_v6, 4  ;;  %v3927_v7 = vld [vmem:[#allocation4 + $0x100] sm:$0xff]  ;;  %v2265_v10 = vor.u32 %v2264_v52, %v2261_v36  ;;  %v1899_v8 = vshrl.u32 %v1775_v21, 16 }
 0x2ac   : > { %8533 = vmatmul.mubr.msk.bf16.gmra.mrb[52].mxu1 %vm829_vm6, %v3924_v57  ;;  %3890 = vst.msk [vmem:[#allocation4 + $0x118] sm:$0xff] %vm829_vm6, %v3794_v9  ;;  %v3811_v27 = vsel %vm1795_vm7, %v3802_v53, %v3810_v25  ;;  %v1902_v63 = vshll.u32 %v1775_v21, 16  ;;  %v1907_v13 = vshrl.u32 %v1776_v26, 16  ;;  %v1910_v61 = vshll.u32 %v1776_v26, 16  ;;  %v6371_v41 = vld [vmem:[#allocation3 + $0x128] sm:$0x1f] }
 0x2ad   : > { %8536 = vmatprep.mubr.msk.bf16.mxu1 %vm829_vm6, %v3927_v7  ;;  %3891 = vst.msk [vmem:[#allocation4 + $0x130] sm:$0xff] %vm829_vm6, %v3811_v27  ;;  %v3464_v11 = vsel %vm452_vm0, %v3462_v3, %v3463_v28  ;;  %v3150_v40 = vshrl.u32 %v3027_v30, 16  ;;  %v2266_v47 = vsel %vm1280_vm8, %v2257_v16, %v2265_v10  ;;  %v1901_v48 = vrot.slane %v1899_v8, 4  ;;  %v1773_v16 = vld [vmem:[#allocation3 + $0x60] sm:$0xf0] }
 0x2ae   : > { %v1904_v49 = vrot.slane %v1902_v63, 5  ;;  %v3153_v45 = vshll.u32 %v3027_v30, 16  ;;  %3507 = vrot.lane.b32.xlu0 %v3467_v20, %s8786_s15  ;;  %2447 = vrot.lane.b32.xlu1 %v2266_v47, %s8786_s15  ;;  %v1909_v14 = vrot.slane %v1907_v13, 4  ;;  %v1912_v24 = vrot.slane %v1910_v61, 5  ;;  %v2661_v30 = vld [vmem:[#allocation3 + $0x98] sm:$0x1f] }
 0x2af   : > { %v3152_v59 = vrot.slane %v3150_v40, 3  ;;  %v3158_v35 = vshrl.u32 %v3028_v5, 16  ;;  %v3161_v50 = vshll.u32 %v3028_v5, 16  ;;  %v2234_v18 = vshrl.u32 %v2141_v31, 16  ;;  %v1774_v5 = vld [vmem:[#allocation3 + $0x68] sm:$0x1f] }
 0x2b0   : > { %v1905_v2 = vor.u32 %v1904_v49, %v1901_v48  ;;  %v3155_v15 = vrot.slane %v3153_v45, 4  ;;  %v1913_v42 = vor.u32 %v1912_v24, %v1909_v14  ;;  %v2237_v37 = vshll.u32 %v2141_v31, 16  ;;  %v3026_v47 = vld [vmem:[#allocation3 + $0x88] sm:$0xf]  ;;  %v1601_v14 = vld [vmem:[#allocation3 + $0x90] sm:$0xf0] }
 0x2b1   : > { %v3160_v56 = vrot.slane %v3158_v35, 3  ;;  %v2242_v62 = vshrl.u32 %v2142_v4, 16  ;;  %v3163_v34 = vrot.slane %v3161_v50, 4  ;;  %v2236_v44 = vrot.slane %v2234_v18, 3 }
 0x2b2   : > { %v3156_v29 = vor.u32 %v3155_v15, %v3152_v59  ;;  %v2245_v1 = vshll.u32 %v2142_v4, 16  ;;  %3505 = vrot.lane.b32.xlu0 %v3464_v11, %s8786_s15  ;;  %v1914_v17 = vsel %vm1795_vm7, %v1905_v2, %v1913_v42  ;;  %v2239_v43 = vrot.slane %v2237_v37, 4  ;;  %v3025_v11 = vld [vmem:[#allocation3 + $0x80] sm:$0xf8]  ;;  %v1602_v15 = vld [vmem:[#allocation3 + $0x98] sm:$0xf] }
 0x2b3   : > { %v3930_v55 = vld [vmem:[#allocation4 + $0x118] sm:$0xff]  ;;  %v2244_v23 = vrot.slane %v2242_v62, 3  ;;  %v3819_v20 = vor.u32 %v9512_v0, %v9510_v39  ;;  %2080 = vrot.lane.b32.xlu1 %v1914_v17, %s8784_s30  ;;  %v3164_v51 = vor.u32 %v3163_v34, %v3160_v56  ;;  %v3827_v60 = vor.u32 %v9516_v32, %v9514_v46  ;;  %v2660_v39 = vld [vmem:[#allocation3 + $0x90] sm:$0xf0]  ;;  %v2658_v37 = vld [vmem:[#allocation3 + $0x80] sm:$0xf0] }
 0x2b4   : > { %8537 = vmatmul.mubr.msk.bf16.gmra.mrb[56].mxu1 %vm829_vm6, %v3930_v55  ;;  %v3933_v33 = vld [vmem:[#allocation4 + $0x130] sm:$0xff]  ;;  %v2247_v6 = vrot.slane %v2245_v1, 4  ;;  %v3830_v36 = vshrl.u32 %v3587_v12, 16  ;;  %v2240_v19 = vor.u32 %v2239_v43, %v2236_v44  ;;  %v3833_v21 = vshll.u32 %v3587_v12, 16  ;;  %v2659_v1 = vld [vmem:[#allocation3 + $0x88] sm:$0x1f] }
 0x2b5   : > { %8540 = vmatprep.mubr.msk.bf16.mxu1 %vm829_vm6, %v3933_v33  ;;  %v3838_v22 = vshrl.u32 %v3588_v58, 16  ;;  %v3841_v52 = vshll.u32 %v3588_v58, 16  ;;  %v3165_v0 = vsel %vm1280_vm8, %v3156_v29, %v3164_v51  ;;  %v3828_v25 = vsel %vm1795_vm7, %v3819_v20, %v3827_v60  ;;  %v3399_v60 = vld [vmem:[#allocation3 + $0xb0] sm:$0xf0] }
 0x2b6   : > { %v2248_v53 = vor.u32 %v2247_v6, %v2244_v23  ;;  %v3832_v26 = vrot.slane %v3830_v36, 4  ;;  %3331 = vrot.lane.b32.xlu0 %v3165_v0, %s8784_s30  ;;  %3892 = vst.msk [vmem:[#allocation4 + $0x148] sm:$0xff] %vm829_vm6, %v3828_v25  ;;  %v3835_v46 = vrot.slane %v3833_v21, 5  ;;  %v6448_v3 = vrot.slane %v6370_v38, 5  ;;  %v1599_v23 = vld [vmem:[#allocation3 + $0x80] sm:$0xf0] }
 0x2b7   : > { %v3840_v32 = vrot.slane %v3838_v22, 4  ;;  %v3843_v57 = vrot.slane %v3841_v52, 5  ;;  %v6449_v28 = vrot.slane %v6371_v41, 5  ;;  %v2798_v7 = vshrl.u32 %v2660_v39, 16  ;;  %v1600_v6 = vld [vmem:[#allocation3 + $0x88] sm:$0xf] }
 0x2b8   : > { %v2249_v9 = vsel %vm1280_vm8, %v2240_v19, %v2248_v53  ;;  %v3836_v10 = vor.u32 %v3835_v46, %v3832_v26  ;;  %v2801_v8 = vshll.u32 %v2660_v39, 16  ;;  %v2806_v63 = vshrl.u32 %v2661_v30, 16  ;;  %v3400_v22 = vld [vmem:[#allocation3 + $0xb8] sm:$0xf]  ;;  %v2147_v25 = vld [vmem:[#allocation3 + $0x90] sm:$0xf8] }
 0x2b9   : > { %2445 = vrot.lane.b32.xlu1 %v2249_v9, %s8786_s15  ;;  %v3844_v27 = vor.u32 %v3843_v57, %v3840_v32  ;;  %v6450_v13 = vsel %vm5380_vm9, %v6448_v3, %v6449_v28  ;;  %v2800_v61 = vrot.slane %v2798_v7, 4  ;;  %v2809_v40 = vshll.u32 %v2661_v30, 16 }
 0x2ba   : > { %v1882_v31 = vshrl.u32 %v1773_v16, 16  ;;  %v2803_v49 = vrot.slane %v2801_v8, 5  ;;  %v2808_v45 = vrot.slane %v2806_v63, 4  ;;  %v1885_v4 = vshll.u32 %v1773_v16, 16  ;;  %v2148_v16 = vld [vmem:[#allocation3 + $0x98] sm:$0xf] }
 0x2bb   : > { %v3845_v48 = vsel %vm1795_vm7, %v3836_v10, %v3844_v27  ;;  %v2811_v24 = vrot.slane %v2809_v40, 5  ;;  %v1890_v35 = vshrl.u32 %v1774_v5, 16  ;;  %v1893_v2 = vshll.u32 %v1774_v5, 16  ;;  %v3397_v10 = vld [vmem:[#allocation3 + $0xa0] sm:$0xf0]  ;;  %v9595_v40 = vpop.permute.xlu0 %1698 }
 0x2bc   : > { %3893 = vst.msk [vmem:[#allocation4 + $0x160] sm:$0xff] %vm829_vm6, %v3845_v48  ;;  %v1884_v59 = vrot.slane %v1882_v31, 4  ;;  %v2804_v50 = vor.u32 %v2803_v49, %v2800_v61  ;;  %v1887_v18 = vrot.slane %v1885_v4, 5  ;;  %v3133_v42 = vshrl.u32 %v3025_v11, 16  ;;  %v9593_v61 = vpop.permute.xlu1 %2068  ;;  %v1779_v49 = vld [vmem:[#allocation3 + $0x90] sm:$0xf0] }
 0x2bd   : > { %v3136_v56 = vshll.u32 %v3025_v11, 16  ;;  %v3936_v62 = vld [vmem:[#allocation4 + $0x148] sm:$0xff]  ;;  %v2812_v12 = vor.u32 %v2811_v24, %v2808_v45  ;;  %v1892_v29 = vrot.slane %v1890_v35, 4  ;;  %v1895_v34 = vrot.slane %v1893_v2, 5 }
 0x2be   : > { %v3141_v44 = vshrl.u32 %v3026_v47, 16  ;;  %8541 = vmatmul.mubr.msk.bf16.gmra.mrb[60].mxu1 %vm829_vm6, %v3936_v62  ;;  %v1888_v58 = vor.u32 %v1887_v18, %v1884_v59  ;;  %v3135_v55 = vrot.slane %v3133_v42, 3  ;;  %v3144_v43 = vshll.u32 %v3026_v47, 16  ;;  %v3398_v11 = vld [vmem:[#allocation3 + $0xa8] sm:$0xf] }
 0x2bf   : > { %v3138_v17 = vrot.slane %v3136_v56, 4  ;;  %v2813_v20 = vsel %vm1795_vm7, %v2804_v50, %v2812_v12  ;;  %v1896_v38 = vor.u32 %v1895_v34, %v1892_v29  ;;  %v1674_v51 = vrot.slane %v1601_v14, 4  ;;  %v1780_v59 = vld [vmem:[#allocation3 + $0x98] sm:$0x1f]  ;;  %v3031_v18 = vld [vmem:[#allocation3 + $0xb0] sm:$0xf8] }
 0x2c0   : > { %v3143_v33 = vrot.slane %v3141_v44, 3  ;;  %2964 = vrot.lane.b32.xlu0 %v2813_v20, %s8785_s8  ;;  %v3146_v41 = vrot.slane %v3144_v43, 4  ;;  %v1675_v19 = vrot.slane %v1602_v15, 4  ;;  %v2781_v21 = vshrl.u32 %v2658_v37, 16  ;;  %v3032_v12 = vld [vmem:[#allocation3 + $0xb8] sm:$0xf]  ;;  %v9605_v20 = vpop.permute.xlu0 %3495 }
 0x2c1   : > { %v3139_v36 = vor.u32 %v3138_v17, %v3135_v55  ;;  %v1897_v52 = vsel %vm1795_vm7, %v1888_v58, %v1896_v38  ;;  %v2784_v39 = vshll.u32 %v2658_v37, 16  ;;  %v2789_v0 = vshrl.u32 %v2659_v1, 16  ;;  %v9607_v38 = vpop.permute.xlu1 %1702 }
 0x2c2   : > { %v2792_v53 = vshll.u32 %v2659_v1, 16  ;;  %2078 = vrot.lane.b32.xlu1 %v1897_v52, %s8784_s30  ;;  %v3147_v30 = vor.u32 %v3146_v41, %v3143_v33  ;;  %v1676_v46 = vsel %vm452_vm0, %v1674_v51, %v1675_v19  ;;  %v2783_v32 = vrot.slane %v2781_v21, 4  ;;  %v2664_v52 = vld [vmem:[#allocation3 + $0xb0] sm:$0xf0] }
 0x2c3   : > { %v3939_v26 = vld [vmem:[#allocation4 + $0x160] sm:$0xff]  ;;  %v1671_v57 = vrot.slane %v1599_v23, 4  ;;  %v2786_v9 = vrot.slane %v2784_v39, 5  ;;  %v2791_v3 = vrot.slane %v2789_v0, 4  ;;  %v1672_v7 = vrot.slane %v1600_v6, 4 }
 0x2c4   : > { %8544 = vmatprep.mubr.msk.bf16.mxu1 %vm829_vm6, %v3939_v26  ;;  %6484 = vst.msk [vmem:[#allocation4 + $0x160] sm:$0xff] %vm829_vm6, %v6450_v13  ;;  %v2794_v28 = vrot.slane %v2792_v53, 5  ;;  %v3148_v27 = vsel %vm1280_vm8, %v3139_v36, %v3147_v30  ;;  %v3471_v8 = vrot.slane %v3399_v60, 4  ;;  %v3472_v63 = vrot.slane %v3400_v22, 4  ;;  %v2145_v23 = vld [vmem:[#allocation3 + $0x80] sm:$0xf8] }
 0x2c5   : > { %v2285_v5 = vshrl.u32 %v2147_v25, 16  ;;  %3329 = vrot.lane.b32.xlu0 %v3148_v27, %s8784_s30  ;;  %v2787_v31 = vor.u32 %v2786_v9, %v2783_v32  ;;  %v1673_v13 = vsel %vm452_vm0, %v1671_v57, %v1672_v7  ;;  %v2288_v48 = vshll.u32 %v2147_v25, 16  ;;  %v2146_v36 = vld [vmem:[#allocation3 + $0x88] sm:$0xf]  ;;  %v2665_v57 = vld [vmem:[#allocation3 + $0xb8] sm:$0x1f] }
 0x2c6   : > { %v2795_v47 = vor.u32 %v2794_v28, %v2791_v3  ;;  %1714 = vrot.lane.b32.xlu1 %v1676_v46, %s8785_s8  ;;  %v3473_v45 = vsel %vm452_vm0, %v3471_v8, %v3472_v63  ;;  %v2293_v14 = vshrl.u32 %v2148_v16, 16  ;;  %v2296_v24 = vshll.u32 %v2148_v16, 16  ;;  %v1777_v7 = vld [vmem:[#allocation3 + $0x80] sm:$0xf0] }
 0x2c7   : > { %v2287_v4 = vrot.slane %v2285_v5, 3  ;;  %v2290_v2 = vrot.slane %v2288_v48, 4  ;;  %v3468_v15 = vrot.slane %v3397_v10, 4  ;;  %v3469_v50 = vrot.slane %v3398_v11, 4  ;;  %v9613_v5 = vpop.permute.xlu0 %2952  ;;  %v9615_v11 = vpop.permute.xlu1 %1700 }
 0x2c8   : > { %v2796_v35 = vsel %vm1795_vm7, %v2787_v31, %v2795_v47  ;;  %v2295_v42 = vrot.slane %v2293_v14, 3  ;;  %v2298_v56 = vrot.slane %v2296_v24, 4  ;;  %v1933_v37 = vshrl.u32 %v1779_v49, 16 }
 0x2c9   : > { %v1936_v62 = vshll.u32 %v1779_v49, 16  ;;  %2962 = vrot.lane.b32.xlu0 %v2796_v35, %s8785_s8  ;;  %v2291_v29 = vor.u32 %v2290_v2, %v2287_v4  ;;  %v3470_v34 = vsel %vm452_vm0, %v3468_v15, %v3469_v50  ;;  %v1941_v44 = vshrl.u32 %v1780_v59, 16  ;;  %v1778_v49 = vld [vmem:[#allocation3 + $0x88] sm:$0x1f] }
 0x2ca   : > { %v1944_v1 = vshll.u32 %v1780_v59, 16  ;;  %1712 = vrot.lane.b32.xlu1 %v1673_v13, %s8785_s8  ;;  %v2299_v58 = vor.u32 %v2298_v56, %v2295_v42  ;;  %v1935_v55 = vrot.slane %v1933_v37, 4  ;;  %v3184_v43 = vshrl.u32 %v3031_v18, 16  ;;  %v3029_v59 = vld [vmem:[#allocation3 + $0xa0] sm:$0xf8] }
 0x2cb   : > { %v1938_v17 = vrot.slane %v1936_v62, 5  ;;  %v1943_v33 = vrot.slane %v1941_v44, 4  ;;  %v3187_v6 = vshll.u32 %v3031_v18, 16  ;;  %v3192_v60 = vshrl.u32 %v3032_v12, 16  ;;  %v3030_v18 = vld [vmem:[#allocation3 + $0xa8] sm:$0xf] }
 0x2cc   : > { %v1946_v51 = vrot.slane %v1944_v1, 5  ;;  %v2300_v41 = vsel %vm1280_vm8, %v2291_v29, %v2299_v58  ;;  %v3186_v21 = vrot.slane %v3184_v43, 3  ;;  %v3195_v22 = vshll.u32 %v3032_v12, 16  ;;  %v1605_v1 = vld [vmem:[#allocation3 + $0xb0] sm:$0xf0] }
 0x2cd   : > { %v1939_v19 = vor.u32 %v1938_v17, %v1935_v55  ;;  %3511 = vrot.lane.b32.xlu0 %v3473_v45, %s8786_s15  ;;  %v3189_v0 = vrot.slane %v3187_v6, 4  ;;  %v3194_v53 = vrot.slane %v3192_v60, 3  ;;  %v2268_v25 = vshrl.u32 %v2145_v23, 16  ;;  %v1606_v58 = vld [vmem:[#allocation3 + $0xb8] sm:$0xf]  ;;  %v9625_v6 = vpop.permute.xlu1 %3319 }
 0x2ce   : > { %v1947_v39 = vor.u32 %v1946_v51, %v1943_v33  ;;  %2451 = vrot.lane.b32.xlu1 %v2300_v41, %s8786_s15  ;;  %v3197_v26 = vrot.slane %v3195_v22, 4  ;;  %v2271_v30 = vshll.u32 %v2145_v23, 16  ;;  %v2276_v46 = vshrl.u32 %v2146_v36, 16  ;;  %v2662_v33 = vld [vmem:[#allocation3 + $0xa0] sm:$0xf0]  ;;  %v9623_v51 = vpop.permute.xlu0 %2950 }
 0x2cf   : > { %v2279_v32 = vshll.u32 %v2146_v36, 16  ;;  %v3190_v9 = vor.u32 %v3189_v0, %v3186_v21  ;;  %v2270_v3 = vrot.slane %v2268_v25, 3  ;;  %v2832_v28 = vshrl.u32 %v2664_v52, 16  ;;  %v2663_v21 = vld [vmem:[#allocation3 + $0xa8] sm:$0x1f] }
 0x2d0   : > { %v1948_v16 = vsel %vm1795_vm7, %v1939_v19, %v1947_v39  ;;  %v3198_v10 = vor.u32 %v3197_v26, %v3194_v53  ;;  %v2273_v27 = vrot.slane %v2271_v30, 4  ;;  %v2278_v8 = vrot.slane %v2276_v46, 3  ;;  %v1603_v53 = vld [vmem:[#allocation3 + $0xa0] sm:$0xf0] }
 0x2d1   : > { %v2281_v63 = vrot.slane %v2279_v32, 4  ;;  %3509 = vrot.lane.b32.xlu0 %v3470_v34, %s8786_s15  ;;  %v2834_v31 = vrot.slane %v2832_v28, 4  ;;  %v2835_v47 = vshll.u32 %v2664_v52, 16  ;;  %v2840_v13 = vshrl.u32 %v2665_v57, 16  ;;  %v1604_v32 = vld [vmem:[#allocation3 + $0xa8] sm:$0xf] }
 0x2d2   : > { %v2843_v48 = vshll.u32 %v2665_v57, 16  ;;  %2084 = vrot.lane.b32.xlu1 %v1948_v16, %s8784_s30  ;;  %v3199_v45 = vsel %vm1280_vm8, %v3190_v9, %v3198_v10  ;;  %v2274_v4 = vor.u32 %v2273_v27, %v2270_v3  ;;  %v1916_v24 = vshrl.u32 %v1777_v7, 16  ;;  %v3403_v28 = vld [vmem:[#allocation3 + $0xd0] sm:$0xf0] }
 0x2d3   : > { %v2282_v14 = vor.u32 %v2281_v63, %v2278_v8  ;;  %v2837_v35 = vrot.slane %v2835_v47, 5  ;;  %v2842_v2 = vrot.slane %v2840_v13, 4  ;;  %v1919_v50 = vshll.u32 %v1777_v7, 16  ;;  %v3404_v7 = vld [vmem:[#allocation3 + $0xd8] sm:$0xf] }
 0x2d4   : > { %v2845_v15 = vrot.slane %v2843_v48, 5  ;;  %v1918_v56 = vrot.slane %v1916_v24, 4  ;;  %v1924_v37 = vshrl.u32 %v1778_v49, 16  ;;  %v1927_v62 = vshll.u32 %v1778_v49, 16  ;;  %v2152_v47 = vld [vmem:[#allocation3 + $0xb8] sm:$0xf]  ;;  %v9634_v24 = vpop.permute.xlu1 %2439 }
 0x2d5   : > { %v2283_v42 = vsel %vm1280_vm8, %v2274_v4, %v2282_v14  ;;  %3335 = vrot.lane.b32.xlu0 %v3199_v45, %s8784_s30  ;;  %v2838_v12 = vor.u32 %v2837_v35, %v2834_v31  ;;  %v1921_v34 = vrot.slane %v1919_v50, 5  ;;  %v3167_v44 = vshrl.u32 %v3029_v59, 16  ;;  %v2151_v31 = vld [vmem:[#allocation3 + $0xb0] sm:$0xf8]  ;;  %v9632_v14 = vpop.permute.xlu0 %3499 }
 0x2d6   : > { %v2846_v29 = vor.u32 %v2845_v15, %v2842_v2  ;;  %2449 = vrot.lane.b32.xlu1 %v2283_v42, %s8786_s15  ;;  %v1926_v55 = vrot.slane %v1924_v37, 4  ;;  %v1929_v17 = vrot.slane %v1927_v62, 5  ;;  %v3170_v43 = vshll.u32 %v3029_v59, 16  ;;  %v1248_v4 = vld [vmem:[#allocation3 + $0x10] sm:$0xf8] }
 0x2d7   : > { %v3175_v23 = vshrl.u32 %v3030_v18, 16  ;;  %v1922_v36 = vor.u32 %v1921_v34, %v1918_v56  ;;  %v3169_v41 = vrot.slane %v3167_v44, 3  ;;  %v3178_v19 = vshll.u32 %v3030_v18, 16  ;;  %v1249_v37 = vld [vmem:[#allocation3 + $0x18] sm:$0xf] }
 0x2d8   : > { %v2847_v60 = vsel %vm1795_vm7, %v2838_v12, %v2846_v29  ;;  %v1930_v22 = vor.u32 %v1929_v17, %v1926_v55  ;;  %v3172_v52 = vrot.slane %v3170_v43, 4  ;;  %v1680_v0 = vrot.slane %v1605_v1, 4  ;;  %v3401_v44 = vld [vmem:[#allocation3 + $0xc0] sm:$0xf0]  ;;  %v3402_v43 = vld [vmem:[#allocation3 + $0xc8] sm:$0xf] }
 0x2d9   : > { %v3177_v39 = vrot.slane %v3175_v23, 3  ;;  %2968 = vrot.lane.b32.xlu0 %v2847_v60, %s8785_s8  ;;  %v3180_v25 = vrot.slane %v3178_v19, 4  ;;  %v1681_v26 = vrot.slane %v1606_v58, 4  ;;  %v2815_v30 = vshrl.u32 %v2662_v33, 16 }
 0x2da   : > { %v2818_v46 = vshll.u32 %v2662_v33, 16  ;;  %v1931_v57 = vsel %vm1795_vm7, %v1922_v36, %v1930_v22  ;;  %v3173_v16 = vor.u32 %v3172_v52, %v3169_v41  ;;  %v2823_v9 = vshrl.u32 %v2663_v21, 16  ;;  %v1783_v41 = vld [vmem:[#allocation3 + $0xb0] sm:$0xf0]  ;;  %v1784_v52 = vld [vmem:[#allocation3 + $0xb8] sm:$0x1f] }
 0x2db   : > { %v2826_v3 = vshll.u32 %v2663_v21, 16  ;;  %2082 = vrot.lane.b32.xlu1 %v1931_v57, %s8784_s30  ;;  %v3181_v10 = vor.u32 %v3180_v25, %v3177_v39  ;;  %v1682_v27 = vsel %vm452_vm0, %v1680_v0, %v1681_v26  ;;  %v2817_v8 = vrot.slane %v2815_v30, 4  ;;  %v9643_v39 = vpop.permute.xlu0 %3497  ;;  %v9645_v0 = vpop.permute.xlu1 %2072 }
 0x2dc   : > { %v2820_v63 = vrot.slane %v2818_v46, 5  ;;  %v2825_v13 = vrot.slane %v2823_v9, 4  ;;  %v1677_v49 = vrot.slane %v1603_v53, 4  ;;  %v1678_v45 = vrot.slane %v1604_v32, 4  ;;  %v1253_v46 = vld [vmem:[#allocation3 + $0x38] sm:$0xf] }
 0x2dd   : > { %v2828_v48 = vrot.slane %v2826_v3, 5  ;;  %v3182_v59 = vsel %vm1280_vm8, %v3173_v16, %v3181_v10  ;;  %v3477_v2 = vrot.slane %v3403_v28, 4  ;;  %v3478_v15 = vrot.slane %v3404_v7, 4  ;;  %v1252_v3 = vld [vmem:[#allocation3 + $0x30] sm:$0xf8] }
 0x2de   : > { %v2821_v35 = vor.u32 %v2820_v63, %v2817_v8  ;;  %3333 = vrot.lane.b32.xlu0 %v3182_v59, %s8784_s30  ;;  %v1679_v18 = vsel %vm452_vm0, %v1677_v49, %v1678_v45  ;;  %v2319_v42 = vshrl.u32 %v2151_v31, 16  ;;  %v2322_v56 = vshll.u32 %v2151_v31, 16  ;;  %v3036_v59 = vld [vmem:[#allocation3 + $0xd8] sm:$0xf] }
 0x2df   : > { %v2829_v50 = vor.u32 %v2828_v48, %v2825_v13  ;;  %1718 = vrot.lane.b32.xlu1 %v1682_v27, %s8785_s8  ;;  %v3479_v62 = vsel %vm452_vm0, %v3477_v2, %v3478_v15  ;;  %v2327_v12 = vshrl.u32 %v2152_v47, 16  ;;  %v2330_v29 = vshll.u32 %v2152_v47, 16  ;;  %v3035_v13 = vld [vmem:[#allocation3 + $0xd0] sm:$0xf8] }
 0x2e0   : > { %v1282_v34 = vshrl.u32 %v1248_v4, 16  ;;  %v2321_v58 = vrot.slane %v2319_v42, 3  ;;  %v2324_v55 = vrot.slane %v2322_v56, 4  ;;  %v1285_v17 = vshll.u32 %v1248_v4, 16  ;;  %v9653_v42 = vpop.permute.xlu0 %3323 }
 0x2e1   : > { %v2830_v1 = vsel %vm1795_vm7, %v2821_v35, %v2829_v50  ;;  %v2329_v23 = vrot.slane %v2327_v12, 3  ;;  %v2332_v33 = vrot.slane %v2330_v29, 4  ;;  %v1290_v36 = vshrl.u32 %v1249_v37, 16  ;;  %v9655_v56 = vpop.permute.xlu1 %2437 }
 0x2e2   : > { %v1284_v60 = vrot.slane %v1282_v34, 3  ;;  %2966 = vrot.lane.b32.xlu0 %v2830_v1, %s8785_s8  ;;  %v2325_v19 = vor.u32 %v2324_v55, %v2321_v58  ;;  %v1287_v21 = vrot.slane %v1285_v17, 4  ;;  %v1293_v22 = vshll.u32 %v1249_v37, 16  ;;  %v2150_v55 = vld [vmem:[#allocation3 + $0xa8] sm:$0xf] }
 0x2e3   : > { %1716 = vrot.lane.b32.xlu1 %v1679_v18, %s8785_s8  ;;  %v2333_v53 = vor.u32 %v2332_v33, %v2329_v23  ;;  %v1292_v25 = vrot.slane %v1290_v36, 3  ;;  %v3474_v26 = vrot.slane %v3401_v44, 4  ;;  %v3475_v30 = vrot.slane %v3402_v43, 4  ;;  %v2149_v18 = vld [vmem:[#allocation3 + $0xa0] sm:$0xf8] }
 0x2e4   : > { %v1288_v32 = vor.u32 %v1287_v21, %v1284_v60  ;;  %v1295_v57 = vrot.slane %v1293_v22, 4  ;;  %v1967_v16 = vshrl.u32 %v1783_v41, 16  ;;  %v1970_v9 = vshll.u32 %v1783_v41, 16  ;;  %v2505_v60 = vld [vmem:[#allocation3 + $0x38] sm:$0xf] }
 0x2e5   : > { %v2334_v28 = vsel %vm1280_vm8, %v2325_v19, %v2333_v53  ;;  %v3476_v7 = vsel %vm452_vm0, %v3474_v26, %v3475_v30  ;;  %v1975_v10 = vshrl.u32 %v1784_v52, 16  ;;  %v1978_v27 = vshll.u32 %v1784_v52, 16  ;;  %v2504_v36 = vld [vmem:[#allocation3 + $0x30] sm:$0xf0]  ;;  %v1251_v22 = vld [vmem:[#allocation3 + $0x28] sm:$0xf] }
 0x2e6   : > { %3515 = vrot.lane.b32.xlu0 %v3479_v62, %s8786_s15  ;;  %v1296_v8 = vor.u32 %v1295_v57, %v1292_v25  ;;  %v1969_v63 = vrot.slane %v1967_v16, 4  ;;  %v1972_v31 = vrot.slane %v1970_v9, 5  ;;  %v1324_v47 = vshrl.u32 %v1253_v46, 16  ;;  %v1250_v30 = vld [vmem:[#allocation3 + $0x20] sm:$0xf8]  ;;  %v9664_v9 = vpop.permute.xlu0 %2956 }
 0x2e7   : > { %2455 = vrot.lane.b32.xlu1 %v2334_v28, %s8786_s15  ;;  %v1977_v48 = vrot.slane %v1975_v10, 4  ;;  %v1980_v49 = vrot.slane %v1978_v27, 5  ;;  %v1327_v45 = vshll.u32 %v1253_v46, 16  ;;  %v1316_v4 = vshrl.u32 %v1252_v3, 16 }
 0x2e8   : > { %v1297_v35 = vsel %vm1280_vm8, %v1288_v32, %v1296_v8  ;;  %v1973_v2 = vor.u32 %v1972_v31, %v1969_v63  ;;  %v1326_v15 = vrot.slane %v1324_v47, 3  ;;  %v1319_v50 = vshll.u32 %v1252_v3, 16  ;;  %v2668_v8 = vld [vmem:[#allocation3 + $0xd0] sm:$0xf0] }
 0x2e9   : > { %1569 = vst.msk [vmem:[#allocation4] sm:$0xff] %vm829_vm6, %v1297_v35  ;;  %v1981_v37 = vor.u32 %v1980_v49, %v1977_v48  ;;  %v1329_v62 = vrot.slane %v1327_v45, 4  ;;  %v1318_v12 = vrot.slane %v1316_v4, 3  ;;  %v3218_v29 = vshrl.u32 %v3035_v13, 16  ;;  %v2669_v48 = vld [vmem:[#allocation3 + $0xd8] sm:$0x1f] }
 0x2ea   : > { %1747 = vst.msk [vmem:[#allocation4] sm:$0xff] %vm1746_vm10, %v9595_v40  ;;  %3513 = vrot.lane.b32.xlu0 %v3476_v7, %s8786_s15  ;;  %v1321_v34 = vrot.slane %v1319_v50, 4  ;;  %v3221_v44 = vshll.u32 %v3035_v13, 16  ;;  %v3226_v1 = vshrl.u32 %v3036_v59, 16  ;;  %v3229_v58 = vshll.u32 %v3036_v59, 16  ;;  %v9666_v3 = vpop.permute.xlu1 %2070 }
 0x2eb   : > { %v1982_v17 = vsel %vm1795_vm7, %v1973_v2, %v1981_v37  ;;  %v1330_v43 = vor.u32 %v1329_v62, %v1326_v15  ;;  %v3220_v23 = vrot.slane %v3218_v29, 3  ;;  %v2302_v33 = vshrl.u32 %v2149_v18, 16  ;;  %v1781_v35 = vld [vmem:[#allocation3 + $0xa0] sm:$0xf0]  ;;  %v1782_v29 = vld [vmem:[#allocation3 + $0xa8] sm:$0x1f] }
 0x2ec   : > { %2088 = vrot.lane.b32.xlu1 %v1982_v17, %s8784_s30  ;;  %v1322_v41 = vor.u32 %v1321_v34, %v1318_v12  ;;  %v3223_v19 = vrot.slane %v3221_v44, 4  ;;  %v3228_v21 = vrot.slane %v3226_v1, 3  ;;  %v3231_v40 = vrot.slane %v3229_v58, 4  ;;  %2117 = vst.msk [vmem:[#allocation4] sm:$0xff] %vm2116_vm11, %v9593_v61 }
 0x2ed   : > { %v2304_v52 = vrot.slane %v2302_v33, 3  ;;  %v2305_v53 = vshll.u32 %v2149_v18, 16  ;;  %v2310_v25 = vshrl.u32 %v2150_v55, 16  ;;  %v2313_v26 = vshll.u32 %v2150_v55, 16  ;;  %v2503_v55 = vld [vmem:[#allocation3 + $0x28] sm:$0xf]  ;;  %v3322_v17 = vpop.permute.xlu0 %3321 }
 0x2ee   : > { %v1331_v46 = vsel %vm1280_vm8, %v1322_v41, %v1330_v43  ;;  %v3224_v32 = vor.u32 %v3223_v19, %v3220_v23  ;;  %v3232_v57 = vor.u32 %v3231_v40, %v3228_v21  ;;  %v2570_v16 = vrot.slane %v2505_v60, 4  ;;  %v9679_v43 = vpop.permute.xlu1 %1706  ;;  %v2502_v41 = vld [vmem:[#allocation3 + $0x20] sm:$0xf0]  ;;  %2486 = vst.msk [vmem:[#allocation4] sm:$0xff] %vm2485_vm12, %v9655_v56 }
 0x2ef   : > { %1571 = vst.msk [vmem:[#allocation4 + $0x30] sm:$0xff] %vm829_vm6, %v1331_v46  ;;  %v2307_v28 = vrot.slane %v2305_v53, 4  ;;  %v2312_v7 = vrot.slane %v2310_v25, 3  ;;  %v2315_v10 = vrot.slane %v2313_v26, 4  ;;  %v2569_v27 = vrot.slane %v2504_v36, 4 }
 0x2f0   : > { %1749 = vst.msk [vmem:[#allocation4 + $0x30] sm:$0xff] %vm1746_vm10, %v9607_v38  ;;  %v3233_v63 = vsel %vm1280_vm8, %v3224_v32, %v3232_v57  ;;  %v1307_v31 = vshrl.u32 %v1251_v22, 16  ;;  %v1310_v47 = vshll.u32 %v1251_v22, 16  ;;  %v1299_v13 = vshrl.u32 %v1250_v30, 16  ;;  %v3033_v22 = vld [vmem:[#allocation3 + $0xc0] sm:$0xf8] }
 0x2f1   : > { %3339 = vrot.lane.b32.xlu0 %v3233_v63, %s8784_s30  ;;  %v2308_v49 = vor.u32 %v2307_v28, %v2304_v52  ;;  %v2316_v45 = vor.u32 %v2315_v10, %v2312_v7  ;;  %v2571_v4 = vsel %vm452_vm0, %v2569_v27, %v2570_v16  ;;  %v1302_v59 = vshll.u32 %v1250_v30, 16  ;;  %v3034_v30 = vld [vmem:[#allocation3 + $0xc8] sm:$0xf]  ;;  %v1609_v46 = vld [vmem:[#allocation3 + $0xd0] sm:$0xf0]  ;;  %2119 = vst.msk [vmem:[#allocation4 + $0x30] sm:$0xff] %vm2116_vm11, %v9645_v0 }
 0x2f2   : > { %2631 = vst.msk [vmem:[#allocation4 + $0x20] sm:$0xff] %vm829_vm6, %v2571_v4  ;;  %v1309_v2 = vrot.slane %v1307_v31, 3  ;;  %v1312_v15 = vrot.slane %v1310_v47, 4  ;;  %v1301_v50 = vrot.slane %v1299_v13, 3  ;;  %v2866_v38 = vshrl.u32 %v2668_v8, 16 }
 0x2f3   : > { %v2317_v18 = vsel %vm1280_vm8, %v2308_v49, %v2316_v45  ;;  %2999 = vst.msk [vmem:[#allocation4 + $0x20] sm:$0xff] %vm1746_vm10, %v9613_v5  ;;  %v1304_v37 = vrot.slane %v1302_v59, 4  ;;  %v2869_v62 = vshll.u32 %v2668_v8, 16  ;;  %v2874_v12 = vshrl.u32 %v2669_v48, 16  ;;  %v1610_v7 = vld [vmem:[#allocation3 + $0xd8] sm:$0xf]  ;;  %v9696_v45 = vpop.permute.xlu1 %1704 }
 0x2f4   : > { %2453 = vrot.lane.b32.xlu1 %v2317_v18, %s8786_s15  ;;  %v1313_v34 = vor.u32 %v1312_v15, %v1309_v2  ;;  %v2868_v44 = vrot.slane %v2866_v38, 4  ;;  %v2877_v1 = vshll.u32 %v2669_v48, 16  ;;  %v1950_v58 = vshrl.u32 %v1781_v35, 16  ;;  %v2666_v8 = vld [vmem:[#allocation3 + $0xc0] sm:$0xf0]  ;;  %3368 = vst.msk [vmem:[#allocation4 + $0x20] sm:$0xff] %vm2116_vm11, %v3322_v17 }
 0x2f5   : > { %v1305_v23 = vor.u32 %v1304_v37, %v1301_v50  ;;  %v2871_v33 = vrot.slane %v2869_v62, 5  ;;  %v2876_v60 = vrot.slane %v2874_v12, 4  ;;  %v1953_v36 = vshll.u32 %v1781_v35, 16  ;;  %v2667_v48 = vld [vmem:[#allocation3 + $0xc8] sm:$0x1f]  ;;  %3544 = vst.msk [vmem:[#allocation4 + $0x20] sm:$0xff] %vm2485_vm12, %v9643_v39 }
 0x2f6   : > { %v2879_v5 = vrot.slane %v2877_v1, 5  ;;  %v1952_v19 = vrot.slane %v1950_v58, 4  ;;  %v1958_v21 = vshrl.u32 %v1782_v29, 16  ;;  %v1961_v40 = vshll.u32 %v1782_v29, 16  ;;  %v1607_v49 = vld [vmem:[#allocation3 + $0xc0] sm:$0xf0] }
 0x2f7   : > { %v1314_v52 = vsel %vm1280_vm8, %v1305_v23, %v1313_v34  ;;  %v2872_v53 = vor.u32 %v2871_v33, %v2868_v44  ;;  %v1955_v25 = vrot.slane %v1953_v36, 5  ;;  %v2567_v26 = vrot.slane %v2503_v55, 4  ;;  %v1608_v2 = vld [vmem:[#allocation3 + $0xc8] sm:$0xf]  ;;  %v3407_v38 = vld [vmem:[#allocation3 + $0xf0] sm:$0xf0] }
 0x2f8   : > { %1570 = vst.msk [vmem:[#allocation4 + $0x18] sm:$0xff] %vm829_vm6, %v1314_v52  ;;  %v2880_v32 = vor.u32 %v2879_v5, %v2876_v60  ;;  %v1960_v57 = vrot.slane %v1958_v21, 4  ;;  %v1963_v16 = vrot.slane %v1961_v40, 5  ;;  %v2566_v28 = vrot.slane %v2502_v41, 4  ;;  %v3408_v62 = vld [vmem:[#allocation3 + $0xf8] sm:$0xf] }
 0x2f9   : > { %1748 = vst.msk [vmem:[#allocation4 + $0x18] sm:$0xff] %vm1746_vm10, %v9615_v11  ;;  %v1956_v10 = vor.u32 %v1955_v25, %v1952_v19  ;;  %v3201_v27 = vshrl.u32 %v3033_v22, 16  ;;  %v3204_v13 = vshll.u32 %v3033_v22, 16  ;;  %v9694_v11 = vpop.permute.xlu0 %2954  ;;  %v3209_v4 = vshrl.u32 %v3034_v30, 16  ;;  %v2155_v34 = vld [vmem:[#allocation3 + $0xd0] sm:$0xf8] }
 0x2fa   : > { %v2881_v63 = vsel %vm1795_vm7, %v2872_v53, %v2880_v32  ;;  %v1964_v31 = vor.u32 %v1963_v16, %v1960_v57  ;;  %v2568_v47 = vsel %vm452_vm0, %v2566_v28, %v2567_v26  ;;  %2118 = vst.msk [vmem:[#allocation4 + $0x18] sm:$0xff] %vm2116_vm11, %v9666_v3  ;;  %v3212_v59 = vshll.u32 %v3034_v30, 16  ;;  %v2156_v44 = vld [vmem:[#allocation3 + $0xd8] sm:$0xf]  ;;  %v3406_v41 = vld [vmem:[#allocation3 + $0xe8] sm:$0xf] }
 0x2fb   : > { %2972 = vrot.lane.b32.xlu0 %v2881_v63, %s8785_s8  ;;  %2630 = vst.msk [vmem:[#allocation4 + $0x8] sm:$0xff] %vm829_vm6, %v2568_v47  ;;  %v3203_v61 = vrot.slane %v3201_v27, 3  ;;  %v1686_v35 = vrot.slane %v1609_v46, 4  ;;  %v3206_v3 = vrot.slane %v3204_v13, 4  ;;  %v1687_v15 = vrot.slane %v1610_v7, 4 }
 0x2fc   : > { %2487 = vst.msk [vmem:[#allocation4 + $0x18] sm:$0xff] %vm2485_vm12, %v9634_v24  ;;  %v1965_v0 = vsel %vm1795_vm7, %v1956_v10, %v1964_v31  ;;  %v2849_v50 = vshrl.u32 %v2666_v8, 16  ;;  %v3211_v56 = vrot.slane %v3209_v4, 3  ;;  %v3214_v18 = vrot.slane %v3212_v59, 4  ;;  %v1787_v52 = vld [vmem:[#allocation3 + $0xd0] sm:$0xf0] }
 0x2fd   : > { %2998 = vst.msk [vmem:[#allocation4 + $0x8] sm:$0xff] %vm1746_vm10, %v9623_v51  ;;  %2086 = vrot.lane.b32.xlu1 %v1965_v0, %s8784_s30  ;;  %v2852_v24 = vshll.u32 %v2666_v8, 16  ;;  %v2857_v37 = vshrl.u32 %v2667_v48, 16  ;;  %v3207_v39 = vor.u32 %v3206_v3, %v3203_v61  ;;  %v1688_v51 = vsel %vm452_vm0, %v1686_v35, %v1687_v15  ;;  %v9715_v5 = vpop.permute.xlu0 %3503  ;;  %v1788_v53 = vld [vmem:[#allocation3 + $0xd8] sm:$0x1f] }
 0x2fe   : > { %3367 = vst.msk [vmem:[#allocation4 + $0x8] sm:$0xff] %vm2116_vm11, %v9625_v6  ;;  %v2851_v12 = vrot.slane %v2849_v50, 4  ;;  %v2860_v29 = vshll.u32 %v2667_v48, 16  ;;  %v3215_v1 = vor.u32 %v3214_v18, %v3211_v56  ;;  %v1683_v17 = vrot.slane %v1607_v49, 4  ;;  %v3405_v6 = vld [vmem:[#allocation3 + $0xe0] sm:$0xf0] }
 0x2ff   : > { %3543 = vst.msk [vmem:[#allocation4 + $0x8] sm:$0xff] %vm2485_vm12, %v9605_v20  ;;  %v2854_v58 = vrot.slane %v2852_v24, 5  ;;  %v2859_v55 = vrot.slane %v2857_v37, 4  ;;  %v1684_v33 = vrot.slane %v1608_v2, 4  ;;  %v3483_v60 = vrot.slane %v3407_v38, 4  ;;  %v3895_v48 = vld [vmem:[#allocation4] sm:$0xff] }
 0x300   : > { %v2862_v23 = vrot.slane %v2860_v29, 5  ;;  %v3484_v36 = vrot.slane %v3408_v62, 4  ;;  %v9717_v20 = vpop.permute.xlu1 %2443  ;;  %v3216_v19 = vsel %vm1280_vm8, %v3207_v39, %v3215_v1  ;;  %v2353_v40 = vshrl.u32 %v2155_v34, 16  ;;  %v2508_v32 = vld [vmem:[#allocation3 + $0x50] sm:$0xf0]  ;;  %v3899_v2 = vld [vmem:[#allocation4 + $0x20] sm:$0xff] }
 0x301   : > { %1722 = vrot.lane.b32.xlu1 %v1688_v51, %s8785_s8  ;;  %v2855_v21 = vor.u32 %v2854_v58, %v2851_v12  ;;  %v2356_v22 = vshll.u32 %v2155_v34, 16  ;;  %3337 = vrot.lane.b32.xlu0 %v3216_v19, %s8784_s30  ;;  %v1685_v26 = vsel %vm452_vm0, %v1683_v17, %v1684_v33  ;;  %v2361_v46 = vshrl.u32 %v2156_v44, 16  ;;  %v2509_v57 = vld [vmem:[#allocation3 + $0x58] sm:$0xf]  ;;  %v3039_v27 = vld [vmem:[#allocation3 + $0xf0] sm:$0xf8]  ;;  %v9728_v38 = vpop.permute.xlu0 %3501 }
 0x302   : > { %v2863_v25 = vor.u32 %v2862_v23, %v2859_v55  ;;  %v3485_v30 = vsel %vm452_vm0, %v3483_v60, %v3484_v36  ;;  %v2355_v16 = vrot.slane %v2353_v40, 3  ;;  %v2364_v7 = vshll.u32 %v2156_v44, 16  ;;  %v3040_v13 = vld [vmem:[#allocation3 + $0xf8] sm:$0xf]  ;;  %v2153_v39 = vld [vmem:[#allocation3 + $0xc0] sm:$0xf8] }
 0x303   : > { %v2358_v28 = vrot.slane %v2356_v22, 4  ;;  %v3480_v10 = vrot.slane %v3405_v6, 4  ;;  %v2363_v63 = vrot.slane %v2361_v46, 3  ;;  %v3481_v31 = vrot.slane %v3406_v41, 4  ;;  %v2154_v44 = vld [vmem:[#allocation3 + $0xc8] sm:$0xf] }
 0x304   : > { %v2864_v8 = vsel %vm1795_vm7, %v2855_v21, %v2863_v25  ;;  %v2001_v47 = vshrl.u32 %v1787_v52, 16  ;;  %v2366_v61 = vrot.slane %v2364_v7, 4  ;;  %v2004_v59 = vshll.u32 %v1787_v52, 16  ;;  %v1256_v6 = vld [vmem:[#allocation3 + $0x50] sm:$0xf8] }
 0x305   : > { %1720 = vrot.lane.b32.xlu1 %v1685_v26, %s8785_s8  ;;  %v2359_v49 = vor.u32 %v2358_v28, %v2355_v16  ;;  %v2009_v35 = vshrl.u32 %v1788_v53, 16  ;;  %2970 = vrot.lane.b32.xlu0 %v2864_v8, %s8785_s8  ;;  %v3482_v0 = vsel %vm452_vm0, %v3480_v10, %v3481_v31  ;;  %v2012_v15 = vshll.u32 %v1788_v53, 16  ;;  %v1257_v22 = vld [vmem:[#allocation3 + $0x58] sm:$0xf] }
 0x306   : > { %v3896_v4 = vld [vmem:[#allocation4 + $0x8] sm:$0xff]  ;;  %v2003_v3 = vrot.slane %v2001_v47, 4  ;;  %v2575_v50 = vrot.slane %v2508_v32, 4  ;;  %v9730_v56 = vpop.permute.xlu1 %2076  ;;  %v2367_v18 = vor.u32 %v2366_v61, %v2363_v63  ;;  %v2006_v24 = vrot.slane %v2004_v59, 5  ;;  %v2673_v10 = vld [vmem:[#allocation3 + $0xf8] sm:$0x1f] }
 0x307   : > { %4171 = vmatprep.mubr.bf16.mxu0 %v3896_v4  ;;  %v2011_v37 = vrot.slane %v2009_v35, 4  ;;  %v2576_v62 = vrot.slane %v2509_v57, 4  ;;  %v2014_v51 = vrot.slane %v2012_v15, 5  ;;  %v3252_v12 = vshrl.u32 %v3039_v27, 16  ;;  %v3898_v31 = vld [vmem:[#allocation4 + $0x18] sm:$0xff] }
 0x308   : > { %4172 = vmatmul.mubr.bf16.vlgmr.msra.gmra.mrb[32].mxu0 %v3895_v48  ;;  %v3255_v29 = vshll.u32 %v3039_v27, 16  ;;  %v3260_v34 = vshrl.u32 %v3040_v13, 16  ;;  %v2368_v1 = vsel %vm1280_vm8, %v2359_v49, %v2367_v18  ;;  %v2007_v58 = vor.u32 %v2006_v24, %v2003_v3  ;;  %v1785_v61 = vld [vmem:[#allocation3 + $0xc0] sm:$0xf0]  ;;  %v1786_v18 = vld [vmem:[#allocation3 + $0xc8] sm:$0x1f] }
 0x309   : > { %4179 = vmatprep.mubr.bf16.mxu0 %v3899_v2  ;;  %v2577_v55 = vsel %vm452_vm0, %v2575_v50, %v2576_v62  ;;  %v3263_v17 = vshll.u32 %v3040_v13, 16  ;;  %3519 = vrot.lane.b32.xlu0 %v3485_v30, %s8786_s15  ;;  %v2015_v23 = vor.u32 %v2014_v51, %v2011_v37  ;;  %v3254_v33 = vrot.slane %v3252_v12, 3  ;;  %v2672_v30 = vld [vmem:[#allocation3 + $0xf0] sm:$0xf0]  ;;  %v9740_v46 = vpop.permute.xlu0 %3327  ;;  %v2506_v51 = vld [vmem:[#allocation3 + $0x40] sm:$0xf0] }
 0x30a   : > { %2459 = vrot.lane.b32.xlu1 %v2368_v1, %s8786_s15  ;;  %2633 = vst.msk [vmem:[#allocation4 + $0x50] sm:$0xff] %vm829_vm6, %v2577_v55  ;;  %v3257_v60 = vrot.slane %v3255_v29, 4  ;;  %v3262_v36 = vrot.slane %v3260_v34, 3  ;;  %v2336_v19 = vshrl.u32 %v2153_v39, 16  ;;  %v2339_v21 = vshll.u32 %v2153_v39, 16 }
 0x30b   : > { %3001 = vst.msk [vmem:[#allocation4 + $0x50] sm:$0xff] %vm1746_vm10, %v9664_v9  ;;  %v3265_v41 = vrot.slane %v3263_v17, 4  ;;  %v2344_v40 = vshrl.u32 %v2154_v44, 16  ;;  %v2016_v52 = vsel %vm1795_vm7, %v2007_v58, %v2015_v23  ;;  %v2347_v25 = vshll.u32 %v2154_v44, 16  ;;  %v2442_v32 = vpop.permute.xlu1 %2441  ;;  %v2507_v12 = vld [vmem:[#allocation3 + $0x48] sm:$0xf] }
 0x30c   : > { %v3258_v53 = vor.u32 %v3257_v60, %v3254_v33  ;;  %v1350_v26 = vshrl.u32 %v1256_v6, 16  ;;  %v2338_v16 = vrot.slane %v2336_v19, 3  ;;  %v2341_v28 = vrot.slane %v2339_v21, 4  ;;  %2488 = vst.msk [vmem:[#allocation4 + $0x30] sm:$0xff] %vm2485_vm12, %v2442_v32  ;;  %v1254_v55 = vld [vmem:[#allocation3 + $0x40] sm:$0xf8] }
 0x30d   : > { %v3266_v57 = vor.u32 %v3265_v41, %v3262_v36  ;;  %v2346_v7 = vrot.slane %v2344_v40, 3  ;;  %3517 = vrot.lane.b32.xlu0 %v3482_v0, %s8786_s15  ;;  %v2349_v9 = vrot.slane %v2347_v25, 4  ;;  %v1353_v8 = vshll.u32 %v1256_v6, 16  ;;  %v1255_v36 = vld [vmem:[#allocation3 + $0x48] sm:$0xf] }
 0x30e   : > { %2092 = vrot.lane.b32.xlu1 %v2016_v52, %s8784_s30  ;;  %v1352_v27 = vrot.slane %v1350_v26, 3  ;;  %v1358_v63 = vshrl.u32 %v1257_v22, 16  ;;  %v2342_v13 = vor.u32 %v2341_v28, %v2338_v16  ;;  %v1361_v48 = vshll.u32 %v1257_v22, 16  ;;  %v3037_v26 = vld [vmem:[#allocation3 + $0xe0] sm:$0xf8] }
 0x30f   : > { %v3267_v47 = vsel %vm1280_vm8, %v3258_v53, %v3266_v57  ;;  %v2900_v49 = vshrl.u32 %v2672_v30, 16  ;;  %v2350_v4 = vor.u32 %v2349_v9, %v2346_v7  ;;  %v1355_v59 = vrot.slane %v1353_v8, 4  ;;  %v3038_v28 = vld [vmem:[#allocation3 + $0xe8] sm:$0xf] }
 0x310   : > { %4180 = vmatmul.mubr.bf16.gmra.mrb[36].mxu0 %v3898_v31  ;;  %v1360_v35 = vrot.slane %v1358_v63, 3  ;;  %v2903_v2 = vshll.u32 %v2672_v30, 16  ;;  %v1363_v3 = vrot.slane %v1361_v48, 4  ;;  %v2908_v15 = vshrl.u32 %v2673_v10, 16  ;;  %v1613_v31 = vld [vmem:[#allocation3 + $0xf0] sm:$0xf0] }
 0x311   : > { %v2902_v0 = vrot.slane %v2900_v49, 4  ;;  %v2911_v50 = vshll.u32 %v2673_v10, 16  ;;  %3343 = vrot.lane.b32.xlu0 %v3267_v47, %s8784_s30  ;;  %v2351_v24 = vsel %vm1280_vm8, %v2342_v13, %v2350_v4  ;;  %v1356_v37 = vor.u32 %v1355_v59, %v1352_v27  ;;  %v1614_v47 = vld [vmem:[#allocation3 + $0xf8] sm:$0xf] }
 0x312   : > { %v2905_v62 = vrot.slane %v2903_v2, 5  ;;  %v1984_v39 = vshrl.u32 %v1785_v61, 16  ;;  %v9748_v29 = vpop.permute.xlu0 %2960  ;;  %2457 = vrot.lane.b32.xlu1 %v2351_v24, %s8786_s15  ;;  %v1364_v34 = vor.u32 %v1363_v3, %v1360_v35  ;;  %v2910_v44 = vrot.slane %v2908_v15, 4  ;;  %v2671_v2 = vld [vmem:[#allocation3 + $0xe8] sm:$0x1f] }
 0x313   : > { %v2913_v1 = vrot.slane %v2911_v50, 5  ;;  %v1987_v58 = vshll.u32 %v1785_v61, 16  ;;  %v1992_v33 = vshrl.u32 %v1786_v18, 16  ;;  %v1995_v60 = vshll.u32 %v1786_v18, 16  ;;  %v2670_v61 = vld [vmem:[#allocation3 + $0xe0] sm:$0xf0] }
 0x314   : > { %v9751_v17 = vpop.permute.xlu1 %2074  ;;  %v2906_v6 = vor.u32 %v2905_v62, %v2902_v0  ;;  %v1986_v23 = vrot.slane %v1984_v39, 4  ;;  %v1365_v41 = vsel %vm1280_vm8, %v1356_v37, %v1364_v34  ;;  %v2572_v40 = vrot.slane %v2506_v51, 4  ;;  %v1611_v18 = vld [vmem:[#allocation3 + $0xe0] sm:$0xf0]  ;;  %v1612_v39 = vld [vmem:[#allocation3 + $0xe8] sm:$0xf] }
 0x315   : > { %v2914_v19 = vor.u32 %v2913_v1, %v2910_v44  ;;  %v1989_v21 = vrot.slane %v1987_v58, 5  ;;  %1573 = vst.msk [vmem:[#allocation4 + $0x60] sm:$0xff] %vm829_vm6, %v1365_v41  ;;  %v1994_v22 = vrot.slane %v1992_v33, 4  ;;  %v1997_v52 = vrot.slane %v1995_v60, 5  ;;  %v3409_v1 = vld [vmem:[#allocation3 + $0x100] sm:$0xf0] }
 0x316   : > { %v2573_v53 = vrot.slane %v2507_v12, 4  ;;  %v1333_v25 = vshrl.u32 %v1254_v55, 16  ;;  %1751 = vst.msk [vmem:[#allocation4 + $0x60] sm:$0xff] %vm1746_vm10, %v9679_v43  ;;  %v1336_v57 = vshll.u32 %v1254_v55, 16  ;;  %v1341_v16 = vshrl.u32 %v1255_v36, 16 }
 0x317   : > { %v2915_v30 = vsel %vm1795_vm7, %v2906_v6, %v2914_v19  ;;  %v1990_v32 = vor.u32 %v1989_v21, %v1986_v23  ;;  %v3326_v7 = vpop.permute.xlu0 %3325  ;;  %v1998_v9 = vor.u32 %v1997_v52, %v1994_v22  ;;  %v1344_v63 = vshll.u32 %v1255_v36, 16  ;;  %2121 = vst.msk [vmem:[#allocation4 + $0x60] sm:$0xff] %vm2116_vm11, %v9730_v56  ;;  %v3410_v33 = vld [vmem:[#allocation3 + $0x108] sm:$0xf]  ;;  %v2160_v21 = vld [vmem:[#allocation3 + $0xf8] sm:$0xf] }
 0x318   : > { %v9758_v10 = vpop.permute.xlu1 %1710  ;;  %2976 = vrot.lane.b32.xlu0 %v2915_v30, %s8785_s8  ;;  %v2574_v27 = vsel %vm452_vm0, %v2572_v40, %v2573_v53  ;;  %v1335_v8 = vrot.slane %v1333_v25, 3  ;;  %3370 = vst.msk [vmem:[#allocation4 + $0x50] sm:$0xff] %vm2116_vm11, %v3326_v7  ;;  %v1338_v43 = vrot.slane %v1336_v57, 4  ;;  %v1343_v13 = vrot.slane %v1341_v16, 3  ;;  %v3043_v25 = vld [vmem:[#allocation3 + $0x110] sm:$0xf8] }
 0x319   : > { %2632 = vst.msk [vmem:[#allocation4 + $0x38] sm:$0xff] %vm829_vm6, %v2574_v27  ;;  %v3235_v48 = vshrl.u32 %v3037_v26, 16  ;;  %v3238_v49 = vshll.u32 %v3037_v26, 16  ;;  %v1999_v4 = vsel %vm1795_vm7, %v1990_v32, %v1998_v9  ;;  %v1346_v59 = vrot.slane %v1344_v63, 4  ;;  %v3044_v7 = vld [vmem:[#allocation3 + $0x118] sm:$0xf] }
 0x31a   : > { %3546 = vst.msk [vmem:[#allocation4 + $0x50] sm:$0xff] %vm2485_vm12, %v9728_v38  ;;  %v3243_v35 = vshrl.u32 %v3038_v28, 16  ;;  %v3246_v56 = vshll.u32 %v3038_v28, 16  ;;  %2090 = vrot.lane.b32.xlu1 %v1999_v4, %s8784_s30  ;;  %v1339_v3 = vor.u32 %v1338_v43, %v1335_v8  ;;  %v1692_v50 = vrot.slane %v1613_v31, 4  ;;  %v2157_v63 = vld [vmem:[#allocation3 + $0xe0] sm:$0xf8] }
 0x31b   : > { %3000 = vst.msk [vmem:[#allocation4 + $0x38] sm:$0xff] %vm1746_vm10, %v9694_v11  ;;  %v3237_v0 = vrot.slane %v3235_v48, 3  ;;  %v3240_v15 = vrot.slane %v3238_v49, 4  ;;  %v1347_v11 = vor.u32 %v1346_v59, %v1343_v13  ;;  %v1693_v62 = vrot.slane %v1614_v47, 4  ;;  %v3901_v31 = vld [vmem:[#allocation4 + $0x30] sm:$0xff] }
 0x31c   : > { %3369 = vst.msk [vmem:[#allocation4 + $0x38] sm:$0xff] %vm2116_vm11, %v9653_v42  ;;  %v9774_v38 = vpop.permute.xlu1 %1708  ;;  %v3245_v24 = vrot.slane %v3243_v35, 3  ;;  %v3248_v37 = vrot.slane %v3246_v56, 4  ;;  %v9778_v51 = vpop.permute.xlu0 %2958  ;;  %v2883_v34 = vshrl.u32 %v2670_v61, 16  ;;  %v2886_v42 = vshll.u32 %v2670_v61, 16 }
 0x31d   : > { %3545 = vst.msk [vmem:[#allocation4 + $0x38] sm:$0xff] %vm2485_vm12, %v9632_v14  ;;  %v3241_v12 = vor.u32 %v3240_v15, %v3237_v0  ;;  %v2891_v44 = vshrl.u32 %v2671_v2, 16  ;;  %v1348_v58 = vsel %vm1280_vm8, %v1339_v3, %v1347_v11  ;;  %v1694_v6 = vsel %vm452_vm0, %v1692_v50, %v1693_v62  ;;  %v2159_v14 = vld [vmem:[#allocation3 + $0xf0] sm:$0xf8]  ;;  %v2158_v56 = vld [vmem:[#allocation3 + $0xe8] sm:$0xf] }
 0x31e   : > { %v3249_v55 = vor.u32 %v3248_v37, %v3245_v24  ;;  %v2894_v23 = vshll.u32 %v2671_v2, 16  ;;  %1572 = vst.msk [vmem:[#allocation4 + $0x48] sm:$0xff] %vm829_vm6, %v1348_v58  ;;  %1726 = vrot.lane.b32.xlu1 %v1694_v6, %s8785_s8  ;;  %v2885_v60 = vrot.slane %v2883_v34, 4  ;;  %v2888_v36 = vrot.slane %v2886_v42, 5  ;;  %v2512_v15 = vld [vmem:[#allocation3 + $0x70] sm:$0xf0] }
 0x31f   : > { %v2893_v41 = vrot.slane %v2891_v44, 4  ;;  %v1689_v19 = vrot.slane %v1611_v18, 4  ;;  %1750 = vst.msk [vmem:[#allocation4 + $0x48] sm:$0xff] %vm1746_vm10, %v9696_v45  ;;  %v1690_v52 = vrot.slane %v1612_v39, 4  ;;  %v3486_v53 = vrot.slane %v3409_v1, 4 }
 0x320   : > { %v3250_v40 = vsel %vm1280_vm8, %v3241_v12, %v3249_v55  ;;  %v2896_v22 = vrot.slane %v2894_v23, 5  ;;  %v9787_v26 = vpop.permute.xlu0 %3507  ;;  %v9789_v30 = vpop.permute.xlu1 %2447  ;;  %v2889_v32 = vor.u32 %v2888_v36, %v2885_v60  ;;  %v3487_v57 = vrot.slane %v3410_v33, 4  ;;  %2120 = vst.msk [vmem:[#allocation4 + $0x48] sm:$0xff] %vm2116_vm11, %v9751_v17  ;;  %v2513_v62 = vld [vmem:[#allocation3 + $0x78] sm:$0xf] }
 0x321   : > { %3341 = vrot.lane.b32.xlu0 %v3250_v40, %s8784_s30  ;;  %v2387_v16 = vshrl.u32 %v2159_v14, 16  ;;  %v2390_v28 = vshll.u32 %v2159_v14, 16  ;;  %v1691_v9 = vsel %vm452_vm0, %v1689_v19, %v1690_v52  ;;  %v2395_v27 = vshrl.u32 %v2160_v21, 16  ;;  %2489 = vst.msk [vmem:[#allocation4 + $0x48] sm:$0xff] %vm2485_vm12, %v9717_v20  ;;  %v3905_v61 = vld [vmem:[#allocation4 + $0x50] sm:$0xff] }
 0x322   : > { %v2897_v45 = vor.u32 %v2896_v22, %v2893_v41  ;;  %v2398_v8 = vshll.u32 %v2160_v21, 16  ;;  %1724 = vrot.lane.b32.xlu1 %v1691_v9, %s8785_s8  ;;  %v3488_v47 = vsel %vm452_vm0, %v3486_v53, %v3487_v57  ;;  %v3286_v49 = vshrl.u32 %v3043_v25, 16  ;;  %v3041_v1 = vld [vmem:[#allocation3 + $0x100] sm:$0xf8]  ;;  %v3042_v33 = vld [vmem:[#allocation3 + $0x108] sm:$0xf] }
 0x323   : > { %v2389_v43 = vrot.slane %v2387_v16, 3  ;;  %v2392_v13 = vrot.slane %v2390_v28, 4  ;;  %v2397_v4 = vrot.slane %v2395_v27, 3  ;;  %v3289_v35 = vshll.u32 %v3043_v25, 16  ;;  %v1789_v19 = vld [vmem:[#allocation3 + $0xe0] sm:$0xf0] }
 0x324   : > { %v3902_v48 = vld [vmem:[#allocation4 + $0x38] sm:$0xff]  ;;  %v2898_v17 = vsel %vm1795_vm7, %v2889_v32, %v2897_v45  ;;  %v2400_v59 = vrot.slane %v2398_v8, 4  ;;  %v3288_v2 = vrot.slane %v3286_v49, 3  ;;  %v3294_v3 = vshrl.u32 %v3044_v7, 16  ;;  %v9803_v39 = vpop.permute.xlu0 %3505  ;;  %v1790_v28 = vld [vmem:[#allocation3 + $0xe8] sm:$0x1f] }
 0x325   : > { %4187 = vmatprep.mubr.bf16.mxu0 %v3902_v48  ;;  %2974 = vrot.lane.b32.xlu0 %v2898_v17, %s8785_s8  ;;  %v2393_v20 = vor.u32 %v2392_v13, %v2389_v43  ;;  %v3297_v0 = vshll.u32 %v3044_v7, 16  ;;  %v9801_v50 = vpop.permute.xlu1 %2080  ;;  %v3291_v11 = vrot.slane %v3289_v35, 4  ;;  %v2370_v24 = vshrl.u32 %v2157_v63, 16  ;;  %v1260_v8 = vld [vmem:[#allocation3 + $0x70] sm:$0xf8] }
 0x326   : > { %4188 = vmatmul.mubr.bf16.gmra.mrb[40].mxu0 %v3901_v31  ;;  %v2401_v18 = vor.u32 %v2400_v59, %v2397_v4  ;;  %v2373_v37 = vshll.u32 %v2157_v63, 16  ;;  %v3296_v12 = vrot.slane %v3294_v3, 3  ;;  %v2378_v42 = vshrl.u32 %v2158_v56, 16  ;;  %v1261_v49 = vld [vmem:[#allocation3 + $0x78] sm:$0xf] }
 0x327   : > { %4195 = vmatprep.mubr.bf16.mxu0 %v3905_v61  ;;  %v3299_v34 = vrot.slane %v3297_v0, 4  ;;  %v2381_v44 = vshll.u32 %v2158_v56, 16  ;;  %v3292_v55 = vor.u32 %v3291_v11, %v3288_v2  ;;  %v2372_v6 = vrot.slane %v2370_v24, 3  ;;  %v3411_v35 = vld [vmem:[#allocation3 + $0x110] sm:$0xf0] }
 0x328   : > { %v2402_v58 = vsel %vm1280_vm8, %v2393_v20, %v2401_v18  ;;  %v2375_v23 = vrot.slane %v2373_v37, 4  ;;  %v2380_v60 = vrot.slane %v2378_v42, 3  ;;  %v2581_v41 = vrot.slane %v2512_v15, 4  ;;  %v3904_v63 = vld [vmem:[#allocation4 + $0x48] sm:$0xff]  ;;  %v9811_v31 = vpop.permute.xlu0 %3331  ;;  %v3412_v0 = vld [vmem:[#allocation3 + $0x118] sm:$0xf] }
 0x329   : > { %3521 = vrot.lane.b32.xlu0 %v3488_v47, %s8786_s15  ;;  %2463 = vrot.lane.b32.xlu1 %v2402_v58, %s8786_s15  ;;  %v3300_v14 = vor.u32 %v3299_v34, %v3296_v12  ;;  %v2383_v36 = vrot.slane %v2381_v44, 4  ;;  %v2582_v40 = vrot.slane %v2513_v62, 4  ;;  %v3269_v22 = vshrl.u32 %v3041_v1, 16  ;;  %v1791_v37 = vld [vmem:[#allocation3 + $0xf0] sm:$0xf0] }
 0x32a   : > { %v2376_v21 = vor.u32 %v2375_v23, %v2372_v6  ;;  %v3272_v52 = vshll.u32 %v3041_v1, 16  ;;  %v3277_v57 = vshrl.u32 %v3042_v33, 16  ;;  %v3280_v16 = vshll.u32 %v3042_v33, 16  ;;  %v1792_v42 = vld [vmem:[#allocation3 + $0xf8] sm:$0x1f] }
 0x32b   : > { %v2446_v53 = vpop.permute.xlu1 %2445  ;;  %v3301_v25 = vsel %vm1280_vm8, %v3292_v55, %v3300_v14  ;;  %v2384_v32 = vor.u32 %v2383_v36, %v2380_v60  ;;  %v2583_v7 = vsel %vm452_vm0, %v2581_v41, %v2582_v40  ;;  %v3271_v45 = vrot.slane %v3269_v22, 3  ;;  %v2510_v6 = vld [vmem:[#allocation3 + $0x60] sm:$0xf0]  ;;  %v2511_v41 = vld [vmem:[#allocation3 + $0x68] sm:$0xf] }
 0x32c   : > { %2490 = vst.msk [vmem:[#allocation4 + $0x60] sm:$0xff] %vm2485_vm12, %v2446_v53  ;;  %v3274_v9 = vrot.slane %v3272_v52, 4  ;;  %v2018_v27 = vshrl.u32 %v1789_v19, 16  ;;  %v3279_v43 = vrot.slane %v3277_v57, 3  ;;  %v3282_v13 = vrot.slane %v3280_v16, 4 }
 0x32d   : > { %3347 = vrot.lane.b32.xlu0 %v3301_v25, %s8784_s30  ;;  %v2385_v47 = vsel %vm1280_vm8, %v2376_v21, %v2384_v32  ;;  %2635 = vst.msk [vmem:[#allocation4 + $0x80] sm:$0xff] %vm829_vm6, %v2583_v7  ;;  %v2021_v48 = vshll.u32 %v1789_v19, 16  ;;  %v2026_v4 = vshrl.u32 %v1790_v28, 16  ;;  %v2029_v59 = vshll.u32 %v1790_v28, 16  ;;  %v1258_v52 = vld [vmem:[#allocation3 + $0x60] sm:$0xf8] }
 0x32e   : > { %4196 = vmatmul.mubr.bf16.gmra.mrb[44].mxu0 %v3904_v63  ;;  %2461 = vrot.lane.b32.xlu1 %v2385_v47, %s8786_s15  ;;  %3003 = vst.msk [vmem:[#allocation4 + $0x80] sm:$0xff] %vm1746_vm10, %v9748_v29  ;;  %v3275_v61 = vor.u32 %v3274_v9, %v3271_v45  ;;  %v2020_v17 = vrot.slane %v2018_v27, 4  ;;  %v3283_v56 = vor.u32 %v3282_v13, %v3279_v43  ;;  %v1384_v2 = vshrl.u32 %v1260_v8, 16  ;;  %v1259_v53 = vld [vmem:[#allocation3 + $0x68] sm:$0xf] }
 0x32f   : > { %v2023_v20 = vrot.slane %v2021_v48, 5  ;;  %v1387_v3 = vshll.u32 %v1260_v8, 16  ;;  %v2028_v15 = vrot.slane %v2026_v4, 4  ;;  %v2031_v18 = vrot.slane %v2029_v59, 5  ;;  %v2674_v7 = vld [vmem:[#allocation3 + $0x100] sm:$0xf0] }
 0x330   : > { %v1392_v11 = vshrl.u32 %v1261_v49, 16  ;;  %v1395_v24 = vshll.u32 %v1261_v49, 16  ;;  %v3284_v62 = vsel %vm1280_vm8, %v3275_v61, %v3283_v56  ;;  %v1386_v34 = vrot.slane %v1384_v2, 3  ;;  %v2675_v48 = vld [vmem:[#allocation3 + $0x108] sm:$0x1f] }
 0x331   : > { %v2024_v12 = vor.u32 %v2023_v20, %v2020_v17  ;;  %v1389_v29 = vrot.slane %v1387_v3, 4  ;;  %3345 = vrot.lane.b32.xlu0 %v3284_v62, %s8784_s30  ;;  %v2032_v44 = vor.u32 %v2031_v18, %v2028_v15  ;;  %v3489_v55 = vrot.slane %v3411_v35, 4  ;;  %v1615_v35 = vld [vmem:[#allocation3 + $0x100] sm:$0xf0]  ;;  %v1616_v56 = vld [vmem:[#allocation3 + $0x108] sm:$0xf] }
 0x332   : > { %v1394_v1 = vrot.slane %v1392_v11, 3  ;;  %v1397_v58 = vrot.slane %v1395_v24, 4  ;;  %v9821_v23 = vpop.permute.xlu0 %2964  ;;  %v3490_v14 = vrot.slane %v3412_v0, 4  ;;  %v2035_v60 = vshrl.u32 %v1791_v37, 16  ;;  %v2676_v18 = vld [vmem:[#allocation3 + $0x110] sm:$0xf0] }
 0x333   : > { %v1390_v33 = vor.u32 %v1389_v29, %v1386_v34  ;;  %v2038_v36 = vshll.u32 %v1791_v37, 16  ;;  %v2033_v19 = vsel %vm1795_vm7, %v2024_v12, %v2032_v44  ;;  %v2043_v40 = vshrl.u32 %v1792_v42, 16  ;;  %v2677_v62 = vld [vmem:[#allocation3 + $0x118] sm:$0x1f] }
 0x334   : > { %v1398_v21 = vor.u32 %v1397_v58, %v1394_v1  ;;  %v2046_v22 = vshll.u32 %v1792_v42, 16  ;;  %v9824_v25 = vpop.permute.xlu1 %2078  ;;  %2094 = vrot.lane.b32.xlu1 %v2033_v19, %s8784_s30  ;;  %v3491_v32 = vsel %vm452_vm0, %v3489_v55, %v3490_v14  ;;  %v2037_v57 = vrot.slane %v2035_v60, 4  ;;  %v2161_v58 = vld [vmem:[#allocation3 + $0x100] sm:$0xf8]  ;;  %v2162_v60 = vld [vmem:[#allocation3 + $0x108] sm:$0xf] }
 0x335   : > { %v2040_v16 = vrot.slane %v2038_v36, 5  ;;  %v2578_v28 = vrot.slane %v2510_v6, 4  ;;  %3523 = vrot.lane.b32.xlu0 %v3491_v32, %s8786_s15  ;;  %v2045_v9 = vrot.slane %v2043_v40, 4  ;;  %v2579_v8 = vrot.slane %v2511_v41, 4  ;;  %v3045_v40 = vld [vmem:[#allocation3 + $0x120] sm:$0xf8] }
 0x336   : > { %v1399_v45 = vsel %vm1280_vm8, %v1390_v33, %v1398_v21  ;;  %v2048_v27 = vrot.slane %v2046_v22, 5  ;;  %v1367_v47 = vshrl.u32 %v1258_v52, 16  ;;  %v1370_v43 = vshll.u32 %v1258_v52, 16 }
 0x337   : > { %1575 = vst.msk [vmem:[#allocation4 + $0x90] sm:$0xff] %vm829_vm6, %v1399_v45  ;;  %v2041_v63 = vor.u32 %v2040_v16, %v2037_v57  ;;  %v1375_v13 = vshrl.u32 %v1259_v53, 16  ;;  %v3330_v49 = vpop.permute.xlu0 %3329  ;;  %v2580_v17 = vsel %vm452_vm0, %v2578_v28, %v2579_v8  ;;  %v1378_v4 = vshll.u32 %v1259_v53, 16  ;;  %v3046_v45 = vld [vmem:[#allocation3 + $0x128] sm:$0xf] }
 0x338   : > { %1753 = vst.msk [vmem:[#allocation4 + $0x90] sm:$0xff] %vm1746_vm10, %v9758_v10  ;;  %v2049_v61 = vor.u32 %v2048_v27, %v2045_v9  ;;  %v2917_v59 = vshrl.u32 %v2674_v7, 16  ;;  %v9835_v20 = vpop.permute.xlu1 %1714  ;;  %v1369_v2 = vrot.slane %v1367_v47, 3  ;;  %v1372_v3 = vrot.slane %v1370_v43, 4  ;;  %v1793_v43 = vld [vmem:[#allocation3 + $0x100] sm:$0xf0] }
 0x339   : > { %3372 = vst.msk [vmem:[#allocation4 + $0x80] sm:$0xff] %vm2116_vm11, %v3330_v49  ;;  %v1377_v0 = vrot.slane %v1375_v13, 3  ;;  %v2920_v15 = vshll.u32 %v2674_v7, 16  ;;  %2123 = vst.msk [vmem:[#allocation4 + $0x90] sm:$0xff] %vm2116_vm11, %v9801_v50  ;;  %v1380_v11 = vrot.slane %v1378_v4, 4  ;;  %v2925_v37 = vshrl.u32 %v2675_v48, 16 }
 0x33a   : > { %2634 = vst.msk [vmem:[#allocation4 + $0x68] sm:$0xff] %vm829_vm6, %v2580_v17  ;;  %v2050_v10 = vsel %vm1795_vm7, %v2041_v63, %v2049_v61  ;;  %v2919_v24 = vrot.slane %v2917_v59, 4  ;;  %v1373_v12 = vor.u32 %v1372_v3, %v1369_v2  ;;  %v2928_v50 = vshll.u32 %v2675_v48, 16  ;;  %v1794_v13 = vld [vmem:[#allocation3 + $0x108] sm:$0x1f]  ;;  %v3907_v4 = vld [vmem:[#allocation4 + $0x60] sm:$0xff] }
 0x33b   : > { %3548 = vst.msk [vmem:[#allocation4 + $0x80] sm:$0xff] %vm2485_vm12, %v9803_v39  ;;  %2096 = vrot.lane.b32.xlu1 %v2050_v10, %s8784_s30  ;;  %v2922_v34 = vrot.slane %v2920_v15, 5  ;;  %v1695_v29 = vrot.slane %v1615_v35, 4  ;;  %v9848_v42 = vpop.permute.xlu0 %2962  ;;  %v1381_v39 = vor.u32 %v1380_v11, %v1377_v0  ;;  %v1696_v44 = vrot.slane %v1616_v56, 4  ;;  %v3413_v17 = vld [vmem:[#allocation3 + $0x120] sm:$0xf0] }
 0x33c   : > { %3002 = vst.msk [vmem:[#allocation4 + $0x68] sm:$0xff] %vm1746_vm10, %v9778_v51  ;;  %v2927_v51 = vrot.slane %v2925_v37, 4  ;;  %v2934_v1 = vshrl.u32 %v2676_v18, 16  ;;  %v9852_v55 = vpop.permute.xlu1 %1712  ;;  %v2930_v33 = vrot.slane %v2928_v50, 5  ;;  %v2937_v14 = vshll.u32 %v2676_v18, 16 }
 0x33d   : > { %3371 = vst.msk [vmem:[#allocation4 + $0x68] sm:$0xff] %vm2116_vm11, %v9740_v46  ;;  %v2923_v6 = vor.u32 %v2922_v34, %v2919_v24  ;;  %v2942_v46 = vshrl.u32 %v2677_v62, 16  ;;  %v1382_v36 = vsel %vm1280_vm8, %v1373_v12, %v1381_v39  ;;  %v1697_v41 = vsel %vm452_vm0, %v1695_v29, %v1696_v44  ;;  %v3414_v24 = vld [vmem:[#allocation3 + $0x128] sm:$0xf]  ;;  %v2163_v37 = vld [vmem:[#allocation3 + $0x110] sm:$0xf8] }
 0x33e   : > { %3547 = vst.msk [vmem:[#allocation4 + $0x68] sm:$0xff] %vm2485_vm12, %v9715_v5  ;;  %v2936_v19 = vrot.slane %v2934_v1, 4  ;;  %v2945_v21 = vshll.u32 %v2677_v62, 16  ;;  %v2931_v5 = vor.u32 %v2930_v33, %v2927_v51  ;;  %v2939_v22 = vrot.slane %v2937_v14, 5 }
 0x33f   : > { %1574 = vst.msk [vmem:[#allocation4 + $0x78] sm:$0xff] %vm829_vm6, %v1382_v36  ;;  %1728 = vrot.lane.b32.xlu1 %v1697_v41, %s8785_s8  ;;  %v2944_v52 = vrot.slane %v2942_v46, 4  ;;  %v2404_v53 = vshrl.u32 %v2161_v58, 16  ;;  %v9858_v32 = vpop.permute.xlu0 %3511  ;;  %v2407_v16 = vshll.u32 %v2161_v58, 16  ;;  %v2412_v28 = vshrl.u32 %v2162_v60, 16 }
 0x340   : > { %1752 = vst.msk [vmem:[#allocation4 + $0x78] sm:$0xff] %vm1746_vm10, %v9774_v38  ;;  %v2947_v57 = vrot.slane %v2945_v21, 5  ;;  %v2415_v7 = vshll.u32 %v2162_v60, 16  ;;  %v9862_v9 = vpop.permute.xlu1 %2451  ;;  %v2932_v27 = vsel %vm1795_vm7, %v2923_v6, %v2931_v5  ;;  %v2940_v8 = vor.u32 %v2939_v22, %v2936_v19  ;;  %v2164_v6 = vld [vmem:[#allocation3 + $0x118] sm:$0xf] }
 0x341   : > { %v2406_v63 = vrot.slane %v2404_v53, 3  ;;  %v3303_v47 = vshrl.u32 %v3045_v40, 16  ;;  %2122 = vst.msk [vmem:[#allocation4 + $0x78] sm:$0xff] %vm2116_vm11, %v9824_v25  ;;  %2978 = vrot.lane.b32.xlu0 %v2932_v27, %s8785_s8  ;;  %v2409_v48 = vrot.slane %v2407_v16, 4  ;;  %v2414_v49 = vrot.slane %v2412_v28, 3 }
 0x342   : > { %v2948_v38 = vor.u32 %v2947_v57, %v2944_v52  ;;  %v2417_v61 = vrot.slane %v2415_v7, 4  ;;  %2491 = vst.msk [vmem:[#allocation4 + $0x78] sm:$0xff] %vm2485_vm12, %v9789_v30  ;;  %v3306_v35 = vshll.u32 %v3045_v40, 16  ;;  %v3311_v56 = vshrl.u32 %v3046_v45, 16  ;;  %v3911_v0 = vld [vmem:[#allocation4 + $0x80] sm:$0xff] }
 0x343   : > { %v3305_v59 = vrot.slane %v3303_v47, 3  ;;  %v3314_v2 = vshll.u32 %v3046_v45, 16  ;;  %v9870_v15 = vpop.permute.xlu0 %3509  ;;  %v2410_v18 = vor.u32 %v2409_v48, %v2406_v63  ;;  %v2052_v11 = vshrl.u32 %v1793_v43, 16  ;;  %v2516_v41 = vld [vmem:[#allocation3 + $0x90] sm:$0xf0] }
 0x344   : > { %v2949_v25 = vsel %vm1795_vm7, %v2940_v8, %v2948_v38  ;;  %v2418_v10 = vor.u32 %v2417_v61, %v2414_v49  ;;  %v9873_v62 = vpop.permute.xlu1 %2084  ;;  %v3308_v12 = vrot.slane %v3306_v35, 4  ;;  %v3313_v34 = vrot.slane %v3311_v56, 3  ;;  %v2517_v53 = vld [vmem:[#allocation3 + $0x98] sm:$0xf]  ;;  %v1264_v27 = vld [vmem:[#allocation3 + $0x90] sm:$0xf8] }
 0x345   : > { %v3908_v3 = vld [vmem:[#allocation4 + $0x68] sm:$0xff]  ;;  %v9875_v30 = vpop.f32.mrb[36].mxu1  ;;  %v3316_v50 = vrot.slane %v3314_v2, 4  ;;  %v2055_v29 = vshll.u32 %v1793_v43, 16  ;;  %2980 = vrot.lane.b32.xlu0 %v2949_v25, %s8785_s8  ;;  %v2054_v44 = vrot.slane %v2052_v11, 4  ;;  %v2060_v1 = vshrl.u32 %v1794_v13, 16 }
 0x346   : > { %4203 = vmatprep.mubr.bf16.mxu0 %v3908_v3  ;;  %v9877_v39 = vpop.f32.mrb[37].mxu1  ;;  %v2419_v51 = vsel %vm1280_vm8, %v2410_v18, %v2418_v10  ;;  %v2063_v58 = vshll.u32 %v1794_v13, 16  ;;  %v3309_v14 = vor.u32 %v3308_v12, %v3305_v59  ;;  %v3492_v36 = vrot.slane %v3413_v17, 4  ;;  %v1265_v13 = vld [vmem:[#allocation3 + $0x98] sm:$0xf] }
 0x347   : > { %4204 = vmatmul.mubr.bf16.gmra.mrb[48].mxu0 %v3907_v4  ;;  %v9881_v33 = vpop.f32.mrb[38].mxu1  ;;  %2465 = vrot.lane.b32.xlu1 %v2419_v51, %s8786_s15  ;;  %v3317_v46 = vor.u32 %v3316_v50, %v3313_v34  ;;  %v2057_v60 = vrot.slane %v2055_v29, 5  ;;  %v9884_v19 = vpop.permute.xlu0 %3335  ;;  %v2062_v40 = vrot.slane %v2060_v1, 4  ;;  %v3493_v22 = vrot.slane %v3414_v24, 4  ;;  %v2514_v38 = vld [vmem:[#allocation3 + $0x80] sm:$0xf0] }
 0x348   : > { %4211 = vmatprep.mubr.bf16.mxu0 %v3911_v0  ;;  %v9886_v21 = vpop.f32.mrb[39].mxu1  ;;  %v2065_v5 = vrot.slane %v2063_v58, 5  ;;  %v2421_v52 = vshrl.u32 %v2163_v37, 16  ;;  %v2450_v57 = vpop.permute.xlu1 %2449  ;;  %v2424_v7 = vshll.u32 %v2163_v37, 16  ;;  %v2429_v45 = vshrl.u32 %v2164_v6, 16 }
 0x349   : > { %v3318_v16 = vsel %vm1280_vm8, %v3309_v14, %v3317_v46  ;;  %v2058_v28 = vor.u32 %v2057_v60, %v2054_v44  ;;  %2492 = vst.msk [vmem:[#allocation4 + $0x90] sm:$0xff] %vm2485_vm12, %v2450_v57  ;;  %v3494_v63 = vsel %vm452_vm0, %v3492_v36, %v3493_v22  ;;  %v2432_v43 = vshll.u32 %v2164_v6, 16  ;;  %v2515_v4 = vld [vmem:[#allocation3 + $0x88] sm:$0xf]  ;;  %v1262_v0 = vld [vmem:[#allocation3 + $0x80] sm:$0xf8] }
 0x34a   : > { %3349 = vrot.lane.b32.xlu0 %v3318_v16, %s8784_s30  ;;  %v2066_v8 = vor.u32 %v2065_v5, %v2062_v40  ;;  %v2423_v47 = vrot.slane %v2421_v52, 3  ;;  %v2426_v48 = vrot.slane %v2424_v7, 4  ;;  %v2431_v49 = vrot.slane %v2429_v45, 3  ;;  %v3910_v25 = vld [vmem:[#allocation4 + $0x78] sm:$0xff]  ;;  %v1263_v37 = vld [vmem:[#allocation3 + $0x88] sm:$0xf] }
 0x34b   : > { %v2587_v61 = vrot.slane %v2516_v41, 4  ;;  %v2588_v17 = vrot.slane %v2517_v53, 4  ;;  %v9892_v59 = vpop.permute.xlu0 %2968  ;;  %v2434_v56 = vrot.slane %v2432_v43, 4  ;;  %v1418_v2 = vshrl.u32 %v1264_v27, 16  ;;  %v2520_v44 = vld [vmem:[#allocation3 + $0xb0] sm:$0xf0] }
 0x34c   : > { %v2067_v35 = vsel %vm1795_vm7, %v2058_v28, %v2066_v8  ;;  %v1421_v3 = vshll.u32 %v1264_v27, 16  ;;  %v2427_v18 = vor.u32 %v2426_v48, %v2423_v47  ;;  %v1426_v11 = vshrl.u32 %v1265_v13, 16  ;;  %v2521_v46 = vld [vmem:[#allocation3 + $0xb8] sm:$0xf]  ;;  %v1268_v22 = vld [vmem:[#allocation3 + $0xb0] sm:$0xf8] }
 0x34d   : > { %2098 = vrot.lane.b32.xlu1 %v2067_v35, %s8784_s30  ;;  %v2589_v10 = vsel %vm452_vm0, %v2587_v61, %v2588_v17  ;;  %v1429_v24 = vshll.u32 %v1265_v13, 16  ;;  %v9897_v12 = vpop.permute.xlu1 %2082  ;;  %v2435_v34 = vor.u32 %v2434_v56, %v2431_v49  ;;  %v1420_v50 = vrot.slane %v1418_v2, 3  ;;  %v1269_v52 = vld [vmem:[#allocation3 + $0xb8] sm:$0xf]  ;;  %v2518_v7 = vld [vmem:[#allocation3 + $0xa0] sm:$0xf0] }
 0x34e   : > { %3525 = vrot.lane.b32.xlu0 %v3494_v63, %s8786_s15  ;;  %2637 = vst.msk [vmem:[#allocation4 + $0xb0] sm:$0xff] %vm829_vm6, %v2589_v10  ;;  %v1423_v29 = vrot.slane %v1421_v3, 4  ;;  %v2584_v51 = vrot.slane %v2514_v38, 4  ;;  %v1428_v1 = vrot.slane %v1426_v11, 3  ;;  %v2585_v6 = vrot.slane %v2515_v4, 4 }
 0x34f   : > { %4212 = vmatmul.mubr.bf16.gmra.mrb[52].mxu0 %v3910_v25  ;;  %3005 = vst.msk [vmem:[#allocation4 + $0xb0] sm:$0xff] %vm1746_vm10, %v9821_v23  ;;  %v1431_v58 = vrot.slane %v1429_v24, 4  ;;  %v1401_v14 = vshrl.u32 %v1262_v0, 16  ;;  %v2436_v60 = vsel %vm1280_vm8, %v2427_v18, %v2435_v34  ;;  %v1404_v41 = vshll.u32 %v1262_v0, 16  ;;  %v2519_v45 = vld [vmem:[#allocation3 + $0xa8] sm:$0xf] }
 0x350   : > { %v1424_v36 = vor.u32 %v1423_v29, %v1420_v50  ;;  %v1409_v40 = vshrl.u32 %v1263_v37, 16  ;;  %v3334_v5 = vpop.permute.xlu0 %3333  ;;  %v2586_v57 = vsel %vm452_vm0, %v2584_v51, %v2585_v6  ;;  %v1412_v23 = vshll.u32 %v1263_v37, 16  ;;  %v1266_v43 = vld [vmem:[#allocation3 + $0xa0] sm:$0xf8]  ;;  %v1267_v61 = vld [vmem:[#allocation3 + $0xa8] sm:$0xf] }
 0x351   : > { %2467 = vrot.lane.b32.xlu1 %v2436_v60, %s8786_s15  ;;  %v1432_v53 = vor.u32 %v1431_v58, %v1428_v1  ;;  %v1403_v16 = vrot.slane %v1401_v14, 3  ;;  %3374 = vst.msk [vmem:[#allocation4 + $0xb0] sm:$0xff] %vm2116_vm11, %v3334_v5  ;;  %v9907_v28 = vpop.permute.xlu1 %1718  ;;  %v1406_v27 = vrot.slane %v1404_v41, 4  ;;  %v2593_v63 = vrot.slane %v2520_v44, 4  ;;  %v2524_v2 = vld [vmem:[#allocation3 + $0xd0] sm:$0xf0] }
 0x352   : > { %2636 = vst.msk [vmem:[#allocation4 + $0x98] sm:$0xff] %vm829_vm6, %v2586_v57  ;;  %v1411_v8 = vrot.slane %v1409_v40, 3  ;;  %v2594_v47 = vrot.slane %v2521_v46, 4  ;;  %v1414_v38 = vrot.slane %v1412_v23, 4  ;;  %v1452_v48 = vshrl.u32 %v1268_v22, 16 }
 0x353   : > { %3550 = vst.msk [vmem:[#allocation4 + $0xb0] sm:$0xff] %vm2485_vm12, %v9870_v15  ;;  %v1433_v13 = vsel %vm1280_vm8, %v1424_v36, %v1432_v53  ;;  %v1455_v49 = vshll.u32 %v1268_v22, 16  ;;  %v1407_v17 = vor.u32 %v1406_v27, %v1403_v16  ;;  %v1460_v35 = vshrl.u32 %v1269_v52, 16  ;;  %v2525_v3 = vld [vmem:[#allocation3 + $0xd8] sm:$0xf] }
 0x354   : > { %3004 = vst.msk [vmem:[#allocation4 + $0x98] sm:$0xff] %vm1746_vm10, %v9848_v42  ;;  %v2595_v4 = vsel %vm452_vm0, %v2593_v63, %v2594_v47  ;;  %v1463_v15 = vshll.u32 %v1269_v52, 16  ;;  %v2967_v56 = vpop.permute.xlu0 %2966  ;;  %v1415_v42 = vor.u32 %v1414_v38, %v1411_v8  ;;  %v1454_v0 = vrot.slane %v1452_v48, 3  ;;  %v1272_v10 = vld [vmem:[#allocation3 + $0xd0] sm:$0xf8] }
 0x355   : > { %1577 = vst.msk [vmem:[#allocation4 + $0xc0] sm:$0xff] %vm829_vm6, %v1433_v13  ;;  %2639 = vst.msk [vmem:[#allocation4 + $0xe0] sm:$0xff] %vm829_vm6, %v2595_v4  ;;  %v1457_v25 = vrot.slane %v1455_v49, 4  ;;  %v9924_v18 = vpop.permute.xlu1 %1716  ;;  %v1435_v37 = vshrl.u32 %v1266_v43, 16  ;;  %v1273_v34 = vld [vmem:[#allocation3 + $0xd8] sm:$0xf] }
 0x356   : > { %3373 = vst.msk [vmem:[#allocation4 + $0x98] sm:$0xff] %vm2116_vm11, %v9811_v31  ;;  %v2590_v31 = vrot.slane %v2518_v7, 4  ;;  %v1465_v24 = vrot.slane %v1463_v15, 4  ;;  %v1416_v29 = vsel %vm1280_vm8, %v1407_v17, %v1415_v42  ;;  %v1438_v44 = vshll.u32 %v1266_v43, 16  ;;  %v2522_v6 = vld [vmem:[#allocation3 + $0xc0] sm:$0xf0] }
 0x357   : > { %1755 = vst.msk [vmem:[#allocation4 + $0xc0] sm:$0xff] %vm1746_vm10, %v9835_v20  ;;  %v9926_v11 = vpop.f32.mrb[40].mxu1  ;;  %3007 = vst.msk [vmem:[#allocation4 + $0xe0] sm:$0xff] %vm1746_vm10, %v9892_v59  ;;  %v1462_v20 = vrot.slane %v1460_v35, 3  ;;  %v1458_v51 = vor.u32 %v1457_v25, %v1454_v0  ;;  %v1443_v1 = vshrl.u32 %v1267_v61, 16  ;;  %v1437_v14 = vrot.slane %v1435_v37, 3 }
 0x358   : > { %3549 = vst.msk [vmem:[#allocation4 + $0x98] sm:$0xff] %vm2485_vm12, %v9787_v26  ;;  %v2591_v26 = vrot.slane %v2519_v45, 4  ;;  %v9932_v50 = vpop.f32.mrb[41].mxu1  ;;  %v1446_v46 = vshll.u32 %v1267_v61, 16  ;;  %v2523_v60 = vld [vmem:[#allocation3 + $0xc8] sm:$0xf]  ;;  %v9955_v8 = vpop.permute.xlu0 %3515 }
 0x359   : > { %2125 = vst.msk [vmem:[#allocation4 + $0xc0] sm:$0xff] %vm2116_vm11, %v9873_v62  ;;  %v9935_v58 = vpop.f32.mrb[42].mxu1  ;;  %v1466_v62 = vor.u32 %v1465_v24, %v1462_v20  ;;  %v1440_v41 = vrot.slane %v1438_v44, 4  ;;  %v1445_v40 = vrot.slane %v1443_v1, 3  ;;  %v9944_v5 = vpop.permute.xlu1 %2455  ;;  %v2599_v22 = vrot.slane %v2524_v2, 4  ;;  %v3913_v45 = vld [vmem:[#allocation4 + $0x90] sm:$0xff] }
 0x35a   : > { %1576 = vst.msk [vmem:[#allocation4 + $0xa8] sm:$0xff] %vm829_vm6, %v1416_v29  ;;  %v2592_v59 = vsel %vm452_vm0, %v2590_v31, %v2591_v26  ;;  %v9939_v36 = vpop.f32.mrb[43].mxu1  ;;  %v2600_v52 = vrot.slane %v2525_v3, 4  ;;  %v1270_v53 = vld [vmem:[#allocation3 + $0xc0] sm:$0xf8]  ;;  %v1448_v16 = vrot.slane %v1446_v46, 4 }
 0x35b   : > { %1754 = vst.msk [vmem:[#allocation4 + $0xa8] sm:$0xff] %vm1746_vm10, %v9852_v55  ;;  %v1467_v57 = vsel %vm1280_vm8, %v1458_v51, %v1466_v62  ;;  %v1486_v23 = vshrl.u32 %v1272_v10, 16  ;;  %v1489_v7 = vshll.u32 %v1272_v10, 16  ;;  %v1271_v55 = vld [vmem:[#allocation3 + $0xc8] sm:$0xf]  ;;  %v1441_v27 = vor.u32 %v1440_v41, %v1437_v14  ;;  %v3917_v38 = vld [vmem:[#allocation4 + $0xb0] sm:$0xff] }
 0x35c   : > { %2638 = vst.msk [vmem:[#allocation4 + $0xc8] sm:$0xff] %vm829_vm6, %v2592_v59  ;;  %1579 = vst.msk [vmem:[#allocation4 + $0xf0] sm:$0xff] %vm829_vm6, %v1467_v57  ;;  %v1494_v63 = vshrl.u32 %v1273_v34, 16  ;;  %v1497_v47 = vshll.u32 %v1273_v34, 16  ;;  %v2528_v43 = vld [vmem:[#allocation3 + $0xf0] sm:$0xf0]  ;;  %v9970_v1 = vpop.permute.xlu0 %3513 }
 0x35d   : > { %2124 = vst.msk [vmem:[#allocation4 + $0xa8] sm:$0xff] %vm2116_vm11, %v9897_v12  ;;  %v2601_v12 = vsel %vm452_vm0, %v2599_v22, %v2600_v52  ;;  %v1491_v48 = vrot.slane %v1489_v7, 4  ;;  %v2596_v49 = vrot.slane %v2522_v6, 4  ;;  %v2597_v4 = vrot.slane %v2523_v60, 4  ;;  %v2529_v15 = vld [vmem:[#allocation3 + $0xf8] sm:$0xf] }
 0x35e   : > { %3006 = vst.msk [vmem:[#allocation4 + $0xc8] sm:$0xff] %vm1746_vm10, %v2967_v56  ;;  %1757 = vst.msk [vmem:[#allocation4 + $0xf0] sm:$0xff] %vm1746_vm10, %v9907_v28  ;;  %v1496_v61 = vrot.slane %v1494_v63, 3  ;;  %v1499_v17 = vrot.slane %v1497_v47, 4  ;;  %v1469_v35 = vshrl.u32 %v1270_v53, 16  ;;  %v2089_v28 = vpop.permute.xlu1 %2088  ;;  %v1472_v3 = vshll.u32 %v1270_v53, 16 }
 0x35f   : > { %2493 = vst.msk [vmem:[#allocation4 + $0xa8] sm:$0xff] %vm2485_vm12, %v9862_v9  ;;  %v3914_v13 = vld [vmem:[#allocation4 + $0x98] sm:$0xff]  ;;  %v1449_v9 = vor.u32 %v1448_v16, %v1445_v40  ;;  %v1276_v42 = vld [vmem:[#allocation3 + $0xf0] sm:$0xf8]  ;;  %v2598_v31 = vsel %vm452_vm0, %v2596_v49, %v2597_v4  ;;  %v1480_v20 = vshll.u32 %v1271_v55, 16  ;;  %v2605_v29 = vrot.slane %v2528_v43, 4 }
 0x360   : > { %3375 = vst.msk [vmem:[#allocation4 + $0xc8] sm:$0xff] %vm2116_vm11, %v9884_v19  ;;  %v1488_v19 = vrot.slane %v1486_v23, 3  ;;  %4219 = vmatprep.mubr.bf16.mxu0 %v3914_v13  ;;  %v1277_v0 = vld [vmem:[#allocation3 + $0xf8] sm:$0xf]  ;;  %2127 = vst.msk [vmem:[#allocation4 + $0xf0] sm:$0xff] %vm2116_vm11, %v2089_v28  ;;  %v1500_v25 = vor.u32 %v1499_v17, %v1496_v61  ;;  %v1471_v10 = vrot.slane %v1469_v35, 3 }
 0x361   : > { %3551 = vst.msk [vmem:[#allocation4 + $0xc8] sm:$0xff] %vm2485_vm12, %v9858_v32  ;;  %4220 = vmatmul.mubr.bf16.gmra.mrb[56].mxu0 %v3913_v45  ;;  %v1450_v56 = vsel %vm1280_vm8, %v1441_v27, %v1449_v9  ;;  %v1477_v32 = vshrl.u32 %v1271_v55, 16  ;;  %v2526_v24 = vld [vmem:[#allocation3 + $0xe0] sm:$0xf0]  ;;  %v2527_v26 = vld [vmem:[#allocation3 + $0xe8] sm:$0xf] }
 0x362   : > { %2641 = vst.msk [vmem:[#allocation4 + $0x110] sm:$0xff] %vm829_vm6, %v2601_v12  ;;  %v1492_v2 = vor.u32 %v1491_v48, %v1488_v19  ;;  %1578 = vst.msk [vmem:[#allocation4 + $0xd8] sm:$0xff] %vm829_vm6, %v1450_v56  ;;  %4227 = vmatprep.mubr.bf16.mxu0 %v3917_v38  ;;  %v1474_v37 = vrot.slane %v1472_v3, 4  ;;  %v2606_v51 = vrot.slane %v2529_v15, 4  ;;  %v1274_v44 = vld [vmem:[#allocation3 + $0xe0] sm:$0xf8] }
 0x363   : > { %1756 = vst.msk [vmem:[#allocation4 + $0xd8] sm:$0xff] %vm1746_vm10, %v9924_v18  ;;  %v1479_v34 = vrot.slane %v1477_v32, 3  ;;  %v1482_v62 = vrot.slane %v1480_v20, 4  ;;  %v1520_v59 = vshrl.u32 %v1276_v42, 16  ;;  %v1523_v14 = vshll.u32 %v1276_v42, 16  ;;  %v9981_v28 = vpop.permute.xlu0 %3339 }
 0x364   : > { %2640 = vst.msk [vmem:[#allocation4 + $0xf8] sm:$0xff] %vm829_vm6, %v2598_v31  ;;  %v1501_v6 = vsel %vm1280_vm8, %v1492_v2, %v1500_v25  ;;  %v1275_v46 = vld [vmem:[#allocation3 + $0xe8] sm:$0xf]  ;;  %v1475_v60 = vor.u32 %v1474_v37, %v1471_v10  ;;  %v2607_v18 = vsel %vm452_vm0, %v2605_v29, %v2606_v51  ;;  %v1528_v41 = vshrl.u32 %v1277_v0, 16  ;;  %v2530_v22 = vld [vmem:[#allocation3 + $0x100] sm:$0xf0] }
 0x365   : > { %1581 = vst.msk [vmem:[#allocation4 + $0x120] sm:$0xff] %vm829_vm6, %v1501_v6  ;;  %v1531_v40 = vshll.u32 %v1277_v0, 16  ;;  %v2531_v52 = vld [vmem:[#allocation3 + $0x108] sm:$0xf]  ;;  %v1483_v53 = vor.u32 %v1482_v62, %v1479_v34  ;;  %2643 = vst.msk [vmem:[#allocation4 + $0x140] sm:$0xff] %vm829_vm6, %v2607_v18  ;;  %v1522_v57 = vrot.slane %v1520_v59, 3 }
 0x366   : > { %v1525_v16 = vrot.slane %v1523_v14, 4  ;;  %v2602_v23 = vrot.slane %v2526_v24, 4  ;;  %v1278_v7 = vld [vmem:[#allocation3 + $0x100] sm:$0xf8]  ;;  %v1530_v45 = vrot.slane %v1528_v41, 3  ;;  %v2603_v12 = vrot.slane %v2527_v26, 4  ;;  %v2454_v49 = vpop.permute.xlu1 %2453 }
 0x367   : > { %v1533_v27 = vrot.slane %v1531_v40, 4  ;;  %v1503_v63 = vshrl.u32 %v1274_v44, 16  ;;  %v1279_v47 = vld [vmem:[#allocation3 + $0x108] sm:$0xf]  ;;  %v1484_v13 = vsel %vm1280_vm8, %v1475_v60, %v1483_v53  ;;  %v1506_v38 = vshll.u32 %v1274_v44, 16  ;;  %v9978_v61 = vpop.f32.mrb[44].mxu1 }
 0x368   : > { %v3920_v55 = vld [vmem:[#allocation4 + $0xc8] sm:$0xff]  ;;  %v1526_v9 = vor.u32 %v1525_v16, %v1522_v57  ;;  %v1511_v19 = vshrl.u32 %v1275_v46, 16  ;;  %v2532_v48 = vld [vmem:[#allocation3 + $0x110] sm:$0xf0]  ;;  %1580 = vst.msk [vmem:[#allocation4 + $0x108] sm:$0xff] %vm829_vm6, %v1484_v13  ;;  %v2604_v4 = vsel %vm452_vm0, %v2602_v23, %v2603_v12  ;;  %v1514_v15 = vshll.u32 %v1275_v46, 16 }
 0x369   : > { %v3916_v43 = vld [vmem:[#allocation4 + $0xa8] sm:$0xff]  ;;  %v1534_v17 = vor.u32 %v1533_v27, %v1530_v45  ;;  %v1505_v35 = vrot.slane %v1503_v63, 3  ;;  %v2533_v56 = vld [vmem:[#allocation3 + $0x118] sm:$0xf]  ;;  %2494 = vst.msk [vmem:[#allocation4 + $0xc0] sm:$0xff] %vm2485_vm12, %v2454_v49  ;;  %v9984_v2 = vpop.f32.mrb[45].mxu1 }
 0x36a   : > { %4228 = vmatmul.mubr.bf16.gmra.mrb[60].mxu0 %v3916_v43  ;;  %2642 = vst.msk [vmem:[#allocation4 + $0x128] sm:$0xff] %vm829_vm6, %v2604_v4  ;;  %v1508_v3 = vrot.slane %v1506_v38, 4  ;;  %v1513_v32 = vrot.slane %v1511_v19, 3  ;;  %v2608_v42 = vrot.slane %v2530_v22, 4  ;;  %v2609_v0 = vrot.slane %v2531_v52, 4  ;;  %v9987_v25 = vpop.f32.mrb[46].mxu1 }
 0x36b   : > { %4235 = vmatprep.mubr.bf16.mxu0 %v3920_v55  ;;  %v1535_v31 = vsel %vm1280_vm8, %v1526_v9, %v1534_v17  ;;  %v1516_v10 = vrot.slane %v1514_v15, 4  ;;  %v1537_v20 = vshrl.u32 %v1278_v7, 16  ;;  %v1540_v24 = vshll.u32 %v1278_v7, 16  ;;  %v3589_v26 = vld [vmem:[#allocation3 + $0x120] sm:$0xf0]  ;;  %v9990_v37 = vpop.f32.mrb[47].mxu1 }
 0x36c   : > { %1583 = vst.msk [vmem:[#allocation4 + $0x150] sm:$0xff] %vm829_vm6, %v1535_v31  ;;  %v1509_v34 = vor.u32 %v1508_v3, %v1505_v35  ;;  %v2610_v29 = vsel %vm452_vm0, %v2608_v42, %v2609_v0  ;;  %v1545_v51 = vshrl.u32 %v1279_v47, 16  ;;  %v1548_v44 = vshll.u32 %v1279_v47, 16  ;;  %v3590_v6 = vld [vmem:[#allocation3 + $0x128] sm:$0x1f] }
 0x36d   : > { %v1517_v62 = vor.u32 %v1516_v10, %v1513_v32  ;;  %2644 = vst.msk [vmem:[#allocation4 + $0x158] sm:$0xff] %vm829_vm6, %v2610_v29  ;;  %v1539_v59 = vrot.slane %v1537_v20, 3  ;;  %v1542_v14 = vrot.slane %v1540_v24, 4  ;;  %v2611_v46 = vrot.slane %v2532_v48, 4  ;;  %v2973_v16 = vpop.permute.xlu0 %2972  ;;  %v6372_v49 = vld [vmem:[#allocation3 + $0x130] sm:$0xe0] }
 0x36e   : > { %v1547_v60 = vrot.slane %v1545_v51, 3  ;;  %v1550_v18 = vrot.slane %v1548_v44, 4  ;;  %v2612_v41 = vrot.slane %v2533_v56, 4  ;;  %v3847_v40 = vshrl.u32 %v3589_v26, 16  ;;  %3009 = vst.msk [vmem:[#allocation4 + $0x110] sm:$0xff] %vm1746_vm10, %v2973_v16 }
 0x36f   : > { %v1518_v22 = vsel %vm1280_vm8, %v1509_v34, %v1517_v62  ;;  %v1543_v52 = vor.u32 %v1542_v14, %v1539_v59  ;;  %v3850_v53 = vshll.u32 %v3589_v26, 16  ;;  %v3855_v57 = vshrl.u32 %v3590_v6, 16  ;;  %v2087_v47 = vpop.permute.xlu1 %2086  ;;  %v6373_v17 = vld [vmem:[#allocation3 + $0x138] sm:$0x1f] }
 0x370   : > { %1582 = vst.msk [vmem:[#allocation4 + $0x138] sm:$0xff] %vm829_vm6, %v1518_v22  ;;  %v1551_v23 = vor.u32 %v1550_v18, %v1547_v60  ;;  %v2613_v7 = vsel %vm452_vm0, %v2611_v46, %v2612_v41  ;;  %v3849_v55 = vrot.slane %v3847_v40, 4  ;;  %v3858_v45 = vshll.u32 %v3590_v6, 16  ;;  %v3919_v27 = vld [vmem:[#allocation4 + $0xc0] sm:$0xff] }
 0x371   : > { %2645 = vst.msk [vmem:[#allocation4 + $0x170] sm:$0xff] %vm829_vm6, %v2613_v7  ;;  %v3852_v12 = vrot.slane %v3850_v53, 5  ;;  %v3857_v63 = vrot.slane %v3855_v57, 4  ;;  %v6452_v32 = vrot.slane %v6373_v17, 5 }
 0x372   : > { %4236 = vmatmul.mubr.bf16.gmra.mrb[64].mxu0 %v3919_v27  ;;  %v1552_v43 = vsel %vm1280_vm8, %v1543_v52, %v1551_v23  ;;  %v3860_v13 = vrot.slane %v3858_v45, 5  ;;  %2126 = vst.msk [vmem:[#allocation4 + $0xd8] sm:$0xff] %vm2116_vm11, %v2087_v47  ;;  %v10005_v38 = vpop.f32.mrb[48].mxu1 }
 0x373   : > { %1584 = vst.msk [vmem:[#allocation4 + $0x168] sm:$0xff] %vm829_vm6, %v1552_v43  ;;  %v3853_v9 = vor.u32 %v3852_v12, %v3849_v55  ;;  %v10007_v48 = vpop.f32.mrb[49].mxu1  ;;  %v1723_v4 = vpop.permute.xlu1 %1722 }
 0x374   : > { %2495 = vst.msk [vmem:[#allocation4 + $0xd8] sm:$0xff] %vm2485_vm12, %v9944_v5  ;;  %v3861_v19 = vor.u32 %v3860_v13, %v3857_v63  ;;  %v10009_v35 = vpop.f32.mrb[50].mxu1  ;;  %v3338_v56 = vpop.permute.xlu0 %3337  ;;  %v6451_v5 = vrot.slane %v6372_v49, 5 }
 0x375   : > { %1759 = vst.msk [vmem:[#allocation4 + $0x120] sm:$0xff] %vm1746_vm10, %v1723_v4  ;;  %v10013_v3 = vpop.f32.mrb[51].mxu1 }
 0x376   : > { %v3862_v15 = vsel %vm1795_vm7, %v3853_v9, %v3861_v19  ;;  %3376 = vst.msk [vmem:[#allocation4 + $0xe0] sm:$0xff] %vm2116_vm11, %v3338_v56  ;;  %v6453_v31 = vsel %vm5380_vm9, %v6451_v5, %v6452_v32 }
 0x377   : > { %3894 = vst.msk [vmem:[#allocation4 + $0x178] sm:$0xff] %vm829_vm6, %v3862_v15  ;;  %v1721_v42 = vpop.permute.xlu1 %1720 }
 0x378   : > { %3552 = vst.msk [vmem:[#allocation4 + $0xe0] sm:$0xff] %vm2485_vm12, %v9970_v1  ;;  %v2971_v0 = vpop.permute.xlu0 %2970 }
 0x379   : > { %1758 = vst.msk [vmem:[#allocation4 + $0x108] sm:$0xff] %vm1746_vm10, %v1721_v42  ;;  %3008 = vst.msk [vmem:[#allocation4 + $0xf8] sm:$0xff] %vm1746_vm10, %v2971_v0 }
 0x37a   : > { %3377 = vst.msk [vmem:[#allocation4 + $0xf8] sm:$0xff] %vm2116_vm11, %v9981_v28 }
 0x37b   : > { %3553 = vst.msk [vmem:[#allocation4 + $0xf8] sm:$0xff] %vm2485_vm12, %v9955_v8  ;;  %v3922_v26 = vld [vmem:[#allocation4 + $0xd8] sm:$0xff] }
 0x37c   : > { %v3520_v20 = vpop.permute.xlu0 %3519  ;;  %v2460_v24 = vpop.permute.xlu1 %2459 }
 0x37e   : > { %v3942_v10 = vld [vmem:[#allocation4 + $0x178] sm:$0xff] }
 0x37f   : > { %8545 = vmatmul.mubr.msk.bf16.gmra.mrb[64].mxu1 %vm829_vm6, %v3942_v10  ;;  %6485 = vst.msk [vmem:[#allocation4 + $0x178] sm:$0xff] %vm829_vm6, %v6453_v31  ;;  %v3923_v1 = vld [vmem:[#allocation4 + $0xe0] sm:$0xff]  ;;  %v10028_v34 = vpop.f32.mrb[52].mxu1 }
 0x380   : > { %4243 = vmatprep.mubr.bf16.mxu0 %v3923_v1  ;;  %v10030_v29 = vpop.f32.mrb[53].mxu1  ;;  %v3518_v51 = vpop.permute.xlu0 %3517 }
 0x381   : > { %4244 = vmatmul.mubr.bf16.gmra.mrb[68].mxu0 %v3922_v26  ;;  %v2093_v28 = vpop.permute.xlu1 %2092  ;;  %v10033_v8 = vpop.f32.mrb[54].mxu1 }
 0x382   : > { %2129 = vst.msk [vmem:[#allocation4 + $0x120] sm:$0xff] %vm2116_vm11, %v2093_v28  ;;  %v3926_v44 = vld [vmem:[#allocation4 + $0xf8] sm:$0xff]  ;;  %v10035_v6 = vpop.f32.mrb[55].mxu1 }
 0x383   : > { %4251 = vmatprep.mubr.bf16.mxu0 %v3926_v44  ;;  %v8737_v44 = vld [vmem:[%s11127_s2 + $0x20] sm:$0xff]  }
 0x384   : > { %v3344_v62 = vpop.permute.xlu0 %3343  ;;  %8548 = vmatprep.subr.bf16.mxu1 %v8737_v44 }
 0x385   : > { %v2458_v59 = vpop.permute.xlu1 %2457  ;;  %8549 = vmatpush3.bf16.msra.mxu1 %v8737_v44 }
 0x386   : > { %2496 = vst.msk [vmem:[#allocation4 + $0xf0] sm:$0xff] %vm2485_vm12, %v2458_v59 }
 0x387   : > { %v10038_v14 = vpop.f32.mrb[56].mxu1 }
 0x388   : > { %v10040_v46 = vpop.f32.mrb[57].mxu1 }
 0x389   : > { %v10042_v60 = vpop.f32.mrb[58].mxu1 }
 0x38a   : > { %v10044_v18 = vpop.f32.mrb[59].mxu1  ;;  %v2977_v41 = vpop.permute.xlu0 %2976 }
 0x38b   : > { %3011 = vst.msk [vmem:[#allocation4 + $0x140] sm:$0xff] %vm1746_vm10, %v2977_v41  ;;  %v10086_v41 = vld [vmem:[%s11131_s6 + $0x2] ss:$0 sm:$0xff] }
 0x38c   : > { %v2091_v40 = vpop.permute.xlu1 %2090 }
 0x38d   : > { %v3925_v22 = vld [vmem:[#allocation4 + $0xf0] sm:$0xff]  ;;  %2128 = vst.msk [vmem:[#allocation4 + $0x108] sm:$0xff] %vm2116_vm11, %v2091_v40 }
 0x38e   : > { %4252 = vmatmul.mubr.bf16.gmra.mrb[72].mxu0 %v3925_v22  ;;  %2497 = vst.msk [vmem:[#allocation4 + $0x108] sm:$0xff] %vm2485_vm12, %v2460_v24 }
 0x390   : > { %v1727_v52 = vpop.permute.xlu1 %1726 }
 0x391   : > { %v10049_v53 = vpop.f32.mrb[60].mxu1  ;;  %1761 = vst.msk [vmem:[#allocation4 + $0x150] sm:$0xff] %vm1746_vm10, %v1727_v52 }
 0x392   : > { %v10052_v57 = vpop.f32.mrb[61].mxu1 }
 0x393   : > { %v3342_v16 = vpop.permute.xlu0 %3341  ;;  %v10054_v23 = vpop.f32.mrb[62].mxu1 }
 0x394   : > { %3378 = vst.msk [vmem:[#allocation4 + $0x110] sm:$0xff] %vm2116_vm11, %v3342_v16  ;;  %v10057_v7 = vpop.f32.mrb[63].mxu1  ;;  %v1725_v55 = vpop.permute.xlu1 %1724 }
 0x395   : > { %3554 = vst.msk [vmem:[#allocation4 + $0x110] sm:$0xff] %vm2485_vm12, %v3518_v51  ;;  %v3928_v47 = vld [vmem:[#allocation4 + $0x108] sm:$0xff] }
 0x396   : > { %1760 = vst.msk [vmem:[#allocation4 + $0x138] sm:$0xff] %vm1746_vm10, %v1725_v55 }
 0x397   : > { %v2975_v45 = vpop.permute.xlu0 %2974 }
 0x398   : > { %3010 = vst.msk [vmem:[#allocation4 + $0x128] sm:$0xff] %vm1746_vm10, %v2975_v45 }
 0x399   : > { %3379 = vst.msk [vmem:[#allocation4 + $0x128] sm:$0xff] %vm2116_vm11, %v3344_v62 }
 0x39a   : > { %3555 = vst.msk [vmem:[#allocation4 + $0x128] sm:$0xff] %vm2485_vm12, %v3520_v20 }
 0x39b   : > { %v3522_v27 = vpop.permute.xlu0 %3521  ;;  %v2464_v12 = vpop.permute.xlu1 %2463 }
 0x39c   : > { %v3929_v63 = vld [vmem:[#allocation4 + $0x110] sm:$0xff] }
 0x39d   : > { %4259 = vmatprep.mubr.bf16.mxu0 %v3929_v63 }
 0x39e   : > { %4260 = vmatmul.mubr.bf16.gmra.mrb[76].mxu0 %v3928_v47  ;;  %v8739_v47 = vld [vmem:[%s11127_s2 + $0x30] sm:$0xff]  }
 0x39f   : > { %v3348_v43 = vpop.permute.xlu0 %3347 }
 0x3a0   : > { %v2462_v13 = vpop.permute.xlu1 %2461 }
 0x3a1   : > { %2498 = vst.msk [vmem:[#allocation4 + $0x120] sm:$0xff] %vm2485_vm12, %v2462_v13  ;;  %v3932_v9 = vld [vmem:[#allocation4 + $0x128] sm:$0xff] }
 0x3a2   : > { %4267 = vmatprep.mubr.bf16.mxu0 %v3932_v9 }
 0x3a3   : > { %v3346_v19 = vpop.permute.xlu0 %3345 }
 0x3a4   : > { %3380 = vst.msk [vmem:[#allocation4 + $0x140] sm:$0xff] %vm2116_vm11, %v3346_v19 }
 0x3a5   : > { %3556 = vst.msk [vmem:[#allocation4 + $0x140] sm:$0xff] %vm2485_vm12, %v3522_v27  ;;  %v8738_v27 = vld [vmem:[%s11127_s2 + $0x28] sm:$0xff]  }
 0x3a6   : > { %v2095_v49 = vpop.permute.xlu1 %2094  ;;  %8550 = vmatprep.subr.bf16.mxu1 %v8738_v27 }
 0x3a7   : > { %2130 = vst.msk [vmem:[#allocation4 + $0x138] sm:$0xff] %vm2116_vm11, %v2095_v49  ;;  %v3524_v56 = vpop.permute.xlu0 %3523  ;;  %8551 = vmatpush3.bf16.msra.mxu1 %v8738_v27 }
 0x3a8   : > { %v3931_v17 = vld [vmem:[#allocation4 + $0x120] sm:$0xff]  ;;  %2499 = vst.msk [vmem:[#allocation4 + $0x138] sm:$0xff] %vm2485_vm12, %v2464_v12  ;;  %8552 = vmatprep.subr.bf16.mxu1 %v8739_v47 }
 0x3a9   : > { %4268 = vmatmul.mubr.bf16.gmra.mrb[80].mxu0 %v3931_v17 }
 0x3ab   : > { %8553 = vmatpush3.bf16.msra.mxu1 %v8739_v47 }
 0x3ac   : > { %v3935_v15 = vld [vmem:[#allocation4 + $0x140] sm:$0xff] }
 0x3ad   : > { %v2097_v4 = vpop.permute.xlu1 %2096  ;;  %4275 = vmatprep.mubr.bf16.mxu0 %v3935_v15 }
 0x3ae   : > { %2131 = vst.msk [vmem:[#allocation4 + $0x150] sm:$0xff] %vm2116_vm11, %v2097_v4 }
 0x3af   : > { %v3934_v5 = vld [vmem:[#allocation4 + $0x138] sm:$0xff] }
 0x3b1   : > { %v1729_v32 = vpop.permute.xlu1 %1728  ;;  %4276 = vmatmul.mubr.bf16.gmra.mrb[84].mxu0 %v3934_v5 }
 0x3b2   : > { %1762 = vst.msk [vmem:[#allocation4 + $0x168] sm:$0xff] %vm1746_vm10, %v1729_v32 }
 0x3b3   : > { %v2979_v42 = vpop.permute.xlu0 %2978 }
 0x3b4   : > { %3012 = vst.msk [vmem:[#allocation4 + $0x158] sm:$0xff] %vm1746_vm10, %v2979_v42 }
 0x3b5   : > { %3381 = vst.msk [vmem:[#allocation4 + $0x158] sm:$0xff] %vm2116_vm11, %v3348_v43 }
 0x3b6   : > { %3557 = vst.msk [vmem:[#allocation4 + $0x158] sm:$0xff] %vm2485_vm12, %v3524_v56 }
 0x3b7   : > { %v2981_v0 = vpop.permute.xlu0 %2980 }
 0x3b8   : > { %3013 = vst.msk [vmem:[#allocation4 + $0x170] sm:$0xff] %vm1746_vm10, %v2981_v0 }
 0x3b9   : > { %v2466_v31 = vpop.permute.xlu1 %2465 }
 0x3ba   : > { %2500 = vst.msk [vmem:[#allocation4 + $0x150] sm:$0xff] %vm2485_vm12, %v2466_v31 }
 0x3bc   : > { %v3350_v10 = vpop.permute.xlu0 %3349 }
 0x3bd   : > { %3382 = vst.msk [vmem:[#allocation4 + $0x170] sm:$0xff] %vm2116_vm11, %v3350_v10  ;;  %v3938_v20 = vld [vmem:[#allocation4 + $0x158] sm:$0xff] }
 0x3be   : > { %4283 = vmatprep.mubr.bf16.mxu0 %v3938_v20  ;;  %v8740_v20 = vld [vmem:[%s11127_s2 + $0x38] sm:$0xff]  }
 0x3bf   : > { %v2099_v24 = vpop.permute.xlu1 %2098  ;;  %8554 = vmatprep.subr.bf16.mxu1 %v8740_v20 }
 0x3c0   : > { %2132 = vst.msk [vmem:[#allocation4 + $0x168] sm:$0xff] %vm2116_vm11, %v2099_v24  ;;  %v3526_v1 = vpop.permute.xlu0 %3525  ;;  %8555 = vmatpush3.bf16.msra.mxu1 %v8740_v20 }
 0x3c1   : > { %3558 = vst.msk [vmem:[#allocation4 + $0x170] sm:$0xff] %vm2485_vm12, %v3526_v1  ;;  %v3937_v26 = vld [vmem:[#allocation4 + $0x150] sm:$0xff] }
 0x3c2   : > { %4284 = vmatmul.mubr.bf16.gmra.mrb[88].mxu0 %v3937_v26 }
 0x3c3   : > { %v2468_v51 = vpop.permute.xlu1 %2467 }
 0x3c4   : > { %2501 = vst.msk [vmem:[#allocation4 + $0x168] sm:$0xff] %vm2485_vm12, %v2468_v51 }
 0x3c8   : > { %v3941_v28 = vld [vmem:[#allocation4 + $0x170] sm:$0xff] }
 0x3c9   : > { %4291 = vmatprep.mubr.bf16.mxu0 %v3941_v28 }
 0x3cb   : > { %v3940_v62 = vld [vmem:[#allocation4 + $0x168] sm:$0xff] }
 0x3cc   : > { %4292 = vmatmul.mubr.bf16.gmra.mrb[92].mxu0 %v3940_v62 }
 0x3db   : > { %v8136_v59 = vpop.f32.mrb[32].mxu0 }
 0x3dc   : > { %v8137_v40 = vpop.f32.mrb[33].mxu0 }
 0x3dd   : > { %v8138_v22 = vadd.f32 %v8137_v40, %v8136_v59  ;;  %v8139_v52 = vpop.f32.mrb[34].mxu0 }
 0x3de   : > { %v8140_v16 = vpop.f32.mrb[35].mxu0 }
 0x3df   : > { %v4174_v55 = vadd.f32 %v8138_v22, %v10086_v41  ;;  %v8141_v45 = vadd.f32 %v8140_v16, %v8139_v52 }
 0x3e1   : > { %v4335_v12 = vadd.f32 %v9877_v39, %v4174_v55  ;;  %v4177_v63 = vadd.f32 %v8141_v45, %v10086_v41 }
 0x3e3   : > { %v4338_v43 = vadd.f32 %v9886_v21, %v4177_v63  ;;  %v8142_v13 = vpop.f32.mrb[36].mxu0  ;;  %v4461_v19 = vmax.f32 %v4335_v12, 0.0 }
 0x3e4   : > { %v8143_v9 = vpop.f32.mrb[37].mxu0 }
 0x3e5   : > { %v4462_v49 = vmax.f32 %v4338_v43, 0.0  ;;  %v8144_v17 = vadd.f32 %v8143_v9, %v8142_v13  ;;  %v8145_v4 = vpop.f32.mrb[38].mxu0  ;;  %v8742_v9 = vld [vmem:[%s11127_s2 + $0x48] sm:$0xff]  }
 0x3e6   : > { %v8146_v15 = vpop.f32.mrb[39].mxu0 }
 0x3e7   : > { %v4182_v39 = vadd.f32 %v8144_v17, %v10086_v41  ;;  %v8147_v56 = vadd.f32 %v8146_v15, %v8145_v4  ;;  %v4493_v5 = vpack.c.bf16 %v4462_v49, %v4461_v19 }
 0x3e9   : > { %v4343_v32 = vadd.f32 %v9875_v30, %v4182_v39  ;;  %v4185_v42 = vadd.f32 %v8147_v56, %v10086_v41  ;;  %4525 = vrot.lane.b32.xlu0 %v4493_v5, %s8784_s30 }
 0x3eb   : > { %v4346_v21 = vadd.f32 %v9881_v33, %v4185_v42  ;;  %v4463_v0 = vmax.f32 %v4343_v32, 0.0  ;;  %v8741_v33 = vld [vmem:[%s11127_s2 + $0x40] sm:$0xff]  }
 0x3ec   : > { %8556 = vmatprep.subr.bf16.mxu1 %v8741_v33 }
 0x3ed   : > { %v4464_v31 = vmax.f32 %v4346_v21, 0.0  ;;  %8557 = vmatpush3.bf16.msra.mxu1 %v8741_v33 }
 0x3ee   : > { %8558 = vmatprep.subr.bf16.mxu1 %v8742_v9 }
 0x3ef   : > { %v4494_v10 = vpack.c.bf16 %v4464_v31, %v4463_v0 }
 0x3f1   : > { %4527 = vrot.lane.b32.xlu1 %v4494_v10, %s8784_s30  ;;  %8559 = vmatpush3.bf16.msra.mxu1 %v8742_v9 }
 0x3f9   : > { %v8148_v24 = vpop.f32.mrb[40].mxu0 }
 0x3fa   : > { %v8149_v1 = vpop.f32.mrb[41].mxu0 }
 0x3fb   : > { %v8150_v30 = vadd.f32 %v8149_v1, %v8148_v24  ;;  %v8151_v26 = vpop.f32.mrb[42].mxu0 }
 0x3fc   : > { %v8152_v51 = vpop.f32.mrb[43].mxu0 }
 0x3fd   : > { %v4190_v28 = vadd.f32 %v8150_v30, %v10086_v41  ;;  %v8153_v44 = vadd.f32 %v8152_v51, %v8151_v26 }
 0x3ff   : > { %v4351_v62 = vadd.f32 %v9932_v50, %v4190_v28  ;;  %v4193_v59 = vadd.f32 %v8153_v44, %v10086_v41 }
 0x401   : > { %v4354_v40 = vadd.f32 %v9939_v36, %v4193_v59  ;;  %v8154_v22 = vpop.f32.mrb[44].mxu0  ;;  %v4465_v16 = vmax.f32 %v4351_v62, 0.0 }
 0x402   : > { %v8155_v52 = vpop.f32.mrb[45].mxu0 }
 0x403   : > { %v4466_v55 = vmax.f32 %v4354_v40, 0.0  ;;  %v8156_v45 = vadd.f32 %v8155_v52, %v8154_v22  ;;  %v8157_v27 = vpop.f32.mrb[46].mxu0 }
 0x404   : > { %v8158_v12 = vpop.f32.mrb[47].mxu0 }
 0x405   : > { %v4495_v63 = vpack.c.bf16 %v4466_v55, %v4465_v16  ;;  %v4198_v47 = vadd.f32 %v8156_v45, %v10086_v41  ;;  %v8159_v43 = vadd.f32 %v8158_v12, %v8157_v27 }
 0x407   : > { %v4359_v13 = vadd.f32 %v9926_v11, %v4198_v47  ;;  %v4201_v50 = vadd.f32 %v8159_v43, %v10086_v41  ;;  %4529 = vrot.lane.b32.xlu0 %v4495_v63, %s8784_s30 }
 0x409   : > { %v4362_v36 = vadd.f32 %v9935_v58, %v4201_v50  ;;  %v4467_v19 = vmax.f32 %v4359_v13, 0.0 }
 0x40b   : > { %v4468_v49 = vmax.f32 %v4362_v36, 0.0 }
 0x40d   : > { %v4496_v17 = vpack.c.bf16 %v4468_v49, %v4467_v19 }
 0x40f   : > { %4531 = vrot.lane.b32.xlu1 %v4496_v17, %s8784_s30 }
 0x41a   : > { %v8160_v4 = vpop.f32.mrb[48].mxu0 }
 0x41b   : > { %v8161_v15 = vpop.f32.mrb[49].mxu0 }
 0x41c   : > { %v8162_v11 = vadd.f32 %v8161_v15, %v8160_v4  ;;  %v8163_v39 = vpop.f32.mrb[50].mxu0 }
 0x41d   : > { %v8164_v56 = vpop.f32.mrb[51].mxu0 }
 0x41e   : > { %v4206_v5 = vadd.f32 %v8162_v11, %v10086_v41  ;;  %v8165_v32 = vadd.f32 %v8164_v56, %v8163_v39 }
 0x420   : > { %v4367_v58 = vadd.f32 %v9984_v2, %v4206_v5  ;;  %v4209_v42 = vadd.f32 %v8165_v32, %v10086_v41 }
 0x422   : > { %v4370_v21 = vadd.f32 %v9990_v37, %v4209_v42  ;;  %v8166_v0 = vpop.f32.mrb[52].mxu0  ;;  %v4469_v10 = vmax.f32 %v4367_v58, 0.0 }
 0x423   : > { %v8167_v31 = vpop.f32.mrb[53].mxu0 }
 0x424   : > { %v4470_v20 = vmax.f32 %v4370_v21, 0.0  ;;  %v8168_v24 = vadd.f32 %v8167_v31, %v8166_v0  ;;  %v8169_v1 = vpop.f32.mrb[54].mxu0 }
 0x425   : > { %v8170_v30 = vpop.f32.mrb[55].mxu0 }
 0x426   : > { %v4497_v26 = vpack.c.bf16 %v4470_v20, %v4469_v10  ;;  %v4214_v51 = vadd.f32 %v8168_v24, %v10086_v41  ;;  %v8171_v28 = vadd.f32 %v8170_v30, %v8169_v1 }
 0x428   : > { %v4375_v44 = vadd.f32 %v9978_v61, %v4214_v51  ;;  %v4217_v33 = vadd.f32 %v8171_v28, %v10086_v41  ;;  %4533 = vrot.lane.b32.xlu0 %v4497_v26, %s8784_s30 }
 0x42a   : > { %v4378_v2 = vadd.f32 %v9987_v25, %v4217_v33  ;;  %v4471_v37 = vmax.f32 %v4375_v44, 0.0 }
 0x42c   : > { %v4472_v62 = vmax.f32 %v4378_v2, 0.0 }
 0x42e   : > { %v4498_v59 = vpack.c.bf16 %v4472_v62, %v4471_v37 }
 0x430   : > { %4535 = vrot.lane.b32.xlu1 %v4498_v59, %s8784_s30 }
 0x434   : > { %v8172_v40 = vpop.f32.mrb[56].mxu0 }
 0x435   : > { %v8173_v22 = vpop.f32.mrb[57].mxu0 }
 0x436   : > { %v8174_v52 = vadd.f32 %v8173_v22, %v8172_v40  ;;  %v8175_v16 = vpop.f32.mrb[58].mxu0 }
 0x437   : > { %v8176_v55 = vpop.f32.mrb[59].mxu0 }
 0x438   : > { %v4222_v45 = vadd.f32 %v8174_v52, %v10086_v41  ;;  %v8177_v27 = vadd.f32 %v8176_v55, %v8175_v16 }
 0x43a   : > { %v4383_v61 = vadd.f32 %v10007_v48, %v4222_v45  ;;  %v4225_v12 = vadd.f32 %v8177_v27, %v10086_v41 }
 0x43c   : > { %v4386_v63 = vadd.f32 %v10013_v3, %v4225_v12  ;;  %v4473_v43 = vmax.f32 %v4383_v61, 0.0 }
 0x43d   : > { %v8178_v25 = vpop.f32.mrb[60].mxu0 }
 0x43e   : > { %v8179_v47 = vpop.f32.mrb[61].mxu0  ;;  %v4474_v13 = vmax.f32 %v4386_v63, 0.0 }
 0x43f   : > { %v8180_v50 = vadd.f32 %v8179_v47, %v8178_v25  ;;  %v8181_v36 = vpop.f32.mrb[62].mxu0 }
 0x440   : > { %v8182_v9 = vpop.f32.mrb[63].mxu0  ;;  %v4499_v19 = vpack.c.bf16 %v4474_v13, %v4473_v43 }
 0x441   : > { %v4230_v49 = vadd.f32 %v8180_v50, %v10086_v41  ;;  %v8183_v17 = vadd.f32 %v8182_v9, %v8181_v36 }
 0x442   : > { %4537 = vrot.lane.b32.xlu0 %v4499_v19, %s8784_s30 }
 0x443   : > { %v4391_v4 = vadd.f32 %v10005_v38, %v4230_v49  ;;  %v4233_v15 = vadd.f32 %v8183_v17, %v10086_v41 }
 0x445   : > { %v4394_v48 = vadd.f32 %v10009_v35, %v4233_v15  ;;  %v8184_v3 = vpop.f32.mrb[64].mxu0  ;;  %v4475_v11 = vmax.f32 %v4391_v4, 0.0 }
 0x446   : > { %v8185_v56 = vpop.f32.mrb[65].mxu0 }
 0x447   : > { %v4476_v39 = vmax.f32 %v4394_v48, 0.0  ;;  %v8186_v5 = vadd.f32 %v8185_v56, %v8184_v3  ;;  %v8187_v32 = vpop.f32.mrb[66].mxu0 }
 0x448   : > { %v8188_v42 = vpop.f32.mrb[67].mxu0 }
 0x449   : > { %v4500_v58 = vpack.c.bf16 %v4476_v39, %v4475_v11  ;;  %v4238_v21 = vadd.f32 %v8186_v5, %v10086_v41  ;;  %v8189_v0 = vadd.f32 %v8188_v42, %v8187_v32 }
 0x44b   : > { %4539 = vrot.lane.b32.xlu1 %v4500_v58, %s8784_s30  ;;  %v4399_v38 = vadd.f32 %v10030_v29, %v4238_v21  ;;  %v4241_v31 = vadd.f32 %v8189_v0, %v10086_v41 }
 0x44d   : > { %v4402_v10 = vadd.f32 %v10035_v6, %v4241_v31  ;;  %v4477_v35 = vmax.f32 %v4399_v38, 0.0 }
 0x44f   : > { %v4478_v20 = vmax.f32 %v4402_v10, 0.0 }
 0x451   : > { %v4501_v24 = vpack.c.bf16 %v4478_v20, %v4477_v35 }
 0x452   : > { %v10147_v1 = vpop.f32.mrb[64].mxu1 }
 0x453   : > { %4541 = vrot.lane.b32.xlu0 %v4501_v24, %s8784_s30  ;;  %v10150_v30 = vpop.f32.mrb[65].mxu1 }
 0x454   : > { %v10152_v26 = vpop.f32.mrb[66].mxu1  ;;  %v8190_v51 = vpop.f32.mrb[68].mxu0 }
 0x455   : > { %v10154_v28 = vpop.f32.mrb[67].mxu1  ;;  %v8191_v44 = vpop.f32.mrb[69].mxu0 }
 0x456   : > { %v8192_v29 = vadd.f32 %v8191_v44, %v8190_v51  ;;  %v8193_v33 = vpop.f32.mrb[70].mxu0 }
 0x457   : > { %v8194_v2 = vpop.f32.mrb[71].mxu0 }
 0x458   : > { %v4246_v6 = vadd.f32 %v8192_v29, %v10086_v41  ;;  %v8195_v37 = vadd.f32 %v8194_v2, %v8193_v33 }
 0x45a   : > { %v4407_v62 = vadd.f32 %v10028_v34, %v4246_v6  ;;  %v4249_v59 = vadd.f32 %v8195_v37, %v10086_v41 }
 0x45b   : > { %v4526_v22 = vpop.permute.xlu0 %4525 }
 0x45c   : > { %v4410_v40 = vadd.f32 %v10033_v8, %v4249_v59  ;;  %4573 = vst.msk [vmem:[#allocation2] sm:$0xff] %vm2116_vm11, %v4526_v22  ;;  %v4479_v52 = vmax.f32 %v4407_v62, 0.0 }
 0x45e   : > { %v4480_v16 = vmax.f32 %v4410_v40, 0.0 }
 0x460   : > { %v4502_v55 = vpack.c.bf16 %v4480_v16, %v4479_v52 }
 0x461   : > { %v8196_v45 = vpop.f32.mrb[72].mxu0 }
 0x462   : > { %4543 = vrot.lane.b32.xlu1 %v4502_v55, %s8784_s30  ;;  %v8197_v27 = vpop.f32.mrb[73].mxu0 }
 0x463   : > { %v4589_v61 = vld [vmem:[#allocation2] sm:$0xff]  ;;  %v4528_v12 = vpop.permute.xlu1 %4527  ;;  %v8198_v63 = vadd.f32 %v8197_v27, %v8196_v45  ;;  %v8199_v25 = vpop.f32.mrb[74].mxu0 }
 0x464   : > { %8560 = vmatprep.mubr.msk.bf16.mxu1 %vm4657_vm13, %v4589_v61  ;;  %4574 = vst.msk [vmem:[#allocation2 + $0x8] sm:$0xff] %vm2116_vm11, %v4528_v12  ;;  %v8200_v34 = vpop.f32.mrb[75].mxu0 }
 0x465   : > { %v4254_v8 = vadd.f32 %v8198_v63, %v10086_v41  ;;  %v8201_v47 = vadd.f32 %v8200_v34, %v8199_v25 }
 0x467   : > { %v4415_v43 = vadd.f32 %v10040_v46, %v4254_v8  ;;  %v4257_v13 = vadd.f32 %v8201_v47, %v10086_v41 }
 0x469   : > { %v4418_v50 = vadd.f32 %v10044_v18, %v4257_v13  ;;  %v4481_v9 = vmax.f32 %v4415_v43, 0.0 }
 0x46b   : > { %v4590_v36 = vld [vmem:[#allocation2 + $0x8] sm:$0xff]  ;;  %v4482_v19 = vmax.f32 %v4418_v50, 0.0 }
 0x46c   : > { %8561 = vmatmul.mubr.msk.bf16.vlgmr.msra.gmra.mrb[68].mxu1 %vm4657_vm13, %v4590_v36 }
 0x46d   : > { %v4503_v49 = vpack.c.bf16 %v4482_v19, %v4481_v9 }
 0x46f   : > { %4545 = vrot.lane.b32.xlu0 %v4503_v49, %s8784_s30 }
 0x471   : > { %v8202_v17 = vpop.f32.mrb[76].mxu0 }
 0x472   : > { %v8203_v4 = vpop.f32.mrb[77].mxu0 }
 0x473   : > { %v8204_v15 = vadd.f32 %v8203_v4, %v8202_v17  ;;  %v8205_v48 = vpop.f32.mrb[78].mxu0 }
 0x474   : > { %v8206_v3 = vpop.f32.mrb[79].mxu0 }
 0x475   : > { %v4262_v11 = vadd.f32 %v8204_v15, %v10086_v41  ;;  %v8207_v46 = vadd.f32 %v8206_v3, %v8205_v48 }
 0x477   : > { %v4423_v39 = vadd.f32 %v10038_v14, %v4262_v11  ;;  %v4265_v18 = vadd.f32 %v8207_v46, %v10086_v41 }
 0x479   : > { %v4530_v56 = vpop.permute.xlu0 %4529  ;;  %v4426_v5 = vadd.f32 %v10042_v60, %v4265_v18  ;;  %v4483_v32 = vmax.f32 %v4423_v39, 0.0 }
 0x47a   : > { %4575 = vst.msk [vmem:[#allocation2 + $0x10] sm:$0xff] %vm2116_vm11, %v4530_v56 }
 0x47b   : > { %v4484_v58 = vmax.f32 %v4426_v5, 0.0 }
 0x47c   : > { %v8208_v42 = vpop.f32.mrb[80].mxu0 }
 0x47d   : > { %v4504_v21 = vpack.c.bf16 %v4484_v58, %v4483_v32  ;;  %v8209_v0 = vpop.f32.mrb[81].mxu0 }
 0x47e   : > { %v8210_v38 = vadd.f32 %v8209_v0, %v8208_v42  ;;  %v8211_v31 = vpop.f32.mrb[82].mxu0 }
 0x47f   : > { %v8212_v10 = vpop.f32.mrb[83].mxu0  ;;  %4547 = vrot.lane.b32.xlu1 %v4504_v21, %s8784_s30 }
 0x480   : > { %v4270_v35 = vadd.f32 %v8210_v38, %v10086_v41  ;;  %v8213_v14 = vadd.f32 %v8212_v10, %v8211_v31  ;;  %v5140_v38 = vld [vmem:[#allocation3] sm:$0xf0]  ;;  %v5141_v31 = vld [vmem:[#allocation3 + $0x8] sm:$0xf] }
 0x481   : > { %v4591_v20 = vld [vmem:[#allocation2 + $0x10] sm:$0xff]  ;;  %v4532_v24 = vpop.permute.xlu1 %4531  ;;  %v5204_v10 = vrot.slane %v5140_v38, 4 }
 0x482   : > { %8564 = vmatprep.mubr.msk.bf16.mxu1 %vm4657_vm13, %v4591_v20  ;;  %4576 = vst.msk [vmem:[#allocation2 + $0x18] sm:$0xff] %vm2116_vm11, %v4532_v24  ;;  %v4431_v60 = vadd.f32 %v10052_v57, %v4270_v35  ;;  %v4273_v51 = vadd.f32 %v8213_v14, %v10086_v41  ;;  %v5205_v35 = vrot.slane %v5141_v31, 4  ;;  %v5316_v14 = vld [vmem:[#allocation3] sm:$0xe0]  ;;  %v5317_v20 = vld [vmem:[#allocation3 + $0x8] sm:$0x1f] }
 0x483   : > { %v5381_v24 = vrot.slane %v5316_v14, 5 }
 0x484   : > { %v4434_v44 = vadd.f32 %v10057_v7, %v4273_v51  ;;  %v8214_v29 = vpop.f32.mrb[84].mxu0  ;;  %v4485_v2 = vmax.f32 %v4431_v60, 0.0  ;;  %v5382_v60 = vrot.slane %v5317_v20, 5  ;;  %v5142_v51 = vld [vmem:[#allocation3 + $0x10] sm:$0xf0] }
 0x485   : > { %v8215_v33 = vpop.f32.mrb[85].mxu0 }
 0x486   : > { %v4486_v6 = vmax.f32 %v4434_v44, 0.0  ;;  %v8216_v37 = vadd.f32 %v8215_v33, %v8214_v29  ;;  %v8217_v62 = vpop.f32.mrb[86].mxu0  ;;  %v5143_v44 = vld [vmem:[#allocation3 + $0x18] sm:$0xf]  ;;  %v5206_v29 = vsel %vm452_vm0, %v5204_v10, %v5205_v35  ;;  %v5383_v33 = vsel %vm5380_vm9, %v5381_v24, %v5382_v60 }
 0x487   : > { %v8218_v59 = vpop.f32.mrb[87].mxu0 }
 0x488   : > { %v4505_v40 = vpack.c.bf16 %v4486_v6, %v4485_v2  ;;  %v4278_v22 = vadd.f32 %v8216_v37, %v10086_v41  ;;  %v8219_v52 = vadd.f32 %v8218_v59, %v8217_v62  ;;  %v5207_v2 = vrot.slane %v5142_v51, 4  ;;  %v5318_v37 = vld [vmem:[#allocation3 + $0x10] sm:$0xe0]  ;;  %v5319_v62 = vld [vmem:[#allocation3 + $0x18] sm:$0x1f] }
 0x489   : > { %v4592_v16 = vld [vmem:[#allocation2 + $0x18] sm:$0xff]  ;;  %v5208_v6 = vrot.slane %v5143_v44, 4 }
 0x48a   : > { %8565 = vmatmul.mubr.msk.bf16.gmra.mrb[72].mxu1 %vm4657_vm13, %v4592_v16  ;;  %v4439_v57 = vadd.f32 %v10049_v53, %v4278_v22  ;;  %v4281_v55 = vadd.f32 %v8219_v52, %v10086_v41  ;;  %4549 = vrot.lane.b32.xlu0 %v4505_v40, %s8784_s30  ;;  %v5384_v22 = vrot.slane %v5318_v37, 5  ;;  %v5385_v52 = vrot.slane %v5319_v62, 5 }
 0x48b   : > { %v5209_v40 = vsel %vm452_vm0, %v5207_v2, %v5208_v6 }
 0x48c   : > { %v4442_v7 = vadd.f32 %v10054_v23, %v4281_v55  ;;  %v4487_v45 = vmax.f32 %v4439_v57, 0.0  ;;  %v5386_v16 = vsel %vm5380_vm9, %v5384_v22, %v5385_v52 }
 0x48e   : > { %v4488_v27 = vmax.f32 %v4442_v7, 0.0 }
 0x490   : > { %v4506_v61 = vpack.c.bf16 %v4488_v27, %v4487_v45 }
 0x492   : > { %4551 = vrot.lane.b32.xlu1 %v4506_v61, %s8784_s30 }
 0x495   : > { %v8220_v12 = vpop.f32.mrb[88].mxu0 }
 0x496   : > { %v8221_v63 = vpop.f32.mrb[89].mxu0 }
 0x497   : > { %v8222_v25 = vadd.f32 %v8221_v63, %v8220_v12  ;;  %v8223_v34 = vpop.f32.mrb[90].mxu0 }
 0x498   : > { %v8224_v8 = vpop.f32.mrb[91].mxu0 }
 0x499   : > { %v8225_v43 = vadd.f32 %v8224_v8, %v8223_v34  ;;  %v4286_v53 = vadd.f32 %v8222_v25, %v10086_v41  ;;  %v10231_v8 = vld [vmem:[%s11128_s3 + $0x110] sm:$0xff]  }
 0x49a   : > { %v4534_v47 = vpop.permute.xlu0 %4533  ;;  %8676 = vmatprep.subr.bf16.mxu1 %v10231_v8 }
 0x49b   : > { %4577 = vst.msk [vmem:[#allocation2 + $0x20] sm:$0xff] %vm2116_vm11, %v4534_v47  ;;  %v4447_v13 = vadd.f32 %v10150_v30, %v4286_v53  ;;  %v4289_v23 = vadd.f32 %v8225_v43, %v10086_v41  ;;  %8678 = vmatpush3.bf16.msra.mxu1 %v10231_v8  ;;  %v8744_v53 = vld [vmem:[%s11128_s3 + $0x118] sm:$0xff]  }
 0x49c   : > { %8677 = vmatprep.subr.bf16.mxu1 %v8744_v53 }
 0x49d   : > { %v4450_v50 = vadd.f32 %v10154_v28, %v4289_v23  ;;  %v4489_v36 = vmax.f32 %v4447_v13, 0.0  ;;  %v8745_v23 = vld [vmem:[%s11128_s3 + $0xd0] sm:$0xff]  }
 0x49e   : > { %8272 = vmatprep.subr.bf16.mxu0 %v8745_v23 }
 0x49f   : > { %v4490_v9 = vmax.f32 %v4450_v50, 0.0  ;;  %v8226_v19 = vpop.f32.mrb[92].mxu0  ;;  %8679 = vmatpush3.bf16.msra.mxu1 %v8744_v53  ;;  %v8746_v50 = vld [vmem:[%s11128_s3 + $0x90] sm:$0xff]  }
 0x4a0   : > { %v8227_v49 = vpop.f32.mrb[93].mxu0  ;;  %8273 = vmatpush3.bf16.msra.mxu0 %v8746_v50 }
 0x4a1   : > { %v4507_v15 = vpack.c.bf16 %v4490_v9, %v4489_v36  ;;  %v8228_v48 = vadd.f32 %v8227_v49, %v8226_v19  ;;  %v8229_v3 = vpop.f32.mrb[94].mxu0  ;;  %v10250_v36 = vld [vmem:[%s11131_s6 + $0x3] ss:$0 sm:$0xff] }
 0x4a2   : > { %v4593_v17 = vld [vmem:[#allocation2 + $0x20] sm:$0xff]  ;;  %v4536_v4 = vpop.permute.xlu1 %4535  ;;  %v8230_v11 = vpop.f32.mrb[95].mxu0 }
 0x4a3   : > { %8568 = vmatprep.mubr.msk.bf16.mxu1 %vm4657_vm13, %v4593_v17  ;;  %4578 = vst.msk [vmem:[#allocation2 + $0x28] sm:$0xff] %vm2116_vm11, %v4536_v4  ;;  %v4294_v30 = vadd.f32 %v8228_v48, %v10086_v41  ;;  %v8231_v46 = vadd.f32 %v8230_v11, %v8229_v3  ;;  %4553 = vrot.lane.b32.xlu0 %v4507_v15, %s8784_s30  ;;  %v8747_v15 = vld [vmem:[%s11128_s3 + $0xd8] sm:$0xff]  }
 0x4a4   : > { %v8748_v48 = vld [vmem:[%s11128_s3 + $0x98] sm:$0xff]   ;;  %8274 = vmatprep.subr.bf16.mxu0 %v8747_v15 }
 0x4a5   : > { %v4455_v28 = vadd.f32 %v10147_v1, %v4294_v30  ;;  %v4297_v39 = vadd.f32 %v8231_v46, %v10086_v41  ;;  %8275 = vmatpush3.bf16.msra.mxu0 %v8748_v48 }
 0x4a7   : > { %v4458_v18 = vadd.f32 %v10152_v26, %v4297_v39  ;;  %v4491_v5 = vmax.f32 %v4455_v28, 0.0 }
 0x4a9   : > { %v4492_v32 = vmax.f32 %v4458_v18, 0.0 }
 0x4aa   : > { %v4594_v56 = vld [vmem:[#allocation2 + $0x28] sm:$0xff] }
 0x4ab   : > { %8569 = vmatmul.mubr.msk.bf16.gmra.mrb[76].mxu1 %vm4657_vm13, %v4594_v56  ;;  %v4508_v58 = vpack.c.bf16 %v4492_v32, %v4491_v5  ;;  %v4995_v5 = vld [vmem:[#allocation3] sm:$0xf8]  ;;  %v4996_v32 = vld [vmem:[#allocation3 + $0x8] sm:$0x7] }
 0x4ad   : > { %4555 = vrot.lane.b32.xlu1 %v4508_v58, %s8784_s30 }
 0x4b1   : > { %5252 = vrot.lane.b32.xlu1 %v5206_v29, %s8785_s8 }
 0x4b4   : > { %v4538_v42 = vpop.permute.xlu0 %4537 }
 0x4b5   : > { %4579 = vst.msk [vmem:[#allocation2 + $0x30] sm:$0xff] %vm2116_vm11, %v4538_v42  ;;  %5429 = vrot.lane.b32.xlu1 %v5383_v33, %s8784_s30  ;;  %v5060_v42 = vrot.slane %v4995_v5, 3 }
 0x4b9   : > { %5254 = vrot.lane.b32.xlu1 %v5209_v40, %s8785_s8 }
 0x4bc   : > { %v4595_v21 = vld [vmem:[#allocation2 + $0x30] sm:$0xff] }
 0x4bd   : > { %v4540_v0 = vpop.permute.xlu1 %4539  ;;  %8572 = vmatprep.mubr.msk.bf16.mxu1 %vm4657_vm13, %v4595_v21  ;;  %5431 = vrot.lane.b32.xlu1 %v5386_v16, %s8784_s30  ;;  %v5061_v21 = vrot.slane %v4996_v32, 3 }
 0x4be   : > { %4580 = vst.msk [vmem:[#allocation2 + $0x38] sm:$0xff] %vm2116_vm11, %v4540_v0 }
 0x4c5   : > { %v4596_v41 = vld [vmem:[#allocation2 + $0x38] sm:$0xff]  ;;  %v4542_v1 = vpop.permute.xlu0 %4541 }
 0x4c6   : > { %8573 = vmatmul.mubr.msk.bf16.gmra.mrb[80].mxu1 %vm4657_vm13, %v4596_v41  ;;  %4581 = vst.msk [vmem:[#allocation2 + $0x40] sm:$0xff] %vm2116_vm11, %v4542_v1  ;;  %v5062_v1 = vsel %vm5059_vm14, %v5060_v42, %v5061_v21 }
 0x4c7   : > { %5124 = vst.msk [vmem:[#allocation4] sm:$0xff] %vm829_vm6, %v5062_v1 }
 0x4cd   : > { %v4597_v26 = vld [vmem:[#allocation2 + $0x40] sm:$0xff] }
 0x4ce   : > { %8576 = vmatprep.mubr.msk.bf16.mxu1 %vm4657_vm13, %v4597_v26 }
 0x4d4   : > { %v4544_v59 = vpop.permute.xlu1 %4543 }
 0x4d5   : > { %4582 = vst.msk [vmem:[#allocation2 + $0x48] sm:$0xff] %vm2116_vm11, %v4544_v59 }
 0x4dc   : > { %v4598_v57 = vld [vmem:[#allocation2 + $0x48] sm:$0xff] }
 0x4dd   : > { %8577 = vmatmul.mubr.msk.bf16.gmra.mrb[84].mxu1 %vm4657_vm13, %v4598_v57 }
 0x4e1   : > { %v4546_v55 = vpop.permute.xlu0 %4545 }
 0x4e2   : > { %4583 = vst.msk [vmem:[#allocation2 + $0x50] sm:$0xff] %vm2116_vm11, %v4546_v55 }
 0x4e9   : > { %v4599_v7 = vld [vmem:[#allocation2 + $0x50] sm:$0xff] }
 0x4ea   : > { %8580 = vmatprep.mubr.msk.bf16.mxu1 %vm4657_vm13, %v4599_v7 }
 0x4f1   : > { %v4548_v45 = vpop.permute.xlu1 %4547 }
 0x4f2   : > { %4584 = vst.msk [vmem:[#allocation2 + $0x58] sm:$0xff] %vm2116_vm11, %v4548_v45 }
 0x4f9   : > { %v4600_v27 = vld [vmem:[#allocation2 + $0x58] sm:$0xff] }
 0x4fa   : > { %8581 = vmatmul.mubr.msk.bf16.gmra.mrb[88].mxu1 %vm4657_vm13, %v4600_v27 }
 0x4fc   : > { %v4550_v61 = vpop.permute.xlu0 %4549 }
 0x4fd   : > { %4585 = vst.msk [vmem:[#allocation2 + $0x60] sm:$0xff] %vm2116_vm11, %v4550_v61 }
 0x504   : > { %v4552_v12 = vpop.permute.xlu1 %4551  ;;  %v4601_v63 = vld [vmem:[#allocation2 + $0x60] sm:$0xff] }
 0x505   : > { %4586 = vst.msk [vmem:[#allocation2 + $0x68] sm:$0xff] %vm2116_vm11, %v4552_v12  ;;  %8584 = vmatprep.mubr.msk.bf16.mxu1 %vm4657_vm13, %v4601_v63  ;;  %v4997_v12 = vld [vmem:[#allocation3 + $0x10] sm:$0xf8]  ;;  %v4998_v63 = vld [vmem:[#allocation3 + $0x18] sm:$0x7] }
 0x50c   : > { %v4602_v25 = vld [vmem:[#allocation2 + $0x68] sm:$0xff] }
 0x50d   : > { %8585 = vmatmul.mubr.msk.bf16.gmra.mrb[92].mxu1 %vm4657_vm13, %v4602_v25  ;;  %v8749_v25 = vld [vmem:[%s11128_s3 + $0xe0] sm:$0xff]  }
 0x50e   : > { %8276 = vmatprep.subr.bf16.mxu0 %v8749_v25 }
 0x515   : > { %v4554_v34 = vpop.permute.xlu0 %4553 }
 0x516   : > { %4587 = vst.msk [vmem:[#allocation2 + $0x70] sm:$0xff] %vm2116_vm11, %v4554_v34  ;;  %v5063_v34 = vrot.slane %v4997_v12, 3 }
 0x51d   : > { %v4603_v47 = vld [vmem:[#allocation2 + $0x70] sm:$0xff] }
 0x51e   : > { %8588 = vmatprep.mubr.msk.bf16.mxu1 %vm4657_vm13, %v4603_v47  ;;  %v5064_v47 = vrot.slane %v4998_v63, 3 }
 0x51f   : > { %v4556_v43 = vpop.permute.xlu1 %4555 }
 0x520   : > { %4588 = vst.msk [vmem:[#allocation2 + $0x78] sm:$0xff] %vm2116_vm11, %v4556_v43  ;;  %v8750_v43 = vld [vmem:[%s11128_s3 + $0xa0] sm:$0xff]  }
 0x521   : > { %8277 = vmatpush3.bf16.msra.mxu0 %v8750_v43 }
 0x523   : > { %v5253_v26 = vpop.permute.xlu1 %5252 }
 0x524   : > { %5300 = vst.msk [vmem:[#allocation4] sm:$0xff] %vm1746_vm10, %v5253_v26 }
 0x527   : > { %v4604_v13 = vld [vmem:[#allocation2 + $0x78] sm:$0xff]  ;;  %v5430_v61 = vpop.permute.xlu1 %5429 }
 0x528   : > { %8589 = vmatmul.mubr.msk.bf16.gmra.mrb[96].mxu1 %vm4657_vm13, %v4604_v13  ;;  %5477 = vst.msk [vmem:[#allocation4] sm:$0xff] %vm2116_vm11, %v5430_v61 }
 0x53f   : > { %v8562_v9 = vpop.f32.mrb[68].mxu1 }
 0x540   : > { %v4749_v19 = vadd.f32 %v8562_v9, %v10250_v36  ;;  %v4740_v49 = vpop.f32.mrb[69].mxu1 }
 0x541   : > { %v4741_v17 = vadd.f32 %v10250_v36, %v4740_v49  ;;  %v8563_v4 = vpop.f32.mrb[70].mxu1 }
 0x542   : > { %v4752_v3 = vadd.f32 %v8563_v4, %v10250_v36  ;;  %v4743_v11 = vpop.f32.mrb[71].mxu1  ;;  %v4869_v46 = vmax.f32 %v4749_v19, 0.0 }
 0x543   : > { %v4744_v30 = vadd.f32 %v10250_v36, %v4743_v11  ;;  %v4867_v39 = vmax.f32 %v4741_v17, 0.0  ;;  %v5065_v17 = vsel %vm5059_vm14, %v5063_v34, %v5064_v47 }
 0x544   : > { %v4870_v28 = vmax.f32 %v4752_v3, 0.0  ;;  %5125 = vst.msk [vmem:[#allocation4 + $0x18] sm:$0xff] %vm829_vm6, %v5065_v17 }
 0x545   : > { %v4868_v18 = vmax.f32 %v4744_v30, 0.0  ;;  %v5255_v30 = vpop.permute.xlu1 %5254 }
 0x546   : > { %v4900_v56 = vpack.c.bf16 %v4870_v28, %v4869_v46  ;;  %5301 = vst.msk [vmem:[#allocation4 + $0x18] sm:$0xff] %vm1746_vm10, %v5255_v30 }
 0x547   : > { %v4899_v58 = vpack.c.bf16 %v4868_v18, %v4867_v39 }
 0x548   : > { %v4932_v0 = vrot.slane %v4900_v56, 4 }
 0x549   : > { %v4931_v41 = vrot.slane %v4899_v58, 4  ;;  %v5432_v26 = vpop.permute.xlu1 %5431 }
 0x54a   : > { %4965 = vst.msk [vmem:[#allocation3 + $0x30] sm:$0xf0] %vm857_vm5, %v4932_v0 }
 0x54b   : > { %4966 = vst.msk [vmem:[#allocation3 + $0x38] sm:$0xf] %vm840_vm4, %v4932_v0  ;;  %4964 = vst.msk [vmem:[#allocation3 + $0x28] sm:$0xf] %vm840_vm4, %v4931_v41 }
 0x54c   : > { %4963 = vst.msk [vmem:[#allocation3 + $0x20] sm:$0xf0] %vm857_vm5, %v4931_v41 }
 0x54d   : > { %5478 = vst.msk [vmem:[#allocation4 + $0x18] sm:$0xff] %vm2116_vm11, %v5432_v26 }
 0x551   : > { %v5815_v38 = vld [vmem:[#allocation3 + $0x30] sm:$0xe0] }
 0x552   : > { %v5816_v31 = vld [vmem:[#allocation3 + $0x38] sm:$0x1f]  ;;  %v5495_v10 = vld [vmem:[#allocation3 + $0x30] sm:$0xf8]  ;;  %v5880_v35 = vrot.slane %v5815_v38, 5 }
 0x553   : > { %v5881_v14 = vrot.slane %v5816_v31, 5  ;;  %v5496_v20 = vld [vmem:[#allocation3 + $0x38] sm:$0x7]  ;;  %v5560_v24 = vrot.slane %v5495_v10, 3  ;;  %v5146_v51 = vld [vmem:[#allocation3 + $0x30] sm:$0xf0] }
 0x554   : > { %v5561_v60 = vrot.slane %v5496_v20, 3  ;;  %v5147_v44 = vld [vmem:[#allocation3 + $0x38] sm:$0xf]  ;;  %v5213_v33 = vrot.slane %v5146_v51, 4  ;;  %v5813_v2 = vld [vmem:[#allocation3 + $0x20] sm:$0xe0] }
 0x555   : > { %v5882_v29 = vsel %vm5380_vm9, %v5880_v35, %v5881_v14  ;;  %v5814_v6 = vld [vmem:[#allocation3 + $0x28] sm:$0x1f]  ;;  %v5214_v62 = vrot.slane %v5147_v44, 4  ;;  %v5877_v59 = vrot.slane %v5813_v2, 5  ;;  %v5322_v22 = vld [vmem:[#allocation3 + $0x30] sm:$0xe0] }
 0x556   : > { %5927 = vrot.lane.b32.xlu0 %v5882_v29, %s8785_s8  ;;  %v5562_v37 = vsel %vm5059_vm14, %v5560_v24, %v5561_v60  ;;  %v5878_v40 = vrot.slane %v5814_v6, 5  ;;  %v5323_v52 = vld [vmem:[#allocation3 + $0x38] sm:$0x1f]  ;;  %v5390_v55 = vrot.slane %v5322_v22, 5  ;;  %v5493_v45 = vld [vmem:[#allocation3 + $0x20] sm:$0xf8] }
 0x557   : > { %5607 = vrot.lane.b32.xlu1 %v5562_v37, %s8786_s15  ;;  %v5215_v57 = vsel %vm452_vm0, %v5213_v33, %v5214_v62  ;;  %v5391_v7 = vrot.slane %v5323_v52, 5  ;;  %v5494_v27 = vld [vmem:[#allocation3 + $0x28] sm:$0x7]  ;;  %v5672_v53 = vld [vmem:[#allocation3 + $0x38] sm:$0xf]  ;;  %v5557_v13 = vrot.slane %v5493_v45, 3 }
 0x558   : > { %v5879_v16 = vsel %vm5380_vm9, %v5877_v59, %v5878_v40  ;;  %v5737_v23 = vrot.slane %v5672_v53, 4  ;;  %v5671_v50 = vld [vmem:[#allocation3 + $0x30] sm:$0xf0]  ;;  %v5558_v49 = vrot.slane %v5494_v27, 3  ;;  %v5144_v3 = vld [vmem:[#allocation3 + $0x20] sm:$0xf0] }
 0x559   : > { %v5392_v19 = vsel %vm5380_vm9, %v5390_v55, %v5391_v7  ;;  %v5736_v4 = vrot.slane %v5671_v50, 4  ;;  %v5145_v11 = vld [vmem:[#allocation3 + $0x28] sm:$0xf]  ;;  %v5210_v58 = vrot.slane %v5144_v3, 4  ;;  %v5320_v41 = vld [vmem:[#allocation3 + $0x20] sm:$0xe0] }
 0x55a   : > { %5925 = vrot.lane.b32.xlu0 %v5879_v16, %s8785_s8  ;;  %v5559_v32 = vsel %vm5059_vm14, %v5557_v13, %v5558_v49  ;;  %v5211_v42 = vrot.slane %v5145_v11, 4  ;;  %v5321_v1 = vld [vmem:[#allocation3 + $0x28] sm:$0x1f]  ;;  %v5387_v20 = vrot.slane %v5320_v41, 5  ;;  %v5002_v60 = vld [vmem:[#allocation3 + $0x38] sm:$0x7] }
 0x55b   : > { %5258 = vrot.lane.b32.xlu1 %v5215_v57, %s8785_s8  ;;  %v5738_v39 = vsel %vm452_vm0, %v5736_v4, %v5737_v23  ;;  %v5388_v24 = vrot.slane %v5321_v1, 5  ;;  %v5001_v51 = vld [vmem:[#allocation3 + $0x30] sm:$0xf8]  ;;  %v5070_v29 = vrot.slane %v5002_v60, 3  ;;  %v5670_v62 = vld [vmem:[#allocation3 + $0x28] sm:$0xf] }
 0x55c   : > { %5798 = vst.msk [vmem:[#allocation4 + $0x20] sm:$0xff] %vm829_vm6, %v5738_v39  ;;  %v5212_v14 = vsel %vm452_vm0, %v5210_v58, %v5211_v42  ;;  %v5069_v33 = vrot.slane %v5001_v51, 3  ;;  %v5669_v59 = vld [vmem:[#allocation3 + $0x20] sm:$0xf0]  ;;  %v5734_v40 = vrot.slane %v5670_v62, 4  ;;  %v8751_v52 = vld [vmem:[%s11128_s3 + $0xe8] sm:$0xff]  }
 0x55d   : > { %v8566_v9 = vpop.f32.mrb[72].mxu1  ;;  %v5389_v37 = vsel %vm5380_vm9, %v5387_v20, %v5388_v24  ;;  %v5733_v22 = vrot.slane %v5669_v59, 4  ;;  %v8752_v16 = vld [vmem:[%s11128_s3 + $0xa8] sm:$0xff]   ;;  %8278 = vmatprep.subr.bf16.mxu0 %v8751_v52 }
 0x55e   : > { %v4765_v15 = vadd.f32 %v8566_v9, %v10250_v36  ;;  %v4756_v48 = vpop.f32.mrb[73].mxu1  ;;  %v5071_v6 = vsel %vm5059_vm14, %v5069_v33, %v5070_v29  ;;  %8279 = vmatpush3.bf16.msra.mxu0 %v8752_v16 }
 0x55f   : > { %5435 = vrot.lane.b32.xlu1 %v5392_v19, %s8784_s30  ;;  %v4757_v46 = vadd.f32 %v10250_v36, %v4756_v48  ;;  %v8567_v28 = vpop.f32.mrb[74].mxu1  ;;  %5127 = vst.msk [vmem:[#allocation4 + $0x48] sm:$0xff] %vm829_vm6, %v5071_v6  ;;  %v5735_v45 = vsel %vm452_vm0, %v5733_v22, %v5734_v40 }
 0x560   : > { %v4768_v18 = vadd.f32 %v8567_v28, %v10250_v36  ;;  %v4759_v56 = vpop.f32.mrb[75].mxu1  ;;  %v4873_v21 = vmax.f32 %v4765_v15, 0.0  ;;  %5797 = vst.msk [vmem:[#allocation4 + $0x8] sm:$0xff] %vm829_vm6, %v5735_v45 }
 0x561   : > { %v4760_v5 = vadd.f32 %v10250_v36, %v4759_v56  ;;  %v4871_v38 = vmax.f32 %v4757_v46, 0.0 }
 0x562   : > { %v4874_v0 = vmax.f32 %v4768_v18, 0.0 }
 0x563   : > { %5605 = vrot.lane.b32.xlu1 %v5559_v32, %s8786_s15  ;;  %v4872_v31 = vmax.f32 %v4760_v5, 0.0 }
 0x564   : > { %v4902_v10 = vpack.c.bf16 %v4874_v0, %v4873_v21 }
 0x565   : > { %v4901_v35 = vpack.c.bf16 %v4872_v31, %v4871_v38 }
 0x566   : > { %v4934_v44 = vrot.slane %v4902_v10, 4 }
 0x567   : > { %5256 = vrot.lane.b32.xlu1 %v5212_v14, %s8785_s8  ;;  %v4933_v2 = vrot.slane %v4901_v35, 4  ;;  %v5000_v35 = vld [vmem:[#allocation3 + $0x28] sm:$0x7]  ;;  %v4999_v14 = vld [vmem:[#allocation3 + $0x20] sm:$0xf8] }
 0x568   : > { %4969 = vst.msk [vmem:[#allocation3 + $0x50] sm:$0xf0] %vm857_vm5, %v4934_v44  ;;  %v5067_v20 = vrot.slane %v5000_v35, 3  ;;  %v5066_v24 = vrot.slane %v4999_v14, 3 }
 0x569   : > { %4970 = vst.msk [vmem:[#allocation3 + $0x58] sm:$0xf] %vm840_vm4, %v4934_v44  ;;  %4968 = vst.msk [vmem:[#allocation3 + $0x48] sm:$0xf] %vm840_vm4, %v4933_v2 }
 0x56a   : > { %4967 = vst.msk [vmem:[#allocation3 + $0x40] sm:$0xf0] %vm857_vm5, %v4933_v2  ;;  %v5068_v59 = vsel %vm5059_vm14, %v5066_v24, %v5067_v20  ;;  %v8758_v20 = vld [vmem:[%s11128_s3 + $0xc0] sm:$0xff]  }
 0x56b   : > { %5433 = vrot.lane.b32.xlu1 %v5389_v37, %s8784_s30  ;;  %5126 = vst.msk [vmem:[#allocation4 + $0x30] sm:$0xff] %vm829_vm6, %v5068_v59 }
 0x56f   : > { %v5992_v57 = vld [vmem:[#allocation3 + $0x50] sm:$0xf8] }
 0x570   : > { %v5993_v55 = vld [vmem:[#allocation3 + $0x58] sm:$0x7]  ;;  %v5499_v7 = vld [vmem:[#allocation3 + $0x50] sm:$0xf8]  ;;  %v6057_v27 = vrot.slane %v5992_v57, 3 }
 0x571   : > { %v6058_v61 = vrot.slane %v5993_v55, 3  ;;  %v5500_v12 = vld [vmem:[#allocation3 + $0x58] sm:$0x7]  ;;  %v5566_v63 = vrot.slane %v5499_v7, 3  ;;  %v6168_v34 = vld [vmem:[#allocation3 + $0x50] sm:$0xf0] }
 0x572   : > { %v5567_v25 = vrot.slane %v5500_v12, 3  ;;  %v6169_v47 = vld [vmem:[#allocation3 + $0x58] sm:$0xf]  ;;  %v6233_v53 = vrot.slane %v6168_v34, 4  ;;  %v5150_v23 = vld [vmem:[#allocation3 + $0x50] sm:$0xf0] }
 0x573   : > { %v6059_v43 = vsel %vm5059_vm14, %v6057_v27, %v6058_v61  ;;  %v6234_v13 = vrot.slane %v6169_v47, 4  ;;  %v5151_v50 = vld [vmem:[#allocation3 + $0x58] sm:$0xf]  ;;  %v5219_v19 = vrot.slane %v5150_v23, 4  ;;  %v5819_v17 = vld [vmem:[#allocation3 + $0x50] sm:$0xe0] }
 0x574   : > { %6104 = vrot.lane.b32.xlu0 %v6059_v43, %s8784_s30  ;;  %v5568_v9 = vsel %vm5059_vm14, %v5566_v63, %v5567_v25  ;;  %v5220_v49 = vrot.slane %v5151_v50, 4  ;;  %v5820_v4 = vld [vmem:[#allocation3 + $0x58] sm:$0x1f]  ;;  %v5326_v15 = vld [vmem:[#allocation3 + $0x50] sm:$0xe0]  ;;  %v5886_v3 = vrot.slane %v5819_v17, 5 }
 0x575   : > { %5611 = vrot.lane.b32.xlu1 %v5568_v9, %s8786_s15  ;;  %v5327_v48 = vld [vmem:[#allocation3 + $0x58] sm:$0x1f]  ;;  %v5887_v11 = vrot.slane %v5820_v4, 5  ;;  %v5990_v30 = vld [vmem:[#allocation3 + $0x40] sm:$0xf8]  ;;  %v6235_v46 = vsel %vm452_vm0, %v6233_v53, %v6234_v13  ;;  %v5396_v5 = vrot.slane %v5326_v15, 5 }
 0x576   : > { %v5991_v28 = vld [vmem:[#allocation3 + $0x48] sm:$0x7]  ;;  %v5497_v39 = vld [vmem:[#allocation3 + $0x40] sm:$0xf8]  ;;  %v5221_v56 = vsel %vm452_vm0, %v5219_v19, %v5220_v49  ;;  %v5397_v32 = vrot.slane %v5327_v48, 5  ;;  %v6054_v58 = vrot.slane %v5990_v30, 3 }
 0x577   : > { %v5498_v18 = vld [vmem:[#allocation3 + $0x48] sm:$0x7]  ;;  %v6055_v42 = vrot.slane %v5991_v28, 3  ;;  %v5563_v21 = vrot.slane %v5497_v39, 3  ;;  %v5888_v41 = vsel %vm5380_vm9, %v5886_v3, %v5887_v11  ;;  %v6166_v1 = vld [vmem:[#allocation3 + $0x40] sm:$0xf0] }
 0x578   : > { %6280 = vrot.lane.b32.xlu0 %v6235_v46, %s8786_s15  ;;  %v5564_v0 = vrot.slane %v5498_v18, 3  ;;  %v6167_v26 = vld [vmem:[#allocation3 + $0x48] sm:$0xf]  ;;  %v5148_v38 = vld [vmem:[#allocation3 + $0x40] sm:$0xf0]  ;;  %v5398_v31 = vsel %vm5380_vm9, %v5396_v5, %v5397_v32  ;;  %v6230_v44 = vrot.slane %v6166_v1, 4 }
 0x579   : > { %5262 = vrot.lane.b32.xlu1 %v5221_v56, %s8785_s8  ;;  %v5149_v10 = vld [vmem:[#allocation3 + $0x48] sm:$0xf]  ;;  %v6056_v51 = vsel %vm5059_vm14, %v6054_v58, %v6055_v42  ;;  %v6231_v29 = vrot.slane %v6167_v26, 4  ;;  %v5216_v6 = vrot.slane %v5148_v38, 4  ;;  %v5817_v62 = vld [vmem:[#allocation3 + $0x40] sm:$0xe0] }
 0x57a   : > { %v5217_v37 = vrot.slane %v5149_v10, 4  ;;  %v5565_v52 = vsel %vm5059_vm14, %v5563_v21, %v5564_v0  ;;  %v5818_v16 = vld [vmem:[#allocation3 + $0x48] sm:$0x1f]  ;;  %v5324_v7 = vld [vmem:[#allocation3 + $0x40] sm:$0xe0]  ;;  %v5883_v12 = vrot.slane %v5817_v62, 5 }
 0x57b   : > { %v5325_v45 = vld [vmem:[#allocation3 + $0x48] sm:$0x1f]  ;;  %v6232_v61 = vsel %vm452_vm0, %v6230_v44, %v6231_v29  ;;  %v5884_v47 = vrot.slane %v5818_v16, 5  ;;  %v5393_v13 = vrot.slane %v5324_v7, 5  ;;  %v5005_v15 = vld [vmem:[#allocation3 + $0x50] sm:$0xf8] }
 0x57c   : > { %5931 = vrot.lane.b32.xlu0 %v5888_v41, %s8785_s8  ;;  %v5218_v34 = vsel %vm452_vm0, %v5216_v6, %v5217_v37  ;;  %v5394_v23 = vrot.slane %v5325_v45, 5  ;;  %v5006_v48 = vld [vmem:[#allocation3 + $0x58] sm:$0x7]  ;;  %v8753_v3 = vld [vmem:[%s11128_s3 + $0xf0] sm:$0xff]   ;;  %v5075_v11 = vrot.slane %v5005_v15, 3  ;;  %v8757_v1 = vld [vmem:[%s11128_s3 + $0x100] sm:$0xff]  }
 0x57d   : > { %5439 = vrot.lane.b32.xlu1 %v5398_v31, %s8784_s30  ;;  %v5885_v49 = vsel %vm5380_vm9, %v5883_v12, %v5884_v47  ;;  %v5076_v30 = vrot.slane %v5006_v48, 3  ;;  %v8754_v46 = vld [vmem:[%s11128_s3 + $0xb0] sm:$0xff]   ;;  %v8755_v39 = vld [vmem:[%s11128_s3 + $0xf8] sm:$0xff]   ;;  %8280 = vmatprep.subr.bf16.mxu0 %v8753_v3  ;;  %v5003_v5 = vld [vmem:[#allocation3 + $0x40] sm:$0xf8] }
 0x57e   : > { %v8570_v60 = vpop.f32.mrb[76].mxu1  ;;  %v5395_v4 = vsel %vm5380_vm9, %v5393_v13, %v5394_v23  ;;  %v5675_v28 = vld [vmem:[#allocation3 + $0x50] sm:$0xf0]  ;;  %v5676_v18 = vld [vmem:[#allocation3 + $0x58] sm:$0xf]  ;;  %8281 = vmatpush3.bf16.msra.mxu0 %v8754_v46  ;;  %v5072_v0 = vrot.slane %v5003_v5, 3 }
 0x57f   : > { %v4781_v33 = vadd.f32 %v8570_v60, %v10250_v36  ;;  %v4772_v2 = vpop.f32.mrb[77].mxu1  ;;  %v5742_v56 = vrot.slane %v5675_v28, 4  ;;  %v5077_v32 = vsel %vm5059_vm14, %v5075_v11, %v5076_v30  ;;  %v5743_v58 = vrot.slane %v5676_v18, 4  ;;  %v8756_v42 = vld [vmem:[%s11128_s3 + $0xb8] sm:$0xff]   ;;  %v5004_v21 = vld [vmem:[#allocation3 + $0x48] sm:$0x7]  ;;  %8282 = vmatprep.subr.bf16.mxu0 %v8755_v39 }
 0x580   : > { %v4773_v40 = vadd.f32 %v10250_v36, %v4772_v2  ;;  %v8571_v22 = vpop.f32.mrb[78].mxu1  ;;  %6102 = vrot.lane.b32.xlu0 %v6056_v51, %s8784_s30  ;;  %5129 = vst.msk [vmem:[#allocation4 + $0x78] sm:$0xff] %vm829_vm6, %v5077_v32  ;;  %v5073_v41 = vrot.slane %v5004_v21, 3  ;;  %v5673_v26 = vld [vmem:[#allocation3 + $0x40] sm:$0xf0]  ;;  %v8759_v37 = vld [vmem:[%s11128_s3 + $0x108] sm:$0xff]  }
 0x581   : > { %v4784_v57 = vadd.f32 %v8571_v22, %v10250_v36  ;;  %v4775_v55 = vpop.f32.mrb[79].mxu1  ;;  %5609 = vrot.lane.b32.xlu1 %v5565_v52, %s8786_s15  ;;  %v4877_v63 = vmax.f32 %v4781_v33, 0.0  ;;  %v5674_v38 = vld [vmem:[#allocation3 + $0x48] sm:$0xf]  ;;  %v5744_v31 = vsel %vm452_vm0, %v5742_v56, %v5743_v58  ;;  %v5739_v10 = vrot.slane %v5673_v26, 4 }
 0x582   : > { %v4776_v27 = vadd.f32 %v10250_v36, %v4775_v55  ;;  %v4875_v43 = vmax.f32 %v4773_v40, 0.0  ;;  %v5740_v35 = vrot.slane %v5674_v38, 4  ;;  %5800 = vst.msk [vmem:[#allocation4 + $0x50] sm:$0xff] %vm829_vm6, %v5744_v31  ;;  %v5074_v14 = vsel %vm5059_vm14, %v5072_v0, %v5073_v41  ;;  %8283 = vmatpush3.bf16.msra.mxu0 %v8756_v42  ;;  %v8760_v22 = vld [vmem:[%s11128_s3 + $0xc8] sm:$0xff]  }
 0x583   : > { %v4878_v25 = vmax.f32 %v4784_v57, 0.0  ;;  %5128 = vst.msk [vmem:[#allocation4 + $0x60] sm:$0xff] %vm829_vm6, %v5074_v14  ;;  %8284 = vmatprep.subr.bf16.mxu0 %v8757_v1 }
 0x584   : > { %v4876_v53 = vmax.f32 %v4776_v27, 0.0  ;;  %6278 = vrot.lane.b32.xlu0 %v6232_v61, %s8786_s15  ;;  %v5741_v44 = vsel %vm452_vm0, %v5739_v10, %v5740_v35 }
 0x585   : > { %v4904_v50 = vpack.c.bf16 %v4878_v25, %v4877_v63  ;;  %5260 = vrot.lane.b32.xlu1 %v5218_v34, %s8785_s8  ;;  %5799 = vst.msk [vmem:[#allocation4 + $0x38] sm:$0xff] %vm829_vm6, %v5741_v44 }
 0x586   : > { %v4903_v9 = vpack.c.bf16 %v4876_v53, %v4875_v43  ;;  %8285 = vmatpush3.bf16.msra.mxu0 %v8758_v20 }
 0x587   : > { %v4936_v19 = vrot.slane %v4904_v50, 4  ;;  %8286 = vmatprep.subr.bf16.mxu0 %v8759_v37 }
 0x588   : > { %v4935_v17 = vrot.slane %v4903_v9, 4  ;;  %5929 = vrot.lane.b32.xlu0 %v5885_v49, %s8785_s8 }
 0x589   : > { %4973 = vst.msk [vmem:[#allocation3 + $0x70] sm:$0xf0] %vm857_vm5, %v4936_v19  ;;  %5437 = vrot.lane.b32.xlu1 %v5395_v4, %s8784_s30 }
 0x58a   : > { %4974 = vst.msk [vmem:[#allocation3 + $0x78] sm:$0xf] %vm840_vm4, %v4936_v19  ;;  %4972 = vst.msk [vmem:[#allocation3 + $0x68] sm:$0xf] %vm840_vm4, %v4935_v17  ;;  %8287 = vmatpush3.bf16.msra.mxu0 %v8760_v22 }
 0x58b   : > { %4971 = vst.msk [vmem:[#allocation3 + $0x60] sm:$0xf0] %vm857_vm5, %v4935_v17  ;;  %8592 = vmatprep.subr.bf16.mxu0 %v10231_v8 }
 0x590   : > { %v5996_v24 = vld [vmem:[#allocation3 + $0x70] sm:$0xf8] }
 0x591   : > { %v5997_v60 = vld [vmem:[#allocation3 + $0x78] sm:$0x7]  ;;  %v5503_v51 = vld [vmem:[#allocation3 + $0x70] sm:$0xf8]  ;;  %v6063_v29 = vrot.slane %v5996_v24, 3 }
 0x592   : > { %v6064_v33 = vrot.slane %v5997_v60, 3  ;;  %v5504_v2 = vld [vmem:[#allocation3 + $0x78] sm:$0x7]  ;;  %v5572_v6 = vrot.slane %v5503_v51, 3  ;;  %v6172_v59 = vld [vmem:[#allocation3 + $0x70] sm:$0xf0] }
 0x593   : > { %v5573_v62 = vrot.slane %v5504_v2, 3  ;;  %v6173_v40 = vld [vmem:[#allocation3 + $0x78] sm:$0xf]  ;;  %v6239_v16 = vrot.slane %v6172_v59, 4  ;;  %v5154_v55 = vld [vmem:[#allocation3 + $0x70] sm:$0xf0] }
 0x594   : > { %v6065_v52 = vsel %vm5059_vm14, %v6063_v29, %v6064_v33  ;;  %v6240_v57 = vrot.slane %v6173_v40, 4  ;;  %v5155_v7 = vld [vmem:[#allocation3 + $0x78] sm:$0xf]  ;;  %v5225_v27 = vrot.slane %v5154_v55, 4  ;;  %v5823_v12 = vld [vmem:[#allocation3 + $0x70] sm:$0xe0] }
 0x595   : > { %6108 = vrot.lane.b32.xlu0 %v6065_v52, %s8784_s30  ;;  %v5574_v45 = vsel %vm5059_vm14, %v5572_v6, %v5573_v62  ;;  %v5226_v61 = vrot.slane %v5155_v7, 4  ;;  %v5824_v63 = vld [vmem:[#allocation3 + $0x78] sm:$0x1f]  ;;  %v5892_v25 = vrot.slane %v5823_v12, 5  ;;  %v5330_v47 = vld [vmem:[#allocation3 + $0x70] sm:$0xe0] }
 0x596   : > { %5615 = vrot.lane.b32.xlu1 %v5574_v45, %s8786_s15  ;;  %v5893_v34 = vrot.slane %v5824_v63, 5  ;;  %v5331_v43 = vld [vmem:[#allocation3 + $0x78] sm:$0x1f]  ;;  %v5402_v53 = vrot.slane %v5330_v47, 5  ;;  %v6346_v23 = vld [vmem:[#allocation3 + $0x60] sm:$0xe0]  ;;  %v6241_v19 = vsel %vm452_vm0, %v6239_v16, %v6240_v57 }
 0x597   : > { %v5403_v13 = vrot.slane %v5331_v43, 5  ;;  %v6347_v50 = vld [vmem:[#allocation3 + $0x68] sm:$0x1f]  ;;  %v6412_v49 = vrot.slane %v6346_v23, 5  ;;  %v6348_v4 = vld [vmem:[#allocation3 + $0x70] sm:$0xe0]  ;;  %v5227_v3 = vsel %vm452_vm0, %v5225_v27, %v5226_v61 }
 0x598   : > { %v6413_v17 = vrot.slane %v6347_v50, 5  ;;  %v6349_v11 = vld [vmem:[#allocation3 + $0x78] sm:$0x1f]  ;;  %v6415_v30 = vrot.slane %v6348_v4, 5  ;;  %v5994_v46 = vld [vmem:[#allocation3 + $0x60] sm:$0xf8]  ;;  %v5894_v42 = vsel %vm5380_vm9, %v5892_v25, %v5893_v34 }
 0x599   : > { %v8574_v9 = vpop.f32.mrb[80].mxu1  ;;  %6284 = vrot.lane.b32.xlu0 %v6241_v19, %s8786_s15  ;;  %v6416_v56 = vrot.slane %v6349_v11, 5  ;;  %v5995_v5 = vld [vmem:[#allocation3 + $0x68] sm:$0x7]  ;;  %v5404_v21 = vsel %vm5380_vm9, %v5402_v53, %v5403_v13  ;;  %v5501_v0 = vld [vmem:[#allocation3 + $0x60] sm:$0xf8] }
 0x59a   : > { %v4797_v15 = vadd.f32 %v8574_v9, %v10250_v36  ;;  %v4788_v48 = vpop.f32.mrb[81].mxu1  ;;  %5266 = vrot.lane.b32.xlu1 %v5227_v3, %s8785_s8  ;;  %v6414_v18 = vsel %vm5380_vm9, %v6412_v49, %v6413_v17  ;;  %v6060_v26 = vrot.slane %v5994_v46, 3  ;;  %v6061_v38 = vrot.slane %v5995_v5, 3  ;;  %v5502_v31 = vld [vmem:[#allocation3 + $0x68] sm:$0x7] }
 0x59b   : > { %v4789_v28 = vadd.f32 %v10250_v36, %v4788_v48  ;;  %v8575_v39 = vpop.f32.mrb[82].mxu1  ;;  %6472 = vst.msk [vmem:[#allocation4 + $0x40] sm:$0xff] %vm829_vm6, %v6414_v18  ;;  %v6417_v1 = vsel %vm5380_vm9, %v6415_v30, %v6416_v56  ;;  %v6170_v10 = vld [vmem:[#allocation3 + $0x60] sm:$0xf0]  ;;  %v5569_v14 = vrot.slane %v5501_v0, 3  ;;  %v5570_v20 = vrot.slane %v5502_v31, 3 }
 0x59c   : > { %v4800_v32 = vadd.f32 %v8575_v39, %v10250_v36  ;;  %v4791_v58 = vpop.f32.mrb[83].mxu1  ;;  %v4881_v35 = vmax.f32 %v4797_v15, 0.0  ;;  %6473 = vst.msk [vmem:[#allocation4 + $0x58] sm:$0xff] %vm829_vm6, %v6417_v1  ;;  %v6171_v24 = vld [vmem:[#allocation3 + $0x68] sm:$0xf]  ;;  %v6236_v2 = vrot.slane %v6170_v10, 4  ;;  %v6062_v62 = vsel %vm5059_vm14, %v6060_v26, %v6061_v38 }
 0x59d   : > { %v4792_v41 = vadd.f32 %v10250_v36, %v4791_v58  ;;  %5935 = vrot.lane.b32.xlu0 %v5894_v42, %s8785_s8  ;;  %v4879_v60 = vmax.f32 %v4789_v28, 0.0  ;;  %v5152_v44 = vld [vmem:[#allocation3 + $0x60] sm:$0xf0]  ;;  %v5153_v29 = vld [vmem:[#allocation3 + $0x68] sm:$0xf]  ;;  %v6237_v59 = vrot.slane %v6171_v24, 4  ;;  %v5571_v57 = vsel %vm5059_vm14, %v5569_v14, %v5570_v20 }
 0x59e   : > { %v4882_v8 = vmax.f32 %v4800_v32, 0.0  ;;  %5443 = vrot.lane.b32.xlu1 %v5404_v21, %s8784_s30  ;;  %v5821_v6 = vld [vmem:[#allocation3 + $0x60] sm:$0xe0]  ;;  %v5222_v40 = vrot.slane %v5152_v44, 4  ;;  %v5822_v22 = vld [vmem:[#allocation3 + $0x68] sm:$0x1f] }
 0x59f   : > { %v4880_v51 = vmax.f32 %v4792_v41, 0.0  ;;  %v5328_v52 = vld [vmem:[#allocation3 + $0x60] sm:$0xe0]  ;;  %v5223_v55 = vrot.slane %v5153_v29, 4  ;;  %v5329_v7 = vld [vmem:[#allocation3 + $0x68] sm:$0x1f]  ;;  %v6238_v23 = vsel %vm452_vm0, %v6236_v2, %v6237_v59 }
 0x5a0   : > { %v4906_v33 = vpack.c.bf16 %v4882_v8, %v4881_v35  ;;  %v5009_v45 = vld [vmem:[#allocation3 + $0x70] sm:$0xf8]  ;;  %v5889_v12 = vrot.slane %v5821_v6, 5  ;;  %v5010_v63 = vld [vmem:[#allocation3 + $0x78] sm:$0x7]  ;;  %v5890_v34 = vrot.slane %v5822_v22, 5 }
 0x5a1   : > { %v4905_v37 = vpack.c.bf16 %v4880_v51, %v4879_v60  ;;  %6106 = vrot.lane.b32.xlu0 %v6062_v62, %s8784_s30  ;;  %v5081_v25 = vrot.slane %v5009_v45, 3  ;;  %v5082_v47 = vrot.slane %v5010_v63, 3  ;;  %v5679_v43 = vld [vmem:[#allocation3 + $0x70] sm:$0xf0]  ;;  %v5680_v53 = vld [vmem:[#allocation3 + $0x78] sm:$0xf]  ;;  %v5224_v17 = vsel %vm452_vm0, %v5222_v40, %v5223_v55 }
 0x5a2   : > { %v4938_v16 = vrot.slane %v4906_v33, 4  ;;  %v6494_v61 = vld [vmem:[#allocation4 + $0x40] sm:$0xff]  ;;  %5613 = vrot.lane.b32.xlu1 %v5571_v57, %s8786_s15  ;;  %v5399_v50 = vrot.slane %v5328_v52, 5  ;;  %v5748_v9 = vrot.slane %v5679_v43, 4  ;;  %v5749_v19 = vrot.slane %v5680_v53, 4 }
 0x5a3   : > { %v4937_v27 = vrot.slane %v4905_v37, 4  ;;  %8600 = vmatprep.mubr.msk.bf16.mxu1 %vm829_vm6, %v6494_v61  ;;  %v6497_v13 = vld [vmem:[#allocation4 + $0x58] sm:$0xff]  ;;  %v5007_v49 = vld [vmem:[#allocation3 + $0x60] sm:$0xf8]  ;;  %v5400_v4 = vrot.slane %v5329_v7, 5  ;;  %v5083_v15 = vsel %vm5059_vm14, %v5081_v25, %v5082_v47  ;;  %v5891_v56 = vsel %vm5380_vm9, %v5889_v12, %v5890_v34 }
 0x5a4   : > { %4977 = vst.msk [vmem:[#allocation3 + $0x90] sm:$0xf0] %vm857_vm5, %v4938_v16  ;;  %8601 = vmatmul.mubr.msk.bf16.vlgmr.msra.gmra.mrb[100].mxu1 %vm829_vm6, %v6497_v13  ;;  %v5008_v48 = vld [vmem:[#allocation3 + $0x68] sm:$0x7]  ;;  %v5078_v3 = vrot.slane %v5007_v49, 3  ;;  %v5750_v30 = vsel %vm452_vm0, %v5748_v9, %v5749_v19 }
 0x5a5   : > { %4978 = vst.msk [vmem:[#allocation3 + $0x98] sm:$0xf] %vm840_vm4, %v4938_v16  ;;  %4976 = vst.msk [vmem:[#allocation3 + $0x88] sm:$0xf] %vm840_vm4, %v4937_v27  ;;  %6282 = vrot.lane.b32.xlu0 %v6238_v23, %s8786_s15  ;;  %v5677_v11 = vld [vmem:[#allocation3 + $0x60] sm:$0xf0]  ;;  %v5401_v32 = vsel %vm5380_vm9, %v5399_v50, %v5400_v4 }
 0x5a6   : > { %4975 = vst.msk [vmem:[#allocation3 + $0x80] sm:$0xf0] %vm857_vm5, %v4937_v27  ;;  %5264 = vrot.lane.b32.xlu1 %v5224_v17, %s8785_s8  ;;  %v5079_v46 = vrot.slane %v5008_v48, 3  ;;  %v5678_v28 = vld [vmem:[#allocation3 + $0x68] sm:$0xf]  ;;  %v5745_v39 = vrot.slane %v5677_v11, 4 }
 0x5a7   : > { %5131 = vst.msk [vmem:[#allocation4 + $0xa8] sm:$0xff] %vm829_vm6, %v5083_v15  ;;  %5802 = vst.msk [vmem:[#allocation4 + $0x80] sm:$0xff] %vm829_vm6, %v5750_v30  ;;  %v5746_v18 = vrot.slane %v5678_v28, 4 }
 0x5a8   : > { %v5080_v5 = vsel %vm5059_vm14, %v5078_v3, %v5079_v46 }
 0x5a9   : > { %5933 = vrot.lane.b32.xlu0 %v5891_v56, %s8785_s8  ;;  %5130 = vst.msk [vmem:[#allocation4 + $0x90] sm:$0xff] %vm829_vm6, %v5080_v5  ;;  %v5747_v58 = vsel %vm452_vm0, %v5745_v39, %v5746_v18 }
 0x5aa   : > { %5441 = vrot.lane.b32.xlu1 %v5401_v32, %s8784_s30  ;;  %5801 = vst.msk [vmem:[#allocation4 + $0x68] sm:$0xff] %vm829_vm6, %v5747_v58 }
 0x5ab   : > { %v6000_v42 = vld [vmem:[#allocation3 + $0x90] sm:$0xf8] }
 0x5ac   : > { %v6001_v21 = vld [vmem:[#allocation3 + $0x98] sm:$0x7]  ;;  %v5507_v0 = vld [vmem:[#allocation3 + $0x90] sm:$0xf8]  ;;  %v6069_v41 = vrot.slane %v6000_v42, 3 }
 0x5ad   : > { %v6070_v1 = vrot.slane %v6001_v21, 3  ;;  %v5508_v26 = vld [vmem:[#allocation3 + $0x98] sm:$0x7]  ;;  %v5578_v38 = vrot.slane %v5507_v0, 3  ;;  %v6176_v10 = vld [vmem:[#allocation3 + $0x90] sm:$0xf0] }
 0x5ae   : > { %v5579_v31 = vrot.slane %v5508_v26, 3  ;;  %v6177_v35 = vld [vmem:[#allocation3 + $0x98] sm:$0xf]  ;;  %v6245_v14 = vrot.slane %v6176_v10, 4  ;;  %v5158_v24 = vld [vmem:[#allocation3 + $0x90] sm:$0xf0] }
 0x5af   : > { %v6071_v8 = vsel %vm5059_vm14, %v6069_v41, %v6070_v1  ;;  %v6246_v20 = vrot.slane %v6177_v35, 4  ;;  %v5159_v60 = vld [vmem:[#allocation3 + $0x98] sm:$0xf]  ;;  %v5231_v44 = vrot.slane %v5158_v24, 4  ;;  %v5827_v33 = vld [vmem:[#allocation3 + $0x90] sm:$0xe0] }
 0x5b0   : > { %6112 = vrot.lane.b32.xlu0 %v6071_v8, %s8784_s30  ;;  %v5580_v51 = vsel %vm5059_vm14, %v5578_v38, %v5579_v31  ;;  %v5232_v29 = vrot.slane %v5159_v60, 4  ;;  %v5828_v2 = vld [vmem:[#allocation3 + $0x98] sm:$0x1f]  ;;  %v5898_v6 = vrot.slane %v5827_v33, 5  ;;  %v5334_v62 = vld [vmem:[#allocation3 + $0x90] sm:$0xe0] }
 0x5b1   : > { %5619 = vrot.lane.b32.xlu1 %v5580_v51, %s8786_s15  ;;  %v5899_v37 = vrot.slane %v5828_v2, 5  ;;  %v5335_v59 = vld [vmem:[#allocation3 + $0x98] sm:$0x1f]  ;;  %v5408_v40 = vrot.slane %v5334_v62, 5  ;;  %v6350_v52 = vld [vmem:[#allocation3 + $0x80] sm:$0xe0]  ;;  %v6247_v55 = vsel %vm452_vm0, %v6245_v14, %v6246_v20 }
 0x5b2   : > { %v5409_v22 = vrot.slane %v5335_v59, 5  ;;  %v6351_v16 = vld [vmem:[#allocation3 + $0x88] sm:$0x1f]  ;;  %v8578_v57 = vpop.f32.mrb[84].mxu1  ;;  %v6418_v7 = vrot.slane %v6350_v52, 5  ;;  %v5233_v63 = vsel %vm452_vm0, %v5231_v44, %v5232_v29 }
 0x5b3   : > { %v6419_v45 = vrot.slane %v6351_v16, 5  ;;  %v6352_v27 = vld [vmem:[#allocation3 + $0x90] sm:$0xe0]  ;;  %v4813_v61 = vadd.f32 %v8578_v57, %v10250_v36  ;;  %v4804_v12 = vpop.f32.mrb[85].mxu1  ;;  %v6353_v25 = vld [vmem:[#allocation3 + $0x98] sm:$0x1f]  ;;  %v5900_v49 = vsel %vm5380_vm9, %v5898_v6, %v5899_v37 }
 0x5b4   : > { %6288 = vrot.lane.b32.xlu0 %v6247_v55, %s8786_s15  ;;  %v6421_v34 = vrot.slane %v6352_v27, 5  ;;  %v5998_v47 = vld [vmem:[#allocation3 + $0x80] sm:$0xf8]  ;;  %v4805_v43 = vadd.f32 %v10250_v36, %v4804_v12  ;;  %v8579_v53 = vpop.f32.mrb[86].mxu1  ;;  %v6422_v23 = vrot.slane %v6353_v25, 5  ;;  %v5410_v17 = vsel %vm5380_vm9, %v5408_v40, %v5409_v22 }
 0x5b5   : > { %5270 = vrot.lane.b32.xlu1 %v5233_v63, %s8785_s8  ;;  %v6420_v13 = vsel %vm5380_vm9, %v6418_v7, %v6419_v45  ;;  %v5999_v50 = vld [vmem:[#allocation3 + $0x88] sm:$0x7]  ;;  %v4816_v9 = vadd.f32 %v8579_v53, %v10250_v36  ;;  %v4807_v19 = vpop.f32.mrb[87].mxu1  ;;  %v5505_v4 = vld [vmem:[#allocation3 + $0x80] sm:$0xf8]  ;;  %v6066_v3 = vrot.slane %v5998_v47, 3 }
 0x5b6   : > { %6474 = vst.msk [vmem:[#allocation4 + $0x70] sm:$0xff] %vm829_vm6, %v6420_v13  ;;  %v4808_v15 = vadd.f32 %v10250_v36, %v4807_v19  ;;  %v6423_v48 = vsel %vm5380_vm9, %v6421_v34, %v6422_v23  ;;  %v6067_v11 = vrot.slane %v5999_v50, 3  ;;  %v5506_v30 = vld [vmem:[#allocation3 + $0x88] sm:$0x7]  ;;  %v6174_v46 = vld [vmem:[#allocation3 + $0x80] sm:$0xf0] }
 0x5b7   : > { %v4885_v28 = vmax.f32 %v4813_v61, 0.0  ;;  %v4886_v39 = vmax.f32 %v4816_v9, 0.0  ;;  %6475 = vst.msk [vmem:[#allocation4 + $0x88] sm:$0xff] %vm829_vm6, %v6423_v48  ;;  %v5575_v18 = vrot.slane %v5505_v4, 3  ;;  %v5576_v56 = vrot.slane %v5506_v30, 3 }
 0x5b8   : > { %5939 = vrot.lane.b32.xlu0 %v5900_v49, %s8785_s8  ;;  %v6175_v5 = vld [vmem:[#allocation3 + $0x88] sm:$0xf]  ;;  %v4883_v32 = vmax.f32 %v4805_v43, 0.0  ;;  %v4884_v58 = vmax.f32 %v4808_v15, 0.0  ;;  %v5156_v36 = vld [vmem:[#allocation3 + $0x80] sm:$0xf0]  ;;  %v6068_v38 = vsel %vm5059_vm14, %v6066_v3, %v6067_v11 }
 0x5b9   : > { %5447 = vrot.lane.b32.xlu1 %v5410_v17, %s8784_s30  ;;  %v5157_v42 = vld [vmem:[#allocation3 + $0x88] sm:$0xf]  ;;  %v4908_v21 = vpack.c.bf16 %v4886_v39, %v4885_v28  ;;  %v6242_v0 = vrot.slane %v6174_v46, 4  ;;  %v6243_v41 = vrot.slane %v6175_v5, 4  ;;  %v5228_v1 = vrot.slane %v5156_v36, 4 }
 0x5ba   : > { %v4907_v26 = vpack.c.bf16 %v4884_v58, %v4883_v32  ;;  %v5825_v31 = vld [vmem:[#allocation3 + $0x80] sm:$0xe0]  ;;  %v5826_v10 = vld [vmem:[#allocation3 + $0x88] sm:$0x1f]  ;;  %v5577_v14 = vsel %vm5059_vm14, %v5575_v18, %v5576_v56  ;;  %v5229_v20 = vrot.slane %v5157_v42, 4 }
 0x5bb   : > { %v5332_v35 = vld [vmem:[#allocation3 + $0x80] sm:$0xe0]  ;;  %v4940_v8 = vrot.slane %v4908_v21, 4  ;;  %v5333_v24 = vld [vmem:[#allocation3 + $0x88] sm:$0x1f]  ;;  %v6244_v2 = vsel %vm452_vm0, %v6242_v0, %v6243_v41  ;;  %v5895_v40 = vrot.slane %v5825_v31, 5 }
 0x5bc   : > { %6110 = vrot.lane.b32.xlu0 %v6068_v38, %s8784_s30  ;;  %v5013_v60 = vld [vmem:[#allocation3 + $0x90] sm:$0xf8]  ;;  %v4939_v51 = vrot.slane %v4907_v26, 4  ;;  %v5014_v29 = vld [vmem:[#allocation3 + $0x98] sm:$0x7]  ;;  %v5896_v22 = vrot.slane %v5826_v10, 5  ;;  %v5230_v57 = vsel %vm452_vm0, %v5228_v1, %v5229_v20 }
 0x5bd   : > { %v6500_v44 = vld [vmem:[#allocation4 + $0x70] sm:$0xff]  ;;  %5617 = vrot.lane.b32.xlu1 %v5577_v14, %s8786_s15  ;;  %v5087_v33 = vrot.slane %v5013_v60, 3  ;;  %4981 = vst.msk [vmem:[#allocation3 + $0xb0] sm:$0xf0] %vm857_vm5, %v4940_v8  ;;  %v5088_v6 = vrot.slane %v5014_v29, 3  ;;  %v5405_v55 = vrot.slane %v5332_v35, 5 }
 0x5be   : > { %4982 = vst.msk [vmem:[#allocation3 + $0xb8] sm:$0xf] %vm840_vm4, %v4940_v8  ;;  %8604 = vmatprep.mubr.msk.bf16.mxu1 %vm829_vm6, %v6500_v44  ;;  %v5683_v37 = vld [vmem:[#allocation3 + $0x90] sm:$0xf0]  ;;  %v5684_v62 = vld [vmem:[#allocation3 + $0x98] sm:$0xf]  ;;  %v5897_v47 = vsel %vm5380_vm9, %v5895_v40, %v5896_v22 }
 0x5bf   : > { %4979 = vst.msk [vmem:[#allocation3 + $0xa0] sm:$0xf0] %vm857_vm5, %v4939_v51  ;;  %v6503_v59 = vld [vmem:[#allocation4 + $0x88] sm:$0xff]  ;;  %v5754_v52 = vrot.slane %v5683_v37, 4  ;;  %v5755_v16 = vrot.slane %v5684_v62, 4  ;;  %v5406_v7 = vrot.slane %v5333_v24, 5  ;;  %v5089_v45 = vsel %vm5059_vm14, %v5087_v33, %v5088_v6 }
 0x5c0   : > { %4980 = vst.msk [vmem:[#allocation3 + $0xa8] sm:$0xf] %vm840_vm4, %v4939_v51  ;;  %8605 = vmatmul.mubr.msk.bf16.gmra.mrb[104].mxu1 %vm829_vm6, %v6503_v59  ;;  %6286 = vrot.lane.b32.xlu0 %v6244_v2, %s8786_s15  ;;  %v5011_v27 = vld [vmem:[#allocation3 + $0x80] sm:$0xf8]  ;;  %v5012_v12 = vld [vmem:[#allocation3 + $0x88] sm:$0x7] }
 0x5c1   : > { %5268 = vrot.lane.b32.xlu1 %v5230_v57, %s8785_s8  ;;  %5133 = vst.msk [vmem:[#allocation4 + $0xd8] sm:$0xff] %vm829_vm6, %v5089_v45  ;;  %v5756_v61 = vsel %vm452_vm0, %v5754_v52, %v5755_v16  ;;  %v5084_v63 = vrot.slane %v5011_v27, 3  ;;  %v5085_v25 = vrot.slane %v5012_v12, 3  ;;  %v5681_v34 = vld [vmem:[#allocation3 + $0x80] sm:$0xf0]  ;;  %v5407_v23 = vsel %vm5380_vm9, %v5405_v55, %v5406_v7 }
 0x5c2   : > { %5804 = vst.msk [vmem:[#allocation4 + $0xb0] sm:$0xff] %vm829_vm6, %v5756_v61  ;;  %v5682_v43 = vld [vmem:[#allocation3 + $0x88] sm:$0xf]  ;;  %v5751_v53 = vrot.slane %v5681_v34, 4  ;;  %v6342_v13 = vld [vmem:[#allocation3 + $0x40] sm:$0xe0] }
 0x5c3   : > { %v5086_v50 = vsel %vm5059_vm14, %v5084_v63, %v5085_v25  ;;  %v5752_v9 = vrot.slane %v5682_v43, 4  ;;  %v6343_v19 = vld [vmem:[#allocation3 + $0x48] sm:$0x1f]  ;;  %v6406_v49 = vrot.slane %v6342_v13, 5 }
 0x5c4   : > { %5937 = vrot.lane.b32.xlu0 %v5897_v47, %s8785_s8  ;;  %v6004_v17 = vld [vmem:[#allocation3 + $0xb0] sm:$0xf8]  ;;  %5132 = vst.msk [vmem:[#allocation4 + $0xc0] sm:$0xff] %vm829_vm6, %v5086_v50  ;;  %v6407_v56 = vrot.slane %v6343_v19, 5 }
 0x5c5   : > { %5445 = vrot.lane.b32.xlu1 %v5407_v23, %s8784_s30  ;;  %v6005_v4 = vld [vmem:[#allocation3 + $0xb8] sm:$0x7]  ;;  %v5511_v15 = vld [vmem:[#allocation3 + $0xb0] sm:$0xf8]  ;;  %v6075_v48 = vrot.slane %v6004_v17, 3  ;;  %v5753_v46 = vsel %vm452_vm0, %v5751_v53, %v5752_v9 }
 0x5c6   : > { %v6076_v3 = vrot.slane %v6005_v4, 3  ;;  %v5512_v11 = vld [vmem:[#allocation3 + $0xb8] sm:$0x7]  ;;  %v5584_v30 = vrot.slane %v5511_v15, 3  ;;  %v6180_v39 = vld [vmem:[#allocation3 + $0xb0] sm:$0xf0]  ;;  %v6408_v38 = vsel %vm5380_vm9, %v6406_v49, %v6407_v56 }
 0x5c7   : > { %v5585_v28 = vrot.slane %v5512_v11, 3  ;;  %v6181_v18 = vld [vmem:[#allocation3 + $0xb8] sm:$0xf]  ;;  %5803 = vst.msk [vmem:[#allocation4 + $0x98] sm:$0xff] %vm829_vm6, %v5753_v46  ;;  %v6251_v32 = vrot.slane %v6180_v39, 4  ;;  %6470 = vst.msk [vmem:[#allocation4 + $0x10] sm:$0xff] %vm829_vm6, %v6408_v38 }
 0x5c8   : > { %v6077_v5 = vsel %vm5059_vm14, %v6075_v48, %v6076_v3  ;;  %v6252_v58 = vrot.slane %v6181_v18, 4  ;;  %v5162_v36 = vld [vmem:[#allocation3 + $0xb0] sm:$0xf0]  ;;  %v5163_v42 = vld [vmem:[#allocation3 + $0xb8] sm:$0xf]  ;;  %v5928_v51 = vpop.permute.xlu0 %5927 }
 0x5c9   : > { %6116 = vrot.lane.b32.xlu0 %v6077_v5, %s8784_s30  ;;  %v5586_v21 = vsel %vm5059_vm14, %v5584_v30, %v5585_v28  ;;  %v5237_v0 = vrot.slane %v5162_v36, 4  ;;  %v5238_v41 = vrot.slane %v5163_v42, 4  ;;  %v5831_v1 = vld [vmem:[#allocation3 + $0xb0] sm:$0xe0]  ;;  %v5832_v26 = vld [vmem:[#allocation3 + $0xb8] sm:$0x1f]  ;;  %v5608_v37 = vpop.permute.xlu1 %5607 }
 0x5ca   : > { %5623 = vrot.lane.b32.xlu1 %v5586_v21, %s8786_s15  ;;  %v5904_v31 = vrot.slane %v5831_v1, 5  ;;  %v5905_v10 = vrot.slane %v5832_v26, 5  ;;  %v5338_v35 = vld [vmem:[#allocation3 + $0xb0] sm:$0xe0]  ;;  %v5339_v8 = vld [vmem:[#allocation3 + $0xb8] sm:$0x1f]  ;;  %v6253_v44 = vsel %vm452_vm0, %v6251_v32, %v6252_v58 }
 0x5cb   : > { %v5414_v14 = vrot.slane %v5338_v35, 5  ;;  %v5415_v20 = vrot.slane %v5339_v8, 5  ;;  %v6354_v24 = vld [vmem:[#allocation3 + $0xa0] sm:$0xe0]  ;;  %v6355_v60 = vld [vmem:[#allocation3 + $0xa8] sm:$0x1f]  ;;  %v5239_v62 = vsel %vm452_vm0, %v5237_v0, %v5238_v41 }
 0x5cc   : > { %v6424_v29 = vrot.slane %v6354_v24, 5  ;;  %v6425_v33 = vrot.slane %v6355_v60, 5  ;;  %v6356_v2 = vld [vmem:[#allocation3 + $0xb0] sm:$0xe0]  ;;  %v6357_v6 = vld [vmem:[#allocation3 + $0xb8] sm:$0x1f]  ;;  %v5926_v34 = vpop.permute.xlu0 %5925  ;;  %v5906_v47 = vsel %vm5380_vm9, %v5904_v31, %v5905_v10 }
 0x5cd   : > { %5974 = vst.msk [vmem:[#allocation4 + $0x20] sm:$0xff] %vm1746_vm10, %v5928_v51  ;;  %6292 = vrot.lane.b32.xlu0 %v6253_v44, %s8786_s15  ;;  %v6427_v59 = vrot.slane %v6356_v2, 5  ;;  %v6428_v40 = vrot.slane %v6357_v6, 5  ;;  %v6002_v22 = vld [vmem:[#allocation3 + $0xa0] sm:$0xf8]  ;;  %v5259_v13 = vpop.permute.xlu1 %5258  ;;  %5973 = vst.msk [vmem:[#allocation4 + $0x8] sm:$0xff] %vm1746_vm10, %v5926_v34  ;;  %v5416_v23 = vsel %vm5380_vm9, %v5414_v14, %v5415_v20 }
 0x5ce   : > { %v6003_v52 = vld [vmem:[#allocation3 + $0xa8] sm:$0x7]  ;;  %5654 = vst.msk [vmem:[#allocation4 + $0x18] sm:$0xff] %vm2485_vm12, %v5608_v37  ;;  %5274 = vrot.lane.b32.xlu1 %v5239_v62, %s8785_s8  ;;  %v6426_v16 = vsel %vm5380_vm9, %v6424_v29, %v6425_v33  ;;  %v6072_v57 = vrot.slane %v6002_v22, 3  ;;  %v5509_v7 = vld [vmem:[#allocation3 + $0xa0] sm:$0xf8] }
 0x5cf   : > { %v6073_v55 = vrot.slane %v6003_v52, 3  ;;  %v5510_v45 = vld [vmem:[#allocation3 + $0xa8] sm:$0x7]  ;;  %6476 = vst.msk [vmem:[#allocation4 + $0xa0] sm:$0xff] %vm829_vm6, %v6426_v16  ;;  %v6429_v27 = vsel %vm5380_vm9, %v6427_v59, %v6428_v40  ;;  %v5581_v61 = vrot.slane %v5509_v7, 3  ;;  %v8582_v49 = vpop.f32.mrb[88].mxu1 }
 0x5d0   : > { %v5582_v12 = vrot.slane %v5510_v45, 3  ;;  %v6178_v63 = vld [vmem:[#allocation3 + $0xa0] sm:$0xf0]  ;;  %v6179_v25 = vld [vmem:[#allocation3 + $0xa8] sm:$0xf]  ;;  %6477 = vst.msk [vmem:[#allocation4 + $0xb8] sm:$0xff] %vm829_vm6, %v6429_v27 }
 0x5d1   : > { %v5160_v43 = vld [vmem:[#allocation3 + $0xa0] sm:$0xf0]  ;;  %v5161_v53 = vld [vmem:[#allocation3 + $0xa8] sm:$0xf]  ;;  %5943 = vrot.lane.b32.xlu0 %v5906_v47, %s8785_s8  ;;  %5303 = vst.msk [vmem:[#allocation4 + $0x48] sm:$0xff] %vm1746_vm10, %v5259_v13  ;;  %v6248_v17 = vrot.slane %v6178_v63, 4  ;;  %v6074_v46 = vsel %vm5059_vm14, %v6072_v57, %v6073_v55  ;;  %v5436_v42 = vpop.permute.xlu1 %5435 }
 0x5d2   : > { %v10495_v50 = vld [vmem:[#allocation3 + $0xa0] sm:$0xe0]  ;;  %v10497_v9 = vld [vmem:[#allocation3 + $0xa8] sm:$0x1f]  ;;  %v10500_v19 = vld [vmem:[#allocation3 + $0x50] sm:$0xe0]  ;;  %5451 = vrot.lane.b32.xlu1 %v5416_v23, %s8784_s30  ;;  %v5583_v28 = vsel %vm5059_vm14, %v5581_v61, %v5582_v12 }
 0x5d3   : > { %v6249_v4 = vrot.slane %v6179_v25, 4  ;;  %v5234_v15 = vrot.slane %v5160_v43, 4  ;;  %v10503_v48 = vld [vmem:[#allocation3 + $0xa0] sm:$0xe0]  ;;  %v10508_v3 = vld [vmem:[%s11131_s6 + $0x3] ss:$0 sm:$0xff] }
 0x5d4   : > { %v4829_v11 = vadd.f32 %v10508_v3, %v8582_v49  ;;  %v4820_v30 = vpop.f32.mrb[89].mxu1  ;;  %v5235_v39 = vrot.slane %v5161_v53, 4  ;;  %v10513_v18 = vld [vmem:[#allocation3 + $0xa8] sm:$0x1f]  ;;  %v5017_v56 = vld [vmem:[#allocation3 + $0xb0] sm:$0xf8] }
 0x5d5   : > { %v4821_v5 = vadd.f32 %v10508_v3, %v4820_v30  ;;  %v8583_v32 = vpop.f32.mrb[90].mxu1  ;;  %v5901_v58 = vrot.slane %v10495_v50, 5  ;;  %v5902_v36 = vrot.slane %v10497_v9, 5  ;;  %v5018_v21 = vld [vmem:[#allocation3 + $0xb8] sm:$0x7]  ;;  %v5093_v0 = vrot.slane %v5017_v56, 3  ;;  %6114 = vrot.lane.b32.xlu0 %v6074_v46, %s8784_s30  ;;  %v5606_v40 = vpop.permute.xlu1 %5605 }
 0x5d6   : > { %v4832_v41 = vadd.f32 %v10508_v3, %v8583_v32  ;;  %v4823_v1 = vpop.f32.mrb[91].mxu1  ;;  %v5411_v26 = vrot.slane %v10503_v48, 5  ;;  %v5412_v38 = vrot.slane %v10513_v18, 5  ;;  %5480 = vst.msk [vmem:[#allocation4 + $0x48] sm:$0xff] %vm2116_vm11, %v5436_v42  ;;  %v5094_v31 = vrot.slane %v5018_v21, 3  ;;  %v6506_v14 = vld [vmem:[#allocation4 + $0xa0] sm:$0xff]  ;;  %5621 = vrot.lane.b32.xlu1 %v5583_v28, %s8786_s15 }
 0x5d7   : > { %v5687_v10 = vld [vmem:[#allocation3 + $0xb0] sm:$0xf0]  ;;  %v4889_v35 = vmax.f32 %v4829_v11, 0.0  ;;  %v4824_v8 = vadd.f32 %v10508_v3, %v4823_v1  ;;  %v5688_v20 = vld [vmem:[#allocation3 + $0xb8] sm:$0xf]  ;;  %v6409_v60 = vrot.slane %v10500_v19, 5  ;;  %8608 = vmatprep.mubr.msk.bf16.mxu1 %vm829_vm6, %v6506_v14  ;;  %v6250_v62 = vsel %vm452_vm0, %v6248_v17, %v6249_v4 }
 0x5d8   : > { %v5760_v24 = vrot.slane %v5687_v10, 4  ;;  %v4887_v51 = vmax.f32 %v4821_v5, 0.0  ;;  %v4890_v44 = vmax.f32 %v4832_v41, 0.0  ;;  %v6509_v29 = vld [vmem:[#allocation4 + $0xb8] sm:$0xff]  ;;  %v5095_v33 = vsel %vm5059_vm14, %v5093_v0, %v5094_v31  ;;  %v5015_v6 = vld [vmem:[#allocation3 + $0xa0] sm:$0xf8] }
 0x5d9   : > { %v5761_v2 = vrot.slane %v5688_v20, 4  ;;  %v4888_v37 = vmax.f32 %v4824_v8, 0.0  ;;  %8609 = vmatmul.mubr.msk.bf16.gmra.mrb[108].mxu1 %vm829_vm6, %v6509_v29  ;;  %v5236_v59 = vsel %vm452_vm0, %v5234_v15, %v5235_v39  ;;  %5135 = vst.msk [vmem:[#allocation4 + $0x108] sm:$0xff] %vm829_vm6, %v5095_v33  ;;  %v5016_v22 = vld [vmem:[#allocation3 + $0xa8] sm:$0x7]  ;;  %v5090_v52 = vrot.slane %v5015_v6, 3  ;;  %6290 = vrot.lane.b32.xlu0 %v6250_v62, %s8786_s15  ;;  %v5257_v13 = vpop.permute.xlu1 %5256 }
 0x5da   : > { %v5685_v16 = vld [vmem:[#allocation3 + $0xa0] sm:$0xf0]  ;;  %v4910_v57 = vpack.c.bf16 %v4890_v44, %v4889_v35  ;;  %5653 = vst.msk [vmem:[#allocation4] sm:$0xff] %vm2485_vm12, %v5606_v40  ;;  %v5091_v7 = vrot.slane %v5016_v22, 3  ;;  %v5686_v45 = vld [vmem:[#allocation3 + $0xa8] sm:$0xf]  ;;  %5272 = vrot.lane.b32.xlu1 %v5236_v59, %s8785_s8  ;;  %v5903_v53 = vsel %vm5380_vm9, %v5901_v58, %v5902_v36  ;;  %v5413_v9 = vsel %vm5380_vm9, %v5411_v26, %v5412_v38 }
 0x5db   : > { %v5762_v55 = vsel %vm452_vm0, %v5760_v24, %v5761_v2  ;;  %v5757_v27 = vrot.slane %v5685_v16, 4  ;;  %v6345_v61 = vld [vmem:[#allocation3 + $0x58] sm:$0x1f]  ;;  %v4909_v12 = vpack.c.bf16 %v4888_v37, %v4887_v51  ;;  %v5758_v63 = vrot.slane %v5686_v45, 4  ;;  %5302 = vst.msk [vmem:[#allocation4 + $0x30] sm:$0xff] %vm1746_vm10, %v5257_v13 }
 0x5dc   : > { %5806 = vst.msk [vmem:[#allocation4 + $0xe0] sm:$0xff] %vm829_vm6, %v5762_v55  ;;  %v6410_v25 = vrot.slane %v6345_v61, 5  ;;  %v4942_v34 = vrot.slane %v4910_v57, 4  ;;  %v5092_v47 = vsel %vm5059_vm14, %v5090_v52, %v5091_v7 }
 0x5dd   : > { %v4941_v43 = vrot.slane %v4909_v12, 4  ;;  %5134 = vst.msk [vmem:[#allocation4 + $0xf0] sm:$0xff] %vm829_vm6, %v5092_v47  ;;  %v5759_v23 = vsel %vm452_vm0, %v5757_v27, %v5758_v63  ;;  %5941 = vrot.lane.b32.xlu0 %v5903_v53, %s8785_s8  ;;  %v5434_v19 = vpop.permute.xlu1 %5433 }
 0x5de   : > { %v6411_v50 = vsel %vm5380_vm9, %v6409_v60, %v6410_v25  ;;  %4985 = vst.msk [vmem:[#allocation3 + $0xd0] sm:$0xf0] %vm857_vm5, %v4942_v34  ;;  %5449 = vrot.lane.b32.xlu1 %v5413_v9, %s8784_s30 }
 0x5df   : > { %4986 = vst.msk [vmem:[#allocation3 + $0xd8] sm:$0xf] %vm840_vm4, %v4942_v34  ;;  %4984 = vst.msk [vmem:[#allocation3 + $0xc8] sm:$0xf] %vm840_vm4, %v4941_v43 }
 0x5e0   : > { %5805 = vst.msk [vmem:[#allocation4 + $0xc8] sm:$0xff] %vm829_vm6, %v5759_v23  ;;  %6471 = vst.msk [vmem:[#allocation4 + $0x28] sm:$0xff] %vm829_vm6, %v6411_v50  ;;  %v8586_v15 = vpop.f32.mrb[92].mxu1 }
 0x5e1   : > { %4983 = vst.msk [vmem:[#allocation3 + $0xc0] sm:$0xf0] %vm857_vm5, %v4941_v43  ;;  %v4845_v28 = vadd.f32 %v10508_v3, %v8586_v15  ;;  %v4836_v39 = vpop.f32.mrb[93].mxu1 }
 0x5e2   : > { %5479 = vst.msk [vmem:[#allocation4 + $0x30] sm:$0xff] %vm2116_vm11, %v5434_v19  ;;  %v4837_v32 = vadd.f32 %v10508_v3, %v4836_v39  ;;  %v8587_v58 = vpop.f32.mrb[94].mxu1 }
 0x5e3   : > { %v4848_v41 = vadd.f32 %v10508_v3, %v8587_v58  ;;  %v4839_v1 = vpop.f32.mrb[95].mxu1  ;;  %v4893_v10 = vmax.f32 %v4845_v28, 0.0 }
 0x5e4   : > { %v4840_v35 = vadd.f32 %v10508_v3, %v4839_v1  ;;  %v4891_v60 = vmax.f32 %v4837_v32, 0.0 }
 0x5e5   : > { %v6008_v49 = vld [vmem:[#allocation3 + $0xd0] sm:$0xf8]  ;;  %v4894_v51 = vmax.f32 %v4848_v41, 0.0 }
 0x5e6   : > { %v6009_v17 = vld [vmem:[#allocation3 + $0xd8] sm:$0x7]  ;;  %v5515_v4 = vld [vmem:[#allocation3 + $0xd0] sm:$0xf8]  ;;  %v6081_v48 = vrot.slane %v6008_v49, 3  ;;  %v6105_v24 = vpop.permute.xlu0 %6104  ;;  %v4892_v6 = vmax.f32 %v4840_v35, 0.0 }
 0x5e7   : > { %v6082_v11 = vrot.slane %v6009_v17, 3  ;;  %v5516_v30 = vld [vmem:[#allocation3 + $0xd8] sm:$0x7]  ;;  %v5590_v46 = vrot.slane %v5515_v4, 3  ;;  %v6184_v56 = vld [vmem:[#allocation3 + $0xd0] sm:$0xf0]  ;;  %v5612_v2 = vpop.permute.xlu1 %5611  ;;  %v4912_v22 = vpack.c.bf16 %v4894_v51, %v4893_v10 }
 0x5e8   : > { %v5591_v18 = vrot.slane %v5516_v30, 3  ;;  %v6185_v5 = vld [vmem:[#allocation3 + $0xd8] sm:$0xf]  ;;  %v6257_v42 = vrot.slane %v6184_v56, 4  ;;  %v5166_v0 = vld [vmem:[#allocation3 + $0xd0] sm:$0xf0]  ;;  %v4911_v45 = vpack.c.bf16 %v4892_v6, %v4891_v60 }
 0x5e9   : > { %v6083_v36 = vsel %vm5059_vm14, %v6081_v48, %v6082_v11  ;;  %v6258_v21 = vrot.slane %v6185_v5, 4  ;;  %v5167_v38 = vld [vmem:[#allocation3 + $0xd8] sm:$0xf]  ;;  %v5243_v31 = vrot.slane %v5166_v0, 4  ;;  %v5835_v14 = vld [vmem:[#allocation3 + $0xd0] sm:$0xe0] }
 0x5ea   : > { %6120 = vrot.lane.b32.xlu0 %v6083_v36, %s8784_s30  ;;  %v5592_v26 = vsel %vm5059_vm14, %v5590_v46, %v5591_v18  ;;  %v5244_v8 = vrot.slane %v5167_v38, 4  ;;  %v5836_v20 = vld [vmem:[#allocation3 + $0xd8] sm:$0x1f]  ;;  %v5910_v44 = vrot.slane %v5835_v14, 5  ;;  %v5342_v33 = vld [vmem:[#allocation3 + $0xd0] sm:$0xe0]  ;;  %v6281_v25 = vpop.permute.xlu0 %6280 }
 0x5eb   : > { %5627 = vrot.lane.b32.xlu1 %v5592_v26, %s8786_s15  ;;  %v5911_v29 = vrot.slane %v5836_v20, 5  ;;  %6151 = vst.msk [vmem:[#allocation4 + $0x20] sm:$0xff] %vm2116_vm11, %v6105_v24  ;;  %v6259_v37 = vsel %vm452_vm0, %v6257_v42, %v6258_v21  ;;  %v5343_v62 = vld [vmem:[#allocation3 + $0xd8] sm:$0x1f]  ;;  %v5420_v59 = vrot.slane %v5342_v33, 5  ;;  %v4944_v34 = vrot.slane %v4912_v22, 4  ;;  %v5263_v13 = vpop.permute.xlu1 %5262 }
 0x5ec   : > { %v6358_v40 = vld [vmem:[#allocation3 + $0xc0] sm:$0xe0]  ;;  %5656 = vst.msk [vmem:[#allocation4 + $0x48] sm:$0xff] %vm2485_vm12, %v5612_v2  ;;  %v5245_v52 = vsel %vm452_vm0, %v5243_v31, %v5244_v8  ;;  %v5421_v16 = vrot.slane %v5343_v62, 5  ;;  %v6359_v57 = vld [vmem:[#allocation3 + $0xc8] sm:$0x1f] }
 0x5ed   : > { %v6430_v55 = vrot.slane %v6358_v40, 5  ;;  %v6360_v7 = vld [vmem:[#allocation3 + $0xd0] sm:$0xe0]  ;;  %v6431_v27 = vrot.slane %v6359_v57, 5  ;;  %v6361_v61 = vld [vmem:[#allocation3 + $0xd8] sm:$0x1f]  ;;  %v5912_v50 = vsel %vm5380_vm9, %v5910_v44, %v5911_v29 }
 0x5ee   : > { %6296 = vrot.lane.b32.xlu0 %v6259_v37, %s8786_s15  ;;  %v6433_v12 = vrot.slane %v6360_v7, 5  ;;  %v6006_v63 = vld [vmem:[#allocation3 + $0xc0] sm:$0xf8]  ;;  %v6434_v47 = vrot.slane %v6361_v61, 5  ;;  %v6007_v43 = vld [vmem:[#allocation3 + $0xc8] sm:$0x7]  ;;  %v5422_v4 = vsel %vm5380_vm9, %v5420_v59, %v5421_v16  ;;  %v5932_v18 = vpop.permute.xlu0 %5931 }
 0x5ef   : > { %5278 = vrot.lane.b32.xlu1 %v5245_v52, %s8785_s8  ;;  %v6078_v53 = vrot.slane %v6006_v63, 3  ;;  %6327 = vst.msk [vmem:[#allocation4 + $0x20] sm:$0xff] %vm2485_vm12, %v6281_v25  ;;  %v4943_v23 = vrot.slane %v4911_v45, 4  ;;  %v6432_v9 = vsel %vm5380_vm9, %v6430_v55, %v6431_v27  ;;  %v6079_v19 = vrot.slane %v6007_v43, 3  ;;  %v5513_v49 = vld [vmem:[#allocation3 + $0xc0] sm:$0xf8]  ;;  %v5440_v32 = vpop.permute.xlu1 %5439 }
 0x5f0   : > { %v5514_v17 = vld [vmem:[#allocation3 + $0xc8] sm:$0x7]  ;;  %5305 = vst.msk [vmem:[#allocation4 + $0x78] sm:$0xff] %vm1746_vm10, %v5263_v13  ;;  %v6435_v15 = vsel %vm5380_vm9, %v6433_v12, %v6434_v47  ;;  %v5587_v48 = vrot.slane %v5513_v49, 3  ;;  %v6182_v30 = vld [vmem:[#allocation3 + $0xc0] sm:$0xf0] }
 0x5f1   : > { %4989 = vst.msk [vmem:[#allocation3 + $0xf0] sm:$0xf0] %vm857_vm5, %v4944_v34  ;;  %v5588_v11 = vrot.slane %v5514_v17, 3  ;;  %v6183_v46 = vld [vmem:[#allocation3 + $0xc8] sm:$0xf]  ;;  %v6254_v56 = vrot.slane %v6182_v30, 4  ;;  %v6080_v58 = vsel %vm5059_vm14, %v6078_v53, %v6079_v19 }
 0x5f2   : > { %4990 = vst.msk [vmem:[#allocation3 + $0xf8] sm:$0xf] %vm840_vm4, %v4944_v34  ;;  %5947 = vrot.lane.b32.xlu0 %v5912_v50, %s8785_s8  ;;  %4988 = vst.msk [vmem:[#allocation3 + $0xe8] sm:$0xf] %vm840_vm4, %v4943_v23  ;;  %v5164_v28 = vld [vmem:[#allocation3 + $0xc0] sm:$0xf0]  ;;  %v6103_v31 = vpop.permute.xlu0 %6102 }
 0x5f3   : > { %6478 = vst.msk [vmem:[#allocation4 + $0xd0] sm:$0xff] %vm829_vm6, %v6432_v9  ;;  %5455 = vrot.lane.b32.xlu1 %v5422_v4, %s8784_s30  ;;  %6479 = vst.msk [vmem:[#allocation4 + $0xe8] sm:$0xff] %vm829_vm6, %v6435_v15  ;;  %v5165_v39 = vld [vmem:[#allocation3 + $0xc8] sm:$0xf]  ;;  %v6255_v5 = vrot.slane %v6183_v46, 4  ;;  %v5240_v36 = vrot.slane %v5164_v28, 4  ;;  %v5589_v41 = vsel %vm5059_vm14, %v5587_v48, %v5588_v11  ;;  %v5610_v24 = vpop.permute.xlu1 %5609 }
 0x5f4   : > { %4987 = vst.msk [vmem:[#allocation3 + $0xe0] sm:$0xf0] %vm857_vm5, %v4943_v23  ;;  %v5241_v42 = vrot.slane %v5165_v39, 4  ;;  %v5833_v21 = vld [vmem:[#allocation3 + $0xc0] sm:$0xe0] }
 0x5f5   : > { %5976 = vst.msk [vmem:[#allocation4 + $0x50] sm:$0xff] %vm1746_vm10, %v5932_v18  ;;  %v5834_v0 = vld [vmem:[#allocation3 + $0xc8] sm:$0x1f]  ;;  %v5340_v1 = vld [vmem:[#allocation3 + $0xc0] sm:$0xe0]  ;;  %v5907_v14 = vrot.slane %v5833_v21, 5  ;;  %v6256_v33 = vsel %vm452_vm0, %v6254_v56, %v6255_v5 }
 0x5f6   : > { %5482 = vst.msk [vmem:[#allocation4 + $0x78] sm:$0xff] %vm2116_vm11, %v5440_v32  ;;  %6118 = vrot.lane.b32.xlu0 %v6080_v58, %s8784_s30  ;;  %v5341_v26 = vld [vmem:[#allocation3 + $0xc8] sm:$0x1f]  ;;  %v5021_v38 = vld [vmem:[#allocation3 + $0xd0] sm:$0xf8]  ;;  %v5908_v20 = vrot.slane %v5834_v0, 5  ;;  %v5242_v2 = vsel %vm452_vm0, %v5240_v36, %v5241_v42  ;;  %v6279_v45 = vpop.permute.xlu0 %6278 }
 0x5f7   : > { %5625 = vrot.lane.b32.xlu1 %v5589_v41, %s8786_s15  ;;  %v5022_v10 = vld [vmem:[#allocation3 + $0xd8] sm:$0x7]  ;;  %v5099_v35 = vrot.slane %v5021_v38, 3  ;;  %v5691_v8 = vld [vmem:[#allocation3 + $0xd0] sm:$0xf0]  ;;  %6150 = vst.msk [vmem:[#allocation4 + $0x8] sm:$0xff] %vm2116_vm11, %v6103_v31  ;;  %v5261_v34 = vpop.permute.xlu1 %5260 }
 0x5f8   : > { %v5100_v60 = vrot.slane %v5022_v10, 3  ;;  %v5692_v51 = vld [vmem:[#allocation3 + $0xd8] sm:$0xf]  ;;  %v5766_v44 = vrot.slane %v5691_v8, 4  ;;  %v6012_v6 = vld [vmem:[#allocation3 + $0xf0] sm:$0xf8]  ;;  %v5909_v47 = vsel %vm5380_vm9, %v5907_v14, %v5908_v20 }
 0x5f9   : > { %v6013_v37 = vld [vmem:[#allocation3 + $0xf8] sm:$0x7]  ;;  %5655 = vst.msk [vmem:[#allocation4 + $0x30] sm:$0xff] %vm2485_vm12, %v5610_v24  ;;  %v5767_v62 = vrot.slane %v5692_v51, 4  ;;  %v5417_v40 = vrot.slane %v5340_v1, 5  ;;  %v5418_v22 = vrot.slane %v5341_v26, 5 }
 0x5fa   : > { %v6512_v29 = vld [vmem:[#allocation4 + $0xd0] sm:$0xff]  ;;  %v6515_v59 = vld [vmem:[#allocation4 + $0xe8] sm:$0xff]  ;;  %6294 = vrot.lane.b32.xlu0 %v6256_v33, %s8786_s15  ;;  %v6087_v52 = vrot.slane %v6012_v6, 3  ;;  %v5101_v16 = vsel %vm5059_vm14, %v5099_v35, %v5100_v60  ;;  %v5520_v55 = vld [vmem:[#allocation3 + $0xf8] sm:$0x7]  ;;  %v6088_v61 = vrot.slane %v6013_v37, 3  ;;  %v5930_v11 = vpop.permute.xlu0 %5929 }
 0x5fb   : > { %8612 = vmatprep.mubr.msk.bf16.mxu1 %vm829_vm6, %v6512_v29  ;;  %5276 = vrot.lane.b32.xlu1 %v5242_v2, %s8785_s8  ;;  %v5519_v57 = vld [vmem:[#allocation3 + $0xf0] sm:$0xf8]  ;;  %v6362_v7 = vld [vmem:[#allocation3 + $0xe0] sm:$0xe0]  ;;  %5137 = vst.msk [vmem:[#allocation4 + $0x138] sm:$0xff] %vm829_vm6, %v5101_v16  ;;  %v5768_v27 = vsel %vm452_vm0, %v5766_v44, %v5767_v62  ;;  %v5419_v50 = vsel %vm5380_vm9, %v5417_v40, %v5418_v22  ;;  %v5597_v19 = vrot.slane %v5520_v55, 3  ;;  %v5438_v39 = vpop.permute.xlu1 %5437 }
 0x5fc   : > { %8613 = vmatmul.mubr.msk.bf16.gmra.mrb[112].mxu1 %vm829_vm6, %v6515_v59  ;;  %v6363_v12 = vld [vmem:[#allocation3 + $0xe8] sm:$0x1f]  ;;  %v6436_v63 = vrot.slane %v6362_v7, 5  ;;  %v6364_v25 = vld [vmem:[#allocation3 + $0xf0] sm:$0xe0]  ;;  %6326 = vst.msk [vmem:[#allocation4 + $0x8] sm:$0xff] %vm2485_vm12, %v6279_v45  ;;  %v6089_v56 = vsel %vm5059_vm14, %v6087_v52, %v6088_v61 }
 0x5fd   : > { %5808 = vst.msk [vmem:[#allocation4 + $0x110] sm:$0xff] %vm829_vm6, %v5768_v27  ;;  %v6437_v43 = vrot.slane %v6363_v12, 5  ;;  %v6365_v53 = vld [vmem:[#allocation3 + $0xf8] sm:$0x1f]  ;;  %v6439_v13 = vrot.slane %v6364_v25, 5  ;;  %v5596_v9 = vrot.slane %v5519_v57, 3 }
 0x5fe   : > { %v6188_v23 = vld [vmem:[#allocation3 + $0xf0] sm:$0xf0]  ;;  %5304 = vst.msk [vmem:[#allocation4 + $0x60] sm:$0xff] %vm1746_vm10, %v5261_v34  ;;  %5945 = vrot.lane.b32.xlu0 %v5909_v47, %s8785_s8  ;;  %v6440_v49 = vrot.slane %v6365_v53, 5  ;;  %v6189_v17 = vld [vmem:[#allocation3 + $0xf8] sm:$0xf] }
 0x5ff   : > { %5453 = vrot.lane.b32.xlu1 %v5419_v50, %s8784_s30  ;;  %v6438_v4 = vsel %vm5380_vm9, %v6436_v63, %v6437_v43  ;;  %v5517_v15 = vld [vmem:[#allocation3 + $0xe0] sm:$0xf8]  ;;  %v5518_v48 = vld [vmem:[#allocation3 + $0xe8] sm:$0x7]  ;;  %v6263_v46 = vrot.slane %v6188_v23, 4  ;;  %v6264_v28 = vrot.slane %v6189_v17, 4  ;;  %v5598_v42 = vsel %vm5059_vm14, %v5596_v9, %v5597_v19 }
 0x600   : > { %6480 = vst.msk [vmem:[#allocation4 + $0x100] sm:$0xff] %vm829_vm6, %v6438_v4  ;;  %v6441_v30 = vsel %vm5380_vm9, %v6439_v13, %v6440_v49  ;;  %v10609_v18 = vld [vmem:[#allocation3 + $0xc0] sm:$0xf8]  ;;  %v5839_v5 = vld [vmem:[#allocation3 + $0xf0] sm:$0xe0]  ;;  %v8590_v36 = vpop.f32.mrb[96].mxu1 }
 0x601   : > { %5975 = vst.msk [vmem:[#allocation4 + $0x38] sm:$0xff] %vm1746_vm10, %v5930_v11  ;;  %v5840_v32 = vld [vmem:[#allocation3 + $0xf8] sm:$0x1f]  ;;  %v5168_v58 = vld [vmem:[#allocation3 + $0xe0] sm:$0xf0]  ;;  %v5593_v21 = vrot.slane %v5517_v15, 3  ;;  %v4861_v1 = vadd.f32 %v10508_v3, %v8590_v36  ;;  %v6265_v33 = vsel %vm452_vm0, %v6263_v46, %v6264_v28 }
 0x602   : > { %6481 = vst.msk [vmem:[#allocation4 + $0x118] sm:$0xff] %vm829_vm6, %v6441_v30  ;;  %6124 = vrot.lane.b32.xlu0 %v6089_v56, %s8784_s30  ;;  %v5594_v0 = vrot.slane %v5518_v48, 3  ;;  %v5169_v41 = vld [vmem:[#allocation3 + $0xe8] sm:$0xf]  ;;  %v4852_v26 = vpop.f32.mrb[97].mxu1  ;;  %v6486_v31 = vld [vmem:[#allocation4] sm:$0xff] }
 0x603   : > { %5481 = vst.msk [vmem:[#allocation4 + $0x60] sm:$0xff] %vm2116_vm11, %v5438_v39  ;;  %5631 = vrot.lane.b32.xlu1 %v5598_v42, %s8786_s15  ;;  %v10618_v38 = vld [vmem:[#allocation3 + $0xe0] sm:$0xf8]  ;;  %v5096_v10 = vrot.slane %v10609_v18, 3  ;;  %v4853_v35 = vadd.f32 %v10508_v3, %v4852_v26  ;;  %v8591_v8 = vpop.f32.mrb[98].mxu1  ;;  %v5916_v14 = vrot.slane %v5839_v5, 5 }
 0x604   : > { %v5917_v20 = vrot.slane %v5840_v32, 5  ;;  %v5246_v24 = vrot.slane %v5168_v58, 4  ;;  %v6487_v60 = vld [vmem:[#allocation4 + $0x8] sm:$0xff]  ;;  %v6490_v51 = vld [vmem:[#allocation4 + $0x20] sm:$0xff]  ;;  %v4864_v44 = vadd.f32 %v10508_v3, %v8591_v8  ;;  %v4855_v29 = vpop.f32.mrb[99].mxu1  ;;  %v5247_v2 = vrot.slane %v5169_v41, 4 }
 0x605   : > { %v6011_v6 = vld [vmem:[#allocation3 + $0xe8] sm:$0x7]  ;;  %v10624_v37 = vld [vmem:[#allocation3 + $0xe0] sm:$0xe0]  ;;  %6763 = vmatprep.mubr.bf16.mxu0 %v6487_v60  ;;  %v4897_v62 = vmax.f32 %v4861_v1, 0.0  ;;  %v4856_v59 = vadd.f32 %v10508_v3, %v4855_v29  ;;  %v5595_v40 = vsel %vm5059_vm14, %v5593_v21, %v5594_v0  ;;  %v6084_v22 = vrot.slane %v10618_v38, 3 }
 0x606   : > { %6300 = vrot.lane.b32.xlu0 %v6265_v33, %s8786_s15  ;;  %v10630_v52 = vld [vmem:[#allocation3 + $0xe8] sm:$0x1f]  ;;  %v10632_v16 = vld [vmem:[#allocation3 + $0xe0] sm:$0xf0]  ;;  %6764 = vmatmul.mubr.bf16.vlgmr.msra.gmra.mrb[96].mxu0 %v6486_v31  ;;  %v4898_v57 = vmax.f32 %v4864_v44, 0.0  ;;  %v4895_v3 = vmax.f32 %v4853_v35, 0.0  ;;  %v5918_v12 = vsel %vm5380_vm9, %v5916_v14, %v5917_v20  ;;  %v5248_v9 = vsel %vm452_vm0, %v5246_v24, %v5247_v2 }
 0x607   : > { %v6518_v55 = vld [vmem:[#allocation4 + $0x100] sm:$0xff]  ;;  %5629 = vrot.lane.b32.xlu1 %v5595_v40, %s8786_s15  ;;  %v10635_v7 = vld [vmem:[#allocation3 + $0xe8] sm:$0xf]  ;;  %v10637_v45 = vld [vmem:[#allocation3 + $0xf0] sm:$0xf0]  ;;  %6771 = vmatprep.mubr.bf16.mxu0 %v6490_v51  ;;  %v4896_v27 = vmax.f32 %v4856_v59, 0.0  ;;  %v6109_v11 = vpop.permute.xlu0 %6108 }
 0x608   : > { %8616 = vmatprep.mubr.msk.bf16.mxu1 %vm829_vm6, %v6518_v55  ;;  %v6085_v63 = vrot.slane %v6011_v6, 3  ;;  %v10641_v25 = vld [vmem:[#allocation3 + $0xf8] sm:$0xf]  ;;  %v8771_v34 = vld [vmem:[%s11128_s3 + $0x110] sm:$0xff]   ;;  %v4914_v47 = vpack.c.bf16 %v4898_v57, %v4897_v62  ;;  %v5423_v43 = vrot.slane %v10624_v37, 5  ;;  %v5424_v53 = vrot.slane %v10630_v52, 5  ;;  %v5616_v5 = vpop.permute.xlu1 %5615 }
 0x609   : > { %v6521_v61 = vld [vmem:[#allocation4 + $0x118] sm:$0xff]  ;;  %8593 = vmatpush3.bf16.msra.mxu0 %v8771_v34  ;;  %v6260_v13 = vrot.slane %v10632_v16, 4  ;;  %v4913_v50 = vpack.c.bf16 %v4896_v27, %v4895_v3  ;;  %v6261_v19 = vrot.slane %v10635_v7, 4  ;;  %v5249_v49 = vrot.slane %v10637_v45, 4  ;;  %v5020_v17 = vld [vmem:[#allocation3 + $0xc8] sm:$0x7] }
 0x60a   : > { %8617 = vmatmul.mubr.msk.bf16.gmra.mrb[116].mxu1 %vm829_vm6, %v6521_v61  ;;  %v8772_v23 = vld [vmem:[%s11128_s3 + $0x118] sm:$0xff]   ;;  %5951 = vrot.lane.b32.xlu0 %v5918_v12, %s8785_s8  ;;  %v5689_v4 = vld [vmem:[#allocation3 + $0xc0] sm:$0xf0]  ;;  %v4946_v15 = vrot.slane %v4914_v47, 4  ;;  %v5250_v48 = vrot.slane %v10641_v25, 4  ;;  %v5097_v46 = vrot.slane %v5020_v17, 3  ;;  %v6086_v0 = vsel %vm5059_vm14, %v6084_v22, %v6085_v63 }
 0x60b   : > { %8594 = vmatprep.subr.bf16.mxu0 %v8772_v23  ;;  %5280 = vrot.lane.b32.xlu1 %v5248_v9, %s8785_s8  ;;  %v6489_v30 = vld [vmem:[#allocation4 + $0x18] sm:$0xff]  ;;  %v5690_v28 = vld [vmem:[#allocation3 + $0xc8] sm:$0xf]  ;;  %v5763_v39 = vrot.slane %v5689_v4, 4  ;;  %v4945_v56 = vrot.slane %v4913_v50, 4  ;;  %6153 = vst.msk [vmem:[#allocation4 + $0x50] sm:$0xff] %vm2116_vm11, %v6109_v11  ;;  %v5425_v35 = vsel %vm5380_vm9, %v5423_v43, %v5424_v53  ;;  %v6285_v24 = vpop.permute.xlu0 %6284  ;;  %v6262_v59 = vsel %vm452_vm0, %v6260_v13, %v6261_v19 }
 0x60c   : > { %v10660_v32 = vld [vmem:[#allocation3 + $0xe0] sm:$0xe0]  ;;  %v10662_v58 = vld [vmem:[#allocation3 + $0xe8] sm:$0x1f]  ;;  %v5764_v36 = vrot.slane %v5690_v28, 4  ;;  %5658 = vst.msk [vmem:[#allocation4 + $0x78] sm:$0xff] %vm2485_vm12, %v5616_v5  ;;  %v5098_v41 = vsel %vm5059_vm14, %v5096_v10, %v5097_v46  ;;  %v5267_v2 = vpop.permute.xlu1 %5266  ;;  %v5251_v16 = vsel %vm452_vm0, %v5249_v49, %v5250_v48 }
 0x60d   : > { %v5695_v42 = vld [vmem:[#allocation3 + $0xf0] sm:$0xf0]  ;;  %v5696_v21 = vld [vmem:[#allocation3 + $0xf8] sm:$0xf]  ;;  %8595 = vmatpush3.bf16.msra.mxu0 %v8772_v23  ;;  %4993 = vst.msk [vmem:[#allocation3 + $0x110] sm:$0xf0] %vm857_vm5, %v4946_v15 }
 0x60e   : > { %4994 = vst.msk [vmem:[#allocation3 + $0x118] sm:$0xf] %vm840_vm4, %v4946_v15  ;;  %v5772_v1 = vrot.slane %v5695_v42, 4  ;;  %v5773_v26 = vrot.slane %v5696_v21, 4  ;;  %v5023_v38 = vld [vmem:[#allocation3 + $0xe0] sm:$0xf8]  ;;  %6122 = vrot.lane.b32.xlu0 %v6086_v0, %s8784_s30  ;;  %6772 = vmatmul.mubr.bf16.gmra.mrb[100].mxu0 %v6489_v30  ;;  %v5765_v8 = vsel %vm452_vm0, %v5763_v39, %v5764_v36 }
 0x60f   : > { %v5024_v31 = vld [vmem:[#allocation3 + $0xe8] sm:$0x7]  ;;  %4991 = vst.msk [vmem:[#allocation3 + $0x100] sm:$0xf0] %vm857_vm5, %v4945_v56  ;;  %v5102_v18 = vrot.slane %v5023_v38, 3  ;;  %5457 = vrot.lane.b32.xlu1 %v5425_v35, %s8784_s30  ;;  %v5913_v40 = vrot.slane %v10660_v32, 5  ;;  %v5936_v55 = vpop.permute.xlu0 %5935 }
 0x610   : > { %4992 = vst.msk [vmem:[#allocation3 + $0x108] sm:$0xf] %vm840_vm4, %v4945_v56  ;;  %v5103_v14 = vrot.slane %v5024_v31, 3  ;;  %v5025_v10 = vld [vmem:[#allocation3 + $0xf0] sm:$0xf8]  ;;  %v5774_v60 = vsel %vm452_vm0, %v5772_v1, %v5773_v26  ;;  %v5914_v22 = vrot.slane %v10662_v58, 5  ;;  %v5444_v12 = vpop.permute.xlu1 %5443 }
 0x611   : > { %5136 = vst.msk [vmem:[#allocation4 + $0x120] sm:$0xff] %vm829_vm6, %v5098_v41  ;;  %v5026_v20 = vld [vmem:[#allocation3 + $0xf8] sm:$0x7]  ;;  %5807 = vst.msk [vmem:[#allocation4 + $0xf8] sm:$0xff] %vm829_vm6, %v5765_v8  ;;  %v5105_v51 = vrot.slane %v5025_v10, 3 }
 0x612   : > { %v5106_v44 = vrot.slane %v5026_v20, 3  ;;  %v5693_v29 = vld [vmem:[#allocation3 + $0xe0] sm:$0xf0]  ;;  %v5694_v33 = vld [vmem:[#allocation3 + $0xe8] sm:$0xf]  ;;  %6329 = vst.msk [vmem:[#allocation4 + $0x50] sm:$0xff] %vm2485_vm12, %v6285_v24  ;;  %v5104_v6 = vsel %vm5059_vm14, %v5102_v18, %v5103_v14  ;;  %6298 = vrot.lane.b32.xlu0 %v6262_v59, %s8786_s15  ;;  %v5915_v34 = vsel %vm5380_vm9, %v5913_v40, %v5914_v22 }
 0x613   : > { %5810 = vst.msk [vmem:[#allocation4 + $0x140] sm:$0xff] %vm829_vm6, %v5774_v60  ;;  %v5769_v37 = vrot.slane %v5693_v29, 4  ;;  %v5770_v62 = vrot.slane %v5694_v33, 4  ;;  %5138 = vst.msk [vmem:[#allocation4 + $0x150] sm:$0xff] %vm829_vm6, %v5104_v6  ;;  %5282 = vrot.lane.b32.xlu1 %v5251_v16, %s8785_s8  ;;  %v5346_v27 = vld [vmem:[#allocation3 + $0xf0] sm:$0xe0]  ;;  %v6107_v4 = vpop.permute.xlu0 %6106 }
 0x614   : > { %5307 = vst.msk [vmem:[#allocation4 + $0xa8] sm:$0xff] %vm1746_vm10, %v5267_v2  ;;  %v5107_v52 = vsel %vm5059_vm14, %v5105_v51, %v5106_v44  ;;  %v6368_v7 = vld [vmem:[#allocation3 + $0x110] sm:$0xe0]  ;;  %v5347_v61 = vld [vmem:[#allocation3 + $0xf8] sm:$0x1f]  ;;  %5978 = vst.msk [vmem:[#allocation4 + $0x80] sm:$0xff] %vm1746_vm10, %v5936_v55  ;;  %v5614_v46 = vpop.permute.xlu1 %5613 }
 0x615   : > { %5139 = vst.msk [vmem:[#allocation4 + $0x168] sm:$0xff] %vm829_vm6, %v5107_v52  ;;  %v5771_v57 = vsel %vm452_vm0, %v5769_v37, %v5770_v62  ;;  %v6369_v45 = vld [vmem:[#allocation3 + $0x118] sm:$0x1f]  ;;  %v6016_v3 = vld [vmem:[#allocation3 + $0x110] sm:$0xf8]  ;;  %v6445_v50 = vrot.slane %v6368_v7, 5 }
 0x616   : > { %5809 = vst.msk [vmem:[#allocation4 + $0x128] sm:$0xff] %vm829_vm6, %v5771_v57  ;;  %v6366_v63 = vld [vmem:[#allocation3 + $0x100] sm:$0xe0]  ;;  %5949 = vrot.lane.b32.xlu0 %v5915_v34, %s8785_s8  ;;  %v6446_v19 = vrot.slane %v6369_v45, 5  ;;  %v6017_v49 = vld [vmem:[#allocation3 + $0x118] sm:$0x7] }
 0x617   : > { %v6367_v25 = vld [vmem:[#allocation3 + $0x108] sm:$0x1f]  ;;  %v5521_v47 = vld [vmem:[#allocation3 + $0x100] sm:$0xf8]  ;;  %5484 = vst.msk [vmem:[#allocation4 + $0xa8] sm:$0xff] %vm2116_vm11, %v5444_v12  ;;  %v6442_v43 = vrot.slane %v6366_v63, 5  ;;  %v6283_v1 = vpop.permute.xlu0 %6282 }
 0x618   : > { %v6443_v53 = vrot.slane %v6367_v25, 5  ;;  %v5522_v13 = vld [vmem:[#allocation3 + $0x108] sm:$0x7]  ;;  %v5599_v23 = vrot.slane %v5521_v47, 3  ;;  %v6093_v17 = vrot.slane %v6016_v3, 3  ;;  %v6094_v48 = vrot.slane %v6017_v49, 3  ;;  %v5265_v26 = vpop.permute.xlu1 %5264 }
 0x619   : > { %v5600_v9 = vrot.slane %v5522_v13, 3  ;;  %v6192_v11 = vld [vmem:[#allocation3 + $0x110] sm:$0xf0]  ;;  %v6193_v30 = vld [vmem:[#allocation3 + $0x118] sm:$0xf]  ;;  %6152 = vst.msk [vmem:[#allocation4 + $0x38] sm:$0xff] %vm2116_vm11, %v6107_v4  ;;  %v6447_v39 = vsel %vm5380_vm9, %v6445_v50, %v6446_v19 }
 0x61a   : > { %v6444_v15 = vsel %vm5380_vm9, %v6442_v43, %v6443_v53  ;;  %v5426_v56 = vrot.slane %v5346_v27, 5  ;;  %v5427_v5 = vrot.slane %v5347_v61, 5  ;;  %5657 = vst.msk [vmem:[#allocation4 + $0x60] sm:$0xff] %vm2485_vm12, %v5614_v46  ;;  %v6095_v32 = vsel %vm5059_vm14, %v6093_v17, %v6094_v48  ;;  %v5523_v42 = vld [vmem:[#allocation3 + $0x110] sm:$0xf8]  ;;  %6328 = vst.msk [vmem:[#allocation4 + $0x38] sm:$0xff] %vm2485_vm12, %v6283_v1 }
 0x61b   : > { %6482 = vst.msk [vmem:[#allocation4 + $0x130] sm:$0xff] %vm829_vm6, %v6444_v15  ;;  %v5601_v28 = vsel %vm5059_vm14, %v5599_v23, %v5600_v9  ;;  %6483 = vst.msk [vmem:[#allocation4 + $0x148] sm:$0xff] %vm829_vm6, %v6447_v39  ;;  %v6269_v58 = vrot.slane %v6192_v11, 4  ;;  %v6270_v36 = vrot.slane %v6193_v30, 4  ;;  %v5524_v21 = vld [vmem:[#allocation3 + $0x118] sm:$0x7]  ;;  %6128 = vrot.lane.b32.xlu0 %v6095_v32, %s8784_s30  ;;  %v5934_v24 = vpop.permute.xlu0 %5933 }
 0x61c   : > { %5633 = vrot.lane.b32.xlu1 %v5601_v28, %s8786_s15  ;;  %v6014_v0 = vld [vmem:[#allocation3 + $0x100] sm:$0xf8]  ;;  %v6015_v41 = vld [vmem:[#allocation3 + $0x108] sm:$0x7]  ;;  %v5428_v38 = vsel %vm5380_vm9, %v5426_v56, %v5427_v5  ;;  %v5602_v31 = vrot.slane %v5523_v42, 3  ;;  %v5603_v35 = vrot.slane %v5524_v21, 3  ;;  %v5442_v51 = vpop.permute.xlu1 %5441 }
 0x61d   : > { %5306 = vst.msk [vmem:[#allocation4 + $0x90] sm:$0xff] %vm1746_vm10, %v5265_v26  ;;  %v6271_v8 = vsel %vm452_vm0, %v6269_v58, %v6270_v36  ;;  %v6090_v18 = vrot.slane %v6014_v0, 3  ;;  %v6091_v14 = vrot.slane %v6015_v41, 3  ;;  %v6190_v10 = vld [vmem:[#allocation3 + $0x100] sm:$0xf0]  ;;  %5977 = vst.msk [vmem:[#allocation4 + $0x68] sm:$0xff] %vm1746_vm10, %v5934_v24 }
 0x61e   : > { %v6191_v20 = vld [vmem:[#allocation3 + $0x108] sm:$0xf]  ;;  %v6018_v44 = vld [vmem:[#allocation3 + $0x120] sm:$0xf8]  ;;  %v5604_v33 = vsel %vm5059_vm14, %v5602_v31, %v5603_v35  ;;  %5483 = vst.msk [vmem:[#allocation4 + $0x90] sm:$0xff] %vm2116_vm11, %v5442_v51  ;;  %v6266_v37 = vrot.slane %v6190_v10, 4 }
 0x61f   : > { %6304 = vrot.lane.b32.xlu0 %v6271_v8, %s8786_s15  ;;  %v6019_v2 = vld [vmem:[#allocation3 + $0x128] sm:$0x7]  ;;  %v6092_v6 = vsel %vm5059_vm14, %v6090_v18, %v6091_v14  ;;  %v6267_v62 = vrot.slane %v6191_v20, 4  ;;  %v6096_v59 = vrot.slane %v6018_v44, 3  ;;  %v6194_v22 = vld [vmem:[#allocation3 + $0x120] sm:$0xf0] }
 0x620   : > { %5459 = vrot.lane.b32.xlu1 %v5428_v38, %s8784_s30  ;;  %v6097_v52 = vrot.slane %v6019_v2, 3  ;;  %v6492_v57 = vld [vmem:[#allocation4 + $0x30] sm:$0xff]  ;;  %v5697_v55 = vld [vmem:[#allocation3 + $0x100] sm:$0xf0]  ;;  %v5698_v7 = vld [vmem:[#allocation3 + $0x108] sm:$0xf] }
 0x621   : > { %v6493_v40 = vld [vmem:[#allocation4 + $0x38] sm:$0xff]  ;;  %v6195_v3 = vld [vmem:[#allocation3 + $0x128] sm:$0xf]  ;;  %v6496_v27 = vld [vmem:[#allocation4 + $0x50] sm:$0xff]  ;;  %v5775_v61 = vrot.slane %v5697_v55, 4  ;;  %v5776_v12 = vrot.slane %v5698_v7, 4  ;;  %v6268_v63 = vsel %vm452_vm0, %v6266_v37, %v6267_v62 }
 0x622   : > { %v6524_v60 = vld [vmem:[#allocation4 + $0x130] sm:$0xff]  ;;  %v6527_v29 = vld [vmem:[#allocation4 + $0x148] sm:$0xff]  ;;  %v6113_v16 = vpop.permute.xlu0 %6112  ;;  %6779 = vmatprep.mubr.bf16.mxu0 %v6493_v40  ;;  %v6098_v34 = vsel %vm5059_vm14, %v6096_v59, %v6097_v52  ;;  %v6272_v47 = vrot.slane %v6194_v22, 4  ;;  %v6273_v43 = vrot.slane %v6195_v3, 4  ;;  %v5700_v23 = vld [vmem:[#allocation3 + $0x118] sm:$0xf] }
 0x623   : > { %8620 = vmatprep.mubr.msk.bf16.mxu1 %vm829_vm6, %v6524_v60  ;;  %6126 = vrot.lane.b32.xlu0 %v6092_v6, %s8784_s30  ;;  %6155 = vst.msk [vmem:[#allocation4 + $0x80] sm:$0xff] %vm2116_vm11, %v6113_v16  ;;  %v5620_v45 = vpop.permute.xlu1 %5619  ;;  %v5777_v25 = vsel %vm452_vm0, %v5775_v61, %v5776_v12  ;;  %v5699_v13 = vld [vmem:[#allocation3 + $0x110] sm:$0xf0]  ;;  %v5779_v19 = vrot.slane %v5700_v23, 4  ;;  %v5841_v49 = vld [vmem:[#allocation3 + $0x100] sm:$0xe0] }
 0x624   : > { %8621 = vmatmul.mubr.msk.bf16.gmra.mrb[120].mxu1 %vm829_vm6, %v6527_v29  ;;  %5635 = vrot.lane.b32.xlu1 %v5604_v33, %s8786_s15  ;;  %5660 = vst.msk [vmem:[#allocation4 + $0xa8] sm:$0xff] %vm2485_vm12, %v5620_v45  ;;  %v5778_v9 = vrot.slane %v5699_v13, 4  ;;  %v5842_v17 = vld [vmem:[#allocation3 + $0x108] sm:$0x1f]  ;;  %v6274_v15 = vsel %vm452_vm0, %v6272_v47, %v6273_v43  ;;  %v5919_v46 = vrot.slane %v5841_v49, 5  ;;  %v6530_v41 = vld [vmem:[#allocation4 + $0x160] sm:$0xff] }
 0x625   : > { %6780 = vmatmul.mubr.bf16.gmra.mrb[104].mxu0 %v6492_v57  ;;  %5811 = vst.msk [vmem:[#allocation4 + $0x158] sm:$0xff] %vm829_vm6, %v5777_v25  ;;  %v6495_v11 = vld [vmem:[#allocation4 + $0x48] sm:$0xff]  ;;  %v5920_v28 = vrot.slane %v5842_v17, 5  ;;  %v5843_v39 = vld [vmem:[#allocation3 + $0x110] sm:$0xe0]  ;;  %v6533_v1 = vld [vmem:[#allocation4 + $0x178] sm:$0xff]  ;;  %8624 = vmatprep.mubr.msk.bf16.mxu1 %vm829_vm6, %v6530_v41 }
 0x626   : > { %6787 = vmatprep.mubr.bf16.mxu0 %v6496_v27  ;;  %v6289_v53 = vpop.permute.xlu0 %6288  ;;  %v5780_v4 = vsel %vm452_vm0, %v5778_v9, %v5779_v19  ;;  %v5844_v56 = vld [vmem:[#allocation3 + $0x118] sm:$0x1f]  ;;  %v6020_v58 = vld [vmem:[#allocation3 + $0x130] sm:$0xf8]  ;;  %v5922_v21 = vrot.slane %v5843_v39, 5  ;;  %v6498_v2 = vld [vmem:[#allocation4 + $0x60] sm:$0xff] }
 0x627   : > { %6302 = vrot.lane.b32.xlu0 %v6268_v63, %s8786_s15  ;;  %6331 = vst.msk [vmem:[#allocation4 + $0x80] sm:$0xff] %vm2485_vm12, %v6289_v53  ;;  %v5271_v50 = vpop.permute.xlu1 %5270  ;;  %v6021_v36 = vld [vmem:[#allocation3 + $0x138] sm:$0x7]  ;;  %v5921_v42 = vsel %vm5380_vm9, %v5919_v46, %v5920_v28  ;;  %v5923_v0 = vrot.slane %v5844_v56, 5  ;;  %v6099_v26 = vrot.slane %v6020_v58, 3 }
 0x628   : > { %5309 = vst.msk [vmem:[#allocation4 + $0xd8] sm:$0xff] %vm1746_vm10, %v5271_v50  ;;  %v6100_v38 = vrot.slane %v6021_v36, 3  ;;  %v6196_v8 = vld [vmem:[#allocation3 + $0x130] sm:$0xf0]  ;;  %v6197_v18 = vld [vmem:[#allocation3 + $0x138] sm:$0xf] }
 0x629   : > { %5812 = vst.msk [vmem:[#allocation4 + $0x170] sm:$0xff] %vm829_vm6, %v5780_v4  ;;  %v5924_v14 = vsel %vm5380_vm9, %v5922_v21, %v5923_v0  ;;  %v6275_v20 = vrot.slane %v6196_v8, 4  ;;  %v6276_v24 = vrot.slane %v6197_v18, 4  ;;  %v6501_v22 = vld [vmem:[#allocation4 + $0x78] sm:$0xff] }
 0x62a   : > { %v5940_v48 = vpop.permute.xlu0 %5939  ;;  %v6101_v10 = vsel %vm5059_vm14, %v6099_v26, %v6100_v38 }
 0x62b   : > { %6130 = vrot.lane.b32.xlu0 %v6098_v34, %s8784_s30  ;;  %5980 = vst.msk [vmem:[#allocation4 + $0xb0] sm:$0xff] %vm1746_vm10, %v5940_v48  ;;  %v5448_v30 = vpop.permute.xlu1 %5447  ;;  %v6277_v44 = vsel %vm452_vm0, %v6275_v20, %v6276_v24  ;;  %v6507_v34 = vld [vmem:[#allocation4 + $0xa8] sm:$0xff] }
 0x62c   : > { %5486 = vst.msk [vmem:[#allocation4 + $0xd8] sm:$0xff] %vm2116_vm11, %v5448_v30  ;;  %8625 = vmatmul.mubr.msk.bf16.gmra.mrb[124].mxu1 %vm829_vm6, %v6533_v1 }
 0x62d   : > { %6788 = vmatmul.mubr.bf16.gmra.mrb[108].mxu0 %v6495_v11 }
 0x62e   : > { %v6111_v5 = vpop.permute.xlu0 %6110  ;;  %v6502_v37 = vld [vmem:[#allocation4 + $0x80] sm:$0xff] }
 0x62f   : > { %6306 = vrot.lane.b32.xlu0 %v6274_v15, %s8786_s15  ;;  %6154 = vst.msk [vmem:[#allocation4 + $0x68] sm:$0xff] %vm2116_vm11, %v6111_v5  ;;  %v5618_v32 = vpop.permute.xlu1 %5617 }
 0x630   : > { %5659 = vst.msk [vmem:[#allocation4 + $0x90] sm:$0xff] %vm2485_vm12, %v5618_v32 }
 0x632   : > { %v6287_v31 = vpop.permute.xlu0 %6286 }
 0x633   : > { %5953 = vrot.lane.b32.xlu0 %v5921_v42, %s8785_s8  ;;  %6330 = vst.msk [vmem:[#allocation4 + $0x68] sm:$0xff] %vm2485_vm12, %v6287_v31  ;;  %v5269_v35 = vpop.permute.xlu1 %5268 }
 0x634   : > { %5308 = vst.msk [vmem:[#allocation4 + $0xc0] sm:$0xff] %vm1746_vm10, %v5269_v35 }
 0x636   : > { %v5938_v60 = vpop.permute.xlu0 %5937 }
 0x637   : > { %5955 = vrot.lane.b32.xlu0 %v5924_v14, %s8785_s8  ;;  %5979 = vst.msk [vmem:[#allocation4 + $0x98] sm:$0xff] %vm1746_vm10, %v5938_v60  ;;  %v5446_v51 = vpop.permute.xlu1 %5445  ;;  %v6504_v61 = vld [vmem:[#allocation4 + $0x90] sm:$0xff] }
 0x638   : > { %5485 = vst.msk [vmem:[#allocation4 + $0xc0] sm:$0xff] %vm2116_vm11, %v5446_v51 }
 0x63a   : > { %v6499_v29 = vld [vmem:[#allocation4 + $0x68] sm:$0xff] }
 0x63b   : > { %6132 = vrot.lane.b32.xlu0 %v6101_v10, %s8784_s30  ;;  %v6117_v33 = vpop.permute.xlu0 %6116  ;;  %6795 = vmatprep.mubr.bf16.mxu0 %v6499_v29 }
 0x63c   : > { %6157 = vst.msk [vmem:[#allocation4 + $0xb0] sm:$0xff] %vm2116_vm11, %v6117_v33  ;;  %v5624_v6 = vpop.permute.xlu1 %5623  ;;  %6796 = vmatmul.mubr.bf16.gmra.mrb[112].mxu0 %v6498_v2 }
 0x63d   : > { %5662 = vst.msk [vmem:[#allocation4 + $0xd8] sm:$0xff] %vm2485_vm12, %v5624_v6  ;;  %6803 = vmatprep.mubr.bf16.mxu0 %v6502_v37 }
 0x63f   : > { %6308 = vrot.lane.b32.xlu0 %v6277_v44, %s8786_s15  ;;  %v6293_v62 = vpop.permute.xlu0 %6292 }
 0x640   : > { %6333 = vst.msk [vmem:[#allocation4 + $0xb0] sm:$0xff] %vm2485_vm12, %v6293_v62  ;;  %v5275_v59 = vpop.permute.xlu1 %5274 }
 0x641   : > { %5311 = vst.msk [vmem:[#allocation4 + $0x108] sm:$0xff] %vm1746_vm10, %v5275_v59 }
 0x643   : > { %v5944_v40 = vpop.permute.xlu0 %5943 }
 0x644   : > { %5982 = vst.msk [vmem:[#allocation4 + $0xe0] sm:$0xff] %vm1746_vm10, %v5944_v40  ;;  %v5452_v52 = vpop.permute.xlu1 %5451  ;;  %6804 = vmatmul.mubr.bf16.gmra.mrb[116].mxu0 %v6501_v22  ;;  %v6513_v32 = vld [vmem:[#allocation4 + $0xd8] sm:$0xff] }
 0x645   : > { %5488 = vst.msk [vmem:[#allocation4 + $0x108] sm:$0xff] %vm2116_vm11, %v5452_v52 }
 0x647   : > { %v6115_v16 = vpop.permute.xlu0 %6114  ;;  %v6508_v12 = vld [vmem:[#allocation4 + $0xb0] sm:$0xff] }
 0x648   : > { %6156 = vst.msk [vmem:[#allocation4 + $0x98] sm:$0xff] %vm2116_vm11, %v6115_v16  ;;  %v5622_v57 = vpop.permute.xlu1 %5621 }
 0x649   : > { %5661 = vst.msk [vmem:[#allocation4 + $0xc0] sm:$0xff] %vm2485_vm12, %v5622_v57 }
 0x64b   : > { %v6291_v55 = vpop.permute.xlu0 %6290 }
 0x64c   : > { %6332 = vst.msk [vmem:[#allocation4 + $0x98] sm:$0xff] %vm2485_vm12, %v6291_v55  ;;  %v5273_v7 = vpop.permute.xlu1 %5272 }
 0x64d   : > { %5310 = vst.msk [vmem:[#allocation4 + $0xf0] sm:$0xff] %vm1746_vm10, %v5273_v7 }
 0x64f   : > { %v5942_v45 = vpop.permute.xlu0 %5941 }
 0x650   : > { %5981 = vst.msk [vmem:[#allocation4 + $0xc8] sm:$0xff] %vm1746_vm10, %v5942_v45  ;;  %v5450_v3 = vpop.permute.xlu1 %5449  ;;  %v6510_v11 = vld [vmem:[#allocation4 + $0xc0] sm:$0xff] }
 0x651   : > { %5487 = vst.msk [vmem:[#allocation4 + $0xf0] sm:$0xff] %vm2116_vm11, %v5450_v3 }
 0x653   : > { %v6505_v27 = vld [vmem:[#allocation4 + $0x98] sm:$0xff] }
 0x654   : > { %6811 = vmatprep.mubr.bf16.mxu0 %v6505_v27 }
 0x655   : > { %6812 = vmatmul.mubr.bf16.gmra.mrb[120].mxu0 %v6504_v61 }
 0x656   : > { %6819 = vmatprep.mubr.bf16.mxu0 %v6508_v12 }
 0x65c   : > { %v6121_v63 = vpop.permute.xlu0 %6120 }
 0x65d   : > { %6159 = vst.msk [vmem:[#allocation4 + $0xe0] sm:$0xff] %vm2116_vm11, %v6121_v63  ;;  %v5628_v25 = vpop.permute.xlu1 %5627  ;;  %6820 = vmatmul.mubr.bf16.gmra.mrb[124].mxu0 %v6507_v34  ;;  %v6488_v34 = vld [vmem:[#allocation4 + $0x10] sm:$0xff] }
 0x65e   : > { %5664 = vst.msk [vmem:[#allocation4 + $0x108] sm:$0xff] %vm2485_vm12, %v5628_v25 }
 0x660   : > { %v6297_v47 = vpop.permute.xlu0 %6296 }
 0x661   : > { %6335 = vst.msk [vmem:[#allocation4 + $0xe0] sm:$0xff] %vm2485_vm12, %v6297_v47  ;;  %v5279_v43 = vpop.permute.xlu1 %5278  ;;  %v6491_v47 = vld [vmem:[#allocation4 + $0x28] sm:$0xff] }
 0x662   : > { %5313 = vst.msk [vmem:[#allocation4 + $0x138] sm:$0xff] %vm1746_vm10, %v5279_v43 }
 0x664   : > { %v5948_v53 = vpop.permute.xlu0 %5947 }
 0x665   : > { %5984 = vst.msk [vmem:[#allocation4 + $0x110] sm:$0xff] %vm1746_vm10, %v5948_v53  ;;  %v5456_v13 = vpop.permute.xlu1 %5455  ;;  %v6519_v60 = vld [vmem:[#allocation4 + $0x108] sm:$0xff] }
 0x666   : > { %5490 = vst.msk [vmem:[#allocation4 + $0x138] sm:$0xff] %vm2116_vm11, %v5456_v13 }
 0x668   : > { %v6119_v23 = vpop.permute.xlu0 %6118  ;;  %v6514_v30 = vld [vmem:[#allocation4 + $0xe0] sm:$0xff] }
 0x669   : > { %6158 = vst.msk [vmem:[#allocation4 + $0xc8] sm:$0xff] %vm2116_vm11, %v6119_v23  ;;  %v5626_v50 = vpop.permute.xlu1 %5625 }
 0x66a   : > { %5663 = vst.msk [vmem:[#allocation4 + $0xf0] sm:$0xff] %vm2485_vm12, %v5626_v50 }
 0x66c   : > { %v6295_v9 = vpop.permute.xlu0 %6294 }
 0x66d   : > { %6334 = vst.msk [vmem:[#allocation4 + $0xc8] sm:$0xff] %vm2485_vm12, %v6295_v9  ;;  %v5277_v19 = vpop.permute.xlu1 %5276 }
 0x66e   : > { %5312 = vst.msk [vmem:[#allocation4 + $0x120] sm:$0xff] %vm1746_vm10, %v5277_v19 }
 0x670   : > { %v5946_v49 = vpop.permute.xlu0 %5945 }
 0x671   : > { %5983 = vst.msk [vmem:[#allocation4 + $0xf8] sm:$0xff] %vm1746_vm10, %v5946_v49  ;;  %v5454_v17 = vpop.permute.xlu1 %5453  ;;  %v6516_v8 = vld [vmem:[#allocation4 + $0xf0] sm:$0xff] }
 0x672   : > { %5489 = vst.msk [vmem:[#allocation4 + $0x120] sm:$0xff] %vm2116_vm11, %v5454_v17 }
 0x674   : > { %v6125_v4 = vpop.permute.xlu0 %6124  ;;  %v6511_v15 = vld [vmem:[#allocation4 + $0xc8] sm:$0xff] }
 0x675   : > { %6161 = vst.msk [vmem:[#allocation4 + $0x110] sm:$0xff] %vm2116_vm11, %v6125_v4  ;;  %v5632_v48 = vpop.permute.xlu1 %5631  ;;  %6827 = vmatprep.mubr.bf16.mxu0 %v6511_v15 }
 0x676   : > { %5666 = vst.msk [vmem:[#allocation4 + $0x138] sm:$0xff] %vm2485_vm12, %v5632_v48  ;;  %6828 = vmatmul.mubr.bf16.gmra.mrb[128].mxu0 %v6510_v11 }
 0x677   : > { %6835 = vmatprep.mubr.bf16.mxu0 %v6514_v30  ;;  %v10783_v56 = vpop.f32.mrb[100].mxu1 }
 0x678   : > { %v6301_v46 = vpop.permute.xlu0 %6300  ;;  %v10786_v58 = vpop.f32.mrb[101].mxu1 }
 0x679   : > { %6337 = vst.msk [vmem:[#allocation4 + $0x110] sm:$0xff] %vm2485_vm12, %v6301_v46  ;;  %v5630_v28 = vpop.permute.xlu1 %5629  ;;  %v10789_v36 = vpop.f32.mrb[102].mxu1 }
 0x67a   : > { %5665 = vst.msk [vmem:[#allocation4 + $0x120] sm:$0xff] %vm2485_vm12, %v5630_v28  ;;  %v10791_v42 = vpop.f32.mrb[103].mxu1 }
 0x67c   : > { %v5952_v39 = vpop.permute.xlu0 %5951 }
 0x67d   : > { %5986 = vst.msk [vmem:[#allocation4 + $0x140] sm:$0xff] %vm1746_vm10, %v5952_v39  ;;  %v5281_v5 = vpop.permute.xlu1 %5280  ;;  %v6525_v16 = vld [vmem:[#allocation4 + $0x138] sm:$0xff] }
 0x67e   : > { %5314 = vst.msk [vmem:[#allocation4 + $0x150] sm:$0xff] %vm1746_vm10, %v5281_v5  ;;  %6836 = vmatmul.mubr.bf16.gmra.mrb[132].mxu0 %v6513_v32 }
 0x680   : > { %v6123_v21 = vpop.permute.xlu0 %6122  ;;  %v6520_v18 = vld [vmem:[#allocation4 + $0x110] sm:$0xff] }
 0x681   : > { %6160 = vst.msk [vmem:[#allocation4 + $0xf8] sm:$0xff] %vm2116_vm11, %v6123_v21  ;;  %v5458_v0 = vpop.permute.xlu1 %5457  ;;  %v6522_v59 = vld [vmem:[#allocation4 + $0x120] sm:$0xff] }
 0x682   : > { %5491 = vst.msk [vmem:[#allocation4 + $0x150] sm:$0xff] %vm2116_vm11, %v5458_v0 }
 0x684   : > { %v6299_v41 = vpop.permute.xlu0 %6298 }
 0x685   : > { %6336 = vst.msk [vmem:[#allocation4 + $0xf8] sm:$0xff] %vm2485_vm12, %v6299_v41  ;;  %v5283_v1 = vpop.permute.xlu1 %5282 }
 0x686   : > { %5315 = vst.msk [vmem:[#allocation4 + $0x168] sm:$0xff] %vm1746_vm10, %v5283_v1 }
 0x688   : > { %v5950_v26 = vpop.permute.xlu0 %5949 }
 0x689   : > { %5985 = vst.msk [vmem:[#allocation4 + $0x128] sm:$0xff] %vm1746_vm10, %v5950_v26 }
 0x68c   : > { %v6517_v31 = vld [vmem:[#allocation4 + $0xf8] sm:$0xff] }
 0x68d   : > { %v6129_v35 = vpop.permute.xlu0 %6128  ;;  %6843 = vmatprep.mubr.bf16.mxu0 %v6517_v31 }
 0x68e   : > { %v5634_v38 = vpop.permute.xlu1 %5633  ;;  %6163 = vst.msk [vmem:[#allocation4 + $0x140] sm:$0xff] %vm2116_vm11, %v6129_v35  ;;  %6844 = vmatmul.mubr.bf16.gmra.mrb[136].mxu0 %v6516_v8 }
 0x68f   : > { %5667 = vst.msk [vmem:[#allocation4 + $0x150] sm:$0xff] %vm2485_vm12, %v5634_v38  ;;  %6851 = vmatprep.mubr.bf16.mxu0 %v6520_v18  ;;  %v10864_v18 = vld [vmem:[%s11131_s6 + $0x4] ss:$0 sm:$0xff] }
 0x691   : > { %v6305_v10 = vpop.permute.xlu0 %6304 }
 0x692   : > { %v5460_v14 = vpop.permute.xlu1 %5459  ;;  %6339 = vst.msk [vmem:[#allocation4 + $0x140] sm:$0xff] %vm2485_vm12, %v6305_v10 }
 0x693   : > { %5492 = vst.msk [vmem:[#allocation4 + $0x168] sm:$0xff] %vm2116_vm11, %v5460_v14  ;;  %v10803_v51 = vpop.f32.mrb[104].mxu1 }
 0x694   : > { %v10806_v44 = vpop.f32.mrb[105].mxu1 }
 0x695   : > { %v6127_v24 = vpop.permute.xlu0 %6126  ;;  %v10808_v29 = vpop.f32.mrb[106].mxu1 }
 0x696   : > { %v5636_v20 = vpop.permute.xlu1 %5635  ;;  %6162 = vst.msk [vmem:[#allocation4 + $0x128] sm:$0xff] %vm2116_vm11, %v6127_v24  ;;  %6852 = vmatmul.mubr.bf16.gmra.mrb[140].mxu0 %v6519_v60  ;;  %v10810_v33 = vpop.f32.mrb[107].mxu1  ;;  %v6528_v12 = vld [vmem:[#allocation4 + $0x150] sm:$0xff] }
 0x697   : > { %5668 = vst.msk [vmem:[#allocation4 + $0x168] sm:$0xff] %vm2485_vm12, %v5636_v20 }
 0x699   : > { %v6303_v2 = vpop.permute.xlu0 %6302  ;;  %v6526_v40 = vld [vmem:[#allocation4 + $0x140] sm:$0xff] }
 0x69a   : > { %6338 = vst.msk [vmem:[#allocation4 + $0x128] sm:$0xff] %vm2485_vm12, %v6303_v2 }
 0x69d   : > { %v6131_v6 = vpop.permute.xlu0 %6130 }
 0x69e   : > { %v6531_v25 = vld [vmem:[#allocation4 + $0x168] sm:$0xff] }
 0x6a1   : > { %v6307_v37 = vpop.permute.xlu0 %6306  ;;  %v6523_v62 = vld [vmem:[#allocation4 + $0x128] sm:$0xff] }
 0x6a2   : > { %6859 = vmatprep.mubr.bf16.mxu0 %v6523_v62 }
 0x6a3   : > { %6860 = vmatmul.mubr.bf16.gmra.mrb[144].mxu0 %v6522_v59 }
 0x6a4   : > { %6867 = vmatprep.mubr.bf16.mxu0 %v6526_v40 }
 0x6a5   : > { %v5954_v22 = vpop.permute.xlu0 %5953 }
 0x6a6   : > { %5987 = vst.msk [vmem:[#allocation4 + $0x158] sm:$0xff] %vm1746_vm10, %v5954_v22 }
 0x6a7   : > { %6164 = vst.msk [vmem:[#allocation4 + $0x158] sm:$0xff] %vm2116_vm11, %v6131_v6 }
 0x6a8   : > { %6340 = vst.msk [vmem:[#allocation4 + $0x158] sm:$0xff] %vm2485_vm12, %v6307_v37 }
 0x6a9   : > { %v5956_v52 = vpop.permute.xlu0 %5955 }
 0x6aa   : > { %5988 = vst.msk [vmem:[#allocation4 + $0x170] sm:$0xff] %vm1746_vm10, %v5956_v52 }
 0x6ab   : > { %6868 = vmatmul.mubr.bf16.gmra.mrb[148].mxu0 %v6525_v16 }
 0x6ac   : > { %v10817_v55 = vpop.f32.mrb[108].mxu1 }
 0x6ad   : > { %v6133_v57 = vpop.permute.xlu0 %6132  ;;  %v10820_v7 = vpop.f32.mrb[109].mxu1 }
 0x6ae   : > { %6165 = vst.msk [vmem:[#allocation4 + $0x170] sm:$0xff] %vm2116_vm11, %v6133_v57  ;;  %v10822_v3 = vpop.f32.mrb[110].mxu1 }
 0x6af   : > { %v6529_v45 = vld [vmem:[#allocation4 + $0x158] sm:$0xff]  ;;  %v10824_v27 = vpop.f32.mrb[111].mxu1 }
 0x6b0   : > { %6875 = vmatprep.mubr.bf16.mxu0 %v6529_v45 }
 0x6b1   : > { %v6309_v61 = vpop.permute.xlu0 %6308 }
 0x6b2   : > { %6341 = vst.msk [vmem:[#allocation4 + $0x170] sm:$0xff] %vm2485_vm12, %v6309_v61 }
 0x6b3   : > { %6876 = vmatmul.mubr.bf16.gmra.mrb[152].mxu0 %v6528_v12 }
 0x6b9   : > { %v6532_v63 = vld [vmem:[#allocation4 + $0x170] sm:$0xff] }
 0x6ba   : > { %6883 = vmatprep.mubr.bf16.mxu0 %v6532_v63 }
 0x6bb   : > { %6884 = vmatmul.mubr.bf16.gmra.mrb[156].mxu0 %v6531_v25 }
 0x6bc   : > { %8596 = vmatprep.mubr.msk.bf16.mxu0 %vm829_vm6, %v6488_v34 }
 0x6c3   : > { %8597 = vmatmul.mubr.msk.bf16.vlgmr.msra.gmra.mrb[160].mxu0 %vm829_vm6, %v6491_v47 }
 0x6cf   : > { %v10829_v43 = vpop.f32.mrb[112].mxu1 }
 0x6d0   : > { %v10831_v53 = vpop.f32.mrb[113].mxu1 }
 0x6d1   : > { %v10833_v13 = vpop.f32.mrb[114].mxu1 }
 0x6d2   : > { %v10835_v23 = vpop.f32.mrb[115].mxu1 }
 0x6d9   : > { %v8288_v50 = vpop.f32.mrb[96].mxu0 }
 0x6da   : > { %v8289_v9 = vpop.f32.mrb[97].mxu0 }
 0x6db   : > { %v10837_v19 = vadd.f32 %v8289_v9, %v8288_v50  ;;  %v8291_v49 = vpop.f32.mrb[98].mxu0 }
 0x6dc   : > { %v8292_v4 = vpop.f32.mrb[99].mxu0 }
 0x6dd   : > { %v10839_v17 = vpop.f32.mrb[116].mxu1  ;;  %v10843_v48 = vadd.f32 %v8292_v4, %v8291_v49 }
 0x6de   : > { %v10841_v15 = vpop.f32.mrb[117].mxu1 }
 0x6df   : > { %v10845_v11 = vpop.f32.mrb[118].mxu1 }
 0x6e0   : > { %v10847_v30 = vpop.f32.mrb[119].mxu1 }
 0x6e1   : > { %v8294_v46 = vpop.f32.mrb[100].mxu0 }
 0x6e2   : > { %v8295_v28 = vpop.f32.mrb[101].mxu0 }
 0x6e3   : > { %v10849_v39 = vadd.f32 %v8295_v28, %v8294_v46  ;;  %v8297_v5 = vpop.f32.mrb[102].mxu0 }
 0x6e4   : > { %v8298_v32 = vpop.f32.mrb[103].mxu0 }
 0x6e5   : > { %v10851_v21 = vadd.f32 %v8298_v32, %v8297_v5 }
 0x6f7   : > { %v10853_v0 = vpop.f32.mrb[120].mxu1 }
 0x6f8   : > { %v10855_v41 = vpop.f32.mrb[121].mxu1  ;;  %v8300_v38 = vpop.f32.mrb[104].mxu0 }
 0x6f9   : > { %v10857_v1 = vpop.f32.mrb[122].mxu1  ;;  %v8301_v31 = vpop.f32.mrb[105].mxu0 }
 0x6fa   : > { %v10859_v26 = vpop.f32.mrb[123].mxu1  ;;  %v8302_v35 = vadd.f32 %v8301_v31, %v8300_v38  ;;  %v8303_v8 = vpop.f32.mrb[106].mxu0 }
 0x6fb   : > { %v8304_v14 = vpop.f32.mrb[107].mxu0 }
 0x6fc   : > { %v6782_v10 = vadd.f32 %v8302_v35, %v10864_v18  ;;  %v8305_v20 = vadd.f32 %v8304_v14, %v8303_v8 }
 0x6fe   : > { %v6943_v24 = vadd.f32 %v10786_v58, %v6782_v10  ;;  %v6785_v60 = vadd.f32 %v8305_v20, %v10864_v18 }
 0x6ff   : > { %v10876_v25 = vpop.f32.mrb[124].mxu1 }
 0x700   : > { %v6946_v2 = vadd.f32 %v10791_v42, %v6785_v60  ;;  %v8306_v6 = vpop.f32.mrb[108].mxu0  ;;  %v7057_v62 = vmax.f32 %v6943_v24, 0.0  ;;  %v10878_v34 = vpop.f32.mrb[125].mxu1 }
 0x701   : > { %v8307_v37 = vpop.f32.mrb[109].mxu0  ;;  %v10882_v50 = vpop.f32.mrb[126].mxu1 }
 0x702   : > { %v7058_v59 = vmax.f32 %v6946_v2, 0.0  ;;  %v8308_v40 = vadd.f32 %v8307_v37, %v8306_v6  ;;  %v8309_v22 = vpop.f32.mrb[110].mxu0  ;;  %v10884_v9 = vpop.f32.mrb[127].mxu1 }
 0x703   : > { %v8310_v52 = vpop.f32.mrb[111].mxu0 }
 0x704   : > { %v10870_v16 = vpack.c.bf16 %v7058_v59, %v7057_v62  ;;  %v6790_v57 = vadd.f32 %v8308_v40, %v10864_v18  ;;  %v8311_v45 = vadd.f32 %v8310_v52, %v8309_v22 }
 0x706   : > { %v6951_v61 = vadd.f32 %v10783_v56, %v6790_v57  ;;  %v6793_v58 = vadd.f32 %v8311_v45, %v10864_v18 }
 0x708   : > { %v6954_v12 = vadd.f32 %v10789_v36, %v6793_v58  ;;  %v7059_v63 = vmax.f32 %v6951_v61, 0.0 }
 0x70a   : > { %v7060_v42 = vmax.f32 %v6954_v12, 0.0 }
 0x70c   : > { %v10880_v47 = vpack.c.bf16 %v7060_v42, %v7059_v63 }
 0x70f   : > { %v8312_v49 = vpop.f32.mrb[112].mxu0 }
 0x710   : > { %v8313_v4 = vpop.f32.mrb[113].mxu0 }
 0x711   : > { %v8314_v46 = vadd.f32 %v8313_v4, %v8312_v49  ;;  %v8315_v56 = vpop.f32.mrb[114].mxu0 }
 0x712   : > { %v8316_v28 = vpop.f32.mrb[115].mxu0 }
 0x713   : > { %v6798_v5 = vadd.f32 %v8314_v46, %v10864_v18  ;;  %v8317_v36 = vadd.f32 %v8316_v28, %v8315_v56 }
 0x715   : > { %v6959_v32 = vadd.f32 %v10806_v44, %v6798_v5  ;;  %v6801_v38 = vadd.f32 %v8317_v36, %v10864_v18 }
 0x717   : > { %v6962_v31 = vadd.f32 %v10810_v33, %v6801_v38  ;;  %v8318_v35 = vpop.f32.mrb[116].mxu0  ;;  %v7061_v14 = vmax.f32 %v6959_v32, 0.0 }
 0x718   : > { %v8319_v8 = vpop.f32.mrb[117].mxu0 }
 0x719   : > { %v7062_v10 = vmax.f32 %v6962_v31, 0.0  ;;  %v8320_v20 = vadd.f32 %v8319_v8, %v8318_v35  ;;  %v8321_v24 = vpop.f32.mrb[118].mxu0 }
 0x71a   : > { %v8322_v60 = vpop.f32.mrb[119].mxu0 }
 0x71b   : > { %v10890_v2 = vpack.c.bf16 %v7062_v10, %v7061_v14  ;;  %v6806_v6 = vadd.f32 %v8320_v20, %v10864_v18  ;;  %v8323_v37 = vadd.f32 %v8322_v60, %v8321_v24  ;;  %v8761_v10 = vld [vmem:[%s11129_s4] sm:$0xff]   ;;  %v8762_v20 = vld [vmem:[%s11129_s4 + $0x8] sm:$0xff]  }
 0x71c   : > { %8628 = vmatprep.subr.bf16.mxu1 %v8761_v10  ;;  %v8765_v60 = vld [vmem:[%s11129_s4 + $0x20] sm:$0xff]  }
 0x71d   : > { %v6967_v62 = vadd.f32 %v10803_v51, %v6806_v6  ;;  %v6809_v44 = vadd.f32 %v8323_v37, %v10864_v18  ;;  %8629 = vmatpush3.bf16.msra.mxu1 %v8761_v10 }
 0x71e   : > { %8630 = vmatprep.subr.bf16.mxu1 %v8762_v20 }
 0x71f   : > { %v6970_v59 = vadd.f32 %v10808_v29, %v6809_v44  ;;  %v7063_v40 = vmax.f32 %v6967_v62, 0.0 }
 0x721   : > { %v7064_v33 = vmax.f32 %v6970_v59, 0.0  ;;  %8631 = vmatpush3.bf16.msra.mxu1 %v8762_v20 }
 0x723   : > { %v10896_v22 = vpack.c.bf16 %v7064_v33, %v7063_v40  ;;  %v8766_v40 = vld [vmem:[%s11129_s4 + $0x28] sm:$0xff]  }
 0x728   : > { %v8324_v52 = vpop.f32.mrb[120].mxu0 }
 0x729   : > { %v8325_v57 = vpop.f32.mrb[121].mxu0 }
 0x72a   : > { %v8326_v45 = vadd.f32 %v8325_v57, %v8324_v52  ;;  %v8327_v61 = vpop.f32.mrb[122].mxu0 }
 0x72b   : > { %v8328_v58 = vpop.f32.mrb[123].mxu0 }
 0x72c   : > { %v6814_v12 = vadd.f32 %v8326_v45, %v10864_v18  ;;  %v8329_v63 = vadd.f32 %v8328_v58, %v8327_v61  ;;  %v8767_v61 = vld [vmem:[%s11129_s4 + $0x30] sm:$0xff]  }
 0x72e   : > { %v6975_v42 = vadd.f32 %v10820_v7, %v6814_v12  ;;  %v6817_v51 = vadd.f32 %v8329_v63, %v10864_v18 }
 0x730   : > { %v6978_v49 = vadd.f32 %v10824_v27, %v6817_v51  ;;  %v8330_v4 = vpop.f32.mrb[124].mxu0  ;;  %v7065_v46 = vmax.f32 %v6975_v42, 0.0 }
 0x731   : > { %v8331_v29 = vpop.f32.mrb[125].mxu0 }
 0x732   : > { %v7066_v56 = vmax.f32 %v6978_v49, 0.0  ;;  %v8332_v28 = vadd.f32 %v8331_v29, %v8330_v4  ;;  %v8333_v5 = vpop.f32.mrb[126].mxu0 }
 0x733   : > { %v8334_v36 = vpop.f32.mrb[127].mxu0 }
 0x734   : > { %v10902_v32 = vpack.c.bf16 %v7066_v56, %v7065_v46  ;;  %v6822_v38 = vadd.f32 %v8332_v28, %v10864_v18  ;;  %v8335_v31 = vadd.f32 %v8334_v36, %v8333_v5 }
 0x736   : > { %v6983_v35 = vadd.f32 %v10817_v55, %v6822_v38  ;;  %v6825_v7 = vadd.f32 %v8335_v31, %v10864_v18  ;;  %v8763_v55 = vld [vmem:[%s11129_s4 + $0x10] sm:$0xff]  }
 0x737   : > { %8632 = vmatprep.subr.bf16.mxu1 %v8763_v55 }
 0x738   : > { %v6986_v8 = vadd.f32 %v10822_v3, %v6825_v7  ;;  %v7067_v14 = vmax.f32 %v6983_v35, 0.0  ;;  %v8764_v3 = vld [vmem:[%s11129_s4 + $0x18] sm:$0xff]   ;;  %8633 = vmatpush3.bf16.msra.mxu1 %v8763_v55 }
 0x739   : > { %8634 = vmatprep.subr.bf16.mxu1 %v8764_v3 }
 0x73a   : > { %v7068_v27 = vmax.f32 %v6986_v8, 0.0 }
 0x73c   : > { %v10914_v24 = vpack.c.bf16 %v7068_v27, %v7067_v14  ;;  %8635 = vmatpush3.bf16.msra.mxu1 %v8764_v3 }
 0x73d   : > { %8636 = vmatprep.subr.bf16.mxu1 %v8765_v60 }
 0x740   : > { %8637 = vmatpush3.bf16.msra.mxu1 %v8765_v60 }
 0x741   : > { %8638 = vmatprep.subr.bf16.mxu1 %v8766_v40 }
 0x744   : > { %8639 = vmatpush3.bf16.msra.mxu1 %v8766_v40 }
 0x745   : > { %8640 = vmatprep.subr.bf16.mxu1 %v8767_v61 }
 0x748   : > { %8641 = vmatpush3.bf16.msra.mxu1 %v8767_v61 }
 0x749   : > { %v8336_v6 = vpop.f32.mrb[128].mxu0 }
 0x74a   : > { %v8337_v37 = vpop.f32.mrb[129].mxu0 }
 0x74b   : > { %v8338_v62 = vadd.f32 %v8337_v37, %v8336_v6  ;;  %v8339_v44 = vpop.f32.mrb[130].mxu0 }
 0x74c   : > { %v8340_v59 = vpop.f32.mrb[131].mxu0 }
 0x74d   : > { %v6830_v33 = vadd.f32 %v8338_v62, %v10864_v18  ;;  %v8341_v52 = vadd.f32 %v8340_v59, %v8339_v44 }
 0x74f   : > { %v6991_v57 = vadd.f32 %v10831_v53, %v6830_v33  ;;  %v6833_v45 = vadd.f32 %v8341_v52, %v10864_v18 }
 0x751   : > { %v6994_v58 = vadd.f32 %v10835_v23, %v6833_v45  ;;  %v8342_v12 = vpop.f32.mrb[132].mxu0  ;;  %v7069_v42 = vmax.f32 %v6991_v57, 0.0 }
 0x752   : > { %v8343_v63 = vpop.f32.mrb[133].mxu0 }
 0x753   : > { %v7070_v51 = vmax.f32 %v6994_v58, 0.0  ;;  %v8344_v49 = vadd.f32 %v8343_v63, %v8342_v12  ;;  %v8345_v4 = vpop.f32.mrb[134].mxu0 }
 0x754   : > { %v8346_v29 = vpop.f32.mrb[135].mxu0 }
 0x755   : > { %v10935_v53 = vpack.c.bf16 %v7070_v51, %v7069_v42  ;;  %v6838_v46 = vadd.f32 %v8344_v49, %v10864_v18  ;;  %v8347_v56 = vadd.f32 %v8346_v29, %v8345_v4 }
 0x757   : > { %v6999_v28 = vadd.f32 %v10829_v43, %v6838_v46  ;;  %v6841_v5 = vadd.f32 %v8347_v56, %v10864_v18 }
 0x759   : > { %v7002_v23 = vadd.f32 %v10833_v13, %v6841_v5  ;;  %v7071_v36 = vmax.f32 %v6999_v28, 0.0 }
 0x75b   : > { %v7072_v38 = vmax.f32 %v7002_v23, 0.0 }
 0x75d   : > { %v10941_v31 = vpack.c.bf16 %v7072_v38, %v7071_v36 }
 0x761   : > { %v8348_v35 = vpop.f32.mrb[136].mxu0 }
 0x762   : > { %v8349_v7 = vpop.f32.mrb[137].mxu0 }
 0x763   : > { %v8350_v8 = vadd.f32 %v8349_v7, %v8348_v35  ;;  %v8351_v14 = vpop.f32.mrb[138].mxu0 }
 0x764   : > { %v8352_v27 = vpop.f32.mrb[139].mxu0 }
 0x765   : > { %v6846_v10 = vadd.f32 %v8350_v8, %v10864_v18  ;;  %v8353_v20 = vadd.f32 %v8352_v27, %v8351_v14 }
 0x767   : > { %v7007_v55 = vadd.f32 %v10841_v15, %v6846_v10  ;;  %v6849_v43 = vadd.f32 %v8353_v20, %v10864_v18 }
 0x769   : > { %v7010_v3 = vadd.f32 %v10847_v30, %v6849_v43  ;;  %v8354_v60 = vpop.f32.mrb[140].mxu0  ;;  %v7073_v6 = vmax.f32 %v7007_v55, 0.0 }
 0x76a   : > { %v8355_v13 = vpop.f32.mrb[141].mxu0 }
 0x76b   : > { %v7074_v37 = vmax.f32 %v7010_v3, 0.0  ;;  %v8356_v62 = vadd.f32 %v8355_v13, %v8354_v60  ;;  %v8357_v44 = vpop.f32.mrb[142].mxu0 }
 0x76c   : > { %v8358_v59 = vpop.f32.mrb[143].mxu0 }
 0x76d   : > { %v10947_v40 = vpack.c.bf16 %v7074_v37, %v7073_v6  ;;  %v6854_v33 = vadd.f32 %v8356_v62, %v10864_v18  ;;  %v8359_v52 = vadd.f32 %v8358_v59, %v8357_v44 }
 0x76f   : > { %v7015_v57 = vadd.f32 %v10839_v17, %v6854_v33  ;;  %v6857_v15 = vadd.f32 %v8359_v52, %v10864_v18 }
 0x771   : > { %v7018_v45 = vadd.f32 %v10845_v11, %v6857_v15  ;;  %v7075_v61 = vmax.f32 %v7015_v57, 0.0 }
 0x773   : > { %v7076_v30 = vmax.f32 %v7018_v45, 0.0 }
 0x775   : > { %v10953_v58 = vpack.c.bf16 %v7076_v30, %v7075_v61 }
 0x776   : > { %v8360_v12 = vpop.f32.mrb[144].mxu0 }
 0x777   : > { %v8361_v63 = vpop.f32.mrb[145].mxu0 }
 0x778   : > { %v8362_v42 = vadd.f32 %v8361_v63, %v8360_v12  ;;  %v8363_v51 = vpop.f32.mrb[146].mxu0 }
 0x779   : > { %v8364_v49 = vpop.f32.mrb[147].mxu0 }
 0x77a   : > { %v6862_v4 = vadd.f32 %v8362_v42, %v10864_v18  ;;  %v8365_v29 = vadd.f32 %v8364_v49, %v8363_v51  ;;  %v8768_v42 = vld [vmem:[%s11129_s4 + $0x38] sm:$0xff]  }
 0x77b   : > { %8642 = vmatprep.subr.bf16.mxu1 %v8768_v42 }
 0x77c   : > { %v7023_v46 = vadd.f32 %v10855_v41, %v6862_v4  ;;  %v6865_v17 = vadd.f32 %v8365_v29, %v10864_v18  ;;  %v6766_v29 = vadd.f32 %v10837_v19, %v10864_v18  ;;  %8643 = vmatpush3.bf16.msra.mxu1 %v8768_v42 }
 0x77e   : > { %v7026_v56 = vadd.f32 %v10859_v26, %v6865_v17  ;;  %v8366_v28 = vpop.f32.mrb[148].mxu0  ;;  %v7077_v5 = vmax.f32 %v7023_v46, 0.0 }
 0x77f   : > { %v8367_v11 = vpop.f32.mrb[149].mxu0 }
 0x780   : > { %v7078_v23 = vmax.f32 %v7026_v56, 0.0  ;;  %v8368_v36 = vadd.f32 %v8367_v11, %v8366_v28  ;;  %v8369_v38 = vpop.f32.mrb[150].mxu0  ;;  %v6777_v56 = vadd.f32 %v10851_v21, %v10864_v18 }
 0x781   : > { %v8370_v35 = vpop.f32.mrb[151].mxu0 }
 0x782   : > { %v10959_v7 = vpack.c.bf16 %v7078_v23, %v7077_v5  ;;  %v6870_v8 = vadd.f32 %v8368_v36, %v10864_v18  ;;  %v8371_v14 = vadd.f32 %v8370_v35, %v8369_v38 }
 0x784   : > { %v7031_v27 = vadd.f32 %v10853_v0, %v6870_v8  ;;  %v6873_v41 = vadd.f32 %v8371_v14, %v10864_v18 }
 0x786   : > { %v7034_v10 = vadd.f32 %v10857_v1, %v6873_v41  ;;  %v8372_v20 = vpop.f32.mrb[152].mxu0  ;;  %v7079_v55 = vmax.f32 %v7031_v27, 0.0 }
 0x787   : > { %v8373_v26 = vpop.f32.mrb[153].mxu0 }
 0x788   : > { %v7080_v43 = vmax.f32 %v7034_v10, 0.0  ;;  %v8374_v3 = vadd.f32 %v8373_v26, %v8372_v20  ;;  %v8375_v60 = vpop.f32.mrb[154].mxu0 }
 0x789   : > { %v8376_v13 = vpop.f32.mrb[155].mxu0 }
 0x78a   : > { %v7098_v6 = vpack.c.bf16 %v7080_v43, %v7079_v55  ;;  %v8377_v37 = vadd.f32 %v8376_v13, %v8375_v60  ;;  %v6878_v62 = vadd.f32 %v8374_v3, %v10864_v18 }
 0x78c   : > { %v7039_v44 = vadd.f32 %v10878_v34, %v6878_v62  ;;  %v6881_v59 = vadd.f32 %v8377_v37, %v10864_v18 }
 0x78e   : > { %v7042_v0 = vadd.f32 %v10884_v9, %v6881_v59  ;;  %v8378_v33 = vpop.f32.mrb[156].mxu0  ;;  %v7081_v1 = vmax.f32 %v7039_v44, 0.0  ;;  %v6774_v9 = vadd.f32 %v10849_v39, %v10864_v18  ;;  %v6769_v39 = vadd.f32 %v10843_v48, %v10864_v18 }
 0x78f   : > { %v8379_v52 = vpop.f32.mrb[157].mxu0 }
 0x790   : > { %v7082_v57 = vmax.f32 %v7042_v0, 0.0  ;;  %v8380_v15 = vadd.f32 %v8379_v52, %v8378_v33  ;;  %v8381_v45 = vpop.f32.mrb[158].mxu0 }
 0x791   : > { %v8382_v61 = vpop.f32.mrb[159].mxu0 }
 0x792   : > { %v7099_v30 = vpack.c.bf16 %v7082_v57, %v7081_v1  ;;  %v6886_v12 = vadd.f32 %v8380_v15, %v10864_v18  ;;  %v8383_v63 = vadd.f32 %v8382_v61, %v8381_v45  ;;  %v7213_v15 = vlaneseq }
 0x794   : > { %v7047_v34 = vadd.f32 %v10876_v25, %v6886_v12  ;;  %v6889_v51 = vadd.f32 %v8383_v63, %v10864_v18  ;;  %v7214_v45 = vshrl.u32 %v7213_v15, 7  ;;  %v11033_v12 = vld [vmem:[%s11131_s6 + $0x5] ss:$0 sm:$0xff] }
 0x796   : > { %v7050_v49 = vadd.f32 %v10882_v50, %v6889_v51  ;;  %v8598_v4 = vpop.f32.mrb[160].mxu0  ;;  %v7083_v28 = vmax.f32 %v7047_v34, 0.0  ;;  %v7215_v61 = vsub.s32 0, %v7214_v45 }
 0x797   : > { %v6935_v46 = vadd.f32 %v8598_v4, %v6774_v9  ;;  %v6926_v17 = vpop.f32.mrb[161].mxu0 }
 0x798   : > { %v7084_v25 = vmax.f32 %v7050_v49, 0.0  ;;  %v6927_v11 = vadd.f32 %v6926_v17, %v6766_v29  ;;  %v8599_v5 = vpop.f32.mrb[162].mxu0 }
 0x799   : > { %v6938_v23 = vadd.f32 %v8599_v5, %v6777_v56  ;;  %v6929_v36 = vpop.f32.mrb[163].mxu0  ;;  %v7055_v35 = vmax.f32 %v6935_v46, 0.0 }
 0x79a   : > { %v7100_v50 = vpack.c.bf16 %v7084_v25, %v7083_v28  ;;  %v6930_v38 = vadd.f32 %v6929_v36, %v6769_v39  ;;  %v7053_v19 = vmax.f32 %v6927_v11, 0.0 }
 0x79b   : > { %v7056_v8 = vmax.f32 %v6938_v23, 0.0 }
 0x79c   : > { %v7054_v14 = vmax.f32 %v6930_v38, 0.0 }
 0x79d   : > { %v7086_v27 = vpack.c.bf16 %v7056_v8, %v7055_v35 }
 0x79e   : > { %v7085_v41 = vpack.c.bf16 %v7054_v14, %v7053_v19 }
 0x79f   : > { %7119 = vrot.lane.b32.xlu1 %v7086_v27, %s8786_s15 }
 0x7a0   : > { %7117 = vrot.lane.b32.xlu0 %v7085_v41, %s8786_s15 }
 0x7a3   : > { %7123 = vrot.lane.b32.xlu1 %v10880_v47, %s8786_s15 }
 0x7a4   : > { %7121 = vrot.lane.b32.xlu0 %v10870_v16, %s8786_s15 }
 0x7a7   : > { %7127 = vrot.lane.b32.xlu1 %v10896_v22, %s8786_s15 }
 0x7a8   : > { %7125 = vrot.lane.b32.xlu0 %v10890_v2, %s8786_s15 }
 0x7ab   : > { %7131 = vrot.lane.b32.xlu1 %v10914_v24, %s8786_s15 }
 0x7ac   : > { %7129 = vrot.lane.b32.xlu0 %v10902_v32, %s8786_s15 }
 0x7af   : > { %7135 = vrot.lane.b32.xlu1 %v10941_v31, %s8786_s15 }
 0x7b0   : > { %7133 = vrot.lane.b32.xlu0 %v10935_v53, %s8786_s15 }
 0x7b3   : > { %7139 = vrot.lane.b32.xlu1 %v10953_v58, %s8786_s15 }
 0x7b4   : > { %7137 = vrot.lane.b32.xlu0 %v10947_v40, %s8786_s15 }
 0x7b7   : > { %7143 = vrot.lane.b32.xlu1 %v7098_v6, %s8786_s15 }
 0x7b8   : > { %7141 = vrot.lane.b32.xlu0 %v10959_v7, %s8786_s15 }
 0x7bb   : > { %7147 = vrot.lane.b32.xlu1 %v7100_v50, %s8786_s15 }
 0x7bc   : > { %7145 = vrot.lane.b32.xlu0 %v7099_v30, %s8786_s15  ;;  %v11028_v30 = vrot.slane %v9118_v54, %v7215_v61 }
 0x811   : > { %v7120_v48 = vpop.permute.xlu1 %7119 }
 0x812   : > { %7166 = vst.msk [vmem:[#allocation2 + $0x8] sm:$0xff] %vm2485_vm12, %v7120_v48  ;;  %v7118_v21 = vpop.permute.xlu0 %7117 }
 0x813   : > { %7165 = vst.msk [vmem:[#allocation2] sm:$0xff] %vm2485_vm12, %v7118_v21 }
 0x815   : > { %v7124_v18 = vpop.permute.xlu1 %7123 }
 0x816   : > { %7168 = vst.msk [vmem:[#allocation2 + $0x18] sm:$0xff] %vm2485_vm12, %v7124_v18  ;;  %v7122_v16 = vpop.permute.xlu0 %7121 }
 0x817   : > { %7167 = vst.msk [vmem:[#allocation2 + $0x10] sm:$0xff] %vm2485_vm12, %v7122_v16 }
 0x819   : > { %v7128_v47 = vpop.permute.xlu1 %7127  ;;  %v7182_v32 = vld [vmem:[#allocation2 + $0x8] sm:$0xff] }
 0x81a   : > { %7170 = vst.msk [vmem:[#allocation2 + $0x28] sm:$0xff] %vm2485_vm12, %v7128_v47  ;;  %v7126_v2 = vpop.permute.xlu0 %7125  ;;  %v7181_v22 = vld [vmem:[#allocation2] sm:$0xff] }
 0x81b   : > { %7169 = vst.msk [vmem:[#allocation2 + $0x20] sm:$0xff] %vm2485_vm12, %v7126_v2  ;;  %8644 = vmatprep.mubr.bf16.mxu1 %v7181_v22 }
 0x81c   : > { %8645 = vmatmul.mubr.bf16.vlgmr.msra.gmra.mrb[128].mxu1 %v7182_v32 }
 0x81d   : > { %v7132_v24 = vpop.permute.xlu1 %7131  ;;  %v7184_v7 = vld [vmem:[#allocation2 + $0x18] sm:$0xff] }
 0x81e   : > { %7172 = vst.msk [vmem:[#allocation2 + $0x38] sm:$0xff] %vm2485_vm12, %v7132_v24  ;;  %v7130_v53 = vpop.permute.xlu0 %7129  ;;  %v7183_v31 = vld [vmem:[#allocation2 + $0x10] sm:$0xff] }
 0x81f   : > { %7171 = vst.msk [vmem:[#allocation2 + $0x30] sm:$0xff] %vm2485_vm12, %v7130_v53  ;;  %8648 = vmatprep.mubr.bf16.mxu1 %v7183_v31 }
 0x821   : > { %v7136_v40 = vpop.permute.xlu1 %7135  ;;  %v7186_v3 = vld [vmem:[#allocation2 + $0x28] sm:$0xff] }
 0x822   : > { %7174 = vst.msk [vmem:[#allocation2 + $0x48] sm:$0xff] %vm2485_vm12, %v7136_v40  ;;  %v7134_v58 = vpop.permute.xlu0 %7133  ;;  %v7185_v10 = vld [vmem:[#allocation2 + $0x20] sm:$0xff] }
 0x823   : > { %7173 = vst.msk [vmem:[#allocation2 + $0x40] sm:$0xff] %vm2485_vm12, %v7134_v58 }
 0x824   : > { %8649 = vmatmul.mubr.bf16.gmra.mrb[132].mxu1 %v7184_v7 }
 0x825   : > { %v7140_v20 = vpop.permute.xlu1 %7139  ;;  %8652 = vmatprep.mubr.bf16.mxu1 %v7185_v10  ;;  %v7188_v37 = vld [vmem:[#allocation2 + $0x38] sm:$0xff] }
 0x826   : > { %7176 = vst.msk [vmem:[#allocation2 + $0x58] sm:$0xff] %vm2485_vm12, %v7140_v20  ;;  %v7138_v26 = vpop.permute.xlu0 %7137  ;;  %v7187_v60 = vld [vmem:[#allocation2 + $0x30] sm:$0xff] }
 0x827   : > { %7175 = vst.msk [vmem:[#allocation2 + $0x50] sm:$0xff] %vm2485_vm12, %v7138_v26 }
 0x829   : > { %v7144_v55 = vpop.permute.xlu1 %7143  ;;  %v7190_v44 = vld [vmem:[#allocation2 + $0x48] sm:$0xff] }
 0x82a   : > { %7178 = vst.msk [vmem:[#allocation2 + $0x68] sm:$0xff] %vm2485_vm12, %v7144_v55  ;;  %v7142_v43 = vpop.permute.xlu0 %7141  ;;  %v7189_v62 = vld [vmem:[#allocation2 + $0x40] sm:$0xff] }
 0x82b   : > { %7177 = vst.msk [vmem:[#allocation2 + $0x60] sm:$0xff] %vm2485_vm12, %v7142_v43 }
 0x82c   : > { %8653 = vmatmul.mubr.bf16.gmra.mrb[136].mxu1 %v7186_v3 }
 0x82d   : > { %v7148_v13 = vpop.permute.xlu1 %7147  ;;  %8656 = vmatprep.mubr.bf16.mxu1 %v7187_v60  ;;  %v7192_v0 = vld [vmem:[#allocation2 + $0x58] sm:$0xff] }
 0x82e   : > { %7180 = vst.msk [vmem:[#allocation2 + $0x78] sm:$0xff] %vm2485_vm12, %v7148_v13  ;;  %v7146_v6 = vpop.permute.xlu0 %7145  ;;  %v7191_v59 = vld [vmem:[#allocation2 + $0x50] sm:$0xff] }
 0x82f   : > { %7179 = vst.msk [vmem:[#allocation2 + $0x70] sm:$0xff] %vm2485_vm12, %v7146_v6 }
 0x831   : > { %v7194_v52 = vld [vmem:[#allocation2 + $0x68] sm:$0xff] }
 0x832   : > { %v7193_v33 = vld [vmem:[#allocation2 + $0x60] sm:$0xff] }
 0x834   : > { %8657 = vmatmul.mubr.bf16.gmra.mrb[140].mxu1 %v7188_v37 }
 0x835   : > { %8660 = vmatprep.mubr.bf16.mxu1 %v7189_v62  ;;  %v7196_v57 = vld [vmem:[#allocation2 + $0x78] sm:$0xff] }
 0x836   : > { %v7195_v1 = vld [vmem:[#allocation2 + $0x70] sm:$0xff] }
 0x83c   : > { %8661 = vmatmul.mubr.bf16.gmra.mrb[144].mxu1 %v7190_v44 }
 0x83d   : > { %8664 = vmatprep.mubr.bf16.mxu1 %v7191_v59 }
 0x844   : > { %8665 = vmatmul.mubr.bf16.gmra.mrb[148].mxu1 %v7192_v0 }
 0x845   : > { %8668 = vmatprep.mubr.bf16.mxu1 %v7193_v33 }
 0x84c   : > { %8669 = vmatmul.mubr.bf16.gmra.mrb[152].mxu1 %v7194_v52 }
 0x84d   : > { %8672 = vmatprep.mubr.bf16.mxu1 %v7195_v1 }
 0x854   : > { %8673 = vmatmul.mubr.bf16.gmra.mrb[156].mxu1 %v7196_v57 }
 0x8ef   : > { %v8646_v63 = vpop.f32.mrb[128].mxu1 }
 0x8f0   : > { %v7308_v42 = vadd.f32 %v8646_v63, %v11028_v30  ;;  %v7299_v34 = vpop.f32.mrb[129].mxu1 }
 0x8f1   : > { %v7300_v51 = vadd.f32 %v7299_v34, %v11028_v30  ;;  %v8647_v9 = vpop.f32.mrb[130].mxu1 }
 0x8f2   : > { %v7432_v49 = vadd.f32 %v11033_v12, %v7308_v42  ;;  %v7311_v4 = vadd.f32 %v8647_v9, %v11028_v30  ;;  %v7302_v29 = vpop.f32.mrb[131].mxu1 }
 0x8f3   : > { %v7430_v54 = vadd.f32 %v11033_v12, %v7300_v51  ;;  %v7303_v46 = vadd.f32 %v7302_v29, %v11028_v30 }
 0x8f4   : > { %v7433_v17 = vadd.f32 %v11033_v12, %v7311_v4  ;;  %v7464_v28 = vmax.f32 %v7432_v49, 0.0 }
 0x8f5   : > { %v7431_v56 = vadd.f32 %v11033_v12, %v7303_v46  ;;  %v7462_v11 = vmax.f32 %v7430_v54, 0.0 }
 0x8f6   : > { %v7465_v25 = vmax.f32 %v7433_v17, 0.0 }
 0x8f7   : > { %v7463_v5 = vmax.f32 %v7431_v56, 0.0  ;;  %v8650_v39 = vpop.f32.mrb[132].mxu1 }
 0x8f8   : > { %v7991_v23 = vpack.c.bf16 %v7465_v25, %v7464_v28  ;;  %v7324_v36 = vadd.f32 %v8650_v39, %v11028_v30  ;;  %v7315_v50 = vpop.f32.mrb[133].mxu1 }
 0x8f9   : > { %v7986_v38 = vpack.c.bf16 %v7463_v5, %v7462_v11  ;;  %v7316_v35 = vadd.f32 %v7315_v50, %v11028_v30  ;;  %v8651_v8 = vpop.f32.mrb[134].mxu1 }
 0x8fa   : > { %8063 = vst [vmem:[%s11048_s23 + $0x8] sm:$0xff] %v7991_v23   ;;  %v7436_v19 = vadd.f32 %v11033_v12, %v7324_v36  ;;  %v7327_v14 = vadd.f32 %v8651_v8, %v11028_v30  ;;  %v7318_v27 = vpop.f32.mrb[135].mxu1 }
 0x8fb   : > { %7987 = vst [vmem:[%s11048_s23] sm:$0xff] %v7986_v38   ;;  %v7434_v41 = vadd.f32 %v11033_v12, %v7316_v35  ;;  %v7319_v48 = vadd.f32 %v7318_v27, %v11028_v30 }
 0x8fc   : > { %v7437_v21 = vadd.f32 %v11033_v12, %v7327_v14  ;;  %v7468_v16 = vmax.f32 %v7436_v19, 0.0 }
 0x8fd   : > { %v7435_v18 = vadd.f32 %v11033_v12, %v7319_v48  ;;  %v7466_v2 = vmax.f32 %v7434_v41, 0.0 }
 0x8fe   : > { %v7469_v47 = vmax.f32 %v7437_v21, 0.0 }
 0x8ff   : > { %v7467_v22 = vmax.f32 %v7435_v18, 0.0  ;;  %v8654_v32 = vpop.f32.mrb[136].mxu1 }
 0x900   : > { %v8001_v24 = vpack.c.bf16 %v7469_v47, %v7468_v16  ;;  %v7340_v53 = vadd.f32 %v8654_v32, %v11028_v30  ;;  %v7331_v31 = vpop.f32.mrb[137].mxu1 }
 0x901   : > { %v7996_v40 = vpack.c.bf16 %v7467_v22, %v7466_v2  ;;  %v7332_v58 = vadd.f32 %v7331_v31, %v11028_v30  ;;  %v8655_v7 = vpop.f32.mrb[138].mxu1 }
 0x902   : > { %8065 = vst [vmem:[%s11048_s23 + $0x18] sm:$0xff] %v8001_v24   ;;  %v7440_v10 = vadd.f32 %v11033_v12, %v7340_v53  ;;  %v7343_v20 = vadd.f32 %v8655_v7, %v11028_v30  ;;  %v7334_v26 = vpop.f32.mrb[139].mxu1 }
 0x903   : > { %8064 = vst [vmem:[%s11048_s23 + $0x10] sm:$0xff] %v7996_v40   ;;  %v7438_v55 = vadd.f32 %v11033_v12, %v7332_v58  ;;  %v7335_v43 = vadd.f32 %v7334_v26, %v11028_v30 }
 0x904   : > { %v7441_v3 = vadd.f32 %v11033_v12, %v7343_v20  ;;  %v7472_v13 = vmax.f32 %v7440_v10, 0.0 }
 0x905   : > { %v7439_v60 = vadd.f32 %v11033_v12, %v7335_v43  ;;  %v7470_v37 = vmax.f32 %v7438_v55, 0.0 }
 0x906   : > { %v7473_v6 = vmax.f32 %v7441_v3, 0.0 }
 0x907   : > { %v7471_v62 = vmax.f32 %v7439_v60, 0.0  ;;  %v8658_v44 = vpop.f32.mrb[140].mxu1 }
 0x908   : > { %v8011_v59 = vpack.c.bf16 %v7473_v6, %v7472_v13  ;;  %v7356_v0 = vadd.f32 %v8658_v44, %v11028_v30  ;;  %v7347_v33 = vpop.f32.mrb[141].mxu1 }
 0x909   : > { %v8006_v52 = vpack.c.bf16 %v7471_v62, %v7470_v37  ;;  %v7348_v1 = vadd.f32 %v7347_v33, %v11028_v30  ;;  %v8659_v57 = vpop.f32.mrb[142].mxu1 }
 0x90a   : > { %8067 = vst [vmem:[%s11048_s23 + $0x28] sm:$0xff] %v8011_v59   ;;  %v7444_v15 = vadd.f32 %v11033_v12, %v7356_v0  ;;  %v7359_v45 = vadd.f32 %v8659_v57, %v11028_v30  ;;  %v7350_v61 = vpop.f32.mrb[143].mxu1 }
 0x90b   : > { %8066 = vst [vmem:[%s11048_s23 + $0x20] sm:$0xff] %v8006_v52   ;;  %v7442_v63 = vadd.f32 %v11033_v12, %v7348_v1  ;;  %v7351_v42 = vadd.f32 %v7350_v61, %v11028_v30 }
 0x90c   : > { %v7445_v34 = vadd.f32 %v11033_v12, %v7359_v45  ;;  %v7476_v9 = vmax.f32 %v7444_v15, 0.0 }
 0x90d   : > { %v7443_v51 = vadd.f32 %v11033_v12, %v7351_v42  ;;  %v7474_v4 = vmax.f32 %v7442_v63, 0.0 }
 0x90e   : > { %v7477_v49 = vmax.f32 %v7445_v34, 0.0 }
 0x90f   : > { %v7475_v29 = vmax.f32 %v7443_v51, 0.0  ;;  %v8662_v54 = vpop.f32.mrb[144].mxu1 }
 0x910   : > { %v8021_v46 = vpack.c.bf16 %v7477_v49, %v7476_v9  ;;  %v7372_v17 = vadd.f32 %v8662_v54, %v11028_v30  ;;  %v7363_v56 = vpop.f32.mrb[145].mxu1 }
 0x911   : > { %v8016_v28 = vpack.c.bf16 %v7475_v29, %v7474_v4  ;;  %v7364_v25 = vadd.f32 %v7363_v56, %v11028_v30  ;;  %v8663_v11 = vpop.f32.mrb[146].mxu1 }
 0x912   : > { %8069 = vst [vmem:[%s11048_s23 + $0x38] sm:$0xff] %v8021_v46   ;;  %v7448_v5 = vadd.f32 %v11033_v12, %v7372_v17  ;;  %v7375_v39 = vadd.f32 %v8663_v11, %v11028_v30  ;;  %v7366_v23 = vpop.f32.mrb[147].mxu1 }
 0x913   : > { %8068 = vst [vmem:[%s11048_s23 + $0x30] sm:$0xff] %v8016_v28   ;;  %v7446_v36 = vadd.f32 %v11033_v12, %v7364_v25  ;;  %v7367_v50 = vadd.f32 %v7366_v23, %v11028_v30 }
 0x914   : > { %v7449_v38 = vadd.f32 %v11033_v12, %v7375_v39  ;;  %v7480_v8 = vmax.f32 %v7448_v5, 0.0 }
 0x915   : > { %v7447_v35 = vadd.f32 %v11033_v12, %v7367_v50  ;;  %v7478_v14 = vmax.f32 %v7446_v36, 0.0 }
 0x916   : > { %v7481_v19 = vmax.f32 %v7449_v38, 0.0 }
 0x917   : > { %v7479_v27 = vmax.f32 %v7447_v35, 0.0  ;;  %v8666_v41 = vpop.f32.mrb[148].mxu1 }
 0x918   : > { %v8031_v48 = vpack.c.bf16 %v7481_v19, %v7480_v8  ;;  %v7388_v21 = vadd.f32 %v8666_v41, %v11028_v30  ;;  %v7379_v18 = vpop.f32.mrb[149].mxu1 }
 0x919   : > { %v8026_v16 = vpack.c.bf16 %v7479_v27, %v7478_v14  ;;  %v7380_v47 = vadd.f32 %v7379_v18, %v11028_v30  ;;  %v8667_v2 = vpop.f32.mrb[150].mxu1 }
 0x91a   : > { %8071 = vst [vmem:[%s11048_s23 + $0x48] sm:$0xff] %v8031_v48   ;;  %v7452_v22 = vadd.f32 %v11033_v12, %v7388_v21  ;;  %v7391_v32 = vadd.f32 %v8667_v2, %v11028_v30  ;;  %v7382_v24 = vpop.f32.mrb[151].mxu1 }
 0x91b   : > { %8070 = vst [vmem:[%s11048_s23 + $0x40] sm:$0xff] %v8026_v16   ;;  %v7450_v53 = vadd.f32 %v11033_v12, %v7380_v47  ;;  %v7383_v31 = vadd.f32 %v7382_v24, %v11028_v30 }
 0x91c   : > { %v7453_v40 = vadd.f32 %v11033_v12, %v7391_v32  ;;  %v7484_v7 = vmax.f32 %v7452_v22, 0.0 }
 0x91d   : > { %v7451_v58 = vadd.f32 %v11033_v12, %v7383_v31  ;;  %v7482_v20 = vmax.f32 %v7450_v53, 0.0 }
 0x91e   : > { %v7485_v10 = vmax.f32 %v7453_v40, 0.0 }
 0x91f   : > { %v7483_v26 = vmax.f32 %v7451_v58, 0.0  ;;  %v8670_v55 = vpop.f32.mrb[152].mxu1 }
 0x920   : > { %v8041_v43 = vpack.c.bf16 %v7485_v10, %v7484_v7  ;;  %v7404_v3 = vadd.f32 %v8670_v55, %v11028_v30  ;;  %v7395_v60 = vpop.f32.mrb[153].mxu1 }
 0x921   : > { %v8036_v13 = vpack.c.bf16 %v7483_v26, %v7482_v20  ;;  %v7396_v6 = vadd.f32 %v7395_v60, %v11028_v30  ;;  %v8671_v37 = vpop.f32.mrb[154].mxu1 }
 0x922   : > { %8073 = vst [vmem:[%s11048_s23 + $0x58] sm:$0xff] %v8041_v43   ;;  %v7456_v62 = vadd.f32 %v11033_v12, %v7404_v3  ;;  %v7407_v44 = vadd.f32 %v8671_v37, %v11028_v30  ;;  %v7398_v59 = vpop.f32.mrb[155].mxu1 }
 0x923   : > { %8072 = vst [vmem:[%s11048_s23 + $0x50] sm:$0xff] %v8036_v13   ;;  %v7454_v0 = vadd.f32 %v11033_v12, %v7396_v6  ;;  %v7399_v33 = vadd.f32 %v7398_v59, %v11028_v30 }
 0x924   : > { %v7457_v52 = vadd.f32 %v11033_v12, %v7407_v44  ;;  %v7488_v57 = vmax.f32 %v7456_v62, 0.0 }
 0x925   : > { %v7455_v1 = vadd.f32 %v11033_v12, %v7399_v33  ;;  %v7486_v45 = vmax.f32 %v7454_v0, 0.0 }
 0x926   : > { %v7489_v15 = vmax.f32 %v7457_v52, 0.0 }
 0x927   : > { %v7487_v61 = vmax.f32 %v7455_v1, 0.0  ;;  %v8674_v63 = vpop.f32.mrb[156].mxu1 }
 0x928   : > { %v8051_v42 = vpack.c.bf16 %v7489_v15, %v7488_v57  ;;  %v7420_v34 = vadd.f32 %v8674_v63, %v11028_v30  ;;  %v7411_v51 = vpop.f32.mrb[157].mxu1 }
 0x929   : > { %v8046_v9 = vpack.c.bf16 %v7487_v61, %v7486_v45  ;;  %v7412_v49 = vadd.f32 %v7411_v51, %v11028_v30  ;;  %v8675_v4 = vpop.f32.mrb[158].mxu1 }
 0x92a   : > { %8075 = vst [vmem:[%s11048_s23 + $0x68] sm:$0xff] %v8051_v42   ;;  %v7460_v29 = vadd.f32 %v11033_v12, %v7420_v34  ;;  %v7423_v54 = vadd.f32 %v8675_v4, %v11028_v30  ;;  %v7414_v46 = vpop.f32.mrb[159].mxu1 }
 0x92b   : > { %8074 = vst [vmem:[%s11048_s23 + $0x60] sm:$0xff] %v8046_v9   ;;  %v7458_v17 = vadd.f32 %v11033_v12, %v7412_v49  ;;  %v7415_v56 = vadd.f32 %v7414_v46, %v11028_v30 }
 0x92c   : > { %v7461_v28 = vadd.f32 %v11033_v12, %v7423_v54  ;;  %v7492_v11 = vmax.f32 %v7460_v29, 0.0 }
 0x92d   : > { %v7459_v25 = vadd.f32 %v11033_v12, %v7415_v56  ;;  %v7490_v39 = vmax.f32 %v7458_v17, 0.0 }
 0x92e   : > { %v7493_v5 = vmax.f32 %v7461_v28, 0.0 }
 0x92f   : > { %v7491_v23 = vmax.f32 %v7459_v25, 0.0 }
 0x930   : > { %v8061_v36 = vpack.c.bf16 %v7493_v5, %v7492_v11 }
 0x931   : > { %v8056_v50 = vpack.c.bf16 %v7491_v23, %v7490_v39 }
 0x932   : > { %8077 = vst [vmem:[%s11048_s23 + $0x78] sm:$0xff] %v8061_v36  }
 0x933   : > { %8076 = vst [vmem:[%s11048_s23 + $0x70] sm:$0xff] %v8056_v50  }
 0x934 PF: > { %s17_s24 = sadd.s32 1, %s8779_s24  }
 0x935   : > { %p14_p4 = scmp.ge.s32.totalorder %s17_s24, 4  }
 0x937   :  { %16 = sbr.rel (!%p14_p4) target bundleno = 1 (0x1), region = 84 }

</bundles_post_ra>
